<compile_context>
chip_gen: v6e
topology: v6e:2x2x1
jax: 0.10.0
libtpu: 0.0.40
codegen_flags: <defaults>
</compile_context>

<pallas_src>
import functools

import numpy as np
import jax
import jax.numpy as jnp
from jax.experimental import pallas as pl
from jax.experimental.pallas import tpu as pltpu

_SQRT_HALF = 0.7071067811865476
_LN_EPS = 1e-5


# ---------------------------------------------------------------------------
# In-kernel math helpers
# ---------------------------------------------------------------------------
def _erf_approx(v):
    # TODO(synk): Mosaic has no erf lowering; Abramowitz-Stegun 7.1.26 rational
    # polynomial stands in for torch's exact-erf GELU (|err| ~1.5e-7 on erf,
    # exact division on the EUP -- no approx reciprocal here).
    a1, a2, a3, a4, a5 = 0.254829592, -0.284496736, 1.421413741, -1.453152027, 1.061405429
    p = 0.3275911
    sign = jnp.where(v >= 0.0, 1.0, -1.0)
    av = jnp.abs(v)
    t = 1.0 / (1.0 + p * av)
    poly = ((((a5 * t + a4) * t + a3) * t + a2) * t + a1) * t
    return sign * (1.0 - poly * jnp.exp(-av * av))


def _gelu(v):
    # exact (erf-based) GELU, matching torch nn.GELU() default
    return 0.5 * v * (1.0 + _erf_approx(v * _SQRT_HALF))


# ---------------------------------------------------------------------------
# Pallas kernel: one batch block (TB rows, all tokens fused along lanes) per step
# ---------------------------------------------------------------------------
def _make_kernel(num_blocks, token_num, hid_dim, in_dim, class_num, pad_w):
    TH = token_num * hid_dim

    def kernel(x_ref, trans_ref, p_ref, tw1_ref, tb1_ref, tw2_ref,
               cw1_ref, cb1_ref, cw2_ref, rows_ref, norm_ref, *rest):
        if class_num is not None:
            cls_ref, out_ref = rest
        else:
            (out_ref,) = rest

        def mm(a, b):
            return jnp.dot(a, b, preferred_element_type=jnp.float32)

        # ---- mixer_trans: Linear(in_dim, T*H) -> LayerNorm over the full T*H row
        row = mm(x_ref[...], trans_ref[0:in_dim, :]) + trans_ref[in_dim:in_dim + 1, :]
        mu = jnp.mean(row, axis=-1, keepdims=True)
        var = jnp.mean(jnp.square(row - mu), axis=-1, keepdims=True)
        feat = (row - mu) * jax.lax.rsqrt(var + _LN_EPS) \
            * trans_ref[in_dim + 1:in_dim + 2, :] + trans_ref[in_dim + 2:in_dim + 3, :]

        pmat = p_ref[...]                      # block-diag per-token averaging, [TH, TH]

        def token_ln(v, g, b):
            # per-token LayerNorm(H) in the [TB, T*H] row layout: mean/variance
            # reductions run as lane-dense MXU matmuls (no reshape / 32-lane ops).
            mu_b = mm(v, pmat)
            c = v - mu_b
            var_b = mm(c * c, pmat)
            return c * jax.lax.rsqrt(var_b + _LN_EPS) * g + b

        for blk in range(num_blocks):          # static unroll (num_blocks is small)
            rows = rows_ref[blk]               # [8, TH]: ln1g,ln1b,tb2,ln2g,ln2b,cb2,pad,pad

            # token-mixing MLP as MXU matmuls with kron(w, I_H)-packed weights
            y = token_ln(feat, rows[0:1, :], rows[1:2, :])
            u = _gelu(mm(y, tw1_ref[blk]) + tb1_ref[blk])
            y_tok = mm(u, tw2_ref[blk]) + rows[2:3, :]

            # channel MLP as block-diagonal kron(I_T, w) matmuls
            z = token_ln(feat + y_tok, rows[3:4, :], rows[4:5, :])
            z = _gelu(mm(z, cw1_ref[blk]) + cb1_ref[blk])
            z = mm(z, cw2_ref[blk]) + rows[5:6, :]

            feat = feat + y_tok + z

        # ---- mixer_norm_layer: block-diag Linear(H, H) -> per-token LayerNorm(H)
        h = mm(feat, norm_ref[0:TH, :]) + norm_ref[TH:TH + 1, :]
        h = token_ln(h, norm_ref[TH + 1:TH + 2, :], norm_ref[TH + 2:TH + 3, :])

        if class_num is None:
            out_ref[...] = h                   # lane-dense [TB, T*H] store
        else:
            # class head: block-diag Linear(H, C) -> per-token softmax, all in the
            # lane-dense [TB, pad_w] layout (pad columns carry harmless finite values
            # that the wrapper slices off).
            logits = mm(h, cls_ref[0:TH, :]) + cls_ref[TH:TH + 1, :]
            # Per-row max is a valid softmax shift (differs from each token's max by
            # a constant); an f32 underflow would need a >87 logit spread per row.
            m = jnp.max(logits, axis=-1, keepdims=True)
            e = jnp.exp(logits - m)
            denom = mm(e, cls_ref[TH + 8:TH + 8 + pad_w, :])   # per-token sums, broadcast
            out_ref[...] = e / denom           # exact division (probabilities sum to 1)

    return kernel


# ---------------------------------------------------------------------------
# Wrapper: batch blocking, host-side structured weight packing, pallas_call
# ---------------------------------------------------------------------------
def token_classifier_forward(x, params, *, num_blocks, token_num, hid_dim, class_num):
    """x: [B, in_dim] f32 -> [B, token_num, hid_dim] or softmax [B, token_num, class_num]."""
    B, in_dim = x.shape
    T, H = token_num, hid_dim
    Hi = params["cw1"].shape[-1]
    Ti = params["tw1"].shape[-1]
    TH, TiH, THi = T * H, Ti * H, T * Hi
    f32 = jnp.float32

    # --- batch blocking: target ~1024 fused rows per step, but keep >=2 grid steps
    #     when the batch allows so v7x can shard the grid over both TensorCores.
    tb_target = max(8, min(256, ((1024 // max(T, 1)) // 8) * 8))
    tb_cap = max(8, ((-(-B // 2)) + 7) // 8 * 8)       # ~ceil(B/2) rounded up to 8
    tb = min(tb_target, tb_cap)
    Bp = ((B + tb - 1) // tb) * tb
    if Bp != B:
        x = jnp.concatenate([x, jnp.zeros((Bp - B, in_dim), x.dtype)], axis=0)

    eyeH = jnp.eye(H, dtype=f32)
    eyeT = jnp.eye(T, dtype=f32)

    # --- mixer_trans slab: [Wt; bias; gamma; beta]  -> [in_dim+3, T*H]
    trans = jnp.concatenate([params["wt"], params["bt"], params["gt"], params["bbt"]], axis=0)

    # --- block-diagonal per-token averaging matrix for LayerNorm(H) in row layout
    p_mat = jnp.asarray(np.kron(np.eye(T), np.full((H, H), 1.0 / H)), dtype=f32)   # [TH, TH]

    # --- per-block structured weights (kron-packed, lane-dense)
    tokw1 = jnp.stack([jnp.kron(params["tw1"][b], eyeH) for b in range(num_blocks)])   # [nb, TH, TiH]
    tokw2 = jnp.stack([jnp.kron(params["tw2"][b], eyeH) for b in range(num_blocks)])   # [nb, TiH, TH]
    chw1 = jnp.stack([jnp.kron(eyeT, params["cw1"][b]) for b in range(num_blocks)])    # [nb, TH, THi]
    chw2 = jnp.stack([jnp.kron(eyeT, params["cw2"][b]) for b in range(num_blocks)])    # [nb, THi, TH]
    tokb1 = jnp.stack([jnp.repeat(params["tb1"][b].reshape(-1), H).reshape(1, TiH)
                       for b in range(num_blocks)])                                    # [nb, 1, TiH]
    chb1 = jnp.stack([jnp.tile(params["cb1"][b].reshape(-1), T).reshape(1, THi)
                      for b in range(num_blocks)])                                     # [nb, 1, THi]

    # --- per-block pre-broadcast row vectors (>=128 lanes wide), padded to 8 rows
    zrow = jnp.zeros((TH,), f32)
    rows = jnp.stack([
        jnp.stack([jnp.tile(params["ln1g"][b].reshape(-1), T),
                   jnp.tile(params["ln1b"][b].reshape(-1), T),
                   jnp.repeat(params["tb2"][b].reshape(-1), H),
                   jnp.tile(params["ln2g"][b].reshape(-1), T),
                   jnp.tile(params["ln2b"][b].reshape(-1), T),
                   jnp.tile(params["cb2"][b].reshape(-1), T),
                   zrow, zrow])
        for b in range(num_blocks)])                                                   # [nb, 8, TH]

    # --- mixer_norm_layer slab: [kron(I_T, Wn); bias; gamma; beta] -> [TH+3, TH]
    norm = jnp.concatenate([jnp.kron(eyeT, params["wn"]),
                            jnp.tile(params["bn"].reshape(-1), T).reshape(1, TH),
                            jnp.tile(params["gn"].reshape(-1), T).reshape(1, TH),
                            jnp.tile(params["bbn"].reshape(-1), T).reshape(1, TH)], axis=0)

    args = [x, trans, p_mat, tokw1, tokb1, tokw2, chw1, chb1, chw2, rows, norm]

    def full_spec(a):      # whole-array block, constant index_map -> fetched once
        zeros = (0,) * a.ndim
        return pl.BlockSpec(a.shape, lambda g: zeros)

    in_specs = [pl.BlockSpec((tb, in_dim), lambda g: (g, 0))] + [full_spec(a) for a in args[1:]]

    if class_num is not None:
        TC = T * class_num
        pad_w = ((TC + 127) // 128) * 128          # lane-dense (>=128) output width
        wc_big = jnp.pad(jnp.kron(eyeT, params["wc"]), ((0, 0), (0, pad_w - TC)))      # [TH, pad_w]
        bc_row = jnp.pad(jnp.tile(params["bc"].reshape(-1), T), (0, pad_w - TC)).reshape(1, pad_w)
        s_np = np.zeros((pad_w, pad_w), np.float32)    # per-token softmax-sum matrix
        for t in range(T):
            s_np[t * class_num:(t + 1) * class_num, t * class_num:(t + 1) * class_num] = 1.0
        for j in range(TC, pad_w):
            s_np[j, j] = 1.0                            # keep pad-column denominators finite
        cls = jnp.concatenate([wc_big, bc_row, jnp.zeros((7, pad_w), f32),
                               jnp.asarray(s_np)], axis=0)                              # [TH+8+pad_w, pad_w]
        args.append(cls)
        in_specs.append(full_spec(cls))
        out_w = pad_w
    else:
        pad_w = TH
        out_w = TH

    kernel = _make_kernel(num_blocks, T, H, in_dim, class_num, pad_w)

    out = pl.pallas_call(
        kernel,
        out_shape=jax.ShapeDtypeStruct((Bp, out_w), jnp.float32),
        grid_spec=pltpu.PrefetchScalarGridSpec(
            num_scalar_prefetch=0,
            grid=(Bp // tb,),
            in_specs=in_specs,
            out_specs=pl.BlockSpec((tb, out_w), lambda g: (g, 0)),
        ),
        compiler_params=pltpu.CompilerParams(
            dimension_semantics=("parallel",),
            vmem_limit_bytes=32 * 1024 * 1024,
        ),
    )(*args)

    if class_num is None:
        return out[:B].reshape(B, T, H)
    return out[:B, :T * class_num].reshape(B, T, class_num)


# ---------------------------------------------------------------------------
# Plain-JAX reference (direct transcription of the PyTorch forward)
# ---------------------------------------------------------------------------
def reference_forward(x, params, *, num_blocks, token_num, hid_dim, class_num):
    T, H = token_num, hid_dim

    def ln(v, g, b):
        mu = jnp.mean(v, axis=-1, keepdims=True)
        var = jnp.mean(jnp.square(v - mu), axis=-1, keepdims=True)
        return (v - mu) * jax.lax.rsqrt(var + _LN_EPS) * g + b

    gelu = functools.partial(jax.nn.gelu, approximate=False)

    row = x @ params["wt"] + params["bt"]
    row = ln(row, params["gt"], params["bbt"])
    B = x.shape[0]
    feat = row.reshape(B, T, H)
    for blk in range(num_blocks):
        y = ln(feat, params["ln1g"][blk], params["ln1b"][blk])
        y = jnp.swapaxes(y, 1, 2)
        y = gelu(y @ params["tw1"][blk] + params["tb1"][blk]) @ params["tw2"][blk] + params["tb2"][blk]
        y = jnp.swapaxes(y, 1, 2)
        z = ln(feat + y, params["ln2g"][blk], params["ln2b"][blk])
        z = gelu(z @ params["cw1"][blk] + params["cb1"][blk]) @ params["cw2"][blk] + params["cb2"][blk]
        feat = feat + y + z
    h = feat @ params["wn"] + params["bn"]
    h = ln(h, params["gn"], params["bbn"])
    if class_num is None:
        return h
    logits = h @ params["wc"] + params["bc"]
    return jax.nn.softmax(logits, axis=-1)


# ---------------------------------------------------------------------------
# Deterministic parameter init (synthetic; torch-Linear weights pre-transposed)
# ---------------------------------------------------------------------------
def init_params(key, *, num_blocks, in_dim, hid_dim, hid_inter_dim,
                token_num, token_inter_dim, class_num):
    T, H, Hi, Ti = token_num, hid_dim, hid_inter_dim, token_inter_dim
    keys = iter(jax.random.split(key, 64))

    def w(shape, scale=0.1):
        return scale * jax.random.normal(next(keys), shape, dtype=jnp.float32)

    def ln_g(shape):
        return 1.0 + 0.05 * jax.random.normal(next(keys), shape, dtype=jnp.float32)

    p = {}
    p["wt"], p["bt"] = w((in_dim, T * H)), w((1, T * H), 0.05)
    p["gt"], p["bbt"] = ln_g((1, T * H)), w((1, T * H), 0.05)
    p["ln1g"], p["ln1b"] = ln_g((num_blocks, 1, H)), w((num_blocks, 1, H), 0.05)
    p["tw1"], p["tb1"] = w((num_blocks, T, Ti)), w((num_blocks, 1, Ti), 0.05)
    p["tw2"], p["tb2"] = w((num_blocks, Ti, T)), w((num_blocks, 1, T), 0.05)
    p["ln2g"], p["ln2b"] = ln_g((num_blocks, 1, H)), w((num_blocks, 1, H), 0.05)
    p["cw1"], p["cb1"] = w((num_blocks, H, Hi)), w((num_blocks, 1, Hi), 0.05)
    p["cw2"], p["cb2"] = w((num_blocks, Hi, H)), w((num_blocks, 1, H), 0.05)
    p["wn"], p["bn"] = w((H, H)), w((1, H), 0.05)
    p["gn"], p["bbn"] = ln_g((1, H)), w((1, H), 0.05)
    if class_num is not None:
        p["wc"], p["bc"] = w((H, class_num)), w((1, class_num), 0.05)
    return p


if __name__ == "__main__":
    B = 64                # batch-blocked grid: TB=32 -> grid=(2,) (even, megacore-friendly)
    num_blocks = 2
    in_dim = 32           # J * dim  (e.g. 16 joints x 2)
    hid_dim = 32
    hid_inter_dim = 64
    token_num = 8
    token_inter_dim = 16
    class_num = 10

    key = jax.random.PRNGKey(0)
    kp, kx = jax.random.split(key)
    params = init_params(kp, num_blocks=num_blocks, in_dim=in_dim, hid_dim=hid_dim,
                         hid_inter_dim=hid_inter_dim, token_num=token_num,
                         token_inter_dim=token_inter_dim, class_num=class_num)
    x = jax.random.normal(kx, (B, in_dim), dtype=jnp.float32)

    cfg = dict(num_blocks=num_blocks, token_num=token_num, hid_dim=hid_dim)

    # class_num branch: Linear head + softmax
    out_cls = token_classifier_forward(x, params, class_num=class_num, **cfg)
    jax.block_until_ready(out_cls)
    ref_cls = reference_forward(x, params, class_num=class_num, **cfg)
    np.testing.assert_allclose(np.asarray(out_cls), np.asarray(ref_cls), atol=2e-3, rtol=2e-2)
    assert out_cls.shape == (B, token_num, class_num)

    # class_num=None branch: Identity head
    out_feat = token_classifier_forward(x, params, class_num=None, **cfg)
    jax.block_until_ready(out_feat)
    ref_feat = reference_forward(x, params, class_num=None, **cfg)
    np.testing.assert_allclose(np.asarray(out_feat), np.asarray(ref_feat), atol=2e-3, rtol=2e-2)
    assert out_feat.shape == (B, token_num, hid_dim)

    print("KERNEL_OK")
</pallas_src>

<mosaic_0001>
module attributes {stable_mosaic.version = 11 : i64} {
  func.func @kernel(%arg0: i32, %arg1: memref<32x32xf32, #tpu.memory_space<vmem>>, %arg2: memref<35x256xf32, #tpu.memory_space<vmem>>, %arg3: memref<256x256xf32, #tpu.memory_space<vmem>>, %arg4: memref<2x256x512xf32, #tpu.memory_space<vmem>>, %arg5: memref<2x1x512xf32, #tpu.memory_space<vmem>>, %arg6: memref<2x512x256xf32, #tpu.memory_space<vmem>>, %arg7: memref<2x256x512xf32, #tpu.memory_space<vmem>>, %arg8: memref<2x1x512xf32, #tpu.memory_space<vmem>>, %arg9: memref<2x512x256xf32, #tpu.memory_space<vmem>>, %arg10: memref<2x8x256xf32, #tpu.memory_space<vmem>>, %arg11: memref<259x256xf32, #tpu.memory_space<vmem>>, %arg12: memref<392x128xf32, #tpu.memory_space<vmem>>, %arg13: memref<32x128xf32, #tpu.memory_space<vmem>>) attributes {dimension_semantics = [#tpu.dimension_semantics<parallel>], iteration_bounds = array<i64: 2>, scalar_prefetch = 0 : i64, scratch_operands = 0 : i64, tpu.core_type = #tpu.core_type<tc>, window_params = [{transform_indices = @transform_0, window_bounds = array<i64: 32, 32>}, {pipeline_mode = #tpu.pipeline_mode<synchronous>, transform_indices = @transform_1, window_bounds = array<i64: 35, 256>}, {pipeline_mode = #tpu.pipeline_mode<synchronous>, transform_indices = @transform_2, window_bounds = array<i64: 256, 256>}, {pipeline_mode = #tpu.pipeline_mode<synchronous>, transform_indices = @transform_3, window_bounds = array<i64: 2, 256, 512>}, {pipeline_mode = #tpu.pipeline_mode<synchronous>, transform_indices = @transform_4, window_bounds = array<i64: 2, 1, 512>}, {pipeline_mode = #tpu.pipeline_mode<synchronous>, transform_indices = @transform_5, window_bounds = array<i64: 2, 512, 256>}, {pipeline_mode = #tpu.pipeline_mode<synchronous>, transform_indices = @transform_6, window_bounds = array<i64: 2, 256, 512>}, {pipeline_mode = #tpu.pipeline_mode<synchronous>, transform_indices = @transform_7, window_bounds = array<i64: 2, 1, 512>}, {pipeline_mode = #tpu.pipeline_mode<synchronous>, transform_indices = @transform_8, window_bounds = array<i64: 2, 512, 256>}, {pipeline_mode = #tpu.pipeline_mode<synchronous>, transform_indices = @transform_9, window_bounds = array<i64: 2, 8, 256>}, {pipeline_mode = #tpu.pipeline_mode<synchronous>, transform_indices = @transform_10, window_bounds = array<i64: 259, 256>}, {pipeline_mode = #tpu.pipeline_mode<synchronous>, transform_indices = @transform_11, window_bounds = array<i64: 392, 128>}, {transform_indices = @transform_12, window_bounds = array<i64: 32, 128>}]} {
    %c0 = arith.constant 0 : index
    %c0_0 = arith.constant 0 : index
    %0 = vector.load %arg1[%c0, %c0_0] : memref<32x32xf32, #tpu.memory_space<vmem>>, vector<32x32xf32>
    %c0_1 = arith.constant 0 : index
    %c0_2 = arith.constant 0 : index
    %1 = vector.load %arg2[%c0_1, %c0_2] : memref<35x256xf32, #tpu.memory_space<vmem>>, vector<32x256xf32>
    %cst = arith.constant dense<0.000000e+00> : vector<32x256xf32>
    %2 = tpu.matmul %0, %1, %cst {dimension_numbers = #tpu.dot_dimension_numbers<[1], [0], [0], [1], [0, 0, 1, 1], [], []>} : vector<32x32xf32>, vector<32x256xf32>, vector<32x256xf32> -> vector<32x256xf32>
    %c32 = arith.constant 32 : index
    %c0_3 = arith.constant 0 : index
    %3 = vector.load %arg2[%c32, %c0_3] : memref<35x256xf32, #tpu.memory_space<vmem>>, vector<1x256xf32>
    %4 = vector.broadcast %3 : vector<1x256xf32> to vector<32x256xf32>
    %5 = arith.addf %2, %4 : vector<32x256xf32>
    %cst_4 = arith.constant dense<0.000000e+00> : vector<32xf32>
    %6 = vector.multi_reduction <add>, %5, %cst_4 [1] : vector<32x256xf32> to vector<32xf32>
    %7 = vector.shape_cast %6 : vector<32xf32> to vector<32x1xf32>
    %cst_5 = arith.constant 2.560000e+02 : f32
    %8 = vector.broadcast %cst_5 : f32 to vector<32x1xf32>
    %9 = arith.divf %7, %8 : vector<32x1xf32>
    %10 = vector.broadcast %9 : vector<32x1xf32> to vector<32x256xf32>
    %11 = arith.subf %5, %10 : vector<32x256xf32>
    %12 = arith.mulf %11, %11 : vector<32x256xf32>
    %cst_6 = arith.constant dense<0.000000e+00> : vector<32xf32>
    %13 = vector.multi_reduction <add>, %12, %cst_6 [1] : vector<32x256xf32> to vector<32xf32>
    %14 = vector.shape_cast %13 : vector<32xf32> to vector<32x1xf32>
    %cst_7 = arith.constant 2.560000e+02 : f32
    %15 = vector.broadcast %cst_7 : f32 to vector<32x1xf32>
    %16 = arith.divf %14, %15 : vector<32x1xf32>
    %17 = vector.broadcast %9 : vector<32x1xf32> to vector<32x256xf32>
    %18 = arith.subf %5, %17 : vector<32x256xf32>
    %cst_8 = arith.constant 9.99999974E-6 : f32
    %19 = vector.broadcast %cst_8 : f32 to vector<32x1xf32>
    %20 = arith.addf %16, %19 : vector<32x1xf32>
    %21 = math.rsqrt %20 : vector<32x1xf32>
    %22 = vector.broadcast %21 : vector<32x1xf32> to vector<32x256xf32>
    %23 = arith.mulf %18, %22 : vector<32x256xf32>
    %c33 = arith.constant 33 : index
    %c0_9 = arith.constant 0 : index
    %24 = vector.load %arg2[%c33, %c0_9] : memref<35x256xf32, #tpu.memory_space<vmem>>, vector<1x256xf32>
    %25 = vector.broadcast %24 : vector<1x256xf32> to vector<32x256xf32>
    %26 = arith.mulf %23, %25 : vector<32x256xf32>
    %c34 = arith.constant 34 : index
    %c0_10 = arith.constant 0 : index
    %27 = vector.load %arg2[%c34, %c0_10] : memref<35x256xf32, #tpu.memory_space<vmem>>, vector<1x256xf32>
    %28 = vector.broadcast %27 : vector<1x256xf32> to vector<32x256xf32>
    %29 = arith.addf %26, %28 : vector<32x256xf32>
    %c0_11 = arith.constant 0 : index
    %c0_12 = arith.constant 0 : index
    %30 = vector.load %arg3[%c0_11, %c0_12] : memref<256x256xf32, #tpu.memory_space<vmem>>, vector<256x256xf32>
    %c0_13 = arith.constant 0 : index
    %c0_14 = arith.constant 0 : index
    %c0_15 = arith.constant 0 : index
    %31 = vector.load %arg10[%c0_13, %c0_14, %c0_15] : memref<2x8x256xf32, #tpu.memory_space<vmem>>, vector<1x8x256xf32>
    %32 = vector.shape_cast %31 : vector<1x8x256xf32> to vector<8x256xf32>
    %33 = vector.extract_strided_slice %32 {offsets = [0, 0], sizes = [1, 256], strides = [1, 1]} : vector<8x256xf32> to vector<1x256xf32>
    %34 = vector.extract_strided_slice %32 {offsets = [1, 0], sizes = [1, 256], strides = [1, 1]} : vector<8x256xf32> to vector<1x256xf32>
    %cst_16 = arith.constant dense<0.000000e+00> : vector<32x256xf32>
    %35 = tpu.matmul %29, %30, %cst_16 {dimension_numbers = #tpu.dot_dimension_numbers<[1], [0], [0], [1], [0, 0, 1, 1], [], []>} : vector<32x256xf32>, vector<256x256xf32>, vector<32x256xf32> -> vector<32x256xf32>
    %36 = arith.subf %29, %35 : vector<32x256xf32>
    %37 = arith.mulf %36, %36 : vector<32x256xf32>
    %cst_17 = arith.constant dense<0.000000e+00> : vector<32x256xf32>
    %38 = tpu.matmul %37, %30, %cst_17 {dimension_numbers = #tpu.dot_dimension_numbers<[1], [0], [0], [1], [0, 0, 1, 1], [], []>} : vector<32x256xf32>, vector<256x256xf32>, vector<32x256xf32> -> vector<32x256xf32>
    %cst_18 = arith.constant 9.99999974E-6 : f32
    %39 = vector.broadcast %cst_18 : f32 to vector<32x256xf32>
    %40 = arith.addf %38, %39 : vector<32x256xf32>
    %41 = math.rsqrt %40 : vector<32x256xf32>
    %42 = arith.mulf %36, %41 : vector<32x256xf32>
    %43 = vector.broadcast %33 : vector<1x256xf32> to vector<32x256xf32>
    %44 = arith.mulf %42, %43 : vector<32x256xf32>
    %45 = vector.broadcast %34 : vector<1x256xf32> to vector<32x256xf32>
    %46 = arith.addf %44, %45 : vector<32x256xf32>
    %c0_19 = arith.constant 0 : index
    %c0_20 = arith.constant 0 : index
    %c0_21 = arith.constant 0 : index
    %47 = vector.load %arg4[%c0_19, %c0_20, %c0_21] : memref<2x256x512xf32, #tpu.memory_space<vmem>>, vector<1x256x512xf32>
    %48 = vector.shape_cast %47 : vector<1x256x512xf32> to vector<256x512xf32>
    %cst_22 = arith.constant dense<0.000000e+00> : vector<32x512xf32>
    %49 = tpu.matmul %46, %48, %cst_22 {dimension_numbers = #tpu.dot_dimension_numbers<[1], [0], [0], [1], [0, 0, 1, 1], [], []>} : vector<32x256xf32>, vector<256x512xf32>, vector<32x512xf32> -> vector<32x512xf32>
    %c0_23 = arith.constant 0 : index
    %c0_24 = arith.constant 0 : index
    %c0_25 = arith.constant 0 : index
    %50 = vector.load %arg5[%c0_23, %c0_24, %c0_25] : memref<2x1x512xf32, #tpu.memory_space<vmem>>, vector<1x1x512xf32>
    %51 = vector.shape_cast %50 : vector<1x1x512xf32> to vector<1x512xf32>
    %52 = vector.broadcast %51 : vector<1x512xf32> to vector<32x512xf32>
    %53 = arith.addf %49, %52 : vector<32x512xf32>
    %cst_26 = arith.constant 5.000000e-01 : f32
    %54 = vector.broadcast %cst_26 : f32 to vector<32x512xf32>
    %55 = arith.mulf %54, %53 : vector<32x512xf32>
    %cst_27 = arith.constant 0.707106769 : f32
    %56 = vector.broadcast %cst_27 : f32 to vector<32x512xf32>
    %57 = arith.mulf %53, %56 : vector<32x512xf32>
    %cst_28 = arith.constant 0.000000e+00 : f32
    %58 = vector.broadcast %cst_28 : f32 to vector<32x512xf32>
    %59 = arith.cmpf oge, %57, %58 : vector<32x512xf32>
    %cst_29 = arith.constant 1.000000e+00 : f32
    %cst_30 = arith.constant -1.000000e+00 : f32
    %60 = vector.broadcast %cst_29 : f32 to vector<32x512xf32>
    %61 = vector.broadcast %cst_30 : f32 to vector<32x512xf32>
    %62 = arith.select %59, %60, %61 : vector<32x512xi1>, vector<32x512xf32>
    %63 = math.absf %57 : vector<32x512xf32>
    %cst_31 = arith.constant 0.327591091 : f32
    %64 = vector.broadcast %cst_31 : f32 to vector<32x512xf32>
    %65 = arith.mulf %64, %63 : vector<32x512xf32>
    %cst_32 = arith.constant 1.000000e+00 : f32
    %66 = vector.broadcast %cst_32 : f32 to vector<32x512xf32>
    %67 = arith.addf %66, %65 : vector<32x512xf32>
    %cst_33 = arith.constant 1.000000e+00 : f32
    %68 = vector.broadcast %cst_33 : f32 to vector<32x512xf32>
    %69 = arith.divf %68, %67 : vector<32x512xf32>
    %cst_34 = arith.constant 1.06140542 : f32
    %70 = vector.broadcast %cst_34 : f32 to vector<32x512xf32>
    %71 = arith.mulf %70, %69 : vector<32x512xf32>
    %cst_35 = arith.constant -1.45315206 : f32
    %72 = vector.broadcast %cst_35 : f32 to vector<32x512xf32>
    %73 = arith.addf %71, %72 : vector<32x512xf32>
    %74 = arith.mulf %73, %69 : vector<32x512xf32>
    %cst_36 = arith.constant 1.42141378 : f32
    %75 = vector.broadcast %cst_36 : f32 to vector<32x512xf32>
    %76 = arith.addf %74, %75 : vector<32x512xf32>
    %77 = arith.mulf %76, %69 : vector<32x512xf32>
    %cst_37 = arith.constant -0.284496725 : f32
    %78 = vector.broadcast %cst_37 : f32 to vector<32x512xf32>
    %79 = arith.addf %77, %78 : vector<32x512xf32>
    %80 = arith.mulf %79, %69 : vector<32x512xf32>
    %cst_38 = arith.constant 0.254829586 : f32
    %81 = vector.broadcast %cst_38 : f32 to vector<32x512xf32>
    %82 = arith.addf %80, %81 : vector<32x512xf32>
    %83 = arith.mulf %82, %69 : vector<32x512xf32>
    %cst_39 = arith.constant 0.000000e+00 : f32
    %84 = vector.broadcast %cst_39 : f32 to vector<32x512xf32>
    %85 = arith.subf %84, %63 : vector<32x512xf32>
    %86 = arith.mulf %85, %63 : vector<32x512xf32>
    %87 = math.exp %86 : vector<32x512xf32>
    %88 = arith.mulf %83, %87 : vector<32x512xf32>
    %cst_40 = arith.constant 1.000000e+00 : f32
    %89 = vector.broadcast %cst_40 : f32 to vector<32x512xf32>
    %90 = arith.subf %89, %88 : vector<32x512xf32>
    %91 = arith.mulf %62, %90 : vector<32x512xf32>
    %cst_41 = arith.constant 1.000000e+00 : f32
    %92 = vector.broadcast %cst_41 : f32 to vector<32x512xf32>
    %93 = arith.addf %92, %91 : vector<32x512xf32>
    %94 = arith.mulf %55, %93 : vector<32x512xf32>
    %c0_42 = arith.constant 0 : index
    %c0_43 = arith.constant 0 : index
    %c0_44 = arith.constant 0 : index
    %95 = vector.load %arg6[%c0_42, %c0_43, %c0_44] : memref<2x512x256xf32, #tpu.memory_space<vmem>>, vector<1x512x256xf32>
    %96 = vector.shape_cast %95 : vector<1x512x256xf32> to vector<512x256xf32>
    %cst_45 = arith.constant dense<0.000000e+00> : vector<32x256xf32>
    %97 = tpu.matmul %94, %96, %cst_45 {dimension_numbers = #tpu.dot_dimension_numbers<[1], [0], [0], [1], [0, 0, 1, 1], [], []>} : vector<32x512xf32>, vector<512x256xf32>, vector<32x256xf32> -> vector<32x256xf32>
    %98 = vector.extract_strided_slice %32 {offsets = [2, 0], sizes = [1, 256], strides = [1, 1]} : vector<8x256xf32> to vector<1x256xf32>
    %99 = vector.broadcast %98 : vector<1x256xf32> to vector<32x256xf32>
    %100 = arith.addf %97, %99 : vector<32x256xf32>
    %101 = arith.addf %29, %100 : vector<32x256xf32>
    %102 = vector.extract_strided_slice %32 {offsets = [3, 0], sizes = [1, 256], strides = [1, 1]} : vector<8x256xf32> to vector<1x256xf32>
    %103 = vector.extract_strided_slice %32 {offsets = [4, 0], sizes = [1, 256], strides = [1, 1]} : vector<8x256xf32> to vector<1x256xf32>
    %cst_46 = arith.constant dense<0.000000e+00> : vector<32x256xf32>
    %104 = tpu.matmul %101, %30, %cst_46 {dimension_numbers = #tpu.dot_dimension_numbers<[1], [0], [0], [1], [0, 0, 1, 1], [], []>} : vector<32x256xf32>, vector<256x256xf32>, vector<32x256xf32> -> vector<32x256xf32>
    %105 = arith.subf %101, %104 : vector<32x256xf32>
    %106 = arith.mulf %105, %105 : vector<32x256xf32>
    %cst_47 = arith.constant dense<0.000000e+00> : vector<32x256xf32>
    %107 = tpu.matmul %106, %30, %cst_47 {dimension_numbers = #tpu.dot_dimension_numbers<[1], [0], [0], [1], [0, 0, 1, 1], [], []>} : vector<32x256xf32>, vector<256x256xf32>, vector<32x256xf32> -> vector<32x256xf32>
    %cst_48 = arith.constant 9.99999974E-6 : f32
    %108 = vector.broadcast %cst_48 : f32 to vector<32x256xf32>
    %109 = arith.addf %107, %108 : vector<32x256xf32>
    %110 = math.rsqrt %109 : vector<32x256xf32>
    %111 = arith.mulf %105, %110 : vector<32x256xf32>
    %112 = vector.broadcast %102 : vector<1x256xf32> to vector<32x256xf32>
    %113 = arith.mulf %111, %112 : vector<32x256xf32>
    %114 = vector.broadcast %103 : vector<1x256xf32> to vector<32x256xf32>
    %115 = arith.addf %113, %114 : vector<32x256xf32>
    %c0_49 = arith.constant 0 : index
    %c0_50 = arith.constant 0 : index
    %c0_51 = arith.constant 0 : index
    %116 = vector.load %arg7[%c0_49, %c0_50, %c0_51] : memref<2x256x512xf32, #tpu.memory_space<vmem>>, vector<1x256x512xf32>
    %117 = vector.shape_cast %116 : vector<1x256x512xf32> to vector<256x512xf32>
    %cst_52 = arith.constant dense<0.000000e+00> : vector<32x512xf32>
    %118 = tpu.matmul %115, %117, %cst_52 {dimension_numbers = #tpu.dot_dimension_numbers<[1], [0], [0], [1], [0, 0, 1, 1], [], []>} : vector<32x256xf32>, vector<256x512xf32>, vector<32x512xf32> -> vector<32x512xf32>
    %c0_53 = arith.constant 0 : index
    %c0_54 = arith.constant 0 : index
    %c0_55 = arith.constant 0 : index
    %119 = vector.load %arg8[%c0_53, %c0_54, %c0_55] : memref<2x1x512xf32, #tpu.memory_space<vmem>>, vector<1x1x512xf32>
    %120 = vector.shape_cast %119 : vector<1x1x512xf32> to vector<1x512xf32>
    %121 = vector.broadcast %120 : vector<1x512xf32> to vector<32x512xf32>
    %122 = arith.addf %118, %121 : vector<32x512xf32>
    %cst_56 = arith.constant 5.000000e-01 : f32
    %123 = vector.broadcast %cst_56 : f32 to vector<32x512xf32>
    %124 = arith.mulf %123, %122 : vector<32x512xf32>
    %cst_57 = arith.constant 0.707106769 : f32
    %125 = vector.broadcast %cst_57 : f32 to vector<32x512xf32>
    %126 = arith.mulf %122, %125 : vector<32x512xf32>
    %cst_58 = arith.constant 0.000000e+00 : f32
    %127 = vector.broadcast %cst_58 : f32 to vector<32x512xf32>
    %128 = arith.cmpf oge, %126, %127 : vector<32x512xf32>
    %cst_59 = arith.constant 1.000000e+00 : f32
    %cst_60 = arith.constant -1.000000e+00 : f32
    %129 = vector.broadcast %cst_59 : f32 to vector<32x512xf32>
    %130 = vector.broadcast %cst_60 : f32 to vector<32x512xf32>
    %131 = arith.select %128, %129, %130 : vector<32x512xi1>, vector<32x512xf32>
    %132 = math.absf %126 : vector<32x512xf32>
    %cst_61 = arith.constant 0.327591091 : f32
    %133 = vector.broadcast %cst_61 : f32 to vector<32x512xf32>
    %134 = arith.mulf %133, %132 : vector<32x512xf32>
    %cst_62 = arith.constant 1.000000e+00 : f32
    %135 = vector.broadcast %cst_62 : f32 to vector<32x512xf32>
    %136 = arith.addf %135, %134 : vector<32x512xf32>
    %cst_63 = arith.constant 1.000000e+00 : f32
    %137 = vector.broadcast %cst_63 : f32 to vector<32x512xf32>
    %138 = arith.divf %137, %136 : vector<32x512xf32>
    %cst_64 = arith.constant 1.06140542 : f32
    %139 = vector.broadcast %cst_64 : f32 to vector<32x512xf32>
    %140 = arith.mulf %139, %138 : vector<32x512xf32>
    %cst_65 = arith.constant -1.45315206 : f32
    %141 = vector.broadcast %cst_65 : f32 to vector<32x512xf32>
    %142 = arith.addf %140, %141 : vector<32x512xf32>
    %143 = arith.mulf %142, %138 : vector<32x512xf32>
    %cst_66 = arith.constant 1.42141378 : f32
    %144 = vector.broadcast %cst_66 : f32 to vector<32x512xf32>
    %145 = arith.addf %143, %144 : vector<32x512xf32>
    %146 = arith.mulf %145, %138 : vector<32x512xf32>
    %cst_67 = arith.constant -0.284496725 : f32
    %147 = vector.broadcast %cst_67 : f32 to vector<32x512xf32>
    %148 = arith.addf %146, %147 : vector<32x512xf32>
    %149 = arith.mulf %148, %138 : vector<32x512xf32>
    %cst_68 = arith.constant 0.254829586 : f32
    %150 = vector.broadcast %cst_68 : f32 to vector<32x512xf32>
    %151 = arith.addf %149, %150 : vector<32x512xf32>
    %152 = arith.mulf %151, %138 : vector<32x512xf32>
    %cst_69 = arith.constant 0.000000e+00 : f32
    %153 = vector.broadcast %cst_69 : f32 to vector<32x512xf32>
    %154 = arith.subf %153, %132 : vector<32x512xf32>
    %155 = arith.mulf %154, %132 : vector<32x512xf32>
    %156 = math.exp %155 : vector<32x512xf32>
    %157 = arith.mulf %152, %156 : vector<32x512xf32>
    %cst_70 = arith.constant 1.000000e+00 : f32
    %158 = vector.broadcast %cst_70 : f32 to vector<32x512xf32>
    %159 = arith.subf %158, %157 : vector<32x512xf32>
    %160 = arith.mulf %131, %159 : vector<32x512xf32>
    %cst_71 = arith.constant 1.000000e+00 : f32
    %161 = vector.broadcast %cst_71 : f32 to vector<32x512xf32>
    %162 = arith.addf %161, %160 : vector<32x512xf32>
    %163 = arith.mulf %124, %162 : vector<32x512xf32>
    %c0_72 = arith.constant 0 : index
    %c0_73 = arith.constant 0 : index
    %c0_74 = arith.constant 0 : index
    %164 = vector.load %arg9[%c0_72, %c0_73, %c0_74] : memref<2x512x256xf32, #tpu.memory_space<vmem>>, vector<1x512x256xf32>
    %165 = vector.shape_cast %164 : vector<1x512x256xf32> to vector<512x256xf32>
    %cst_75 = arith.constant dense<0.000000e+00> : vector<32x256xf32>
    %166 = tpu.matmul %163, %165, %cst_75 {dimension_numbers = #tpu.dot_dimension_numbers<[1], [0], [0], [1], [0, 0, 1, 1], [], []>} : vector<32x512xf32>, vector<512x256xf32>, vector<32x256xf32> -> vector<32x256xf32>
    %167 = vector.extract_strided_slice %32 {offsets = [5, 0], sizes = [1, 256], strides = [1, 1]} : vector<8x256xf32> to vector<1x256xf32>
    %168 = vector.broadcast %167 : vector<1x256xf32> to vector<32x256xf32>
    %169 = arith.addf %166, %168 : vector<32x256xf32>
    %170 = arith.addf %29, %100 : vector<32x256xf32>
    %171 = arith.addf %170, %169 : vector<32x256xf32>
    %c1 = arith.constant 1 : index
    %c0_76 = arith.constant 0 : index
    %c0_77 = arith.constant 0 : index
    %172 = vector.load %arg10[%c1, %c0_76, %c0_77] : memref<2x8x256xf32, #tpu.memory_space<vmem>>, vector<1x8x256xf32>
    %173 = vector.shape_cast %172 : vector<1x8x256xf32> to vector<8x256xf32>
    %174 = vector.extract_strided_slice %173 {offsets = [0, 0], sizes = [1, 256], strides = [1, 1]} : vector<8x256xf32> to vector<1x256xf32>
    %175 = vector.extract_strided_slice %173 {offsets = [1, 0], sizes = [1, 256], strides = [1, 1]} : vector<8x256xf32> to vector<1x256xf32>
    %cst_78 = arith.constant dense<0.000000e+00> : vector<32x256xf32>
    %176 = tpu.matmul %171, %30, %cst_78 {dimension_numbers = #tpu.dot_dimension_numbers<[1], [0], [0], [1], [0, 0, 1, 1], [], []>} : vector<32x256xf32>, vector<256x256xf32>, vector<32x256xf32> -> vector<32x256xf32>
    %177 = arith.subf %171, %176 : vector<32x256xf32>
    %178 = arith.mulf %177, %177 : vector<32x256xf32>
    %cst_79 = arith.constant dense<0.000000e+00> : vector<32x256xf32>
    %179 = tpu.matmul %178, %30, %cst_79 {dimension_numbers = #tpu.dot_dimension_numbers<[1], [0], [0], [1], [0, 0, 1, 1], [], []>} : vector<32x256xf32>, vector<256x256xf32>, vector<32x256xf32> -> vector<32x256xf32>
    %cst_80 = arith.constant 9.99999974E-6 : f32
    %180 = vector.broadcast %cst_80 : f32 to vector<32x256xf32>
    %181 = arith.addf %179, %180 : vector<32x256xf32>
    %182 = math.rsqrt %181 : vector<32x256xf32>
    %183 = arith.mulf %177, %182 : vector<32x256xf32>
    %184 = vector.broadcast %174 : vector<1x256xf32> to vector<32x256xf32>
    %185 = arith.mulf %183, %184 : vector<32x256xf32>
    %186 = vector.broadcast %175 : vector<1x256xf32> to vector<32x256xf32>
    %187 = arith.addf %185, %186 : vector<32x256xf32>
    %c1_81 = arith.constant 1 : index
    %c0_82 = arith.constant 0 : index
    %c0_83 = arith.constant 0 : index
    %188 = vector.load %arg4[%c1_81, %c0_82, %c0_83] : memref<2x256x512xf32, #tpu.memory_space<vmem>>, vector<1x256x512xf32>
    %189 = vector.shape_cast %188 : vector<1x256x512xf32> to vector<256x512xf32>
    %cst_84 = arith.constant dense<0.000000e+00> : vector<32x512xf32>
    %190 = tpu.matmul %187, %189, %cst_84 {dimension_numbers = #tpu.dot_dimension_numbers<[1], [0], [0], [1], [0, 0, 1, 1], [], []>} : vector<32x256xf32>, vector<256x512xf32>, vector<32x512xf32> -> vector<32x512xf32>
    %c1_85 = arith.constant 1 : index
    %c0_86 = arith.constant 0 : index
    %c0_87 = arith.constant 0 : index
    %191 = vector.load %arg5[%c1_85, %c0_86, %c0_87] : memref<2x1x512xf32, #tpu.memory_space<vmem>>, vector<1x1x512xf32>
    %192 = vector.shape_cast %191 : vector<1x1x512xf32> to vector<1x512xf32>
    %193 = vector.broadcast %192 : vector<1x512xf32> to vector<32x512xf32>
    %194 = arith.addf %190, %193 : vector<32x512xf32>
    %cst_88 = arith.constant 5.000000e-01 : f32
    %195 = vector.broadcast %cst_88 : f32 to vector<32x512xf32>
    %196 = arith.mulf %195, %194 : vector<32x512xf32>
    %cst_89 = arith.constant 0.707106769 : f32
    %197 = vector.broadcast %cst_89 : f32 to vector<32x512xf32>
    %198 = arith.mulf %194, %197 : vector<32x512xf32>
    %cst_90 = arith.constant 0.000000e+00 : f32
    %199 = vector.broadcast %cst_90 : f32 to vector<32x512xf32>
    %200 = arith.cmpf oge, %198, %199 : vector<32x512xf32>
    %cst_91 = arith.constant 1.000000e+00 : f32
    %cst_92 = arith.constant -1.000000e+00 : f32
    %201 = vector.broadcast %cst_91 : f32 to vector<32x512xf32>
    %202 = vector.broadcast %cst_92 : f32 to vector<32x512xf32>
    %203 = arith.select %200, %201, %202 : vector<32x512xi1>, vector<32x512xf32>
    %204 = math.absf %198 : vector<32x512xf32>
    %cst_93 = arith.constant 0.327591091 : f32
    %205 = vector.broadcast %cst_93 : f32 to vector<32x512xf32>
    %206 = arith.mulf %205, %204 : vector<32x512xf32>
    %cst_94 = arith.constant 1.000000e+00 : f32
    %207 = vector.broadcast %cst_94 : f32 to vector<32x512xf32>
    %208 = arith.addf %207, %206 : vector<32x512xf32>
    %cst_95 = arith.constant 1.000000e+00 : f32
    %209 = vector.broadcast %cst_95 : f32 to vector<32x512xf32>
    %210 = arith.divf %209, %208 : vector<32x512xf32>
    %cst_96 = arith.constant 1.06140542 : f32
    %211 = vector.broadcast %cst_96 : f32 to vector<32x512xf32>
    %212 = arith.mulf %211, %210 : vector<32x512xf32>
    %cst_97 = arith.constant -1.45315206 : f32
    %213 = vector.broadcast %cst_97 : f32 to vector<32x512xf32>
    %214 = arith.addf %212, %213 : vector<32x512xf32>
    %215 = arith.mulf %214, %210 : vector<32x512xf32>
    %cst_98 = arith.constant 1.42141378 : f32
    %216 = vector.broadcast %cst_98 : f32 to vector<32x512xf32>
    %217 = arith.addf %215, %216 : vector<32x512xf32>
    %218 = arith.mulf %217, %210 : vector<32x512xf32>
    %cst_99 = arith.constant -0.284496725 : f32
    %219 = vector.broadcast %cst_99 : f32 to vector<32x512xf32>
    %220 = arith.addf %218, %219 : vector<32x512xf32>
    %221 = arith.mulf %220, %210 : vector<32x512xf32>
    %cst_100 = arith.constant 0.254829586 : f32
    %222 = vector.broadcast %cst_100 : f32 to vector<32x512xf32>
    %223 = arith.addf %221, %222 : vector<32x512xf32>
    %224 = arith.mulf %223, %210 : vector<32x512xf32>
    %cst_101 = arith.constant 0.000000e+00 : f32
    %225 = vector.broadcast %cst_101 : f32 to vector<32x512xf32>
    %226 = arith.subf %225, %204 : vector<32x512xf32>
    %227 = arith.mulf %226, %204 : vector<32x512xf32>
    %228 = math.exp %227 : vector<32x512xf32>
    %229 = arith.mulf %224, %228 : vector<32x512xf32>
    %cst_102 = arith.constant 1.000000e+00 : f32
    %230 = vector.broadcast %cst_102 : f32 to vector<32x512xf32>
    %231 = arith.subf %230, %229 : vector<32x512xf32>
    %232 = arith.mulf %203, %231 : vector<32x512xf32>
    %cst_103 = arith.constant 1.000000e+00 : f32
    %233 = vector.broadcast %cst_103 : f32 to vector<32x512xf32>
    %234 = arith.addf %233, %232 : vector<32x512xf32>
    %235 = arith.mulf %196, %234 : vector<32x512xf32>
    %c1_104 = arith.constant 1 : index
    %c0_105 = arith.constant 0 : index
    %c0_106 = arith.constant 0 : index
    %236 = vector.load %arg6[%c1_104, %c0_105, %c0_106] : memref<2x512x256xf32, #tpu.memory_space<vmem>>, vector<1x512x256xf32>
    %237 = vector.shape_cast %236 : vector<1x512x256xf32> to vector<512x256xf32>
    %cst_107 = arith.constant dense<0.000000e+00> : vector<32x256xf32>
    %238 = tpu.matmul %235, %237, %cst_107 {dimension_numbers = #tpu.dot_dimension_numbers<[1], [0], [0], [1], [0, 0, 1, 1], [], []>} : vector<32x512xf32>, vector<512x256xf32>, vector<32x256xf32> -> vector<32x256xf32>
    %239 = vector.extract_strided_slice %173 {offsets = [2, 0], sizes = [1, 256], strides = [1, 1]} : vector<8x256xf32> to vector<1x256xf32>
    %240 = vector.broadcast %239 : vector<1x256xf32> to vector<32x256xf32>
    %241 = arith.addf %238, %240 : vector<32x256xf32>
    %242 = arith.addf %171, %241 : vector<32x256xf32>
    %243 = vector.extract_strided_slice %173 {offsets = [3, 0], sizes = [1, 256], strides = [1, 1]} : vector<8x256xf32> to vector<1x256xf32>
    %244 = vector.extract_strided_slice %173 {offsets = [4, 0], sizes = [1, 256], strides = [1, 1]} : vector<8x256xf32> to vector<1x256xf32>
    %cst_108 = arith.constant dense<0.000000e+00> : vector<32x256xf32>
    %245 = tpu.matmul %242, %30, %cst_108 {dimension_numbers = #tpu.dot_dimension_numbers<[1], [0], [0], [1], [0, 0, 1, 1], [], []>} : vector<32x256xf32>, vector<256x256xf32>, vector<32x256xf32> -> vector<32x256xf32>
    %246 = arith.subf %242, %245 : vector<32x256xf32>
    %247 = arith.mulf %246, %246 : vector<32x256xf32>
    %cst_109 = arith.constant dense<0.000000e+00> : vector<32x256xf32>
    %248 = tpu.matmul %247, %30, %cst_109 {dimension_numbers = #tpu.dot_dimension_numbers<[1], [0], [0], [1], [0, 0, 1, 1], [], []>} : vector<32x256xf32>, vector<256x256xf32>, vector<32x256xf32> -> vector<32x256xf32>
    %cst_110 = arith.constant 9.99999974E-6 : f32
    %249 = vector.broadcast %cst_110 : f32 to vector<32x256xf32>
    %250 = arith.addf %248, %249 : vector<32x256xf32>
    %251 = math.rsqrt %250 : vector<32x256xf32>
    %252 = arith.mulf %246, %251 : vector<32x256xf32>
    %253 = vector.broadcast %243 : vector<1x256xf32> to vector<32x256xf32>
    %254 = arith.mulf %252, %253 : vector<32x256xf32>
    %255 = vector.broadcast %244 : vector<1x256xf32> to vector<32x256xf32>
    %256 = arith.addf %254, %255 : vector<32x256xf32>
    %c1_111 = arith.constant 1 : index
    %c0_112 = arith.constant 0 : index
    %c0_113 = arith.constant 0 : index
    %257 = vector.load %arg7[%c1_111, %c0_112, %c0_113] : memref<2x256x512xf32, #tpu.memory_space<vmem>>, vector<1x256x512xf32>
    %258 = vector.shape_cast %257 : vector<1x256x512xf32> to vector<256x512xf32>
    %cst_114 = arith.constant dense<0.000000e+00> : vector<32x512xf32>
    %259 = tpu.matmul %256, %258, %cst_114 {dimension_numbers = #tpu.dot_dimension_numbers<[1], [0], [0], [1], [0, 0, 1, 1], [], []>} : vector<32x256xf32>, vector<256x512xf32>, vector<32x512xf32> -> vector<32x512xf32>
    %c1_115 = arith.constant 1 : index
    %c0_116 = arith.constant 0 : index
    %c0_117 = arith.constant 0 : index
    %260 = vector.load %arg8[%c1_115, %c0_116, %c0_117] : memref<2x1x512xf32, #tpu.memory_space<vmem>>, vector<1x1x512xf32>
    %261 = vector.shape_cast %260 : vector<1x1x512xf32> to vector<1x512xf32>
    %262 = vector.broadcast %261 : vector<1x512xf32> to vector<32x512xf32>
    %263 = arith.addf %259, %262 : vector<32x512xf32>
    %cst_118 = arith.constant 5.000000e-01 : f32
    %264 = vector.broadcast %cst_118 : f32 to vector<32x512xf32>
    %265 = arith.mulf %264, %263 : vector<32x512xf32>
    %cst_119 = arith.constant 0.707106769 : f32
    %266 = vector.broadcast %cst_119 : f32 to vector<32x512xf32>
    %267 = arith.mulf %263, %266 : vector<32x512xf32>
    %cst_120 = arith.constant 0.000000e+00 : f32
    %268 = vector.broadcast %cst_120 : f32 to vector<32x512xf32>
    %269 = arith.cmpf oge, %267, %268 : vector<32x512xf32>
    %cst_121 = arith.constant 1.000000e+00 : f32
    %cst_122 = arith.constant -1.000000e+00 : f32
    %270 = vector.broadcast %cst_121 : f32 to vector<32x512xf32>
    %271 = vector.broadcast %cst_122 : f32 to vector<32x512xf32>
    %272 = arith.select %269, %270, %271 : vector<32x512xi1>, vector<32x512xf32>
    %273 = math.absf %267 : vector<32x512xf32>
    %cst_123 = arith.constant 0.327591091 : f32
    %274 = vector.broadcast %cst_123 : f32 to vector<32x512xf32>
    %275 = arith.mulf %274, %273 : vector<32x512xf32>
    %cst_124 = arith.constant 1.000000e+00 : f32
    %276 = vector.broadcast %cst_124 : f32 to vector<32x512xf32>
    %277 = arith.addf %276, %275 : vector<32x512xf32>
    %cst_125 = arith.constant 1.000000e+00 : f32
    %278 = vector.broadcast %cst_125 : f32 to vector<32x512xf32>
    %279 = arith.divf %278, %277 : vector<32x512xf32>
    %cst_126 = arith.constant 1.06140542 : f32
    %280 = vector.broadcast %cst_126 : f32 to vector<32x512xf32>
    %281 = arith.mulf %280, %279 : vector<32x512xf32>
    %cst_127 = arith.constant -1.45315206 : f32
    %282 = vector.broadcast %cst_127 : f32 to vector<32x512xf32>
    %283 = arith.addf %281, %282 : vector<32x512xf32>
    %284 = arith.mulf %283, %279 : vector<32x512xf32>
    %cst_128 = arith.constant 1.42141378 : f32
    %285 = vector.broadcast %cst_128 : f32 to vector<32x512xf32>
    %286 = arith.addf %284, %285 : vector<32x512xf32>
    %287 = arith.mulf %286, %279 : vector<32x512xf32>
    %cst_129 = arith.constant -0.284496725 : f32
    %288 = vector.broadcast %cst_129 : f32 to vector<32x512xf32>
    %289 = arith.addf %287, %288 : vector<32x512xf32>
    %290 = arith.mulf %289, %279 : vector<32x512xf32>
    %cst_130 = arith.constant 0.254829586 : f32
    %291 = vector.broadcast %cst_130 : f32 to vector<32x512xf32>
    %292 = arith.addf %290, %291 : vector<32x512xf32>
    %293 = arith.mulf %292, %279 : vector<32x512xf32>
    %cst_131 = arith.constant 0.000000e+00 : f32
    %294 = vector.broadcast %cst_131 : f32 to vector<32x512xf32>
    %295 = arith.subf %294, %273 : vector<32x512xf32>
    %296 = arith.mulf %295, %273 : vector<32x512xf32>
    %297 = math.exp %296 : vector<32x512xf32>
    %298 = arith.mulf %293, %297 : vector<32x512xf32>
    %cst_132 = arith.constant 1.000000e+00 : f32
    %299 = vector.broadcast %cst_132 : f32 to vector<32x512xf32>
    %300 = arith.subf %299, %298 : vector<32x512xf32>
    %301 = arith.mulf %272, %300 : vector<32x512xf32>
    %cst_133 = arith.constant 1.000000e+00 : f32
    %302 = vector.broadcast %cst_133 : f32 to vector<32x512xf32>
    %303 = arith.addf %302, %301 : vector<32x512xf32>
    %304 = arith.mulf %265, %303 : vector<32x512xf32>
    %c1_134 = arith.constant 1 : index
    %c0_135 = arith.constant 0 : index
    %c0_136 = arith.constant 0 : index
    %305 = vector.load %arg9[%c1_134, %c0_135, %c0_136] : memref<2x512x256xf32, #tpu.memory_space<vmem>>, vector<1x512x256xf32>
    %306 = vector.shape_cast %305 : vector<1x512x256xf32> to vector<512x256xf32>
    %cst_137 = arith.constant dense<0.000000e+00> : vector<32x256xf32>
    %307 = tpu.matmul %304, %306, %cst_137 {dimension_numbers = #tpu.dot_dimension_numbers<[1], [0], [0], [1], [0, 0, 1, 1], [], []>} : vector<32x512xf32>, vector<512x256xf32>, vector<32x256xf32> -> vector<32x256xf32>
    %308 = vector.extract_strided_slice %173 {offsets = [5, 0], sizes = [1, 256], strides = [1, 1]} : vector<8x256xf32> to vector<1x256xf32>
    %309 = vector.broadcast %308 : vector<1x256xf32> to vector<32x256xf32>
    %310 = arith.addf %307, %309 : vector<32x256xf32>
    %311 = arith.addf %171, %241 : vector<32x256xf32>
    %312 = arith.addf %311, %310 : vector<32x256xf32>
    %c0_138 = arith.constant 0 : index
    %c0_139 = arith.constant 0 : index
    %313 = vector.load %arg11[%c0_138, %c0_139] : memref<259x256xf32, #tpu.memory_space<vmem>>, vector<256x256xf32>
    %cst_140 = arith.constant dense<0.000000e+00> : vector<32x256xf32>
    %314 = tpu.matmul %312, %313, %cst_140 {dimension_numbers = #tpu.dot_dimension_numbers<[1], [0], [0], [1], [0, 0, 1, 1], [], []>} : vector<32x256xf32>, vector<256x256xf32>, vector<32x256xf32> -> vector<32x256xf32>
    %c256 = arith.constant 256 : index
    %c0_141 = arith.constant 0 : index
    %315 = vector.load %arg11[%c256, %c0_141] : memref<259x256xf32, #tpu.memory_space<vmem>>, vector<1x256xf32>
    %316 = vector.broadcast %315 : vector<1x256xf32> to vector<32x256xf32>
    %317 = arith.addf %314, %316 : vector<32x256xf32>
    %c257 = arith.constant 257 : index
    %c0_142 = arith.constant 0 : index
    %318 = vector.load %arg11[%c257, %c0_142] : memref<259x256xf32, #tpu.memory_space<vmem>>, vector<1x256xf32>
    %c258 = arith.constant 258 : index
    %c0_143 = arith.constant 0 : index
    %319 = vector.load %arg11[%c258, %c0_143] : memref<259x256xf32, #tpu.memory_space<vmem>>, vector<1x256xf32>
    %cst_144 = arith.constant dense<0.000000e+00> : vector<32x256xf32>
    %320 = tpu.matmul %317, %30, %cst_144 {dimension_numbers = #tpu.dot_dimension_numbers<[1], [0], [0], [1], [0, 0, 1, 1], [], []>} : vector<32x256xf32>, vector<256x256xf32>, vector<32x256xf32> -> vector<32x256xf32>
    %321 = arith.subf %317, %320 : vector<32x256xf32>
    %322 = arith.mulf %321, %321 : vector<32x256xf32>
    %cst_145 = arith.constant dense<0.000000e+00> : vector<32x256xf32>
    %323 = tpu.matmul %322, %30, %cst_145 {dimension_numbers = #tpu.dot_dimension_numbers<[1], [0], [0], [1], [0, 0, 1, 1], [], []>} : vector<32x256xf32>, vector<256x256xf32>, vector<32x256xf32> -> vector<32x256xf32>
    %cst_146 = arith.constant 9.99999974E-6 : f32
    %324 = vector.broadcast %cst_146 : f32 to vector<32x256xf32>
    %325 = arith.addf %323, %324 : vector<32x256xf32>
    %326 = math.rsqrt %325 : vector<32x256xf32>
    %327 = arith.mulf %321, %326 : vector<32x256xf32>
    %328 = vector.broadcast %318 : vector<1x256xf32> to vector<32x256xf32>
    %329 = arith.mulf %327, %328 : vector<32x256xf32>
    %330 = vector.broadcast %319 : vector<1x256xf32> to vector<32x256xf32>
    %331 = arith.addf %329, %330 : vector<32x256xf32>
    %c0_147 = arith.constant 0 : index
    %c0_148 = arith.constant 0 : index
    %332 = vector.load %arg12[%c0_147, %c0_148] : memref<392x128xf32, #tpu.memory_space<vmem>>, vector<256x128xf32>
    %cst_149 = arith.constant dense<0.000000e+00> : vector<32x128xf32>
    %333 = tpu.matmul %331, %332, %cst_149 {dimension_numbers = #tpu.dot_dimension_numbers<[1], [0], [0], [1], [0, 0, 1, 1], [], []>} : vector<32x256xf32>, vector<256x128xf32>, vector<32x128xf32> -> vector<32x128xf32>
    %c256_150 = arith.constant 256 : index
    %c0_151 = arith.constant 0 : index
    %334 = vector.load %arg12[%c256_150, %c0_151] : memref<392x128xf32, #tpu.memory_space<vmem>>, vector<1x128xf32>
    %335 = vector.broadcast %334 : vector<1x128xf32> to vector<32x128xf32>
    %336 = arith.addf %333, %335 : vector<32x128xf32>
    %cst_152 = arith.constant dense<0xFF800000> : vector<32xf32>
    %337 = vector.multi_reduction <maximumf>, %336, %cst_152 [1] : vector<32x128xf32> to vector<32xf32>
    %338 = vector.shape_cast %337 : vector<32xf32> to vector<32x1xf32>
    %339 = vector.broadcast %338 : vector<32x1xf32> to vector<32x128xf32>
    %340 = arith.subf %336, %339 : vector<32x128xf32>
    %341 = math.exp %340 : vector<32x128xf32>
    %c264 = arith.constant 264 : index
    %c0_153 = arith.constant 0 : index
    %342 = vector.load %arg12[%c264, %c0_153] : memref<392x128xf32, #tpu.memory_space<vmem>>, vector<128x128xf32>
    %cst_154 = arith.constant dense<0.000000e+00> : vector<32x128xf32>
    %343 = tpu.matmul %341, %342, %cst_154 {dimension_numbers = #tpu.dot_dimension_numbers<[1], [0], [0], [1], [0, 0, 1, 1], [], []>} : vector<32x128xf32>, vector<128x128xf32>, vector<32x128xf32> -> vector<32x128xf32>
    %344 = arith.divf %341, %343 : vector<32x128xf32>
    %c0_155 = arith.constant 0 : index
    %c0_156 = arith.constant 0 : index
    %345 = vector.load %arg13[%c0_155, %c0_156] : memref<32x128xf32, #tpu.memory_space<vmem>>, vector<32x128xf32>
    tpu.vector_store %arg13[%c0_155, %c0_156], %344 {strides = array<i32>} : memref<32x128xf32, #tpu.memory_space<vmem>>, vector<32x128xf32>,
    return
  }
  func.func @transform_0(%arg0: i32) -> (i32, i32) {
    %c0_i32 = arith.constant 0 : i32
    %c0_i32_0 = arith.constant 0 : i32
    return %arg0, %c0_i32 : i32, i32
  }
  func.func @transform_1(%arg0: i32) -> (i32, i32) {
    %c0_i32 = arith.constant 0 : i32
    %c0_i32_0 = arith.constant 0 : i32
    %c0_i32_1 = arith.constant 0 : i32
    return %c0_i32, %c0_i32_0 : i32, i32
  }
  func.func @transform_2(%arg0: i32) -> (i32, i32) {
    %c0_i32 = arith.constant 0 : i32
    %c0_i32_0 = arith.constant 0 : i32
    %c0_i32_1 = arith.constant 0 : i32
    return %c0_i32, %c0_i32_0 : i32, i32
  }
  func.func @transform_3(%arg0: i32) -> (i32, i32, i32) {
    %c0_i32 = arith.constant 0 : i32
    %c0_i32_0 = arith.constant 0 : i32
    %c0_i32_1 = arith.constant 0 : i32
    %c0_i32_2 = arith.constant 0 : i32
    return %c0_i32, %c0_i32_0, %c0_i32_1 : i32, i32, i32
  }
  func.func @transform_4(%arg0: i32) -> (i32, i32, i32) {
    %c0_i32 = arith.constant 0 : i32
    %c0_i32_0 = arith.constant 0 : i32
    %c0_i32_1 = arith.constant 0 : i32
    %c0_i32_2 = arith.constant 0 : i32
    return %c0_i32, %c0_i32_0, %c0_i32_1 : i32, i32, i32
  }
  func.func @transform_5(%arg0: i32) -> (i32, i32, i32) {
    %c0_i32 = arith.constant 0 : i32
    %c0_i32_0 = arith.constant 0 : i32
    %c0_i32_1 = arith.constant 0 : i32
    %c0_i32_2 = arith.constant 0 : i32
    return %c0_i32, %c0_i32_0, %c0_i32_1 : i32, i32, i32
  }
  func.func @transform_6(%arg0: i32) -> (i32, i32, i32) {
    %c0_i32 = arith.constant 0 : i32
    %c0_i32_0 = arith.constant 0 : i32
    %c0_i32_1 = arith.constant 0 : i32
    %c0_i32_2 = arith.constant 0 : i32
    return %c0_i32, %c0_i32_0, %c0_i32_1 : i32, i32, i32
  }
  func.func @transform_7(%arg0: i32) -> (i32, i32, i32) {
    %c0_i32 = arith.constant 0 : i32
    %c0_i32_0 = arith.constant 0 : i32
    %c0_i32_1 = arith.constant 0 : i32
    %c0_i32_2 = arith.constant 0 : i32
    return %c0_i32, %c0_i32_0, %c0_i32_1 : i32, i32, i32
  }
  func.func @transform_8(%arg0: i32) -> (i32, i32, i32) {
    %c0_i32 = arith.constant 0 : i32
    %c0_i32_0 = arith.constant 0 : i32
    %c0_i32_1 = arith.constant 0 : i32
    %c0_i32_2 = arith.constant 0 : i32
    return %c0_i32, %c0_i32_0, %c0_i32_1 : i32, i32, i32
  }
  func.func @transform_9(%arg0: i32) -> (i32, i32, i32) {
    %c0_i32 = arith.constant 0 : i32
    %c0_i32_0 = arith.constant 0 : i32
    %c0_i32_1 = arith.constant 0 : i32
    %c0_i32_2 = arith.constant 0 : i32
    return %c0_i32, %c0_i32_0, %c0_i32_1 : i32, i32, i32
  }
  func.func @transform_10(%arg0: i32) -> (i32, i32) {
    %c0_i32 = arith.constant 0 : i32
    %c0_i32_0 = arith.constant 0 : i32
    %c0_i32_1 = arith.constant 0 : i32
    return %c0_i32, %c0_i32_0 : i32, i32
  }
  func.func @transform_11(%arg0: i32) -> (i32, i32) {
    %c0_i32 = arith.constant 0 : i32
    %c0_i32_0 = arith.constant 0 : i32
    %c0_i32_1 = arith.constant 0 : i32
    return %c0_i32, %c0_i32_0 : i32, i32
  }
  func.func @transform_12(%arg0: i32) -> (i32, i32) {
    %c0_i32 = arith.constant 0 : i32
    %c0_i32_0 = arith.constant 0 : i32
    return %arg0, %c0_i32 : i32, i32
  }
}

</mosaic_0001>

<bundles_post_ra>
// kernel: tpu_custom_call.1
= control target key start
LH: loop header
LB: loop body
LE: loop exit
PB: predicated region body
PF: predicated region fallthrough
CT: control target
= control target key end

     0   :  { %s10971_s0 = inlined_call_operand.vmem [shape: f32[64,32], index: 0, kind: input, shape index: {}]   ;;  %s10972_s1 = inlined_call_operand.vmem [shape: f32[35,256], index: 1, kind: input, shape index: {}]   ;;  %s10973_s2 = inlined_call_operand.hbm [shape: f32[256,256], index: 2, kind: input, shape index: {}]   ;;  %s10974_s3 = inlined_call_operand.hbm [shape: f32[2,256,512], index: 3, kind: input, shape index: {}]   ;;  %s10975_s4 = inlined_call_operand.hbm [shape: f32[2,1,512], index: 4, kind: input, shape index: {}]   ;;  %s10976_s5 = inlined_call_operand.hbm [shape: f32[2,512,256], index: 5, kind: input, shape index: {}]   ;;  %s10977_s6 = inlined_call_operand.hbm [shape: f32[2,256,512], index: 6, kind: input, shape index: {}]   ;;  %s10978_s7 = inlined_call_operand.hbm [shape: f32[2,1,512], index: 7, kind: input, shape index: {}]   ;;  %s10979_s8 = inlined_call_operand.hbm [shape: f32[2,512,256], index: 8, kind: input, shape index: {}]   ;;  %s10980_s9 = inlined_call_operand.vmem [shape: f32[2,8,256], index: 9, kind: input, shape index: {}]   ;;  %s10981_s10 = inlined_call_operand.hbm [shape: f32[259,256], index: 10, kind: input, shape index: {}]   ;;  %s10982_s11 = inlined_call_operand.hbm [shape: f32[392,128], index: 11, kind: input, shape index: {}]   ;;  %s10983_s12 = inlined_call_operand.hbm [shape: f32[64,128], index: 12, kind: output, shape index: {}]  }
   0x1   :  { %11129 = sst [smem:[#allocation62_spill]] %s10974_s3 }
   0x2   :  { %17 = vsyncpa [#allocation3], 0 }
   0x3   :  { %18 = vsyncpa [#allocation6], 0 }
   0x4   :  { %19 = vsyncpa [#allocation9], 0 }
   0x5   :  { %20 = vsyncpa [#allocation12], 0 }
   0x6   :  { %21 = vsyncpa [#allocation15], 0 }
   0x7   :  { %22 = vsyncpa [#allocation4], 0 }
   0x8   :  { %24 = vsyncpa [#allocation4 + $0x1], 0  ;;  %s8301_s21 = smov 0   ;;  %s8303_s22 = smov 0  }
   0x9   :  { %s8305_s23 = smov 0   ;;  %s8307_s24 = smov 0  }
   0xa LB: > { %11130 = sst [smem:[#allocation24_spill]] %s8208_s23  ;;  %s8322_s25 = sadd.s32 4294967295, %s8212_s24   ;;  %s8212_s24 = sphi %s8307_s24, %s11392_s24   ;;  %s8208_s23 = sphi %s8305_s23, %s11397_s23   ;;  %s8204_s22 = sphi %s8303_s22, %s11396_s22   ;;  %s8200_s21 = sphi %s8301_s21, %s11395_s21  }
   0xb   : > { %s6988_s26 = sadd.s32 4294967294, %s8212_s24   ;;  %s8326_s27 = sadd.s32 1, %s8212_s24  }
   0xc   : > { %11131 = sst [smem:[#allocation25_spill]] %s8326_s27  ;;  %s294_s28 = sadd.s32 1, %s8208_s23 }
   0xd   : > { %s291_s29 = ssub.s32 %s8212_s24, %s8326_s27  ;;  %p304_p0 = scmp.ne.s32.totalorder %s8208_s23, %s8204_s22 }
   0xe   : > { %p292_p1 = scmp.eq.s32.totalorder %s291_s29, 0  ;;  %p305_p2 = scmp.eq.s32.totalorder %s8322_s25, 1 }
   0xf   : > { %p310_p3 = scmp.ne.s32.totalorder %s8204_s22, %s8200_s21  ;;  %p311_p4 = scmp.eq.s32.totalorder %s6988_s26, 1 }
  0x10   : > { %s8337_s30 = scalar_select %p292_p1, %s8208_s23, %s294_s28  }
  0x11   : > { %p8339_p5 = por %p305_p2, %p304_p0  ;;  %p8343_p6 = por %p311_p4, %p310_p3 }
  0x12   : > { %11132 = sst [smem:[#allocation26_spill]] %s8337_s30  ;;  %p6989_p7 = scmp.ge.s32.totalorder %s8212_s24, 1 }
  0x13   : > { %s11134_s14 = scalar_select %p8343_p6, 1, 0 }
  0x14   : > { %p318_p8 = scmp.lt.s32.totalorder %s8212_s24, 3  ;;  %p10991_p9 = scmp.eq.s32.totalorder %s8322_s25, 0 }
  0x15   : > { %11135 = sst [smem:[#allocation27_spill]] %s11134_s14  ;;  %s8214_s16 = smov [#allocation5]  }
  0x16   : > { %p8350_p10 = pnand %p6989_p7, %p318_p8  ;;  %s346_s17 = sshll.u32 %s8214_s16, 4  ;;  %s347_s17 = int_to_ptr.vmem [resolvable:$true] %s346_s17 }
  0x17   : > { %s8215_s19 = smov [#allocation8]   ;;  %s7909_s28 = scalar_lea.vmem %s347_s17, 32768 }
  0x18   : > { %p7169_p11 = pneg %p8350_p10  ;;  %s372_s20 = sshll.u32 %s8215_s19, 4  ;;  %s373_s20 = int_to_ptr.vmem [resolvable:$true] %s372_s20 }
  0x19   : > { %p7910_p0 = scmp.ne.s32.totalorder %s347_s17, %s7909_s28  ;;  %p7917_p3 = scmp.lt.s32.totalorder %s347_s17, %s347_s17 }
  0x1a   : > { %p8358_p12 = pnand %p10991_p9, %p7169_p11  ;;  %p7918_p4 = scmp.lt.s32.totalorder %s7909_s28, %s7909_s28 }
  0x1c   : > { %p8364_p13 = pneg %p8358_p12  ;;  %p7919_p7 = por %p7918_p4, %p7917_p3 }
  0x1e   : > { %p7912_p1 = pnand %p7910_p0, %p8364_p13 }
  0x20   : > { %p7913_p2 = pneg %p7912_p1 }
  0x22   : > { %p7920_p8 = pnand %p7919_p7, %p7913_p2 }
  0x24   : > { %7923 = shalt.err (!%p7920_p8)
}
  0x25   : > { %s10987_s29 = smov 512   ;;  %s10988_s16 = smov 32  }
  0x26   : > { %s11139_s3 = sld [smem:[#allocation62_spill]]  ;;  %s7935_s23 = scalar_lea.vmem %s373_s20, 32768 }
  0x27   : > { %p7936_p11 = scmp.ne.s32.totalorder %s373_s20, %s7935_s23  ;;  %p7943_p2 = scmp.lt.s32.totalorder %s373_s20, %s373_s20 }
  0x28   : > { %p7944_p3 = scmp.lt.s32.totalorder %s7935_s23, %s7935_s23 }
  0x29   : > { %p7938_p0 = pnand %p7936_p11, %p8364_p13 }
  0x2a   : > { %p7945_p4 = por %p7944_p3, %p7943_p2 }
  0x2b   : > { %p7939_p1 = pneg %p7938_p0 }
  0x2c   : > { %7175 = dma.hbm_to_vmem [thread:$0]  (!%p8358_p12), %s11139_s3, 32768, %s347_s17, [#allocation6], %s10987_s29, %s10987_s29, %s10988_s16  }
  0x2d   : > { %p7946_p7 = pnand %p7945_p4, %p7939_p1 }
  0x2f   : > { %7949 = shalt.err (!%p7946_p7)
}
  0x30   : > { %s10992_s28 = smov 256   ;;  %s8219_s27 = smov 16  }
  0x31   : > { %7181 = dma.hbm_to_vmem [thread:$0]  (!%p8358_p12), %s10976_s5, 32768, %s373_s20, [#allocation9], %s10992_s28, %s10992_s28, %s8219_s27  }
  0x32   : > { %s8220_s19 = smov [#allocation11]   ;;  %s8221_s16 = smov [#allocation14]  }
  0x33   : > { %s398_s29 = sshll.u32 %s8220_s19, 4  ;;  %s427_s3 = sshll.u32 %s8221_s16, 4  ;;  %s399_s29 = int_to_ptr.vmem [resolvable:$true] %s398_s29  ;;  %s428_s3 = int_to_ptr.vmem [resolvable:$true] %s427_s3 }
  0x34   : > { %s7961_s23 = scalar_lea.vmem %s399_s29, 128  ;;  %p7969_p1 = scmp.lt.s32.totalorder %s399_s29, %s399_s29 }
  0x35   : > { %p7962_p8 = scmp.ne.s32.totalorder %s399_s29, %s7961_s23  ;;  %p7970_p2 = scmp.lt.s32.totalorder %s7961_s23, %s7961_s23 }
  0x37   : > { %p7964_p11 = pnand %p7962_p8, %p8364_p13  ;;  %p7971_p3 = por %p7970_p2, %p7969_p1 }
  0x39   : > { %p7965_p0 = pneg %p7964_p11 }
  0x3b   : > { %p7972_p4 = pnand %p7971_p3, %p7965_p0 }
  0x3d   : > { %7975 = shalt.err (!%p7972_p4)
}
  0x3e   : > { %s10990_s14 = smov 64   ;;  %s8223_s20 = smov 4  }
  0x3f   : > { %7187 = dma.hbm_to_vmem [thread:$0]  (!%p8358_p12), %s10978_s7, 128, %s399_s29, [#allocation12], %s10990_s14, %s10990_s14, %s8223_s20  }
  0x40   : > { %s7987_s17 = scalar_lea.vmem %s428_s3, 8448  ;;  %p7995_p1 = scmp.lt.s32.totalorder %s428_s3, %s428_s3 }
  0x41   : > { %p7988_p7 = scmp.ne.s32.totalorder %s428_s3, %s7987_s17  ;;  %p7996_p0 = scmp.lt.s32.totalorder %s7987_s17, %s7987_s17 }
  0x43   : > { %p7990_p8 = pnand %p7988_p7, %p8364_p13  ;;  %p7997_p2 = por %p7996_p0, %p7995_p1 }
  0x45   : > { %p7991_p11 = pneg %p7990_p8 }
  0x47   : > { %p7998_p3 = pnand %p7997_p2, %p7991_p11 }
  0x49   : > { %8001 = shalt.err (!%p7998_p3)
}
  0x4a   : > { %7193 = dma.hbm_to_vmem [thread:$0]  (!%p8358_p12), %s10981_s10, 8448, %s428_s3, [#allocation15], %s10992_s28, %s10992_s28, %s8219_s27  }
  0x4b   : > { %s8224_s29 = smov [#allocation2]   ;;  %s8225_s30 = smov [#allocation7]  }
  0x4c   : > { %s333_s16 = sshll.u32 %s8224_s29, 4  ;;  %s359_s14 = sshll.u32 %s8225_s30, 4  ;;  %s334_s16 = int_to_ptr.vmem [resolvable:$true] %s333_s16  ;;  %s360_s14 = int_to_ptr.vmem [resolvable:$true] %s359_s14 }
  0x4d   : > { %s8013_s17 = scalar_lea.vmem %s334_s16, 8192  ;;  %p8021_p11 = scmp.lt.s32.totalorder %s334_s16, %s334_s16 }
  0x4e   : > { %p8014_p4 = scmp.ne.s32.totalorder %s334_s16, %s8013_s17  ;;  %p8022_p1 = scmp.lt.s32.totalorder %s8013_s17, %s8013_s17 }
  0x50   : > { %p8016_p7 = pnand %p8014_p4, %p8364_p13  ;;  %p8023_p0 = por %p8022_p1, %p8021_p11 }
  0x52   : > { %p8017_p8 = pneg %p8016_p7 }
  0x54   : > { %p8024_p2 = pnand %p8023_p0, %p8017_p8 }
  0x56   : > { %8027 = shalt.err (!%p8024_p2)
}
  0x57   : > { %7172 = dma.hbm_to_vmem [thread:$0]  (!%p8358_p12), %s10973_s2, 8192, %s334_s16, [#allocation3], %s10992_s28, %s10992_s28, %s8219_s27  }
  0x58   : > { %s8039_s23 = scalar_lea.vmem %s360_s14, 128  ;;  %p8047_p9 = scmp.lt.s32.totalorder %s360_s14, %s360_s14 }
  0x59   : > { %p8040_p3 = scmp.ne.s32.totalorder %s360_s14, %s8039_s23  ;;  %p8048_p6 = scmp.lt.s32.totalorder %s8039_s23, %s8039_s23 }
  0x5b   : > { %p8042_p4 = pnand %p8040_p3, %p8364_p13  ;;  %p8049_p11 = por %p8048_p6, %p8047_p9 }
  0x5d   : > { %p8043_p7 = pneg %p8042_p4 }
  0x5f   : > { %p8050_p8 = pnand %p8049_p11, %p8043_p7 }
  0x61   : > { %8053 = shalt.err (!%p8050_p8)
}
  0x62   : > { %s11140_s29 = smov 64   ;;  %s8226_s16 = smov [#allocation10]  }
  0x63   : > { %7178 = dma.hbm_to_vmem [thread:$0]  (!%p8358_p12), %s10975_s4, 128, %s360_s14, [#allocation6], %s11140_s29, %s11140_s29, %s8223_s20  }
  0x64   : > { %s385_s3 = sshll.u32 %s8226_s16, 4  ;;  %s8227_s19 = smov [#allocation13]   ;;  %s386_s3 = int_to_ptr.vmem [resolvable:$true] %s385_s3 }
  0x65   : > { %s411_s28 = sshll.u32 %s8227_s19, 4  ;;  %s8065_s23 = scalar_lea.vmem %s386_s3, 32768  ;;  %s412_s28 = int_to_ptr.vmem [resolvable:$true] %s411_s28 }
  0x66   : > { %p8066_p6 = scmp.ne.s32.totalorder %s386_s3, %s8065_s23  ;;  %p8073_p0 = scmp.lt.s32.totalorder %s386_s3, %s386_s3 }
  0x67   : > { %p8074_p2 = scmp.lt.s32.totalorder %s8065_s23, %s8065_s23 }
  0x68   : > { %p8068_p9 = pnand %p8066_p6, %p8364_p13 }
  0x69   : > { %p8075_p3 = por %p8074_p2, %p8073_p0 }
  0x6a   : > { %p8069_p1 = pneg %p8068_p9 }
  0x6c   : > { %p8076_p4 = pnand %p8075_p3, %p8069_p1 }
  0x6e   : > { %8079 = shalt.err (!%p8076_p4)
}
  0x6f   : > { %s11141_s30 = smov 32   ;;  %s11142_s14 = smov 512  }
  0x70   : > { %7184 = dma.hbm_to_vmem [thread:$0]  (!%p8358_p12), %s10977_s6, 32768, %s386_s3, [#allocation9], %s11142_s14, %s11142_s14, %s11141_s30  }
  0x71   : > { %s8091_s17 = scalar_lea.vmem %s412_s28, 32768  ;;  %p8099_p6 = scmp.lt.s32.totalorder %s412_s28, %s412_s28 }
  0x72   : > { %p8092_p7 = scmp.ne.s32.totalorder %s412_s28, %s8091_s17  ;;  %p8100_p9 = scmp.lt.s32.totalorder %s8091_s17, %s8091_s17 }
  0x74   : > { %p8094_p11 = pnand %p8092_p7, %p8364_p13  ;;  %p8101_p0 = por %p8100_p9, %p8099_p6 }
  0x76   : > { %p8095_p8 = pneg %p8094_p11 }
  0x78   : > { %p8102_p1 = pnand %p8101_p0, %p8095_p8 }
  0x7a   : > { %8105 = shalt.err (!%p8102_p1)
}
  0x7b   : > { %s11143_s16 = smov 256   ;;  %s8228_s3 = smov [#allocation16]  }
  0x7c   : > { %7190 = dma.hbm_to_vmem [thread:$0]  (!%p8358_p12), %s10979_s8, 32768, %s412_s28, [#allocation12], %s11143_s16, %s11143_s16, %s8219_s27  }
  0x7d   : > { %s440_s30 = sshll.u32 %s8228_s3, 4  ;;  %s441_s30 = int_to_ptr.vmem [resolvable:$true] %s440_s30 }
  0x7e   : > { %s8117_s14 = scalar_lea.vmem %s441_s30, 6272  ;;  %p8125_p7 = scmp.lt.s32.totalorder %s441_s30, %s441_s30 }
  0x7f   : > { %p8118_p2 = scmp.ne.s32.totalorder %s441_s30, %s8117_s14  ;;  %p8126_p11 = scmp.lt.s32.totalorder %s8117_s14, %s8117_s14 }
  0x81   : > { %p8120_p3 = pnand %p8118_p2, %p8364_p13  ;;  %p8127_p8 = por %p8126_p11, %p8125_p7 }
  0x83   : > { %p8121_p4 = pneg %p8120_p3 }
  0x85   : > { %p8128_p6 = pnand %p8127_p8, %p8121_p4 }
  0x87   : > { %8131 = shalt.err (!%p8128_p6)
}
  0x88   : > { %s8229_s20 = smov 128   ;;  %s8230_s29 = smov 8  }
  0x89   : > { %7196 = dma.hbm_to_vmem [thread:$0]  (!%p8358_p12), %s10982_s11, 6272, %s441_s30, [#allocation15], %s8229_s20, %s8229_s20, %s8230_s29  }
  0x8a   : > { %465 = sbr.rel (%p8350_p10) target bundleno = 5488 (0x1570), region = 68 }
  0x8f   : > { %p11144_p9 = scmp.eq.s32.totalorder %s8322_s25, 0 }
  0x91   : > { %8175 = dma.done.wait (%p11144_p9), [#allocation3], 8192   ;;  %p11145_p13 = pmov %p11144_p9 }
  0x92   : > { %p11146_p0 = pmov %p11144_p9 }
  0x93   : > { %8177 = vsyncadd (%p11145_p13), [#allocation3], 4294959104 }
  0x94   : > { %8179 = dma.done.wait (%p11146_p0), [#allocation6], 32896   ;;  %p11147_p1 = pmov %p11146_p0 }
  0x95   : > { %p11148_p2 = pmov %p11146_p0 }
  0x96   : > { %8181 = vsyncadd (%p11147_p1), [#allocation6], 4294934400 }
  0x97   : > { %8183 = dma.done.wait (%p11148_p2), [#allocation9], 65536   ;;  %p11149_p12 = pmov %p11146_p0 }
  0x98   : > { %p11150_p10 = pmov %p11146_p0 }
  0x99   : > { %8185 = vsyncadd (%p11149_p12), [#allocation9], 4294901760 }
  0x9a   : > { %8187 = dma.done.wait (%p11150_p10), [#allocation12], 32896   ;;  %p11151_p3 = pmov %p11146_p0 }
  0x9b   : > { %p11152_p4 = pmov %p11146_p0 }
  0x9c   : > { %8189 = vsyncadd (%p11151_p3), [#allocation12], 4294934400 }
  0x9d   : > { %8191 = dma.done.wait (%p11152_p4), [#allocation15], 14720   ;;  %p11153_p7 = pmov %p11146_p0 }
  0x9e   : > { %s7011_s27 = sshll.u32 %s8322_s25, 2  ;;  %v8231_v0 = vmov 0.0   ;;  %v557_v1 = vld [vmem:[%s10972_s1 + $0x38] sm:$0xff]  ;;  %v556_v2 = vld [vmem:[%s10972_s1 + $0x30] sm:$0xff]  ;;  %v555_v3 = vld [vmem:[%s10972_s1 + $0x28] sm:$0xff]  ;;  %vm571_vm0 = vcmask 261120   ;;  %v561_v13 = vlaneseq }
  0x9f   : > { %8193 = vsyncadd (%p11153_p7), [#allocation15], 4294952576  ;;  %648 = vmatprep.mubr.f32.mxu0 %v8231_v0  ;;  %p540_p11 = scmp.lt.s32.totalorder %s7011_s27, 7  ;;  %608 = vmatprep.subr.mxu0 %v557_v1  ;;  %v554_v4 = vld [vmem:[%s10972_s1 + $0x20] sm:$0xff]  ;;  %v553_v5 = vld [vmem:[%s10972_s1 + $0x18] sm:$0xff]  ;;  %s536_s14 = sand.u32 1, %s8204_s22  }
  0xa0   : > { %609 = vmatpush1.msra.mxu0 %v556_v2  ;;  %v552_v6 = vld [vmem:[%s10972_s1 + $0x10] sm:$0xff]  ;;  %v551_v7 = vld [vmem:[%s10972_s1 + $0x8] sm:$0xff]  ;;  %v550_v8 = vld [vmem:[%s10972_s1] sm:$0xff]  ;;  %v8505_v14 = vshrl.u32 %v561_v13, 7  ;;  %s7010_s20 = sshll.u32 %s536_s14, 5  ;;  %s7028_s17 = sshll.u32 %s8322_s25, 9 }
  0xa1   : > { %s11399_s27 = smov (!%p540_p11, %s7011_s27), 7  ;;  %610 = vmatprep.subr.mxu0 %v555_v3  ;;  %v7013_v17 = vld [vmem:[%s10972_s1 + $0x40] ss:$8 sm:$0x3]  ;;  %v811_v40 = vld [vmem:[#allocation2 + $0xf8] sm:$0xff]  ;;  %v810_v41 = vld [vmem:[#allocation2 + $0xf0] sm:$0xff] }
  0xa2   : > { %s7012_s3 = sshll.u32 %s11399_s27, 3  ;;  %611 = vmatpush1.msra.mxu0 %v554_v4  ;;  %11154 = vst [vmem:[#allocation28_spill] sm:$0xff] %v8505_v14  ;;  %v8508_v15 = vsub.s32 0, %v8505_v14  ;;  %v8511_v16 = vsub.s32 1, %v8505_v14  ;;  %v809_v42 = vld [vmem:[#allocation2 + $0xe8] sm:$0xff]  ;;  %846 = vmatprep.subr.mxu1 %v811_v40  ;;  %v808_v43 = vld [vmem:[#allocation2 + $0xe0] sm:$0xff] }
  0xa3   : > { %s543_s26 = scalar_lea.vmem %s10971_s0, %s7012_s3  ;;  %612 = vmatprep.subr.mxu0 %v553_v5  ;;  %847 = vmatpush1.msra.mxu1 %v810_v41  ;;  %v807_v44 = vld [vmem:[#allocation2 + $0xd8] sm:$0xff]  ;;  %v806_v45 = vld [vmem:[#allocation2 + $0xd0] sm:$0xff]  ;;  %v805_v46 = vld [vmem:[#allocation2 + $0xc8] sm:$0xff]  ;;  %s538_s29 = scalar_lea.vmem [#allocation17], %s7010_s20 }
  0xa4   : > { %613 = vmatpush1.msra.mxu0 %v552_v6  ;;  %v546_v9 = vld [vmem:[%s543_s26] sm:$0xff]  ;;  %v547_v10 = vld [vmem:[%s543_s26 + $0x8] sm:$0xff]  ;;  %v548_v11 = vld [vmem:[%s543_s26 + $0x10] sm:$0xff]  ;;  %11155 = vst [vmem:[#allocation29_spill] sm:$0xff] %v8508_v15  ;;  %v564_v18 = vrot.slane %v7013_v17, %v8508_v15  ;;  %v568_v19 = vrot.slane %v7013_v17, %v8511_v16  ;;  %848 = vmatprep.subr.mxu1 %v809_v42  ;;  %s6838_s19 = sshll.u32 %s538_s29, 4  ;;  %s10931_s27 = scalar_lea.sflag [#allocation4], %s536_s14  ;;  %s10929_s19 = int_to_ptr.vmem [resolvable:$true] %s6838_s19 }
  0xa5   : > { %614 = vmatprep.subr.mxu0 %v551_v7  ;;  %v549_v12 = vld [vmem:[%s543_s26 + $0x18] sm:$0xff]  ;;  %11156 = vst [vmem:[#allocation30_spill] sm:$0xff] %v8511_v16  ;;  %849 = vmatpush1.msra.mxu1 %v808_v43  ;;  %v804_v47 = vld [vmem:[#allocation2 + $0xc0] sm:$0xff]  ;;  %v802_v49 = vld [vmem:[#allocation2 + $0xb0] sm:$0xff]  ;;  %s10927_s26 = scalar_lea.hbm %s10983_s12, %s7028_s17  ;;  %s8132_s25 = scalar_lea.vmem %s10929_s19, 512 }
  0xa6   : > { %615 = vmatpush1.msra.mxu0 %v550_v8  ;;  %850 = vmatprep.subr.mxu1 %v807_v44  ;;  %v803_v48 = vld [vmem:[#allocation2 + $0xb8] sm:$0xff]  ;;  %v801_v50 = vld [vmem:[#allocation2 + $0xa8] sm:$0xff]  ;;  %v800_v51 = vld [vmem:[#allocation2 + $0xa0] sm:$0xff]  ;;  %p8133_p8 = scmp.ne.s32.totalorder %s10929_s19, %s8132_s25  ;;  %s8233_s28 = smov [#allocation17]  }
  0xa7   : > { %7014 = vmatmul.mubr.msk.f32.vlgmr.msra.gmra.mxu0 %vm571_vm0, %v546_v9  ;;  %951 = vmatprep.subr.mxu0 %v811_v40  ;;  %v799_v52 = vld [vmem:[#allocation2 + $0x98] sm:$0xff]  ;;  %v798_v53 = vld [vmem:[#allocation2 + $0x90] sm:$0xff]  ;;  %v797_v54 = vld [vmem:[#allocation2 + $0x88] sm:$0xff]  ;;  %s8136_s16 = sshll.u32 %s8233_s28, 4  ;;  %s8137_s16 = int_to_ptr.vmem [resolvable:$false] %s8136_s16 }
  0xa8   : > { %654 = vmatprep.mubr.f32.mxu0 %v8231_v0  ;;  %952 = vmatpush1.msra.mxu0 %v810_v41  ;;  %v796_v55 = vld [vmem:[#allocation2 + $0x80] sm:$0xff]  ;;  %v795_v56 = vld [vmem:[#allocation2 + $0x78] sm:$0xff]  ;;  %v794_v57 = vld [vmem:[#allocation2 + $0x70] sm:$0xff]  ;;  %p8134_p6 = pnand %p8133_p8, %p8339_p5  ;;  %s8138_s23 = scalar_lea.vmem %s8137_s16, 1024 }
  0xa9   : > { %953 = vmatprep.subr.mxu0 %v809_v42  ;;  %851 = vmatpush1.msra.mxu1 %v806_v45  ;;  %v793_v58 = vld [vmem:[#allocation2 + $0x68] sm:$0xff]  ;;  %v792_v59 = vld [vmem:[#allocation2 + $0x60] sm:$0xff]  ;;  %v791_v60 = vld [vmem:[#allocation2 + $0x58] sm:$0xff]  ;;  %p8139_p13 = scmp.lt.s32.totalorder %s10929_s19, %s8137_s16  ;;  %p8140_p0 = scmp.lt.s32.totalorder %s8138_s23, %s8132_s25 }
  0xaa   : > { %954 = vmatpush1.msra.mxu0 %v808_v43  ;;  %852 = vmatprep.subr.mxu1 %v805_v46  ;;  %v790_v61 = vld [vmem:[#allocation2 + $0x50] sm:$0xff]  ;;  %v789_v62 = vld [vmem:[#allocation2 + $0x48] sm:$0xff]  ;;  %v788_v63 = vld [vmem:[#allocation2 + $0x40] sm:$0xff]  ;;  %p8135_p9 = pneg %p8134_p6 }
  0xab   : > { %7015 = vmatmul.mubr.msk.f32.gmra.mxu0 %vm571_vm0, %v547_v10  ;;  %955 = vmatprep.subr.mxu0 %v807_v44  ;;  %v786_v1 = vld [vmem:[#allocation2 + $0x30] sm:$0xff]  ;;  %v785_v2 = vld [vmem:[#allocation2 + $0x28] sm:$0xff]  ;;  %v784_v3 = vld [vmem:[#allocation2 + $0x20] sm:$0xff]  ;;  %p8141_p1 = por %p8140_p0, %p8139_p13 }
  0xac   : > { %660 = vmatprep.mubr.f32.mxu0 %v8231_v0  ;;  %956 = vmatpush1.msra.mxu0 %v806_v45  ;;  %v783_v4 = vld [vmem:[#allocation2 + $0x18] sm:$0xff]  ;;  %v782_v5 = vld [vmem:[#allocation2 + $0x10] sm:$0xff]  ;;  %v781_v6 = vld [vmem:[#allocation2 + $0x8] sm:$0xff] }
  0xad   : > { %957 = vmatprep.subr.mxu0 %v805_v46  ;;  %853 = vmatpush1.msra.mxu1 %v804_v47  ;;  %v780_v7 = vld [vmem:[#allocation2] sm:$0xff]  ;;  %v843_v8 = vld [vmem:[#allocation2 + $0x1f8] sm:$0xff]  ;;  %v842_v9 = vld [vmem:[#allocation2 + $0x1f0] sm:$0xff]  ;;  %p8142_p2 = pnand %p8141_p1, %p8135_p9 }
  0xae   : > { %958 = vmatpush1.msra.mxu0 %v804_v47  ;;  %854 = vmatprep.subr.mxu1 %v803_v48  ;;  %v841_v10 = vld [vmem:[#allocation2 + $0x1e8] sm:$0xff]  ;;  %v838_v13 = vld [vmem:[#allocation2 + $0x1d0] sm:$0xff]  ;;  %v836_v47 = vld [vmem:[#allocation2 + $0x1c0] sm:$0xff] }
  0xaf   : > { %7016 = vmatmul.mubr.msk.f32.gmra.mxu0 %vm571_vm0, %v548_v11  ;;  %959 = vmatprep.subr.mxu0 %v803_v48  ;;  %v840_v11 = vld [vmem:[#allocation2 + $0x1e0] sm:$0xff]  ;;  %v837_v17 = vld [vmem:[#allocation2 + $0x1c8] sm:$0xff] }
  0xb0   : > { %666 = vmatprep.mubr.f32.mxu0 %v8231_v0  ;;  %855 = vmatpush1.msra.mxu1 %v802_v49  ;;  %v787_v0 = vld [vmem:[#allocation2 + $0x38] sm:$0xff] }
  0xb1   : > { %960 = vmatpush1.msra.mxu0 %v802_v49  ;;  %856 = vmatprep.subr.mxu1 %v801_v50  ;;  %v835_v49 = vld [vmem:[#allocation2 + $0x1b8] sm:$0xff] }
  0xb2   : > { %961 = vmatprep.subr.mxu0 %v801_v50  ;;  %857 = vmatpush1.msra.mxu1 %v800_v51  ;;  %v834_v50 = vld [vmem:[#allocation2 + $0x1b0] sm:$0xff] }
  0xb3   : > { %7017 = vmatmul.mubr.msk.f32.gmra.mxu0 %vm571_vm0, %v549_v12  ;;  %858 = vmatprep.subr.mxu1 %v799_v52  ;;  %v839_v12 = vld [vmem:[#allocation2 + $0x1d8] sm:$0xff] }
  0xb4   : > { %962 = vmatpush1.msra.mxu0 %v800_v51  ;;  %859 = vmatpush1.msra.mxu1 %v798_v53  ;;  %v831_v51 = vld [vmem:[#allocation2 + $0x198] sm:$0xff] }
  0xb5   : > { %963 = vmatprep.subr.mxu0 %v799_v52  ;;  %860 = vmatprep.subr.mxu1 %v797_v54  ;;  %v830_v52 = vld [vmem:[#allocation2 + $0x190] sm:$0xff] }
  0xb6   : > { %964 = vmatpush1.msra.mxu0 %v798_v53  ;;  %861 = vmatpush1.msra.mxu1 %v796_v55  ;;  %v829_v53 = vld [vmem:[#allocation2 + $0x188] sm:$0xff] }
  0xb7   : > { %965 = vmatprep.subr.mxu0 %v797_v54  ;;  %862 = vmatprep.subr.mxu1 %v795_v56  ;;  %v828_v54 = vld [vmem:[#allocation2 + $0x180] sm:$0xff] }
  0xb8   : > { %966 = vmatpush1.msra.mxu0 %v796_v55  ;;  %863 = vmatpush1.msra.mxu1 %v794_v57  ;;  %v827_v55 = vld [vmem:[#allocation2 + $0x178] sm:$0xff] }
  0xb9   : > { %967 = vmatprep.subr.mxu0 %v795_v56  ;;  %864 = vmatprep.subr.mxu1 %v793_v58  ;;  %v826_v56 = vld [vmem:[#allocation2 + $0x170] sm:$0xff] }
  0xba   : > { %968 = vmatpush1.msra.mxu0 %v794_v57  ;;  %865 = vmatpush1.msra.mxu1 %v792_v59  ;;  %v825_v57 = vld [vmem:[#allocation2 + $0x168] sm:$0xff] }
  0xbb   : > { %969 = vmatprep.subr.mxu0 %v793_v58  ;;  %866 = vmatprep.subr.mxu1 %v791_v60  ;;  %v824_v58 = vld [vmem:[#allocation2 + $0x160] sm:$0xff] }
  0xbc   : > { %970 = vmatpush1.msra.mxu0 %v792_v59  ;;  %867 = vmatpush1.msra.mxu1 %v790_v61  ;;  %v823_v59 = vld [vmem:[#allocation2 + $0x158] sm:$0xff] }
  0xbd   : > { %971 = vmatprep.subr.mxu0 %v791_v60  ;;  %868 = vmatprep.subr.mxu1 %v789_v62  ;;  %v822_v60 = vld [vmem:[#allocation2 + $0x150] sm:$0xff] }
  0xbe   : > { %972 = vmatpush1.msra.mxu0 %v790_v61  ;;  %869 = vmatpush1.msra.mxu1 %v788_v63  ;;  %v821_v61 = vld [vmem:[#allocation2 + $0x148] sm:$0xff] }
  0xbf   : > { %973 = vmatprep.subr.mxu0 %v789_v62  ;;  %870 = vmatprep.subr.mxu1 %v787_v0  ;;  %v820_v62 = vld [vmem:[#allocation2 + $0x140] sm:$0xff] }
  0xc0   : > { %974 = vmatpush1.msra.mxu0 %v788_v63  ;;  %871 = vmatpush1.msra.mxu1 %v786_v1  ;;  %v819_v63 = vld [vmem:[#allocation2 + $0x138] sm:$0xff] }
  0xc1   : > { %975 = vmatprep.subr.mxu0 %v787_v0  ;;  %872 = vmatprep.subr.mxu1 %v785_v2  ;;  %v818_v0 = vld [vmem:[#allocation2 + $0x130] sm:$0xff] }
  0xc2   : > { %976 = vmatpush1.msra.mxu0 %v786_v1  ;;  %873 = vmatpush1.msra.mxu1 %v784_v3  ;;  %v817_v1 = vld [vmem:[#allocation2 + $0x128] sm:$0xff] }
  0xc3   : > { %977 = vmatprep.subr.mxu0 %v785_v2  ;;  %874 = vmatprep.subr.mxu1 %v783_v4  ;;  %v816_v2 = vld [vmem:[#allocation2 + $0x120] sm:$0xff] }
  0xc4   : > { %978 = vmatpush1.msra.mxu0 %v784_v3  ;;  %875 = vmatpush1.msra.mxu1 %v782_v5  ;;  %v815_v3 = vld [vmem:[#allocation2 + $0x118] sm:$0xff] }
  0xc5   : > { %979 = vmatprep.subr.mxu0 %v783_v4  ;;  %876 = vmatprep.subr.mxu1 %v781_v6  ;;  %v814_v4 = vld [vmem:[#allocation2 + $0x110] sm:$0xff] }
  0xc6   : > { %980 = vmatpush1.msra.mxu0 %v782_v5  ;;  %877 = vmatpush1.msra.mxu1 %v780_v7  ;;  %v813_v5 = vld [vmem:[#allocation2 + $0x108] sm:$0xff] }
  0xc7   : > { %981 = vmatprep.subr.mxu0 %v781_v6  ;;  %878 = vmatprep.subr.mxu1 %v843_v8  ;;  %v812_v6 = vld [vmem:[#allocation2 + $0x100] sm:$0xff] }
  0xc8   : > { %982 = vmatpush1.msra.mxu0 %v780_v7  ;;  %879 = vmatpush2.msra.mxu1 %v842_v9 }
  0xc9   : > { %983 = vmatprep.subr.mxu0 %v843_v8  ;;  %880 = vmatprep.subr.mxu1 %v841_v10 }
  0xca   : > { %984 = vmatpush2.msra.mxu0 %v842_v9  ;;  %881 = vmatpush2.msra.mxu1 %v840_v11 }
  0xcb   : > { %985 = vmatprep.subr.mxu0 %v841_v10  ;;  %882 = vmatprep.subr.mxu1 %v839_v12 }
  0xcc   : > { %986 = vmatpush2.msra.mxu0 %v840_v11  ;;  %883 = vmatpush2.msra.mxu1 %v838_v13 }
  0xcd   : > { %987 = vmatprep.subr.mxu0 %v839_v12  ;;  %884 = vmatprep.subr.mxu1 %v837_v17 }
  0xce   : > { %988 = vmatpush2.msra.mxu0 %v838_v13  ;;  %885 = vmatpush2.msra.mxu1 %v836_v47 }
  0xcf   : > { %989 = vmatprep.subr.mxu0 %v837_v17  ;;  %886 = vmatprep.subr.mxu1 %v835_v49 }
  0xd0   : > { %990 = vmatpush2.msra.mxu0 %v836_v47  ;;  %887 = vmatpush2.msra.mxu1 %v834_v50 }
  0xd1   : > { %991 = vmatprep.subr.mxu0 %v835_v49 }
  0xd2   : > { %992 = vmatpush2.msra.mxu0 %v834_v50 }
 0x167   : > { %v650_v20 = vpop.f32.mrf.mxu0 }
 0x168   : > { %v8518_v22 = vadd.f32 %v650_v20, %v564_v18 }
 0x169   : > { %v652_v21 = vpop.f32.mrf.mxu0 }
 0x16a   : > { %v8520_v23 = vadd.f32 %v652_v21, %v568_v19 }
 0x16b   : > { %v656_v24 = vpop.f32.mrf.mxu0 }
 0x16c   : > { %v673_v25 = vadd.f32 %v8520_v23, %v8518_v22  ;;  %v8524_v27 = vadd.f32 %v656_v24, %v564_v18 }
 0x16d   : > { %v658_v26 = vpop.f32.mrf.mxu0 }
 0x16e   : > { %v8526_v28 = vadd.f32 %v658_v26, %v568_v19  ;;  %674 = vadd.xlane.f32.xlu0 %v673_v25 }
 0x16f   : > { %v662_v29 = vpop.f32.mrf.mxu0 }
 0x170   : > { %v676_v30 = vadd.f32 %v8526_v28, %v8524_v27  ;;  %v8530_v32 = vadd.f32 %v662_v29, %v564_v18 }
 0x171   : > { %v664_v31 = vpop.f32.mrf.mxu0 }
 0x172   : > { %v8532_v33 = vadd.f32 %v664_v31, %v568_v19  ;;  %677 = vadd.xlane.f32.xlu0 %v676_v30 }
 0x173   : > { %v668_v34 = vpop.f32.mrf.mxu0 }
 0x174   : > { %v679_v35 = vadd.f32 %v8532_v33, %v8530_v32  ;;  %v8536_v37 = vadd.f32 %v668_v34, %v564_v18 }
 0x175   : > { %v670_v36 = vpop.f32.mrf.mxu0 }
 0x176   : > { %v8538_v38 = vadd.f32 %v670_v36, %v568_v19  ;;  %680 = vadd.xlane.f32.xlu1 %v679_v35 }
 0x178   : > { %v682_v39 = vadd.f32 %v8538_v38, %v8536_v37 }
 0x17a   : > { %683 = vadd.xlane.f32.xlu1 %v682_v39 }
 0x1f7   : > { %v675_v18 = vpop.xlane.xlu0 %674 }
 0x1f8   : > { %v686_v19 = vmul.f32 0.00390625, %v675_v18 }
 0x1fa   : > { %v8543_v20 = vsub.f32 %v8518_v22, %v686_v19  ;;  %v8546_v21 = vsub.f32 %v8520_v23, %v686_v19 }
 0x1fb   : > { %v678_v24 = vpop.xlane.xlu0 %677 }
 0x1fc   : > { %v687_v25 = vmul.f32 0.00390625, %v678_v24  ;;  %v698_v26 = vmul.f32 %v8543_v20, %v8543_v20  ;;  %v699_v29 = vmul.f32 %v8546_v21, %v8546_v21 }
 0x1fe   : > { %v8553_v30 = vsub.f32 %v8524_v27, %v687_v25  ;;  %v8556_v31 = vsub.f32 %v8526_v28, %v687_v25  ;;  %v706_v34 = vadd.f32 %v699_v29, %v698_v26  ;;  %v7018_v25 = vld [vmem:[%s10972_s1 + $0x41] ss:$8 sm:$0x3]  ;;  %v7019_v29 = vld [vmem:[%s10972_s1 + $0x42] ss:$8 sm:$0x3] }
 0x1ff   : > { %v681_v22 = vpop.xlane.xlu1 %680 }
 0x200   : > { %v688_v35 = vmul.f32 0.00390625, %v681_v22  ;;  %707 = vadd.xlane.f32.xlu0 %v706_v34  ;;  %v700_v23 = vmul.f32 %v8553_v30, %v8553_v30  ;;  %v701_v36 = vmul.f32 %v8556_v31, %v8556_v31  ;;  %v748_v34 = vrot.slane %v7018_v25, %v8511_v16 }
 0x201   : > { %v744_v22 = vrot.slane %v7018_v25, %v8508_v15  ;;  %v1100_v25 = vld [vmem:[#allocation5 + $0x60] sm:$0xff] }
 0x202   : > { %v8563_v39 = vsub.f32 %v8530_v32, %v688_v35  ;;  %v8566_v40 = vsub.f32 %v8532_v33, %v688_v35  ;;  %v709_v27 = vadd.f32 %v701_v36, %v700_v23  ;;  %v769_v36 = vrot.slane %v7019_v29, %v8511_v16 }
 0x203   : > { %v684_v41 = vpop.xlane.xlu1 %683 }
 0x204   : > { %v689_v28 = vmul.f32 0.00390625, %v684_v41  ;;  %710 = vadd.xlane.f32.xlu1 %v709_v27  ;;  %v702_v42 = vmul.f32 %v8563_v39, %v8563_v39  ;;  %v703_v43 = vmul.f32 %v8566_v40, %v8566_v40  ;;  %v765_v41 = vrot.slane %v7019_v29, %v8508_v15  ;;  %v1096_v29 = vld [vmem:[#allocation5 + $0x40] sm:$0xff] }
 0x206   : > { %v8573_v44 = vsub.f32 %v8536_v37, %v689_v28  ;;  %v8576_v45 = vsub.f32 %v8538_v38, %v689_v28  ;;  %v712_v32 = vadd.f32 %v703_v43, %v702_v42  ;;  %v833_v37 = vld [vmem:[#allocation2 + $0x1a8] sm:$0xff]  ;;  %v832_v38 = vld [vmem:[#allocation2 + $0x1a0] sm:$0xff] }
 0x207   : > { %888 = vmatprep.subr.mxu1 %v833_v37  ;;  %993 = vmatprep.subr.mxu0 %v833_v37 }
 0x208   : > { %713 = vadd.xlane.f32.xlu0 %v712_v32  ;;  %v704_v33 = vmul.f32 %v8573_v44, %v8573_v44  ;;  %v705_v46 = vmul.f32 %v8576_v45, %v8576_v45  ;;  %889 = vmatpush2.msra.mxu1 %v832_v38 }
 0x209   : > { %890 = vmatprep.subr.mxu1 %v831_v51  ;;  %994 = vmatpush2.msra.mxu0 %v832_v38 }
 0x20a   : > { %v715_v48 = vadd.f32 %v705_v46, %v704_v33  ;;  %891 = vmatpush2.msra.mxu1 %v830_v52  ;;  %995 = vmatprep.subr.mxu0 %v831_v51 }
 0x20b   : > { %892 = vmatprep.subr.mxu1 %v829_v53  ;;  %996 = vmatpush2.msra.mxu0 %v830_v52 }
 0x20c   : > { %716 = vadd.xlane.f32.xlu1 %v715_v48  ;;  %893 = vmatpush2.msra.mxu1 %v828_v54 }
 0x20d   : > { %997 = vmatprep.subr.mxu0 %v829_v53  ;;  %894 = vmatprep.subr.mxu1 %v827_v55 }
 0x20e   : > { %998 = vmatpush2.msra.mxu0 %v828_v54  ;;  %895 = vmatpush2.msra.mxu1 %v826_v56 }
 0x20f   : > { %999 = vmatprep.subr.mxu0 %v827_v55  ;;  %896 = vmatprep.subr.mxu1 %v825_v57 }
 0x210   : > { %1000 = vmatpush2.msra.mxu0 %v826_v56  ;;  %897 = vmatpush2.msra.mxu1 %v824_v58 }
 0x211   : > { %1001 = vmatprep.subr.mxu0 %v825_v57  ;;  %898 = vmatprep.subr.mxu1 %v823_v59 }
 0x212   : > { %1002 = vmatpush2.msra.mxu0 %v824_v58  ;;  %899 = vmatpush2.msra.mxu1 %v822_v60  ;;  %v1149_v58 = vld [vmem:[#allocation5 + $0x1e8] sm:$0xff] }
 0x213   : > { %1003 = vmatprep.subr.mxu0 %v823_v59  ;;  %900 = vmatprep.subr.mxu1 %v821_v61  ;;  %v1151_v59 = vld [vmem:[#allocation5 + $0x1f8] sm:$0xff] }
 0x214   : > { %1004 = vmatpush2.msra.mxu0 %v822_v60  ;;  %901 = vmatpush2.msra.mxu1 %v820_v62  ;;  %v1148_v60 = vld [vmem:[#allocation5 + $0x1e0] sm:$0xff] }
 0x215   : > { %1005 = vmatprep.subr.mxu0 %v821_v61  ;;  %902 = vmatprep.subr.mxu1 %v819_v63  ;;  %v1141_v61 = vld [vmem:[#allocation5 + $0x1a8] sm:$0xff] }
 0x216   : > { %1006 = vmatpush2.msra.mxu0 %v820_v62  ;;  %903 = vmatpush2.msra.mxu1 %v818_v0  ;;  %v1140_v62 = vld [vmem:[#allocation5 + $0x1a0] sm:$0xff] }
 0x217   : > { %1007 = vmatprep.subr.mxu0 %v819_v63  ;;  %904 = vmatprep.subr.mxu1 %v817_v1  ;;  %v1137_v63 = vld [vmem:[#allocation5 + $0x188] sm:$0xff] }
 0x218   : > { %1008 = vmatpush2.msra.mxu0 %v818_v0  ;;  %905 = vmatpush2.msra.mxu1 %v816_v2  ;;  %v1136_v0 = vld [vmem:[#allocation5 + $0x180] sm:$0xff] }
 0x219   : > { %1009 = vmatprep.subr.mxu0 %v817_v1  ;;  %906 = vmatprep.subr.mxu1 %v815_v3  ;;  %v1133_v1 = vld [vmem:[#allocation5 + $0x168] sm:$0xff] }
 0x21a   : > { %1010 = vmatpush2.msra.mxu0 %v816_v2  ;;  %907 = vmatpush2.msra.mxu1 %v814_v4  ;;  %v1132_v2 = vld [vmem:[#allocation5 + $0x160] sm:$0xff] }
 0x21b   : > { %1011 = vmatprep.subr.mxu0 %v815_v3  ;;  %908 = vmatprep.subr.mxu1 %v813_v5  ;;  %v1129_v3 = vld [vmem:[#allocation5 + $0x148] sm:$0xff] }
 0x21c   : > { %1012 = vmatpush2.msra.mxu0 %v814_v4  ;;  %909 = vmatpush2.msra.mxu1 %v812_v6  ;;  %v1128_v4 = vld [vmem:[#allocation5 + $0x140] sm:$0xff] }
 0x21d   : > { %1013 = vmatprep.subr.mxu0 %v813_v5  ;;  %1238 = vmatprep.subr.mxu1 %v1149_v58  ;;  %v1125_v5 = vld [vmem:[#allocation5 + $0x128] sm:$0xff] }
 0x21e   : > { %1014 = vmatpush2.msra.mxu0 %v812_v6  ;;  %v1124_v6 = vld [vmem:[#allocation5 + $0x120] sm:$0xff] }
 0x21f   : > { %1327 = vmatprep.subr.mxu0 %v1151_v59  ;;  %v1143_v59 = vld [vmem:[#allocation5 + $0x1b8] sm:$0xff] }
 0x289   : > { %v708_v7 = vpop.xlane.xlu0 %707 }
 0x28a   : > { %v718_v8 = vmul.f32 0.00390625, %v708_v7  ;;  %v1121_v7 = vld [vmem:[#allocation5 + $0x108] sm:$0xff] }
 0x28c   : > { %v722_v9 = vadd.f32 1e-05, %v718_v8  ;;  %v1120_v8 = vld [vmem:[#allocation5 + $0x100] sm:$0xff] }
 0x28d   : > { %v711_v10 = vpop.xlane.xlu1 %710 }
 0x28e   : > { %7273 = vrsqrt.f32 %v722_v9  ;;  %v719_v11 = vmul.f32 0.00390625, %v711_v10  ;;  %v1117_v9 = vld [vmem:[#allocation5 + $0xe8] sm:$0xff]  ;;  %v1116_v10 = vld [vmem:[#allocation5 + $0xe0] sm:$0xff] }
 0x290   : > { %v723_v12 = vadd.f32 1e-05, %v719_v11  ;;  %v1113_v11 = vld [vmem:[#allocation5 + $0xc8] sm:$0xff] }
 0x291   : > { %v714_v13 = vpop.xlane.xlu0 %713 }
 0x292   : > { %7275 = vrsqrt.f32 %v723_v12  ;;  %v720_v17 = vmul.f32 0.00390625, %v714_v13  ;;  %v1112_v12 = vld [vmem:[#allocation5 + $0xc0] sm:$0xff]  ;;  %v1109_v13 = vld [vmem:[#allocation5 + $0xa8] sm:$0xff] }
 0x294   : > { %v724_v18 = vadd.f32 1e-05, %v720_v17  ;;  %v1108_v17 = vld [vmem:[#allocation5 + $0xa0] sm:$0xff] }
 0x295   : > { %v717_v19 = vpop.xlane.xlu1 %716 }
 0x296   : > { %7277 = vrsqrt.f32 %v724_v18  ;;  %v721_v24 = vmul.f32 0.00390625, %v717_v19  ;;  %v1105_v18 = vld [vmem:[#allocation5 + $0x88] sm:$0xff]  ;;  %v1104_v19 = vld [vmem:[#allocation5 + $0x80] sm:$0xff] }
 0x298   : > { %v725_v26 = vadd.f32 1e-05, %v721_v24  ;;  %v1101_v24 = vld [vmem:[#allocation5 + $0x68] sm:$0xff] }
 0x29a   : > { %7279 = vrsqrt.f32 %v725_v26  ;;  %v1097_v26 = vld [vmem:[#allocation5 + $0x48] sm:$0xff] }
 0x29b   : > { %v7274_v35 = vpop.eup %7273 }
 0x29c   : > { %v731_v23 = vmul.f32 %v7274_v35, %v8546_v21  ;;  %v730_v27 = vmul.f32 %v7274_v35, %v8543_v20  ;;  %v1089_v35 = vld [vmem:[#allocation5 + $0x8] sm:$0xff] }
 0x29e   : > { %v752_v28 = vmul.f32 %v748_v34, %v731_v23  ;;  %v751_v42 = vmul.f32 %v744_v22, %v730_v27  ;;  %v1088_v23 = vld [vmem:[#allocation5] sm:$0xff] }
 0x29f   : > { %v7276_v43 = vpop.eup %7275  ;;  %v1212_v27 = vld [vmem:[#allocation5 + $0x3e0] sm:$0xff] }
 0x2a0   : > { %v8594_v32 = vadd.f32 %v769_v36, %v752_v28  ;;  %v8596_v33 = vadd.f32 %v765_v41, %v751_v42  ;;  %v733_v46 = vmul.f32 %v7276_v43, %v8556_v31  ;;  %v732_v47 = vmul.f32 %v7276_v43, %v8553_v30  ;;  %v1208_v28 = vld [vmem:[#allocation5 + $0x3c0] sm:$0xff]  ;;  %v1205_v42 = vld [vmem:[#allocation5 + $0x3a8] sm:$0xff] }
 0x2a1   : > { %v1204_v43 = vld [vmem:[#allocation5 + $0x3a0] sm:$0xff] }
 0x2a2   : > { %11157 = vst [vmem:[#allocation31_spill] sm:$0xff] %v8594_v32  ;;  %11158 = vst [vmem:[#allocation32_spill] sm:$0xff] %v8596_v33  ;;  %910 = vmatprep.mubr.f32.mxu1 %v8594_v32  ;;  %v754_v21 = vmul.f32 %v748_v34, %v733_v46  ;;  %v753_v48 = vmul.f32 %v744_v22, %v732_v47 }
 0x2a3   : > { %v7278_v49 = vpop.eup %7277  ;;  %911 = vmatmul.mubr.f32.vlgmr.msra.gmra.mxu1 %v8596_v33 }
 0x2a4   : > { %v8602_v20 = vadd.f32 %v769_v36, %v754_v21  ;;  %v8604_v50 = vadd.f32 %v765_v41, %v753_v48  ;;  %v735_v37 = vmul.f32 %v7278_v49, %v8566_v40  ;;  %v734_v38 = vmul.f32 %v7278_v49, %v8563_v39  ;;  %1239 = vmatpush1.msra.mxu1 %v1148_v60 }
 0x2a6   : > { %11159 = vst [vmem:[#allocation33_spill] sm:$0xff] %v8602_v20  ;;  %11160 = vst [vmem:[#allocation34_spill] sm:$0xff] %v8604_v50  ;;  %916 = vmatprep.mubr.f32.mxu1 %v8602_v20  ;;  %v756_v31 = vmul.f32 %v748_v34, %v735_v37  ;;  %v755_v51 = vmul.f32 %v744_v22, %v734_v38 }
 0x2a7   : > { %v7280_v30 = vpop.eup %7279  ;;  %917 = vmatmul.mubr.f32.gmra.mxu1 %v8604_v50 }
 0x2a8   : > { %v8610_v52 = vadd.f32 %v769_v36, %v756_v31  ;;  %v8612_v53 = vadd.f32 %v765_v41, %v755_v51  ;;  %v737_v54 = vmul.f32 %v7280_v30, %v8576_v45  ;;  %v736_v55 = vmul.f32 %v7280_v30, %v8573_v44  ;;  %v1145_v44 = vld [vmem:[#allocation5 + $0x1c8] sm:$0xff]  ;;  %v1144_v45 = vld [vmem:[#allocation5 + $0x1c0] sm:$0xff]  ;;  %v1150_v30 = vld [vmem:[#allocation5 + $0x1f0] sm:$0xff] }
 0x2a9   : > { %1240 = vmatprep.subr.mxu1 %v1145_v44 }
 0x2aa   : > { %11161 = vst [vmem:[#allocation35_spill] sm:$0xff] %v8610_v52  ;;  %11162 = vst [vmem:[#allocation36_spill] sm:$0xff] %v8612_v53  ;;  %922 = vmatprep.mubr.f32.mxu1 %v8610_v52  ;;  %v758_v40 = vmul.f32 %v748_v34, %v737_v54  ;;  %v757_v56 = vmul.f32 %v744_v22, %v736_v55  ;;  %1241 = vmatpush1.msra.mxu1 %v1144_v45  ;;  %v1093_v34 = vld [vmem:[#allocation5 + $0x28] sm:$0xff]  ;;  %v1092_v22 = vld [vmem:[#allocation5 + $0x20] sm:$0xff] }
 0x2ab   : > { %923 = vmatmul.mubr.f32.gmra.mxu1 %v8612_v53  ;;  %1242 = vmatprep.subr.mxu1 %v1141_v61  ;;  %v1147_v55 = vld [vmem:[#allocation5 + $0x1d8] sm:$0xff]  ;;  %v1142_v61 = vld [vmem:[#allocation5 + $0x1b0] sm:$0xff] }
 0x2ac   : > { %v8618_v39 = vadd.f32 %v769_v36, %v758_v40  ;;  %v8620_v57 = vadd.f32 %v765_v41, %v757_v56  ;;  %1243 = vmatpush1.msra.mxu1 %v1140_v62  ;;  %v1213_v36 = vld [vmem:[#allocation5 + $0x3e8] sm:$0xff]  ;;  %v1146_v56 = vld [vmem:[#allocation5 + $0x1d0] sm:$0xff] }
 0x2ad   : > { %1244 = vmatprep.subr.mxu1 %v1137_v63  ;;  %v1209_v41 = vld [vmem:[#allocation5 + $0x3c8] sm:$0xff]  ;;  %v1139_v63 = vld [vmem:[#allocation5 + $0x198] sm:$0xff] }
 0x2ae   : > { %11163 = vst [vmem:[#allocation37_spill] sm:$0xff] %v8618_v39  ;;  %11164 = vst [vmem:[#allocation38_spill] sm:$0xff] %v8620_v57  ;;  %928 = vmatprep.mubr.f32.mxu1 %v8618_v39  ;;  %1245 = vmatpush1.msra.mxu1 %v1136_v0 }
 0x2af   : > { %929 = vmatmul.mubr.f32.gmra.mxu1 %v8620_v57  ;;  %1246 = vmatprep.subr.mxu1 %v1133_v1  ;;  %v1138_v1 = vld [vmem:[#allocation5 + $0x190] sm:$0xff] }
 0x2b0   : > { %1247 = vmatpush1.msra.mxu1 %v1132_v2 }
 0x2b1   : > { %1248 = vmatprep.subr.mxu1 %v1129_v3  ;;  %v1135_v3 = vld [vmem:[#allocation5 + $0x178] sm:$0xff] }
 0x2b2   : > { %1249 = vmatpush1.msra.mxu1 %v1128_v4 }
 0x2b3   : > { %1250 = vmatprep.subr.mxu1 %v1125_v5 }
 0x2b4   : > { %1251 = vmatpush1.msra.mxu1 %v1124_v6 }
 0x2b5   : > { %1252 = vmatprep.subr.mxu1 %v1121_v7  ;;  %v1134_v7 = vld [vmem:[#allocation5 + $0x170] sm:$0xff] }
 0x2b6   : > { %1253 = vmatpush1.msra.mxu1 %v1120_v8 }
 0x2b7   : > { %1254 = vmatprep.subr.mxu1 %v1117_v9  ;;  %v1131_v9 = vld [vmem:[#allocation5 + $0x158] sm:$0xff] }
 0x2b8   : > { %1255 = vmatpush1.msra.mxu1 %v1116_v10  ;;  %v1130_v10 = vld [vmem:[#allocation5 + $0x150] sm:$0xff] }
 0x2b9   : > { %1256 = vmatprep.subr.mxu1 %v1113_v11 }
 0x2ba   : > { %1257 = vmatpush1.msra.mxu1 %v1112_v12  ;;  %v1127_v12 = vld [vmem:[#allocation5 + $0x138] sm:$0xff] }
 0x2bb   : > { %1258 = vmatprep.subr.mxu1 %v1109_v13 }
 0x2bc   : > { %1259 = vmatpush1.msra.mxu1 %v1108_v17  ;;  %v1126_v17 = vld [vmem:[#allocation5 + $0x130] sm:$0xff] }
 0x2bd   : > { %1260 = vmatprep.subr.mxu1 %v1105_v18  ;;  %v1123_v18 = vld [vmem:[#allocation5 + $0x118] sm:$0xff] }
 0x2be   : > { %1261 = vmatpush1.msra.mxu1 %v1104_v19  ;;  %v1122_v19 = vld [vmem:[#allocation5 + $0x110] sm:$0xff] }
 0x2bf   : > { %1262 = vmatprep.subr.mxu1 %v1101_v24  ;;  %v1119_v24 = vld [vmem:[#allocation5 + $0xf8] sm:$0xff] }
 0x2c0   : > { %1263 = vmatpush1.msra.mxu1 %v1100_v25  ;;  %v1118_v25 = vld [vmem:[#allocation5 + $0xf0] sm:$0xff] }
 0x2c1   : > { %1264 = vmatprep.subr.mxu1 %v1097_v26  ;;  %v1115_v26 = vld [vmem:[#allocation5 + $0xd8] sm:$0xff] }
 0x2c2   : > { %1265 = vmatpush1.msra.mxu1 %v1096_v29  ;;  %v1114_v29 = vld [vmem:[#allocation5 + $0xd0] sm:$0xff] }
 0x2c3   : > { %1266 = vmatprep.subr.mxu1 %v1093_v34  ;;  %v1111_v34 = vld [vmem:[#allocation5 + $0xb8] sm:$0xff] }
 0x2c4   : > { %1267 = vmatpush1.msra.mxu1 %v1092_v22  ;;  %v1110_v22 = vld [vmem:[#allocation5 + $0xb0] sm:$0xff] }
 0x2c5   : > { %1268 = vmatprep.subr.mxu1 %v1089_v35  ;;  %v1107_v35 = vld [vmem:[#allocation5 + $0x98] sm:$0xff] }
 0x2c6   : > { %1269 = vmatpush1.msra.mxu1 %v1088_v23  ;;  %v1106_v23 = vld [vmem:[#allocation5 + $0x90] sm:$0xff] }
 0x2c7   : > { %1270 = vmatprep.subr.mxu1 %v1213_v36  ;;  %v1103_v36 = vld [vmem:[#allocation5 + $0x78] sm:$0xff] }
 0x2c8   : > { %1271 = vmatpush2.msra.mxu1 %v1212_v27  ;;  %v1102_v27 = vld [vmem:[#allocation5 + $0x70] sm:$0xff] }
 0x2c9   : > { %1272 = vmatprep.subr.mxu1 %v1209_v41  ;;  %v1099_v41 = vld [vmem:[#allocation5 + $0x58] sm:$0xff] }
 0x2ca   : > { %1273 = vmatpush2.msra.mxu1 %v1208_v28  ;;  %v1098_v28 = vld [vmem:[#allocation5 + $0x50] sm:$0xff] }
 0x2cb   : > { %1274 = vmatprep.subr.mxu1 %v1205_v42  ;;  %v1095_v42 = vld [vmem:[#allocation5 + $0x38] sm:$0xff] }
 0x2cc   : > { %1275 = vmatpush2.msra.mxu1 %v1204_v43  ;;  %v1094_v43 = vld [vmem:[#allocation5 + $0x30] sm:$0xff] }
 0x363   : > { %v912_v46 = vpop.f32.mrf.mxu1 }
 0x364   : > { %v8625_v47 = vsub.f32 %v8596_v33, %v912_v46  ;;  %v1091_v46 = vld [vmem:[#allocation5 + $0x18] sm:$0xff] }
 0x365   : > { %v914_v21 = vpop.f32.mrf.mxu1 }
 0x366   : > { %v8628_v48 = vsub.f32 %v8594_v32, %v914_v21  ;;  %v943_v38 = vmul.f32 %v8625_v47, %v8625_v47  ;;  %v1090_v21 = vld [vmem:[#allocation5 + $0x10] sm:$0xff] }
 0x367   : > { %v918_v49 = vpop.f32.mrf.mxu1 }
 0x368   : > { %v944_v37 = vmul.f32 %v8628_v48, %v8628_v48  ;;  %v8635_v31 = vsub.f32 %v8604_v50, %v918_v49  ;;  %v1215_v49 = vld [vmem:[#allocation5 + $0x3f8] sm:$0xff] }
 0x369   : > { %v920_v51 = vpop.f32.mrf.mxu1 }
 0x36a   : > { %v8638_v54 = vsub.f32 %v8602_v20, %v920_v51  ;;  %1015 = vmatprep.mubr.f32.mxu0 %v944_v37  ;;  %v945_v60 = vmul.f32 %v8635_v31, %v8635_v31  ;;  %v1214_v37 = vld [vmem:[#allocation5 + $0x3f0] sm:$0xff] }
 0x36b   : > { %v924_v40 = vpop.f32.mrf.mxu1  ;;  %1016 = vmatmul.mubr.f32.vlgmr.msra.gmra.mxu0 %v943_v38  ;;  %v1211_v38 = vld [vmem:[#allocation5 + $0x3d8] sm:$0xff]  ;;  %v1210_v51 = vld [vmem:[#allocation5 + $0x3d0] sm:$0xff] }
 0x36c   : > { %v946_v58 = vmul.f32 %v8638_v54, %v8638_v54  ;;  %1328 = vmatpush1.msra.mxu0 %v1150_v30  ;;  %v8645_v44 = vsub.f32 %v8612_v53, %v924_v40  ;;  %v1207_v30 = vld [vmem:[#allocation5 + $0x3b8] sm:$0xff]  ;;  %v1201_v40 = vld [vmem:[#allocation5 + $0x388] sm:$0xff] }
 0x36d   : > { %v926_v45 = vpop.f32.mrf.mxu1  ;;  %1329 = vmatprep.subr.mxu0 %v1147_v55  ;;  %v1206_v55 = vld [vmem:[#allocation5 + $0x3b0] sm:$0xff]  ;;  %1276 = vmatprep.subr.mxu1 %v1201_v40  ;;  %v1159_v40 = vld [vmem:[#allocation5 + $0x238] sm:$0xff] }
 0x36e   : > { %v8648_v62 = vsub.f32 %v8610_v52, %v926_v45  ;;  %1021 = vmatprep.mubr.f32.mxu0 %v946_v58  ;;  %1330 = vmatpush1.msra.mxu0 %v1146_v56  ;;  %v947_v4 = vmul.f32 %v8645_v44, %v8645_v44  ;;  %v1203_v56 = vld [vmem:[#allocation5 + $0x398] sm:$0xff]  ;;  %v1200_v58 = vld [vmem:[#allocation5 + $0x380] sm:$0xff] }
 0x36f   : > { %v930_v0 = vpop.f32.mrf.mxu1  ;;  %1022 = vmatmul.mubr.f32.gmra.mxu0 %v945_v60  ;;  %1331 = vmatprep.subr.mxu0 %v1143_v59  ;;  %v1202_v59 = vld [vmem:[#allocation5 + $0x390] sm:$0xff]  ;;  %v1197_v60 = vld [vmem:[#allocation5 + $0x368] sm:$0xff]  ;;  %v1199_v45 = vld [vmem:[#allocation5 + $0x378] sm:$0xff] }
 0x370   : > { %v948_v2 = vmul.f32 %v8648_v62, %v8648_v62  ;;  %1332 = vmatpush1.msra.mxu0 %v1142_v61  ;;  %v8655_v5 = vsub.f32 %v8620_v57, %v930_v0  ;;  %1277 = vmatpush2.msra.mxu1 %v1200_v58  ;;  %v1196_v61 = vld [vmem:[#allocation5 + $0x360] sm:$0xff]  ;;  %v1193_v0 = vld [vmem:[#allocation5 + $0x348] sm:$0xff]  ;;  %v1158_v58 = vld [vmem:[#allocation5 + $0x230] sm:$0xff] }
 0x371   : > { %v932_v6 = vpop.f32.mrf.mxu1  ;;  %1333 = vmatprep.subr.mxu0 %v1139_v63  ;;  %1278 = vmatprep.subr.mxu1 %v1197_v60  ;;  %v1198_v63 = vld [vmem:[#allocation5 + $0x370] sm:$0xff]  ;;  %v1155_v60 = vld [vmem:[#allocation5 + $0x218] sm:$0xff] }
 0x372   : > { %v8658_v8 = vsub.f32 %v8618_v39, %v932_v6  ;;  %1027 = vmatprep.mubr.f32.mxu0 %v948_v2  ;;  %1334 = vmatpush1.msra.mxu0 %v1138_v1  ;;  %v949_v13 = vmul.f32 %v8655_v5, %v8655_v5  ;;  %v1195_v1 = vld [vmem:[#allocation5 + $0x358] sm:$0xff]  ;;  %v1192_v2 = vld [vmem:[#allocation5 + $0x340] sm:$0xff] }
 0x373   : > { %1028 = vmatmul.mubr.f32.gmra.mxu0 %v947_v4  ;;  %1335 = vmatprep.subr.mxu0 %v1135_v3  ;;  %v1194_v3 = vld [vmem:[#allocation5 + $0x350] sm:$0xff]  ;;  %v1189_v4 = vld [vmem:[#allocation5 + $0x328] sm:$0xff]  ;;  %v1191_v6 = vld [vmem:[#allocation5 + $0x338] sm:$0xff] }
 0x374   : > { %v950_v11 = vmul.f32 %v8658_v8, %v8658_v8  ;;  %1336 = vmatpush1.msra.mxu0 %v1134_v7  ;;  %1279 = vmatpush2.msra.mxu1 %v1196_v61  ;;  %v1188_v7 = vld [vmem:[#allocation5 + $0x320] sm:$0xff]  ;;  %v1154_v61 = vld [vmem:[#allocation5 + $0x210] sm:$0xff] }
 0x375   : > { %1337 = vmatprep.subr.mxu0 %v1131_v9  ;;  %1280 = vmatprep.subr.mxu1 %v1193_v0  ;;  %v1190_v9 = vld [vmem:[#allocation5 + $0x330] sm:$0xff]  ;;  %v1943_v0 = vld [vmem:[#allocation8 + $0x2f8] sm:$0xff] }
 0x376   : > { %1033 = vmatprep.mubr.f32.mxu0 %v950_v11  ;;  %1338 = vmatpush1.msra.mxu0 %v1130_v10  ;;  %v1185_v10 = vld [vmem:[#allocation5 + $0x308] sm:$0xff]  ;;  %v1187_v11 = vld [vmem:[#allocation5 + $0x318] sm:$0xff] }
 0x377   : > { %1034 = vmatmul.mubr.f32.gmra.mxu0 %v949_v13  ;;  %1339 = vmatprep.subr.mxu0 %v1127_v12  ;;  %v1184_v12 = vld [vmem:[#allocation5 + $0x300] sm:$0xff]  ;;  %v1186_v13 = vld [vmem:[#allocation5 + $0x310] sm:$0xff] }
 0x378   : > { %1340 = vmatpush1.msra.mxu0 %v1126_v17  ;;  %1281 = vmatpush2.msra.mxu1 %v1192_v2  ;;  %v1181_v17 = vld [vmem:[#allocation5 + $0x2e8] sm:$0xff] }
 0x379   : > { %1341 = vmatprep.subr.mxu0 %v1123_v18  ;;  %1282 = vmatprep.subr.mxu1 %v1189_v4  ;;  %v1183_v18 = vld [vmem:[#allocation5 + $0x2f8] sm:$0xff] }
 0x37a   : > { %1342 = vmatpush1.msra.mxu0 %v1122_v19  ;;  %1283 = vmatpush2.msra.mxu1 %v1188_v7  ;;  %v1180_v19 = vld [vmem:[#allocation5 + $0x2e0] sm:$0xff] }
 0x37b   : > { %1343 = vmatprep.subr.mxu0 %v1119_v24  ;;  %1284 = vmatprep.subr.mxu1 %v1185_v10  ;;  %v1182_v24 = vld [vmem:[#allocation5 + $0x2f0] sm:$0xff] }
 0x37c   : > { %1344 = vmatpush1.msra.mxu0 %v1118_v25  ;;  %1285 = vmatpush2.msra.mxu1 %v1184_v12  ;;  %v1177_v25 = vld [vmem:[#allocation5 + $0x2c8] sm:$0xff] }
 0x37d   : > { %1345 = vmatprep.subr.mxu0 %v1115_v26  ;;  %1286 = vmatprep.subr.mxu1 %v1181_v17  ;;  %v1179_v26 = vld [vmem:[#allocation5 + $0x2d8] sm:$0xff] }
 0x37e   : > { %1346 = vmatpush1.msra.mxu0 %v1114_v29  ;;  %1287 = vmatpush2.msra.mxu1 %v1180_v19  ;;  %v1176_v29 = vld [vmem:[#allocation5 + $0x2c0] sm:$0xff] }
 0x37f   : > { %1347 = vmatprep.subr.mxu0 %v1111_v34  ;;  %1288 = vmatprep.subr.mxu1 %v1177_v25  ;;  %v1178_v34 = vld [vmem:[#allocation5 + $0x2d0] sm:$0xff] }
 0x380   : > { %1348 = vmatpush1.msra.mxu0 %v1110_v22  ;;  %1289 = vmatpush2.msra.mxu1 %v1176_v29  ;;  %v1173_v22 = vld [vmem:[#allocation5 + $0x2a8] sm:$0xff] }
 0x381   : > { %1349 = vmatprep.subr.mxu0 %v1107_v35  ;;  %v1175_v35 = vld [vmem:[#allocation5 + $0x2b8] sm:$0xff]  ;;  %1290 = vmatprep.subr.mxu1 %v1173_v22 }
 0x382   : > { %1350 = vmatpush1.msra.mxu0 %v1106_v23  ;;  %v1172_v23 = vld [vmem:[#allocation5 + $0x2a0] sm:$0xff] }
 0x383   : > { %1351 = vmatprep.subr.mxu0 %v1103_v36  ;;  %v1174_v36 = vld [vmem:[#allocation5 + $0x2b0] sm:$0xff]  ;;  %1291 = vmatpush2.msra.mxu1 %v1172_v23 }
 0x384   : > { %1352 = vmatpush1.msra.mxu0 %v1102_v27  ;;  %v1169_v27 = vld [vmem:[#allocation5 + $0x288] sm:$0xff] }
 0x385   : > { %1353 = vmatprep.subr.mxu0 %v1099_v41  ;;  %v1171_v41 = vld [vmem:[#allocation5 + $0x298] sm:$0xff]  ;;  %1292 = vmatprep.subr.mxu1 %v1169_v27 }
 0x386   : > { %1354 = vmatpush1.msra.mxu0 %v1098_v28  ;;  %v1168_v28 = vld [vmem:[#allocation5 + $0x280] sm:$0xff] }
 0x387   : > { %1355 = vmatprep.subr.mxu0 %v1095_v42  ;;  %v1170_v42 = vld [vmem:[#allocation5 + $0x290] sm:$0xff]  ;;  %1293 = vmatpush2.msra.mxu1 %v1168_v28 }
 0x388   : > { %1356 = vmatpush1.msra.mxu0 %v1094_v43  ;;  %v1165_v43 = vld [vmem:[#allocation5 + $0x268] sm:$0xff] }
 0x389   : > { %1357 = vmatprep.subr.mxu0 %v1091_v46  ;;  %v1167_v46 = vld [vmem:[#allocation5 + $0x278] sm:$0xff]  ;;  %1294 = vmatprep.subr.mxu1 %v1165_v43 }
 0x38a   : > { %1358 = vmatpush1.msra.mxu0 %v1090_v21  ;;  %v1164_v21 = vld [vmem:[#allocation5 + $0x260] sm:$0xff] }
 0x38b   : > { %1359 = vmatprep.subr.mxu0 %v1215_v49  ;;  %v1166_v49 = vld [vmem:[#allocation5 + $0x270] sm:$0xff]  ;;  %1295 = vmatpush2.msra.mxu1 %v1164_v21 }
 0x38c   : > { %1360 = vmatpush2.msra.mxu0 %v1214_v37  ;;  %v1161_v37 = vld [vmem:[#allocation5 + $0x248] sm:$0xff] }
 0x38d   : > { %1361 = vmatprep.subr.mxu0 %v1211_v38  ;;  %v1163_v38 = vld [vmem:[#allocation5 + $0x258] sm:$0xff]  ;;  %1296 = vmatprep.subr.mxu1 %v1161_v37 }
 0x38e   : > { %1362 = vmatpush2.msra.mxu0 %v1210_v51  ;;  %v1160_v51 = vld [vmem:[#allocation5 + $0x240] sm:$0xff] }
 0x38f   : > { %1363 = vmatprep.subr.mxu0 %v1207_v30  ;;  %v1162_v30 = vld [vmem:[#allocation5 + $0x250] sm:$0xff]  ;;  %1297 = vmatpush2.msra.mxu1 %v1160_v51 }
 0x390   : > { %1364 = vmatpush2.msra.mxu0 %v1206_v55  ;;  %v1157_v55 = vld [vmem:[#allocation5 + $0x228] sm:$0xff] }
 0x391   : > { %1365 = vmatprep.subr.mxu0 %v1203_v56  ;;  %v1156_v56 = vld [vmem:[#allocation5 + $0x220] sm:$0xff]  ;;  %1298 = vmatprep.subr.mxu1 %v1157_v55  ;;  %v1878_v55 = vld [vmem:[#allocation8 + $0xf0] sm:$0xff] }
 0x392   : > { %1366 = vmatpush2.msra.mxu0 %v1202_v59  ;;  %v1153_v59 = vld [vmem:[#allocation5 + $0x208] sm:$0xff]  ;;  %1299 = vmatpush2.msra.mxu1 %v1156_v56 }
 0x393   : > { %1367 = vmatprep.subr.mxu0 %v1199_v45  ;;  %v1152_v45 = vld [vmem:[#allocation5 + $0x200] sm:$0xff]  ;;  %1300 = vmatprep.subr.mxu1 %v1153_v59  ;;  %v1941_v59 = vld [vmem:[#allocation8 + $0x2e8] sm:$0xff] }
 0x394   : > { %1368 = vmatpush2.msra.mxu0 %v1198_v63  ;;  %1301 = vmatpush2.msra.mxu1 %v1152_v45  ;;  %v1879_v63 = vld [vmem:[#allocation8 + $0xf8] sm:$0xff] }
 0x395   : > { %1369 = vmatprep.subr.mxu0 %v1195_v1  ;;  %1984 = vmatprep.subr.mxu1 %v1879_v63 }
 0x396   : > { %1370 = vmatpush2.msra.mxu0 %v1194_v3 }
 0x397   : > { %1371 = vmatprep.subr.mxu0 %v1191_v6 }
 0x398   : > { %1372 = vmatpush2.msra.mxu0 %v1190_v9 }
 0x399   : > { %1373 = vmatprep.subr.mxu0 %v1187_v11 }
 0x39a   : > { %1374 = vmatpush2.msra.mxu0 %v1186_v13 }
 0x39b   : > { %1375 = vmatprep.subr.mxu0 %v1183_v18 }
 0x39c   : > { %1376 = vmatpush2.msra.mxu0 %v1182_v24  ;;  %v844_v24 = vld [vmem:[%s10980_s9] sm:$0xff] }
 0x39d   : > { %1377 = vmatprep.subr.mxu0 %v1179_v26  ;;  %v845_v26 = vld [vmem:[%s10980_s9 + $0x8] sm:$0xff]  ;;  %v1059_v22 = vrot.slane %v844_v24, %v8508_v15  ;;  %v1075_v43 = vrot.slane %v844_v24, %v8511_v16 }
 0x39e   : > { %1378 = vmatpush2.msra.mxu0 %v1178_v34  ;;  %v1063_v23 = vrot.slane %v845_v26, %v8508_v15  ;;  %v1936_v24 = vld [vmem:[#allocation8 + $0x2c0] sm:$0xff] }
 0x39f   : > { %1379 = vmatprep.subr.mxu0 %v1175_v35 }
 0x3a0   : > { %1380 = vmatpush2.msra.mxu0 %v1174_v36 }
 0x3a1   : > { %1381 = vmatprep.subr.mxu0 %v1171_v41  ;;  %v1079_v41 = vrot.slane %v845_v26, %v8511_v16  ;;  %v1935_v26 = vld [vmem:[#allocation8 + $0x2b8] sm:$0xff] }
 0x3a2   : > { %1382 = vmatpush2.msra.mxu0 %v1170_v42 }
 0x3a3   : > { %1383 = vmatprep.subr.mxu0 %v1167_v46 }
 0x3a4   : > { %1384 = vmatpush2.msra.mxu0 %v1166_v49 }
 0x3a5   : > { %1385 = vmatprep.subr.mxu0 %v1163_v38 }
 0x3a6   : > { %1386 = vmatpush2.msra.mxu0 %v1162_v30 }
 0x3a7   : > { %1387 = vmatprep.subr.mxu0 %v1159_v40  ;;  %v1942_v40 = vld [vmem:[#allocation8 + $0x2f0] sm:$0xff] }
 0x3a8   : > { %1388 = vmatpush2.msra.mxu0 %v1158_v58  ;;  %v1877_v58 = vld [vmem:[#allocation8 + $0xe8] sm:$0xff] }
 0x3a9   : > { %1389 = vmatprep.subr.mxu0 %v1155_v60 }
 0x3aa   : > { %1390 = vmatpush2.msra.mxu0 %v1154_v61 }
 0x3ab   : > { %2073 = vmatprep.subr.mxu0 %v1943_v0  ;;  %v1876_v0 = vld [vmem:[#allocation8 + $0xe0] sm:$0xff] }
 0x42b   : > { %v1017_v1 = vpop.f32.mrf.mxu0 }
 0x42c   : > { %v1018_v2 = vadd.f32 1e-05, %v1017_v1  ;;  %v1940_v1 = vld [vmem:[#allocation8 + $0x2e0] sm:$0xff] }
 0x42d   : > { %v1019_v3 = vpop.f32.mrf.mxu0 }
 0x42e   : > { %7281 = vrsqrt.f32 %v1018_v2  ;;  %v1020_v4 = vadd.f32 1e-05, %v1019_v3  ;;  %v1875_v3 = vld [vmem:[#allocation8 + $0xd8] sm:$0xff] }
 0x42f   : > { %v1023_v6 = vpop.f32.mrf.mxu0 }
 0x430   : > { %7283 = vrsqrt.f32 %v1020_v4  ;;  %v1024_v7 = vadd.f32 1e-05, %v1023_v6  ;;  %v1939_v4 = vld [vmem:[#allocation8 + $0x2d8] sm:$0xff] }
 0x431   : > { %v1025_v9 = vpop.f32.mrf.mxu0 }
 0x432   : > { %7285 = vrsqrt.f32 %v1024_v7  ;;  %v1026_v10 = vadd.f32 1e-05, %v1025_v9 }
 0x433   : > { %v1029_v11 = vpop.f32.mrf.mxu0 }
 0x434   : > { %7287 = vrsqrt.f32 %v1026_v10  ;;  %v1030_v12 = vadd.f32 1e-05, %v1029_v11  ;;  %v1874_v11 = vld [vmem:[#allocation8 + $0xd0] sm:$0xff] }
 0x435   : > { %v1031_v13 = vpop.f32.mrf.mxu0 }
 0x436   : > { %7289 = vrsqrt.f32 %v1030_v12  ;;  %v1032_v17 = vadd.f32 1e-05, %v1031_v13  ;;  %v1938_v12 = vld [vmem:[#allocation8 + $0x2d0] sm:$0xff] }
 0x437   : > { %v1035_v18 = vpop.f32.mrf.mxu0 }
 0x438   : > { %7291 = vrsqrt.f32 %v1032_v17  ;;  %v1036_v19 = vadd.f32 1e-05, %v1035_v18  ;;  %v1937_v17 = vld [vmem:[#allocation8 + $0x2c8] sm:$0xff] }
 0x439   : > { %v1037_v25 = vpop.f32.mrf.mxu0 }
 0x43a   : > { %7293 = vrsqrt.f32 %v1036_v19  ;;  %v1038_v29 = vadd.f32 1e-05, %v1037_v25  ;;  %v1871_v25 = vld [vmem:[#allocation8 + $0xb8] sm:$0xff] }
 0x43b   : > { %v7282_v34 = vpop.eup %7281 }
 0x43c   : > { %v1048_v35 = vmul.f32 %v7282_v34, %v8625_v47  ;;  %7295 = vrsqrt.f32 %v1038_v29  ;;  %v1870_v29 = vld [vmem:[#allocation8 + $0xb0] sm:$0xff] }
 0x43d   : > { %v7284_v36 = vpop.eup %7283  ;;  %v1934_v34 = vld [vmem:[#allocation8 + $0x2b0] sm:$0xff] }
 0x43e   : > { %v1049_v27 = vmul.f32 %v7284_v36, %v8628_v48  ;;  %v1064_v42 = vmul.f32 %v1059_v22, %v1048_v35  ;;  %v1933_v35 = vld [vmem:[#allocation8 + $0x2a8] sm:$0xff]  ;;  %v1932_v36 = vld [vmem:[#allocation8 + $0x2a0] sm:$0xff] }
 0x43f   : > { %v7286_v28 = vpop.eup %7285 }
 0x440   : > { %v1065_v46 = vmul.f32 %v1063_v23, %v1049_v27  ;;  %v1050_v21 = vmul.f32 %v7286_v28, %v8635_v31  ;;  %v1080_v51 = vadd.f32 %v1075_v43, %v1064_v42  ;;  %v1867_v27 = vld [vmem:[#allocation8 + $0x98] sm:$0xff]  ;;  %v1866_v28 = vld [vmem:[#allocation8 + $0x90] sm:$0xff] }
 0x441   : > { %v7288_v49 = vpop.eup %7287  ;;  %v1930_v42 = vld [vmem:[#allocation8 + $0x290] sm:$0xff] }
 0x442   : > { %v1081_v37 = vadd.f32 %v1079_v41, %v1065_v46  ;;  %v1051_v38 = vmul.f32 %v7288_v49, %v8638_v54  ;;  %v1066_v30 = vmul.f32 %v1059_v22, %v1050_v21  ;;  %v1929_v46 = vld [vmem:[#allocation8 + $0x288] sm:$0xff]  ;;  %v1864_v21 = vld [vmem:[#allocation8 + $0x80] sm:$0xff] }
 0x443   : > { %v7290_v47 = vpop.eup %7289  ;;  %v1928_v49 = vld [vmem:[#allocation8 + $0x280] sm:$0xff] }
 0x444   : > { %1302 = vmatprep.mubr.f32.mxu1 %v1081_v37  ;;  %1391 = vmatprep.mubr.f32.mxu0 %v1081_v37  ;;  %v1067_v48 = vmul.f32 %v1063_v23, %v1051_v38  ;;  %v1052_v56 = vmul.f32 %v7290_v47, %v8645_v44  ;;  %v1082_v61 = vadd.f32 %v1075_v43, %v1066_v30  ;;  %v1863_v37 = vld [vmem:[#allocation8 + $0x78] sm:$0xff]  ;;  %v1862_v47 = vld [vmem:[#allocation8 + $0x70] sm:$0xff]  ;;  %v1861_v30 = vld [vmem:[#allocation8 + $0x68] sm:$0xff] }
 0x445   : > { %v7292_v60 = vpop.eup %7291  ;;  %1303 = vmatmul.mubr.f32.vlgmr.msra.gmra.mxu1 %v1080_v51  ;;  %1392 = vmatmul.mubr.f32.vlgmr.msra.gmra.mxu0 %v1080_v51  ;;  %v1927_v38 = vld [vmem:[#allocation8 + $0x278] sm:$0xff]  ;;  %v1926_v51 = vld [vmem:[#allocation8 + $0x270] sm:$0xff] }
 0x446   : > { %v1083_v31 = vadd.f32 %v1079_v41, %v1067_v48  ;;  %v1053_v45 = vmul.f32 %v7292_v60, %v8648_v62  ;;  %1985 = vmatpush1.msra.mxu1 %v1878_v55  ;;  %2074 = vmatpush1.msra.mxu0 %v1942_v40  ;;  %v1068_v63 = vmul.f32 %v1059_v22, %v1052_v56  ;;  %v1925_v55 = vld [vmem:[#allocation8 + $0x268] sm:$0xff]  ;;  %v1860_v40 = vld [vmem:[#allocation8 + $0x60] sm:$0xff]  ;;  %v1859_v56 = vld [vmem:[#allocation8 + $0x58] sm:$0xff] }
 0x447   : > { %v7294_v54 = vpop.eup %7293  ;;  %1986 = vmatprep.subr.mxu1 %v1877_v58  ;;  %2075 = vmatprep.subr.mxu0 %v1941_v59  ;;  %v1924_v48 = vld [vmem:[#allocation8 + $0x260] sm:$0xff]  ;;  %v1923_v58 = vld [vmem:[#allocation8 + $0x258] sm:$0xff]  ;;  %v1858_v59 = vld [vmem:[#allocation8 + $0x50] sm:$0xff] }
 0x448   : > { %1308 = vmatprep.mubr.f32.mxu1 %v1083_v31  ;;  %1397 = vmatprep.mubr.f32.mxu0 %v1083_v31  ;;  %v1069_v44 = vmul.f32 %v1063_v23, %v1053_v45  ;;  %v1054_v2 = vmul.f32 %v7294_v54, %v8655_v5  ;;  %v1084_v9 = vadd.f32 %v1075_v43, %v1068_v63  ;;  %v1873_v5 = vld [vmem:[#allocation8 + $0xc8] sm:$0xff]  ;;  %v1922_v60 = vld [vmem:[#allocation8 + $0x250] sm:$0xff]  ;;  %v1856_v54 = vld [vmem:[#allocation8 + $0x40] sm:$0xff] }
 0x449   : > { %v7296_v6 = vpop.eup %7295  ;;  %1309 = vmatmul.mubr.f32.gmra.mxu1 %v1082_v61  ;;  %1398 = vmatmul.mubr.f32.gmra.mxu0 %v1082_v61  ;;  %v1857_v31 = vld [vmem:[#allocation8 + $0x48] sm:$0xff]  ;;  %v1920_v61 = vld [vmem:[#allocation8 + $0x240] sm:$0xff]  ;;  %v1855_v63 = vld [vmem:[#allocation8 + $0x38] sm:$0xff] }
 0x44a   : > { %v1085_v62 = vadd.f32 %v1079_v41, %v1069_v44  ;;  %v1055_v7 = vmul.f32 %v7296_v6, %v8658_v8  ;;  %1987 = vmatpush1.msra.mxu1 %v1876_v0  ;;  %2076 = vmatpush1.msra.mxu0 %v1940_v1  ;;  %v1070_v10 = vmul.f32 %v1059_v22, %v1054_v2  ;;  %v1872_v8 = vld [vmem:[#allocation8 + $0xc0] sm:$0xff]  ;;  %v1869_v22 = vld [vmem:[#allocation8 + $0xa8] sm:$0xff]  ;;  %v1919_v0 = vld [vmem:[#allocation8 + $0x238] sm:$0xff] }
 0x44b   : > { %1988 = vmatprep.subr.mxu1 %v1875_v3  ;;  %2077 = vmatprep.subr.mxu0 %v1939_v4  ;;  %v1921_v45 = vld [vmem:[#allocation8 + $0x248] sm:$0xff]  ;;  %v1854_v1 = vld [vmem:[#allocation8 + $0x30] sm:$0xff]  ;;  %v1852_v4 = vld [vmem:[#allocation8 + $0x20] sm:$0xff] }
 0x44c   : > { %1314 = vmatprep.mubr.f32.mxu1 %v1085_v62  ;;  %1403 = vmatprep.mubr.f32.mxu0 %v1085_v62  ;;  %v1071_v13 = vmul.f32 %v1063_v23, %v1055_v7  ;;  %v1086_v19 = vadd.f32 %v1075_v43, %v1070_v10  ;;  %v1868_v23 = vld [vmem:[#allocation8 + $0xa0] sm:$0xff]  ;;  %v1865_v43 = vld [vmem:[#allocation8 + $0x88] sm:$0xff]  ;;  %v1918_v44 = vld [vmem:[#allocation8 + $0x230] sm:$0xff] }
 0x44d   : > { %1315 = vmatmul.mubr.f32.gmra.mxu1 %v1084_v9  ;;  %1404 = vmatmul.mubr.f32.gmra.mxu0 %v1084_v9  ;;  %v1853_v2 = vld [vmem:[#allocation8 + $0x28] sm:$0xff]  ;;  %v1916_v6 = vld [vmem:[#allocation8 + $0x220] sm:$0xff]  ;;  %v1851_v62 = vld [vmem:[#allocation8 + $0x18] sm:$0xff] }
 0x44e   : > { %v1087_v18 = vadd.f32 %v1079_v41, %v1071_v13  ;;  %1989 = vmatpush1.msra.mxu1 %v1874_v11  ;;  %2078 = vmatpush1.msra.mxu0 %v1938_v12  ;;  %v1931_v41 = vld [vmem:[#allocation8 + $0x298] sm:$0xff]  ;;  %v1917_v3 = vld [vmem:[#allocation8 + $0x228] sm:$0xff]  ;;  %v1850_v9 = vld [vmem:[#allocation8 + $0x10] sm:$0xff] }
 0x44f   : > { %1990 = vmatprep.subr.mxu1 %v1873_v5  ;;  %2079 = vmatprep.subr.mxu0 %v1937_v17  ;;  %v1915_v7 = vld [vmem:[#allocation8 + $0x218] sm:$0xff]  ;;  %v1914_v10 = vld [vmem:[#allocation8 + $0x210] sm:$0xff]  ;;  %v1849_v11 = vld [vmem:[#allocation8 + $0x8] sm:$0xff] }
 0x450   : > { %1320 = vmatprep.mubr.f32.mxu1 %v1087_v18  ;;  %1409 = vmatprep.mubr.f32.mxu0 %v1087_v18  ;;  %v1913_v12 = vld [vmem:[#allocation8 + $0x208] sm:$0xff]  ;;  %v1848_v13 = vld [vmem:[#allocation8] sm:$0xff]  ;;  %v1911_v17 = vld [vmem:[#allocation8 + $0x1f8] sm:$0xff] }
 0x451   : > { %1321 = vmatmul.mubr.f32.gmra.mxu1 %v1086_v19  ;;  %1410 = vmatmul.mubr.f32.gmra.mxu0 %v1086_v19  ;;  %v1912_v5 = vld [vmem:[#allocation8 + $0x200] sm:$0xff]  ;;  %v1975_v18 = vld [vmem:[#allocation8 + $0x3f8] sm:$0xff]  ;;  %v1910_v19 = vld [vmem:[#allocation8 + $0x1f0] sm:$0xff] }
 0x452   : > { %1991 = vmatpush1.msra.mxu1 %v1872_v8  ;;  %2080 = vmatpush1.msra.mxu0 %v1936_v24  ;;  %v1974_v8 = vld [vmem:[#allocation8 + $0x3f0] sm:$0xff]  ;;  %v1909_v24 = vld [vmem:[#allocation8 + $0x1e8] sm:$0xff] }
 0x453   : > { %1992 = vmatprep.subr.mxu1 %v1871_v25  ;;  %2081 = vmatprep.subr.mxu0 %v1935_v26  ;;  %v1973_v25 = vld [vmem:[#allocation8 + $0x3e8] sm:$0xff]  ;;  %v1908_v26 = vld [vmem:[#allocation8 + $0x1e0] sm:$0xff] }
 0x454   : > { %1993 = vmatpush1.msra.mxu1 %v1870_v29  ;;  %2082 = vmatpush1.msra.mxu0 %v1934_v34  ;;  %v1972_v29 = vld [vmem:[#allocation8 + $0x3e0] sm:$0xff]  ;;  %v1907_v34 = vld [vmem:[#allocation8 + $0x1d8] sm:$0xff] }
 0x455   : > { %1994 = vmatprep.subr.mxu1 %v1869_v22  ;;  %2083 = vmatprep.subr.mxu0 %v1933_v35  ;;  %v1971_v22 = vld [vmem:[#allocation8 + $0x3d8] sm:$0xff]  ;;  %v1906_v35 = vld [vmem:[#allocation8 + $0x1d0] sm:$0xff] }
 0x456   : > { %1995 = vmatpush1.msra.mxu1 %v1868_v23  ;;  %2084 = vmatpush1.msra.mxu0 %v1932_v36  ;;  %v1970_v23 = vld [vmem:[#allocation8 + $0x3d0] sm:$0xff]  ;;  %v1905_v36 = vld [vmem:[#allocation8 + $0x1c8] sm:$0xff] }
 0x457   : > { %1996 = vmatprep.subr.mxu1 %v1867_v27  ;;  %2085 = vmatprep.subr.mxu0 %v1931_v41  ;;  %v1969_v27 = vld [vmem:[#allocation8 + $0x3c8] sm:$0xff]  ;;  %v1904_v41 = vld [vmem:[#allocation8 + $0x1c0] sm:$0xff] }
 0x458   : > { %1997 = vmatpush1.msra.mxu1 %v1866_v28  ;;  %2086 = vmatpush1.msra.mxu0 %v1930_v42  ;;  %v1968_v28 = vld [vmem:[#allocation8 + $0x3c0] sm:$0xff]  ;;  %v1903_v42 = vld [vmem:[#allocation8 + $0x1b8] sm:$0xff] }
 0x459   : > { %1998 = vmatprep.subr.mxu1 %v1865_v43  ;;  %2087 = vmatprep.subr.mxu0 %v1929_v46  ;;  %v1967_v43 = vld [vmem:[#allocation8 + $0x3b8] sm:$0xff]  ;;  %v1902_v46 = vld [vmem:[#allocation8 + $0x1b0] sm:$0xff] }
 0x45a   : > { %1999 = vmatpush1.msra.mxu1 %v1864_v21  ;;  %2088 = vmatpush1.msra.mxu0 %v1928_v49  ;;  %v1966_v21 = vld [vmem:[#allocation8 + $0x3b0] sm:$0xff]  ;;  %v1901_v49 = vld [vmem:[#allocation8 + $0x1a8] sm:$0xff] }
 0x45b   : > { %2000 = vmatprep.subr.mxu1 %v1863_v37  ;;  %2089 = vmatprep.subr.mxu0 %v1927_v38  ;;  %v1965_v37 = vld [vmem:[#allocation8 + $0x3a8] sm:$0xff]  ;;  %v1900_v38 = vld [vmem:[#allocation8 + $0x1a0] sm:$0xff] }
 0x45c   : > { %2001 = vmatpush1.msra.mxu1 %v1862_v47  ;;  %2090 = vmatpush1.msra.mxu0 %v1926_v51  ;;  %v1964_v47 = vld [vmem:[#allocation8 + $0x3a0] sm:$0xff]  ;;  %v1899_v51 = vld [vmem:[#allocation8 + $0x198] sm:$0xff] }
 0x45d   : > { %2002 = vmatprep.subr.mxu1 %v1861_v30  ;;  %2091 = vmatprep.subr.mxu0 %v1925_v55  ;;  %v1963_v30 = vld [vmem:[#allocation8 + $0x398] sm:$0xff]  ;;  %v1898_v55 = vld [vmem:[#allocation8 + $0x190] sm:$0xff] }
 0x45e   : > { %2003 = vmatpush1.msra.mxu1 %v1860_v40  ;;  %2092 = vmatpush1.msra.mxu0 %v1924_v48  ;;  %v1962_v40 = vld [vmem:[#allocation8 + $0x390] sm:$0xff]  ;;  %v1897_v48 = vld [vmem:[#allocation8 + $0x188] sm:$0xff] }
 0x45f   : > { %2004 = vmatprep.subr.mxu1 %v1859_v56  ;;  %2093 = vmatprep.subr.mxu0 %v1923_v58  ;;  %v1961_v56 = vld [vmem:[#allocation8 + $0x388] sm:$0xff]  ;;  %v1896_v58 = vld [vmem:[#allocation8 + $0x180] sm:$0xff] }
 0x460   : > { %2005 = vmatpush1.msra.mxu1 %v1858_v59  ;;  %2094 = vmatpush1.msra.mxu0 %v1922_v60  ;;  %v1960_v59 = vld [vmem:[#allocation8 + $0x380] sm:$0xff]  ;;  %v1895_v60 = vld [vmem:[#allocation8 + $0x178] sm:$0xff] }
 0x461   : > { %2006 = vmatprep.subr.mxu1 %v1857_v31  ;;  %2095 = vmatprep.subr.mxu0 %v1921_v45  ;;  %v1959_v31 = vld [vmem:[#allocation8 + $0x378] sm:$0xff]  ;;  %v1894_v45 = vld [vmem:[#allocation8 + $0x170] sm:$0xff] }
 0x462   : > { %2007 = vmatpush1.msra.mxu1 %v1856_v54  ;;  %2096 = vmatpush1.msra.mxu0 %v1920_v61  ;;  %v1958_v54 = vld [vmem:[#allocation8 + $0x370] sm:$0xff]  ;;  %v1893_v61 = vld [vmem:[#allocation8 + $0x168] sm:$0xff] }
 0x463   : > { %2008 = vmatprep.subr.mxu1 %v1855_v63  ;;  %2097 = vmatprep.subr.mxu0 %v1919_v0  ;;  %v1957_v63 = vld [vmem:[#allocation8 + $0x368] sm:$0xff]  ;;  %v1892_v0 = vld [vmem:[#allocation8 + $0x160] sm:$0xff] }
 0x464   : > { %2009 = vmatpush1.msra.mxu1 %v1854_v1  ;;  %2098 = vmatpush1.msra.mxu0 %v1918_v44  ;;  %v1956_v1 = vld [vmem:[#allocation8 + $0x360] sm:$0xff]  ;;  %v1891_v44 = vld [vmem:[#allocation8 + $0x158] sm:$0xff] }
 0x465   : > { %2010 = vmatprep.subr.mxu1 %v1853_v2  ;;  %2099 = vmatprep.subr.mxu0 %v1917_v3  ;;  %v1955_v2 = vld [vmem:[#allocation8 + $0x358] sm:$0xff]  ;;  %v1890_v3 = vld [vmem:[#allocation8 + $0x150] sm:$0xff] }
 0x466   : > { %2011 = vmatpush1.msra.mxu1 %v1852_v4  ;;  %2100 = vmatpush1.msra.mxu0 %v1916_v6  ;;  %v1954_v4 = vld [vmem:[#allocation8 + $0x350] sm:$0xff]  ;;  %v1889_v6 = vld [vmem:[#allocation8 + $0x148] sm:$0xff] }
 0x467   : > { %2012 = vmatprep.subr.mxu1 %v1851_v62  ;;  %2101 = vmatprep.subr.mxu0 %v1915_v7  ;;  %v1953_v62 = vld [vmem:[#allocation8 + $0x348] sm:$0xff]  ;;  %v1888_v7 = vld [vmem:[#allocation8 + $0x140] sm:$0xff] }
 0x468   : > { %2013 = vmatpush1.msra.mxu1 %v1850_v9  ;;  %2102 = vmatpush1.msra.mxu0 %v1914_v10  ;;  %v1952_v9 = vld [vmem:[#allocation8 + $0x340] sm:$0xff]  ;;  %v1887_v10 = vld [vmem:[#allocation8 + $0x138] sm:$0xff] }
 0x469   : > { %2014 = vmatprep.subr.mxu1 %v1849_v11  ;;  %2103 = vmatprep.subr.mxu0 %v1913_v12  ;;  %v1951_v11 = vld [vmem:[#allocation8 + $0x338] sm:$0xff]  ;;  %v1886_v12 = vld [vmem:[#allocation8 + $0x130] sm:$0xff] }
 0x46a   : > { %2015 = vmatpush1.msra.mxu1 %v1848_v13  ;;  %2104 = vmatpush1.msra.mxu0 %v1912_v5  ;;  %v1950_v13 = vld [vmem:[#allocation8 + $0x330] sm:$0xff]  ;;  %v1885_v5 = vld [vmem:[#allocation8 + $0x128] sm:$0xff] }
 0x46b   : > { %2016 = vmatprep.subr.mxu1 %v1911_v17  ;;  %2105 = vmatprep.subr.mxu0 %v1975_v18  ;;  %v1949_v17 = vld [vmem:[#allocation8 + $0x328] sm:$0xff]  ;;  %v1884_v18 = vld [vmem:[#allocation8 + $0x120] sm:$0xff] }
 0x46c   : > { %2017 = vmatpush2.msra.mxu1 %v1910_v19  ;;  %2106 = vmatpush2.msra.mxu0 %v1974_v8  ;;  %v1948_v19 = vld [vmem:[#allocation8 + $0x320] sm:$0xff]  ;;  %v1883_v8 = vld [vmem:[#allocation8 + $0x118] sm:$0xff] }
 0x46d   : > { %2018 = vmatprep.subr.mxu1 %v1909_v24  ;;  %2107 = vmatprep.subr.mxu0 %v1973_v25  ;;  %v1947_v24 = vld [vmem:[#allocation8 + $0x318] sm:$0xff]  ;;  %v1882_v25 = vld [vmem:[#allocation8 + $0x110] sm:$0xff] }
 0x46e   : > { %2019 = vmatpush2.msra.mxu1 %v1908_v26  ;;  %2108 = vmatpush2.msra.mxu0 %v1972_v29  ;;  %v1946_v26 = vld [vmem:[#allocation8 + $0x310] sm:$0xff]  ;;  %v1881_v29 = vld [vmem:[#allocation8 + $0x108] sm:$0xff] }
 0x46f   : > { %2020 = vmatprep.subr.mxu1 %v1907_v34  ;;  %2109 = vmatprep.subr.mxu0 %v1971_v22  ;;  %v1945_v34 = vld [vmem:[#allocation8 + $0x308] sm:$0xff]  ;;  %v1880_v22 = vld [vmem:[#allocation8 + $0x100] sm:$0xff] }
 0x470   : > { %2021 = vmatpush2.msra.mxu1 %v1906_v35  ;;  %2110 = vmatpush2.msra.mxu0 %v1970_v23  ;;  %v1944_v35 = vld [vmem:[#allocation8 + $0x300] sm:$0xff]  ;;  %v7633_v23 = vld [vmem:[#allocation2 + $0xf8] sm:$0xff] }
 0x471   : > { %2022 = vmatprep.subr.mxu1 %v1905_v36  ;;  %2111 = vmatprep.subr.mxu0 %v1969_v27  ;;  %v8683_v36 = vsub.s32 2, %v8505_v14  ;;  %v1216_v27 = vld [vmem:[#allocation7] sm:$0xf] }
 0x472   : > { %2023 = vmatpush2.msra.mxu1 %v1904_v41  ;;  %2112 = vmatpush2.msra.mxu0 %v1968_v28  ;;  %v8686_v41 = vrot.slane %v1216_v27, %v8508_v15 }
 0x473   : > { %2024 = vmatprep.subr.mxu1 %v1903_v42  ;;  %2113 = vmatprep.subr.mxu0 %v1967_v43  ;;  %11165 = vst [vmem:[#allocation39_spill] sm:$0xff] %v8683_v36  ;;  %v8689_v28 = vrot.slane %v1216_v27, %v8683_v36  ;;  %v8692_v42 = vsub.s32 3, %v8505_v14 }
 0x474   : > { %2025 = vmatpush2.msra.mxu1 %v1902_v46  ;;  %2114 = vmatpush2.msra.mxu0 %v1966_v21  ;;  %v8695_v21 = vrot.slane %v1216_v27, %v8511_v16 }
 0x475   : > { %2026 = vmatprep.subr.mxu1 %v1901_v49  ;;  %2115 = vmatprep.subr.mxu0 %v1965_v37  ;;  %11166 = vst [vmem:[#allocation40_spill] sm:$0xff] %v8692_v42 }
 0x476   : > { %2027 = vmatpush2.msra.mxu1 %v1900_v38  ;;  %2116 = vmatpush2.msra.mxu0 %v1964_v47  ;;  %v8700_v38 = vrot.slane %v1216_v27, %v8692_v42 }
 0x477   : > { %2028 = vmatprep.subr.mxu1 %v1899_v51  ;;  %2117 = vmatprep.subr.mxu0 %v1963_v30 }
 0x478   : > { %2029 = vmatpush2.msra.mxu1 %v1898_v55  ;;  %2118 = vmatpush2.msra.mxu0 %v1962_v40 }
 0x479   : > { %2030 = vmatprep.subr.mxu1 %v1897_v48  ;;  %2119 = vmatprep.subr.mxu0 %v1961_v56 }
 0x47a   : > { %2031 = vmatpush2.msra.mxu1 %v1896_v58  ;;  %2120 = vmatpush2.msra.mxu0 %v1960_v59 }
 0x47b   : > { %2032 = vmatprep.subr.mxu1 %v1895_v60  ;;  %2121 = vmatprep.subr.mxu0 %v1959_v31 }
 0x47c   : > { %2033 = vmatpush2.msra.mxu1 %v1894_v45  ;;  %2122 = vmatpush2.msra.mxu0 %v1958_v54 }
 0x47d   : > { %2034 = vmatprep.subr.mxu1 %v1893_v61  ;;  %2123 = vmatprep.subr.mxu0 %v1957_v63 }
 0x47e   : > { %2035 = vmatpush2.msra.mxu1 %v1892_v0  ;;  %2124 = vmatpush2.msra.mxu0 %v1956_v1 }
 0x47f   : > { %2036 = vmatprep.subr.mxu1 %v1891_v44  ;;  %2125 = vmatprep.subr.mxu0 %v1955_v2 }
 0x480   : > { %2037 = vmatpush2.msra.mxu1 %v1890_v3  ;;  %2126 = vmatpush2.msra.mxu0 %v1954_v4 }
 0x481   : > { %2038 = vmatprep.subr.mxu1 %v1889_v6  ;;  %2127 = vmatprep.subr.mxu0 %v1953_v62 }
 0x482   : > { %2039 = vmatpush2.msra.mxu1 %v1888_v7  ;;  %2128 = vmatpush2.msra.mxu0 %v1952_v9 }
 0x483   : > { %2040 = vmatprep.subr.mxu1 %v1887_v10  ;;  %2129 = vmatprep.subr.mxu0 %v1951_v11 }
 0x484   : > { %2041 = vmatpush2.msra.mxu1 %v1886_v12  ;;  %2130 = vmatpush2.msra.mxu0 %v1950_v13 }
 0x485   : > { %2042 = vmatprep.subr.mxu1 %v1885_v5  ;;  %2131 = vmatprep.subr.mxu0 %v1949_v17  ;;  %v10993_v17 = vmov -1.0  }
 0x486   : > { %2043 = vmatpush2.msra.mxu1 %v1884_v18  ;;  %2132 = vmatpush2.msra.mxu0 %v1948_v19 }
 0x487   : > { %2044 = vmatprep.subr.mxu1 %v1883_v8  ;;  %2133 = vmatprep.subr.mxu0 %v1947_v24 }
 0x488   : > { %2045 = vmatpush2.msra.mxu1 %v1882_v25  ;;  %2134 = vmatpush2.msra.mxu0 %v1946_v26 }
 0x489   : > { %2046 = vmatprep.subr.mxu1 %v1881_v29  ;;  %2135 = vmatprep.subr.mxu0 %v1945_v34 }
 0x48a   : > { %2047 = vmatpush2.msra.mxu1 %v1880_v22  ;;  %2136 = vmatpush2.msra.mxu0 %v1944_v35 }
 0x48b   : > { %2170 = vmatprep.subr.mxu1 %v7633_v23  ;;  %2275 = vmatprep.subr.mxu0 %v7633_v23 }
 0x505   : > { %v1304_v43 = vpop.f32.mrf.mxu1  ;;  %v1393_v46 = vpop.f32.mrf.mxu0 }
 0x506   : > { %v1305_v49 = vadd.f32 %v1304_v43, %v8686_v41  ;;  %v1394_v37 = vadd.f32 %v1393_v46, %v8689_v28 }
 0x507   : > { %v1306_v47 = vpop.f32.mrf.mxu1  ;;  %v1395_v51 = vpop.f32.mrf.mxu0 }
 0x508   : > { %v1432_v30 = vmul.f32 0.70710677, %v1305_v49  ;;  %v1434_v55 = vmul.f32 0.70710677, %v1394_v37  ;;  %v1307_v40 = vadd.f32 %v1306_v47, %v8695_v21  ;;  %v1396_v58 = vadd.f32 %v1395_v51, %v8700_v38 }
 0x509   : > { %v1310_v44 = vpop.f32.mrf.mxu1  ;;  %v1399_v2 = vpop.f32.mrf.mxu0  ;;  %v8706_v12 = vmul.f32 0.5, %v1305_v49  ;;  %v8711_v8 = vmul.f32 0.5, %v1394_v37 }
 0x50a   : > { %v1480_v48 = vand.u32 2147483647, %v1432_v30  ;;  %v1482_v56 = vand.u32 2147483647, %v1434_v55  ;;  %v1433_v59 = vmul.f32 0.70710677, %v1307_v40  ;;  %v1311_v7 = vadd.f32 %v1310_v44, %v8686_v41 }
 0x50b   : > { %v1435_v1 = vmul.f32 0.70710677, %v1396_v58  ;;  %vm1448_vm1 = vcmp.ge.f32.partialorder %v1432_v30, 0.0  ;;  %v1400_v9 = vadd.f32 %v1399_v2, %v8689_v28  ;;  %v1312_v10 = vpop.f32.mrf.mxu1  ;;  %vm1450_vm2 = vcmp.ge.f32.partialorder %v1434_v55, 0.0  ;;  %v1401_v34 = vpop.f32.mrf.mxu0 }
 0x50c   : > { %v1496_v60 = vmul.f32 0.3275911, %v1480_v48  ;;  %v1498_v31 = vmul.f32 0.3275911, %v1482_v56  ;;  %v1704_v45 = vsub.f32 0.0, %v1480_v48  ;;  %v1706_v0 = vsub.f32 0.0, %v1482_v56 }
 0x50d   : > { %v1481_v54 = vand.u32 2147483647, %v1433_v59  ;;  %v1483_v62 = vand.u32 2147483647, %v1435_v1  ;;  %v1436_v5 = vmul.f32 0.70710677, %v1311_v7  ;;  %v1313_v24 = vadd.f32 %v1312_v10, %v8695_v21 }
 0x50e   : > { %v1512_v61 = vadd.f32 1.0, %v1496_v60  ;;  %v1514_v63 = vadd.f32 1.0, %v1498_v31  ;;  %v1720_v4 = vmul.f32 %v1704_v45, %v1480_v48  ;;  %v1722_v6 = vmul.f32 %v1706_v0, %v1482_v56 }
 0x50f   : > { %v1705_v3 = vsub.f32 0.0, %v1481_v54  ;;  %v1497_v11 = vmul.f32 0.3275911, %v1481_v54  ;;  %v8709_v18 = vsel %vm1448_vm1, 1.0, %v10993_v17  ;;  %vm1449_vm3 = vcmp.ge.f32.partialorder %v1433_v59, 0.0 }
 0x510   : > { %7297 = vrcp.f32 %v1512_v61  ;;  %v1736_v19 = vmul.f32 1.442695, %v1720_v4  ;;  %v1740_v25 = vmul.f32 1.442695, %v1722_v6  ;;  %v1707_v26 = vsub.f32 0.0, %v1483_v62 }
 0x511   : > { %7299 = vrcp.f32 %v1514_v63  ;;  %v1721_v13 = vmul.f32 %v1705_v3, %v1481_v54  ;;  %v1438_v29 = vmul.f32 0.70710677, %v1400_v9  ;;  %v8715_v22 = vsel %vm1450_vm2, 1.0, %v10993_v17 }
 0x512   : > { %v1513_v35 = vadd.f32 1.0, %v1497_v11  ;;  %vm1451_vm4 = vcmp.ge.f32.partialorder %v1435_v1, 0.0  ;;  %v1484_v23 = vand.u32 2147483647, %v1436_v5  ;;  %v8717_v27 = vmul.f32 0.5, %v1307_v40  ;;  %v1316_v40 = vpop.f32.mrf.mxu1 }
 0x513   : > { %v1738_v43 = vmul.f32 1.442695, %v1721_v13  ;;  %v8719_v46 = vmul.f32 0.5, %v1396_v58  ;;  %v1499_v49 = vmul.f32 0.3275911, %v1483_v62  ;;  %7301 = vpow2.f32 %v1736_v19 }
 0x514   : > { %v8722_v37 = vsel %vm1449_vm3, 1.0, %v10993_v17  ;;  %v1437_v47 = vmul.f32 0.70710677, %v1313_v24  ;;  %v8725_v51 = vadd.f32 %v1401_v34, %v8700_v38  ;;  %7303 = vpow2.f32 %v1740_v25 }
 0x515   : > { %v8728_v30 = vsel %vm1451_vm4, 1.0, %v10993_v17  ;;  %v1723_v55 = vmul.f32 %v1707_v26, %v1483_v62  ;;  %v1486_v48 = vand.u32 2147483647, %v1438_v29  ;;  %7305 = vrcp.f32 %v1513_v35 }
 0x516   : > { %v8730_v56 = vmul.f32 0.5, %v1311_v7  ;;  %vm1452_vm5 = vcmp.ge.f32.partialorder %v1436_v5, 0.0  ;;  %v1708_v58 = vsub.f32 0.0, %v1484_v23  ;;  %7307 = vpow2.f32 %v1738_v43  ;;  %v1405_v7 = vpop.f32.mrf.mxu0 }
 0x517   : > { %v1515_v59 = vadd.f32 1.0, %v1499_v49  ;;  %v8732_v60 = vmul.f32 0.5, %v1400_v9  ;;  %v8734_v31 = vmul.f32 0.5, %v1313_v24  ;;  %v1500_v54 = vmul.f32 0.3275911, %v1484_v23  ;;  %v1318_v49 = vpop.f32.mrf.mxu1 }
 0x518   : > { %v1485_v61 = vand.u32 2147483647, %v1437_v47  ;;  %v8739_v63 = vmul.f32 0.70710677, %v8725_v51  ;;  %v8742_v0 = vadd.f32 %v1316_v40, %v8686_v41  ;;  %v1742_v2 = vmul.f32 1.442695, %v1723_v55 }
 0x519   : > { %v8748_v3 = vsel %vm1452_vm5, 1.0, %v10993_v17  ;;  %v1710_v4 = vsub.f32 0.0, %v1486_v48  ;;  %v1724_v62 = vmul.f32 %v1708_v58, %v1484_v23  ;;  %vm1454_vm6 = vcmp.ge.f32.partialorder %v1438_v29, 0.0 }
 0x51a   : > { %vm1453_vm7 = vcmp.ge.f32.partialorder %v1437_v47, 0.0  ;;  %7309 = vrcp.f32 %v1515_v59  ;;  %v1502_v10 = vmul.f32 0.3275911, %v1486_v48  ;;  %v1487_v11 = vand.u32 2147483647, %v8739_v63 }
 0x51b   : > { %v1516_v5 = vadd.f32 1.0, %v1500_v54  ;;  %v1709_v19 = vsub.f32 0.0, %v1485_v61  ;;  %v8753_v24 = vmul.f32 0.70710677, %v8742_v0  ;;  %v8757_v26 = vsel %vm1454_vm6, 1.0, %v10993_v17 }
 0x51c   : > { %v1726_v34 = vmul.f32 %v1710_v4, %v1486_v48  ;;  %v8760_v29 = vadd.f32 %v1405_v7, %v8689_v28  ;;  %7311 = vpow2.f32 %v1742_v2  ;;  %v1744_v23 = vmul.f32 1.442695, %v1724_v62 }
 0x51d   : > { %v8736_v45 = vpop.eup %7297  ;;  %v1501_v43 = vmul.f32 0.3275911, %v1485_v61  ;;  %v8765_v40 = vsel %vm1453_vm7, 1.0, %v10993_v17  ;;  %v1711_v58 = vsub.f32 0.0, %v1487_v11  ;;  %v1488_v59 = vand.u32 2147483647, %v8753_v24 }
 0x51e   : > { %v8744_v1 = vpop.eup %7299  ;;  %v1560_v44 = vmul.f32 1.0614054, %v8736_v45  ;;  %11167 = vst [vmem:[#allocation41_spill] sm:$0xff] %v8760_v29  ;;  %7313 = vrcp.f32 %v1516_v5  ;;  %v1518_v48 = vadd.f32 1.0, %v1502_v10  ;;  %v1748_v7 = vmul.f32 1.442695, %v1726_v34  ;;  %v1407_v34 = vpop.f32.mrf.mxu0 }
 0x51f   : > { %v1562_v6 = vmul.f32 1.0614054, %v8744_v1  ;;  %v8770_v2 = vmul.f32 0.70710677, %v8760_v29  ;;  %v8773_v62 = vadd.f32 %v1318_v49, %v8695_v21  ;;  %7315 = vpow2.f32 %v1744_v23 }
 0x520   : > { %v1576_v9 = vadd.f32 -1.4531521, %v1560_v44  ;;  %v1725_v44 = vmul.f32 %v1709_v19, %v1485_v61  ;;  %v7302_v4 = vpop.eup %7301  ;;  %v1727_v61 = vmul.f32 %v1711_v58, %v1487_v11  ;;  %v1712_v5 = vsub.f32 0.0, %v1488_v59 }
 0x521   : > { %v1578_v13 = vadd.f32 -1.4531521, %v1562_v6  ;;  %11168 = vst [vmem:[#allocation42_spill] sm:$0xff] %v8770_v2  ;;  %v7304_v47 = vpop.eup %7303  ;;  %v1490_v19 = vand.u32 2147483647, %v8770_v2  ;;  %7317 = vrcp.f32 %v1518_v48  ;;  %vm1455_vm8 = vcmp.ge.f32.partialorder %v8739_v63, 0.0 }
 0x522   : > { %v1592_v25 = vmul.f32 %v8736_v45, %v1576_v9  ;;  %v1746_v49 = vmul.f32 1.442695, %v1725_v44  ;;  %v1504_v16 = vmul.f32 0.3275911, %v1488_v59  ;;  %7319 = vpow2.f32 %v1748_v7 }
 0x523   : > { %v1594_v35 = vmul.f32 %v8744_v1, %v1578_v13  ;;  %v1517_v13 = vadd.f32 1.0, %v1501_v43  ;;  %v8784_v23 = vmul.f32 0.70710677, %v8773_v62  ;;  %v8788_v58 = vadd.f32 %v1407_v34, %v8700_v38 }
 0x524   : > { %v1608_v55 = vadd.f32 1.4214138, %v1592_v25  ;;  %v1503_v25 = vmul.f32 0.3275911, %v1487_v11  ;;  %v1750_v48 = vmul.f32 1.442695, %v1727_v61  ;;  %v1728_v44 = vmul.f32 %v1712_v5, %v1488_v59 }
 0x525   : > { %v1610_v54 = vadd.f32 1.4214138, %v1594_v35  ;;  %v8776_v35 = vpop.eup %7305  ;;  %7321 = vrcp.f32 %v1517_v13  ;;  %v1714_v14 = vsub.f32 0.0, %v1490_v19  ;;  %v1489_v57 = vand.u32 2147483647, %v8784_v23 }
 0x526   : > { %v1624_v6 = vmul.f32 %v8736_v45, %v1608_v55  ;;  %v8779_v55 = vpop.eup %7307  ;;  %v1519_v43 = vadd.f32 1.0, %v1503_v25  ;;  %7323 = vpow2.f32 %v1746_v49  ;;  %v1752_v5 = vmul.f32 1.442695, %v1728_v44 }
 0x527   : > { %v1626_v9 = vmul.f32 %v8744_v1, %v1610_v54  ;;  %v1322_v54 = vpop.f32.mrf.mxu1  ;;  %v8790_v42 = vpop.eup %7309  ;;  %v1505_v59 = vmul.f32 0.3275911, %v1489_v57  ;;  %v1713_v25 = vsub.f32 0.0, %v1489_v57  ;;  %vm1457_vm9 = vcmp.ge.f32.partialorder %v8784_v23, 0.0 }
 0x528   : > { %v1640_v10 = vadd.f32 -0.28449672, %v1624_v6  ;;  %v8798_v13 = vadd.f32 %v1322_v54, %v8686_v41  ;;  %7325 = vrcp.f32 %v1519_v43  ;;  %vm1456_vm11 = vcmp.ge.f32.partialorder %v8753_v24, 0.0 }
 0x529   : > { %v1642_v17 = vadd.f32 -0.28449672, %v1626_v9  ;;  %v1506_v9 = vmul.f32 0.3275911, %v1490_v19  ;;  %v8801_v61 = vpop.eup %7311  ;;  %7327 = vpow2.f32 %v1750_v48  ;;  %v1521_v52 = vadd.f32 1.0, %v1505_v59 }
 0x52a   : > { %v1656_v15 = vmul.f32 %v8736_v45, %v1640_v10  ;;  %v1520_v10 = vadd.f32 1.0, %v1504_v16  ;;  %11169 = vst [vmem:[#allocation43_spill] sm:$0xff] %v8798_v13  ;;  %v8807_v43 = vmul.f32 0.70710677, %v8798_v13 }
 0x52b   : > { %v1658_v11 = vmul.f32 %v8744_v1, %v1642_v17  ;;  %v8795_v17 = vmul.f32 0.70710677, %v8788_v58  ;;  %v8804_v53 = vpop.eup %7313 }
 0x52c   : > { %v1672_v6 = vadd.f32 0.2548296, %v1656_v15  ;;  %7329 = vrcp.f32 %v1520_v10  ;;  %11170 = vst [vmem:[#allocation44_spill] sm:$0xff] %v8807_v43  ;;  %v8812_v48 = vpop.eup %7315 }
 0x52d   : > { %v1674_v7 = vadd.f32 0.2548296, %v1658_v11  ;;  %v1491_v34 = vand.u32 2147483647, %v8795_v17  ;;  %v1522_v11 = vadd.f32 1.0, %v1506_v9  ;;  %7331 = vpow2.f32 %v1752_v5 }
 0x52e   : > { %v1688_v39 = vmul.f32 %v8736_v45, %v1672_v6  ;;  %v1411_v45 = vpop.f32.mrf.mxu0  ;;  %v1730_v6 = vmul.f32 %v1714_v14, %v1490_v19  ;;  %v11172_v14 = vmov -1.0   ;;  %vm1459_vm10 = vcmp.ge.f32.partialorder %v8795_v17, 0.0 }
 0x52f   : > { %v1690_v15 = vmul.f32 %v8744_v1, %v1674_v7  ;;  %v1507_v54 = vmul.f32 0.3275911, %v1491_v34  ;;  %v1715_v1 = vsub.f32 0.0, %v1491_v34  ;;  %v8820_v19 = vsel %vm1455_vm8, 1.0, %v11172_v14 }
 0x530   : > { %v1768_v16 = vmul.f32 %v7302_v4, %v1688_v39  ;;  %v1729_v39 = vmul.f32 %v1713_v25, %v1489_v57  ;;  %v8810_v4 = vadd.f32 %v1411_v45, %v8689_v28  ;;  %v1756_v10 = vmul.f32 1.442695, %v1730_v6  ;;  %v1324_v28 = vpop.f32.mrf.mxu1  ;;  %v1413_v59 = vpop.f32.mrf.mxu0 }
 0x531   : > { %v1770_v49 = vmul.f32 %v7304_v47, %v1690_v15  ;;  %v8815_v47 = vmul.f32 0.5, %v8725_v51  ;;  %v1523_v44 = vadd.f32 1.0, %v1507_v54  ;;  %v1731_v15 = vmul.f32 %v1715_v1, %v1491_v34  ;;  %v8824_v25 = vpop.eup %7317 }
 0x532   : > { %v1784_v41 = vsub.f32 1.0, %v1768_v16  ;;  %11171 = vst [vmem:[#allocation45_spill] sm:$0xff] %v8810_v4  ;;  %v1492_v57 = vand.u32 2147483647, %v8807_v43  ;;  %7333 = vrcp.f32 %v1522_v11  ;;  %v8828_v16 = vmul.f32 0.5, %v8773_v62  ;;  %v8831_v63 = vpop.eup %7319 }
 0x533   : > { %v1786_v7 = vsub.f32 1.0, %v1770_v49  ;;  %7335 = vrcp.f32 %v1521_v52  ;;  %v8834_v34 = vmul.f32 0.70710677, %v8810_v4  ;;  %v8836_v45 = vpop.eup %7321  ;;  %v8842_v62 = vadd.f32 %v1413_v59, %v8700_v38 }
 0x534   : > { %v1800_v9 = vmul.f32 %v1784_v41, %v8709_v18  ;;  %v1754_v18 = vmul.f32 1.442695, %v1729_v39  ;;  %v1508_v5 = vmul.f32 0.3275911, %v1492_v57  ;;  %7337 = vrcp.f32 %v1523_v44  ;;  %v8852_v1 = vpop.eup %7323 }
 0x535   : > { %v1802_v51 = vmul.f32 %v1786_v7, %v8715_v22  ;;  %11173 = vst [vmem:[#allocation46_spill] sm:$0xff] %v8834_v34  ;;  %v1716_v49 = vsub.f32 0.0, %v1492_v57  ;;  %v8839_v22 = vadd.f32 %v1324_v28, %v8695_v21  ;;  %11175 = vst [vmem:[#allocation48_spill] sm:$0xff] %v8842_v62  ;;  %7339 = vpow2.f32 %v1756_v10  ;;  %v8860_v39 = vpop.eup %7325 }
 0x536   : > { %v1816_v11 = vadd.f32 1.0, %v1800_v9  ;;  %v8845_v23 = vsel %vm1457_vm9, 1.0, %v11172_v14  ;;  %v1758_v52 = vmul.f32 1.442695, %v1731_v15  ;;  %v1494_v41 = vand.u32 2147483647, %v8834_v34  ;;  %v8863_v15 = vpop.eup %7327 }
 0x537   : > { %11174 = vst [vmem:[#allocation47_spill] sm:$0xff] %v8839_v22  ;;  %v1818_v6 = vadd.f32 1.0, %v1802_v51  ;;  %v8850_v54 = vmul.f32 0.70710677, %v8839_v22  ;;  %7341 = vpow2.f32 %v1754_v18  ;;  %v8855_v21 = vmul.f32 0.5, %v8788_v58 }
 0x538   : > { %v1524_v38 = vadd.f32 1.0, %v1508_v5  ;;  %v8858_v7 = vmul.f32 0.70710677, %v8842_v62  ;;  %v1732_v44 = vmul.f32 %v1716_v49, %v1492_v57  ;;  %v1510_v9 = vmul.f32 0.3275911, %v1494_v41 }
 0x539   : > { %11176 = vst [vmem:[#allocation49_spill] sm:$0xff] %v8850_v54  ;;  %v1718_v17 = vsub.f32 0.0, %v1494_v41  ;;  %v1493_v10 = vand.u32 2147483647, %v8850_v54  ;;  %v8866_v28 = vmul.f32 %v1816_v11, %v8706_v12  ;;  %v8869_v59 = vsel %vm1459_vm10, 1.0, %v11172_v14  ;;  %v8872_v51 = vpop.eup %7329 }
 0x53a   : > { %11177 = vst [vmem:[#allocation50_spill] sm:$0xff] %v8858_v7  ;;  %7343 = vpow2.f32 %v1758_v52  ;;  %v1495_v58 = vand.u32 2147483647, %v8858_v7  ;;  %v8875_v18 = vmul.f32 %v1818_v6, %v8711_v8  ;;  %v1526_v57 = vadd.f32 1.0, %v1510_v9  ;;  %v8880_v36 = vpop.eup %7331 }
 0x53b   : > { %v1509_v5 = vmul.f32 0.3275911, %v1493_v10  ;;  %v1717_v49 = vsub.f32 0.0, %v1493_v10  ;;  %v1734_v50 = vmul.f32 %v1718_v17, %v1494_v41  ;;  %v1561_v12 = vmul.f32 1.0614054, %v8776_v35  ;;  %11178 = vst [vmem:[#allocation51_spill] sm:$0xff] %v8880_v36 }
 0x53c   : > { %v1511_v20 = vmul.f32 0.3275911, %v1495_v58  ;;  %v1719_v33 = vsub.f32 0.0, %v1495_v58  ;;  %7345 = vrcp.f32 %v1524_v38  ;;  %v8878_v11 = vmul.f32 1.442695, %v1732_v44 }
 0x53d   : > { %v1525_v32 = vadd.f32 1.0, %v1509_v5  ;;  %v1733_v52 = vmul.f32 %v1717_v49, %v1493_v10  ;;  %v1577_v62 = vadd.f32 -1.4531521, %v1561_v12  ;;  %v1563_v8 = vmul.f32 1.0614054, %v8790_v42 }
 0x53e   : > { %v1527_v4 = vadd.f32 1.0, %v1511_v20  ;;  %v1735_v13 = vmul.f32 %v1719_v33, %v1495_v58  ;;  %7347 = vrcp.f32 %v1526_v57  ;;  %v1565_v41 = vmul.f32 1.0614054, %v8836_v45 }
 0x53f   : > { %v1762_v6 = vmul.f32 1.442695, %v1733_v52  ;;  %v1567_v9 = vmul.f32 1.0614054, %v8860_v39  ;;  %v8885_v17 = vpop.eup %7333  ;;  %v8887_v38 = vmul.f32 1.442695, %v1734_v50  ;;  %v1593_v10 = vmul.f32 %v8776_v35, %v1577_v62 }
 0x540   : > { %v8889_v44 = vmul.f32 1.442695, %v1735_v13  ;;  %v1579_v5 = vadd.f32 -1.4531521, %v1563_v8  ;;  %v8892_v20 = vpop.eup %7335  ;;  %7349 = vrcp.f32 %v1525_v32  ;;  %v1581_v33 = vadd.f32 -1.4531521, %v1565_v41 }
 0x541   : > { %v1583_v58 = vadd.f32 -1.4531521, %v1567_v9  ;;  %v1564_v57 = vmul.f32 1.0614054, %v8804_v53  ;;  %v8895_v49 = vpop.eup %7337  ;;  %7351 = vpow2.f32 %v1762_v6  ;;  %v1609_v12 = vadd.f32 1.4214138, %v1593_v10 }
 0x542   : > { %v1595_v52 = vmul.f32 %v8790_v42, %v1579_v5  ;;  %v1566_v50 = vmul.f32 1.0614054, %v8824_v25  ;;  %v8899_v13 = vpop.eup %7339  ;;  %7353 = vrcp.f32 %v1527_v4  ;;  %v1597_v62 = vmul.f32 %v8836_v45, %v1581_v33  ;;  %v11183_v24 = vld [vmem:[#allocation51_spill] sm:$0xff] }
 0x543   : > { %11179 = vst [vmem:[#allocation52_spill] sm:$0xff] %v8899_v13  ;;  %v1599_v8 = vmul.f32 %v8860_v39, %v1583_v58  ;;  %v1580_v32 = vadd.f32 -1.4531521, %v1564_v57  ;;  %v1625_v41 = vmul.f32 %v8776_v35, %v1609_v12  ;;  %v1569_v34 = vmul.f32 1.0614054, %v8892_v20 }
 0x544   : > { %v1611_v9 = vadd.f32 1.4214138, %v1595_v52  ;;  %v1582_v22 = vadd.f32 -1.4531521, %v1566_v50  ;;  %v8905_v6 = vpop.eup %7341  ;;  %v1613_v10 = vadd.f32 1.4214138, %v1597_v62  ;;  %7355 = vpow2.f32 %v8889_v44 }
 0x545   : > { %v1615_v5 = vadd.f32 1.4214138, %v1599_v8  ;;  %v1596_v7 = vmul.f32 %v8804_v53, %v1580_v32  ;;  %v1571_v13 = vmul.f32 1.0614054, %v8895_v49  ;;  %v1641_v4 = vadd.f32 -0.28449672, %v1625_v41 }
 0x546   : > { %v1627_v33 = vmul.f32 %v8790_v42, %v1611_v9  ;;  %v1598_v58 = vmul.f32 %v8824_v25, %v1582_v22  ;;  %v1585_v57 = vadd.f32 -1.4531521, %v1569_v34  ;;  %v1629_v12 = vmul.f32 %v8836_v45, %v1613_v10 }
 0x547   : > { %v8911_v54 = vpop.eup %7343  ;;  %v1631_v52 = vmul.f32 %v8860_v39, %v1615_v5  ;;  %v1612_v50 = vadd.f32 1.4214138, %v1596_v7  ;;  %v1587_v43 = vadd.f32 -1.4531521, %v1571_v13  ;;  %v1657_v62 = vmul.f32 %v8776_v35, %v1641_v4 }
 0x548   : > { %v1643_v8 = vadd.f32 -0.28449672, %v1627_v33  ;;  %v1614_v32 = vadd.f32 1.4214138, %v1598_v58  ;;  %v1601_v36 = vmul.f32 %v8892_v20, %v1585_v57  ;;  %v1645_v41 = vadd.f32 -0.28449672, %v1629_v12 }
 0x549   : > { %v1647_v14 = vadd.f32 -0.28449672, %v1631_v52  ;;  %v1628_v9 = vmul.f32 %v8804_v53, %v1612_v50  ;;  %v1603_v34 = vmul.f32 %v8895_v49, %v1587_v43  ;;  %v8919_v22 = vpop.eup %7345  ;;  %v1673_v2 = vadd.f32 0.2548296, %v1657_v62 }
 0x54a   : > { %v1659_v10 = vmul.f32 %v8790_v42, %v1643_v8  ;;  %v1630_v7 = vmul.f32 %v8824_v25, %v1614_v32  ;;  %v1617_v13 = vadd.f32 1.4214138, %v1601_v36  ;;  %v1661_v5 = vmul.f32 %v8836_v45, %v1645_v41 }
 0x54b   : > { %v1663_v4 = vmul.f32 %v8860_v39, %v1647_v14  ;;  %v1644_v33 = vadd.f32 -0.28449672, %v1628_v9  ;;  %v1619_v58 = vadd.f32 1.4214138, %v1603_v34  ;;  %v8925_v57 = vpop.eup %7347  ;;  %v1689_v12 = vmul.f32 %v8776_v35, %v1673_v2 }
 0x54c   : > { %v1675_v52 = vadd.f32 0.2548296, %v1659_v10  ;;  %v1646_v43 = vadd.f32 -0.28449672, %v1630_v7  ;;  %v1633_v50 = vmul.f32 %v8892_v20, %v1617_v13  ;;  %v1677_v62 = vadd.f32 0.2548296, %v1661_v5 }
 0x54d   : > { %v1679_v29 = vadd.f32 0.2548296, %v1663_v4  ;;  %v1660_v8 = vmul.f32 %v8804_v53, %v1644_v33  ;;  %v1635_v36 = vmul.f32 %v8895_v49, %v1619_v58  ;;  %v8931_v32 = vpop.eup %7349  ;;  %v1769_v14 = vmul.f32 %v8779_v55, %v1689_v12 }
 0x54e   : > { %v1691_v41 = vmul.f32 %v8790_v42, %v1675_v52  ;;  %v1662_v9 = vmul.f32 %v8824_v25, %v1646_v43  ;;  %v1649_v34 = vadd.f32 -0.28449672, %v1633_v50  ;;  %v8936_v2 = vpop.eup %7351  ;;  %v1693_v35 = vmul.f32 %v8836_v45, %v1677_v62 }
 0x54f   : > { %v1695_v10 = vmul.f32 %v8860_v39, %v1679_v29  ;;  %v1676_v7 = vadd.f32 0.2548296, %v1660_v8  ;;  %v1651_v13 = vadd.f32 -0.28449672, %v1635_v36  ;;  %v8940_v5 = vpop.eup %7353  ;;  %v1785_v4 = vsub.f32 1.0, %v1769_v14 }
 0x550   : > { %v1771_v33 = vmul.f32 %v8801_v61, %v1691_v41  ;;  %v1678_v58 = vadd.f32 0.2548296, %v1662_v9  ;;  %v1665_v55 = vmul.f32 %v8892_v20, %v1649_v34  ;;  %v1773_v42 = vmul.f32 %v8852_v1, %v1693_v35 }
 0x551   : > { %v1775_v12 = vmul.f32 %v8863_v15, %v1695_v10  ;;  %v1692_v52 = vmul.f32 %v8804_v53, %v1676_v7  ;;  %v1667_v45 = vmul.f32 %v8895_v49, %v1651_v13  ;;  %v1801_v29 = vmul.f32 %v1785_v4, %v8722_v37 }
 0x552   : > { %v1787_v39 = vsub.f32 1.0, %v1771_v33  ;;  %v1694_v43 = vmul.f32 %v8824_v25, %v1678_v58  ;;  %v1681_v50 = vadd.f32 0.2548296, %v1665_v55  ;;  %v1789_v62 = vsub.f32 1.0, %v1773_v42  ;;  %v7634_v55 = vld [vmem:[#allocation2 + $0xf0] sm:$0xff] }
 0x553   : > { %v1791_v8 = vsub.f32 1.0, %v1775_v12  ;;  %v1772_v61 = vmul.f32 %v8812_v48, %v1692_v52  ;;  %v1683_v36 = vadd.f32 0.2548296, %v1667_v45  ;;  %v1817_v14 = vadd.f32 1.0, %v1801_v29  ;;  %v7635_v52 = vld [vmem:[#allocation2 + $0xe8] sm:$0xff] }
 0x554   : > { %v1803_v1 = vmul.f32 %v1787_v39, %v8728_v30  ;;  %v1774_v15 = vmul.f32 %v8831_v63, %v1694_v43  ;;  %v1697_v53 = vmul.f32 %v8892_v20, %v1681_v50  ;;  %v1805_v41 = vmul.f32 %v1789_v62, %v8765_v40  ;;  %v7636_v50 = vld [vmem:[#allocation2 + $0xe0] sm:$0xff] }
 0x555   : > { %v1807_v37 = vmul.f32 %v1791_v8, %v8820_v19  ;;  %v1788_v9 = vsub.f32 1.0, %v1772_v61  ;;  %v1699_v25 = vmul.f32 %v8895_v49, %v1683_v36  ;;  %v1833_v34 = vmul.f32 %v1817_v14, %v8717_v27  ;;  %v7637_v36 = vld [vmem:[#allocation2 + $0xd8] sm:$0xff] }
 0x556   : > { %v1819_v35 = vadd.f32 1.0, %v1803_v1  ;;  %v1790_v10 = vsub.f32 1.0, %v1774_v15  ;;  %v1777_v48 = vmul.f32 %v8905_v6, %v1697_v53  ;;  %v1821_v7 = vadd.f32 1.0, %v1805_v41  ;;  %v7638_v53 = vld [vmem:[#allocation2 + $0xd0] sm:$0xff] }
 0x557   : > { %v1823_v13 = vadd.f32 1.0, %v1807_v37  ;;  %v1804_v30 = vmul.f32 %v1788_v9, %v8748_v3  ;;  %v1779_v63 = vmul.f32 %v8911_v54, %v1699_v25  ;;  %2048 = vmatprep.mubr.f32.mxu1 %v1833_v34  ;;  %v1568_v49 = vmul.f32 1.0614054, %v8872_v51  ;;  %v7639_v9 = vld [vmem:[#allocation2 + $0xc8] sm:$0xff] }
 0x558   : > { %v1835_v40 = vmul.f32 %v1819_v35, %v8719_v46  ;;  %v1806_v19 = vmul.f32 %v1790_v10, %v8757_v26  ;;  %v1793_v20 = vsub.f32 1.0, %v1777_v48  ;;  %2049 = vmatmul.mubr.f32.vlgmr.msra.gmra.mxu1 %v8866_v28  ;;  %v1837_v27 = vmul.f32 %v1821_v7, %v8734_v31  ;;  %v7640_v35 = vld [vmem:[#allocation2 + $0xc0] sm:$0xff] }
 0x559   : > { %v1839_v6 = vmul.f32 %v1823_v13, %v8815_v47  ;;  %v1820_v4 = vadd.f32 1.0, %v1804_v30  ;;  %v1795_v33 = vsub.f32 1.0, %v1779_v63  ;;  %v1584_v58 = vadd.f32 -1.4531521, %v1568_v49  ;;  %2171 = vmatpush1.msra.mxu1 %v7634_v55  ;;  %v7641_v13 = vld [vmem:[#allocation2 + $0xb8] sm:$0xff]  ;;  %v7643_v49 = vld [vmem:[#allocation2 + $0xa8] sm:$0xff] }
 0x55a   : > { %2137 = vmatprep.mubr.f32.mxu0 %v1835_v40  ;;  %v1822_v3 = vadd.f32 1.0, %v1806_v19  ;;  %v1809_v54 = vmul.f32 %v1793_v20, %v8845_v23  ;;  %v1570_v46 = vmul.f32 1.0614054, %v8885_v17  ;;  %2054 = vmatprep.mubr.f32.mxu1 %v1837_v27  ;;  %v1573_v47 = vmul.f32 1.0614054, %v8931_v32  ;;  %v7642_v40 = vld [vmem:[#allocation2 + $0xb0] sm:$0xff] }
 0x55b   : > { %2138 = vmatmul.mubr.f32.vlgmr.msra.gmra.mxu0 %v8875_v18  ;;  %v1836_v26 = vmul.f32 %v1820_v4, %v8730_v56  ;;  %v1811_v31 = vmul.f32 %v1795_v33, %v8869_v59  ;;  %v1575_v28 = vmul.f32 1.0614054, %v8940_v5  ;;  %v1600_v42 = vmul.f32 %v8872_v51, %v1584_v58  ;;  %2172 = vmatprep.subr.mxu1 %v7635_v52  ;;  %v11180_v27 = vld [vmem:[#allocation41_spill] sm:$0xff]  ;;  %v11181_v58 = vld [vmem:[#allocation42_spill] sm:$0xff] }
 0x55c   : > { %2143 = vmatprep.mubr.f32.mxu0 %v1839_v6  ;;  %v1825_v23 = vadd.f32 1.0, %v1809_v54  ;;  %v1586_v12 = vadd.f32 -1.4531521, %v1570_v46  ;;  %v1838_v18 = vmul.f32 %v1822_v3, %v8732_v60  ;;  %v1589_v56 = vadd.f32 -1.4531521, %v1573_v47  ;;  %2276 = vmatpush1.msra.mxu0 %v7634_v55  ;;  %v7644_v54 = vld [vmem:[#allocation2 + $0xa0] sm:$0xff] }
 0x55d   : > { %2055 = vmatmul.mubr.f32.gmra.mxu1 %v1836_v26  ;;  %v1827_v45 = vadd.f32 1.0, %v1811_v31  ;;  %v1591_v29 = vadd.f32 -1.4531521, %v1575_v28  ;;  %v1616_v39 = vadd.f32 1.4214138, %v1600_v42  ;;  %2277 = vmatprep.subr.mxu0 %v7635_v52  ;;  %7357 = vpow2.f32 %v8878_v11  ;;  %v7645_v31 = vld [vmem:[#allocation2 + $0x98] sm:$0xff] }
 0x55e   : > { %v1841_v59 = vmul.f32 %v1825_v23, %v8828_v16  ;;  %v1602_v43 = vmul.f32 %v8885_v17, %v1586_v12  ;;  %v1572_v44 = vmul.f32 1.0614054, %v8919_v22  ;;  %2173 = vmatpush1.msra.mxu1 %v7636_v50  ;;  %v1605_v8 = vmul.f32 %v8931_v32, %v1589_v56  ;;  %2278 = vmatpush1.msra.mxu0 %v7636_v50  ;;  %v7646_v52 = vld [vmem:[#allocation2 + $0x90] sm:$0xff]  ;;  %v7648_v50 = vld [vmem:[#allocation2 + $0x80] sm:$0xff] }
 0x55f   : > { %2144 = vmatmul.mubr.f32.gmra.mxu0 %v1838_v18  ;;  %v1843_v62 = vmul.f32 %v1827_v45, %v8855_v21  ;;  %v1607_v60 = vmul.f32 %v8940_v5, %v1591_v29  ;;  %v1574_v61 = vmul.f32 1.0614054, %v8925_v57  ;;  %2174 = vmatprep.subr.mxu1 %v7637_v36  ;;  %v8985_v16 = vmul.f32 0.5, %v8742_v0  ;;  %v7356_v18 = vpop.eup %7355 }
 0x560   : > { %2060 = vmatprep.mubr.f32.mxu1 %v1841_v59  ;;  %v1632_v14 = vmul.f32 %v8872_v51, %v1616_v39  ;;  %v1618_v1 = vadd.f32 1.4214138, %v1602_v43  ;;  %v1588_v15 = vadd.f32 -1.4531521, %v1572_v44  ;;  %2175 = vmatpush1.msra.mxu1 %v7638_v53  ;;  %v1621_v21 = vadd.f32 1.4214138, %v1605_v8 }
 0x561   : > { %2149 = vmatprep.mubr.f32.mxu0 %v1843_v62  ;;  %v1623_v41 = vadd.f32 1.4214138, %v1607_v60  ;;  %v1590_v37 = vadd.f32 -1.4531521, %v1574_v61  ;;  %2176 = vmatprep.subr.mxu1 %v7639_v9  ;;  %7359 = vpow2.f32 %v8887_v38  ;;  %v8998_v6 = vmul.f32 0.5, %v11180_v27  ;;  %v7647_v59 = vld [vmem:[#allocation2 + $0x88] sm:$0xff] }
 0x562   : > { %v1648_v25 = vadd.f32 -0.28449672, %v1632_v14  ;;  %v1634_v34 = vmul.f32 %v8885_v17, %v1618_v1  ;;  %v1604_v0 = vmul.f32 %v8919_v22, %v1588_v15  ;;  %2177 = vmatpush1.msra.mxu1 %v7640_v35  ;;  %v1637_v10 = vmul.f32 %v8931_v32, %v1621_v21  ;;  %2279 = vmatprep.subr.mxu0 %v7637_v36  ;;  %v11184_v62 = vld [vmem:[#allocation44_spill] sm:$0xff]  ;;  %v7649_v36 = vld [vmem:[#allocation2 + $0x78] sm:$0xff]  ;;  %v11185_v14 = vld [vmem:[#allocation49_spill] sm:$0xff] }
 0x563   : > { %v1639_v48 = vmul.f32 %v8940_v5, %v1623_v41  ;;  %v1606_v7 = vmul.f32 %v8925_v57, %v1590_v37  ;;  %2178 = vmatprep.subr.mxu1 %v7641_v13  ;;  %2280 = vmatpush1.msra.mxu0 %v7638_v53  ;;  %vm1458_vm12 = vcmp.ge.f32.partialorder %v11181_v58, 0.0  ;;  %v11182_v47 = vmov -1.0   ;;  %v7650_v21 = vld [vmem:[#allocation2 + $0x70] sm:$0xff]  ;;  %v11187_v41 = vld [vmem:[#allocation50_spill] sm:$0xff] }
 0x564   : > { %v1664_v11 = vmul.f32 %v8872_v51, %v1648_v25  ;;  %v1650_v30 = vadd.f32 -0.28449672, %v1634_v34  ;;  %v1620_v63 = vadd.f32 1.4214138, %v1604_v0  ;;  %2179 = vmatpush1.msra.mxu1 %v7642_v40  ;;  %v1653_v19 = vadd.f32 -0.28449672, %v1637_v10  ;;  %2281 = vmatprep.subr.mxu0 %v7639_v9 }
 0x565   : > { %v1655_v38 = vadd.f32 -0.28449672, %v1639_v48  ;;  %v1622_v20 = vadd.f32 1.4214138, %v1606_v7  ;;  %2180 = vmatprep.subr.mxu1 %v7643_v49  ;;  %2282 = vmatpush1.msra.mxu0 %v7640_v35  ;;  %v1472_v28 = vsel %vm1456_vm11, 1.0, %v11182_v47  ;;  %v1474_v39 = vsel %vm1458_vm12, 1.0, %v11182_v47 }
 0x566   : > { %v1680_v4 = vadd.f32 0.2548296, %v1664_v11  ;;  %v1666_v33 = vmul.f32 %v8885_v17, %v1650_v30  ;;  %v1636_v3 = vmul.f32 %v8919_v22, %v1620_v63  ;;  %2181 = vmatpush1.msra.mxu1 %v7644_v54  ;;  %v1669_v46 = vmul.f32 %v8931_v32, %v1653_v19  ;;  %2283 = vmatprep.subr.mxu0 %v7641_v13  ;;  %v7651_v9 = vld [vmem:[#allocation2 + $0x68] sm:$0xff]  ;;  %v7652_v10 = vld [vmem:[#allocation2 + $0x60] sm:$0xff]  ;;  %v7653_v30 = vld [vmem:[#allocation2 + $0x58] sm:$0xff] }
 0x567   : > { %v1671_v55 = vmul.f32 %v8940_v5, %v1655_v38  ;;  %v1638_v26 = vmul.f32 %v8925_v57, %v1622_v20  ;;  %2182 = vmatprep.subr.mxu1 %v7645_v31  ;;  %2284 = vmatpush1.msra.mxu0 %v7642_v40  ;;  %vm1460_vm13 = vcmp.ge.f32.partialorder %v11184_v62, 0.0  ;;  %vm1461_vm14 = vcmp.ge.f32.partialorder %v11185_v14, 0.0  ;;  %v7654_v20 = vld [vmem:[#allocation2 + $0x50] sm:$0xff] }
 0x568   : > { %v1696_v23 = vmul.f32 %v8872_v51, %v1680_v4  ;;  %v1682_v42 = vadd.f32 0.2548296, %v1666_v33  ;;  %v1652_v12 = vadd.f32 -0.28449672, %v1636_v3  ;;  %2183 = vmatpush1.msra.mxu1 %v7646_v52  ;;  %v1685_v45 = vadd.f32 0.2548296, %v1669_v46  ;;  %2285 = vmatprep.subr.mxu0 %v7643_v49 }
 0x569   : > { %v1687_v56 = vadd.f32 0.2548296, %v1671_v55  ;;  %v1654_v29 = vadd.f32 -0.28449672, %v1638_v26  ;;  %2184 = vmatprep.subr.mxu1 %v7647_v59  ;;  %2286 = vmatpush1.msra.mxu0 %v7644_v54  ;;  %vm1463_vm15 = vcmp.ge.f32.partialorder %v11187_v41, 0.0  ;;  %v1476_v25 = vsel %vm1460_vm13, 1.0, %v11182_v47 }
 0x56a   : > { %v1776_v43 = vmul.f32 %v11183_v24, %v1696_v23  ;;  %v1698_v51 = vmul.f32 %v8885_v17, %v1682_v42  ;;  %v1668_v44 = vmul.f32 %v8919_v22, %v1652_v12  ;;  %2185 = vmatpush1.msra.mxu1 %v7648_v50  ;;  %v1701_v8 = vmul.f32 %v8931_v32, %v1685_v45  ;;  %v11186_v17 = vld [vmem:[#allocation52_spill] sm:$0xff]  ;;  %v7358_v48 = vpop.eup %7357  ;;  %v11188_v49 = vld [vmem:[#allocation46_spill] sm:$0xff]  ;;  %v11189_v3 = vld [vmem:[#allocation47_spill] sm:$0xff] }
 0x56b   : > { %v1703_v60 = vmul.f32 %v8940_v5, %v1687_v56  ;;  %v1670_v61 = vmul.f32 %v8925_v57, %v1654_v29  ;;  %2186 = vmatprep.subr.mxu1 %v7649_v36  ;;  %2287 = vmatprep.subr.mxu0 %v7645_v31  ;;  %vm1462_vm0 = vcmp.ge.f32.partialorder %v11188_v49, 0.0  ;;  %v1429_v54 = vmul.f32 0.5, %v11189_v3  ;;  %v7656_v26 = vld [vmem:[#allocation2 + $0x40] sm:$0xff]  ;;  %v11190_v31 = vld [vmem:[#allocation48_spill] sm:$0xff]  ;;  %v7662_v14 = vld [vmem:[#allocation2 + $0x10] sm:$0xff] }
 0x56c   : > { %v1792_v1 = vsub.f32 1.0, %v1776_v43  ;;  %v1778_v15 = vmul.f32 %v11186_v17, %v1698_v51  ;;  %v1684_v53 = vadd.f32 0.2548296, %v1668_v44  ;;  %2187 = vmatpush1.msra.mxu1 %v7650_v21  ;;  %2288 = vmatpush1.msra.mxu0 %v7646_v52  ;;  %v1781_v32 = vmul.f32 %v8936_v2, %v1701_v8  ;;  %v7657_v52 = vld [vmem:[#allocation2 + $0x38] sm:$0xff]  ;;  %v11191_v24 = vld [vmem:[#allocation43_spill] sm:$0xff]  ;;  %v7659_v44 = vld [vmem:[#allocation2 + $0x28] sm:$0xff] }
 0x56d   : > { %v1783_v37 = vmul.f32 %v7356_v18, %v1703_v60  ;;  %v1686_v5 = vadd.f32 0.2548296, %v1670_v61  ;;  %2188 = vmatprep.subr.mxu1 %v7651_v9  ;;  %2289 = vmatprep.subr.mxu0 %v7647_v59  ;;  %v1477_v2 = vsel %vm1461_vm14, 1.0, %v11182_v47  ;;  %v1478_v18 = vsel %vm1462_vm0, 1.0, %v11182_v47  ;;  %v7660_v60 = vld [vmem:[#allocation2 + $0x20] sm:$0xff]  ;;  %v7690_v49 = vld [vmem:[#allocation2 + $0x130] sm:$0xff] }
 0x56e   : > { %v1808_v34 = vmul.f32 %v1792_v1, %v1472_v28  ;;  %v1794_v0 = vsub.f32 1.0, %v1778_v15  ;;  %v1700_v35 = vmul.f32 %v8919_v22, %v1684_v53  ;;  %2189 = vmatpush1.msra.mxu1 %v7652_v10  ;;  %2290 = vmatpush1.msra.mxu0 %v7648_v50  ;;  %v1797_v7 = vsub.f32 1.0, %v1781_v32  ;;  %v7360_v63 = vpop.eup %7359  ;;  %v11192_v50 = vld [vmem:[#allocation45_spill] sm:$0xff]  ;;  %v7663_v1 = vld [vmem:[#allocation2 + $0x8] sm:$0xff]  ;;  %v7664_v17 = vld [vmem:[#allocation2] sm:$0xff] }
 0x56f   : > { %v1799_v13 = vsub.f32 1.0, %v1783_v37  ;;  %v1702_v11 = vmul.f32 %v8925_v57, %v1686_v5  ;;  %2190 = vmatprep.subr.mxu1 %v7653_v30  ;;  %2291 = vmatprep.subr.mxu0 %v7649_v36  ;;  %v1479_v22 = vsel %vm1463_vm15, 1.0, %v11182_v47  ;;  %v7655_v57 = vld [vmem:[#allocation2 + $0x48] sm:$0xff]  ;;  %v1431_v28 = vmul.f32 0.5, %v11190_v31  ;;  %v7661_v36 = vld [vmem:[#allocation2 + $0x18] sm:$0xff]  ;;  %v7666_v53 = vld [vmem:[#allocation2 + $0x1f0] sm:$0xff] }
 0x570   : > { %v1824_v40 = vadd.f32 1.0, %v1808_v34  ;;  %v1810_v19 = vmul.f32 %v1794_v0, %v1474_v39  ;;  %v1780_v38 = vmul.f32 %v7358_v48, %v1700_v35  ;;  %2191 = vmatpush1.msra.mxu1 %v7654_v20  ;;  %2292 = vmatpush1.msra.mxu0 %v7650_v21  ;;  %v1813_v27 = vmul.f32 %v1797_v7, %v1477_v2  ;;  %v7658_v39 = vld [vmem:[#allocation2 + $0x30] sm:$0xff]  ;;  %v7665_v15 = vld [vmem:[#allocation2 + $0x1f8] sm:$0xff]  ;;  %v7667_v21 = vld [vmem:[#allocation2 + $0x1e8] sm:$0xff] }
 0x571   : > { %v1815_v4 = vmul.f32 %v1799_v13, %v1479_v22  ;;  %v1782_v33 = vmul.f32 %v7360_v63, %v1702_v11  ;;  %2192 = vmatprep.subr.mxu1 %v7655_v57  ;;  %2293 = vmatprep.subr.mxu0 %v7651_v9  ;;  %v1428_v43 = vmul.f32 0.5, %v11191_v24  ;;  %v1430_v62 = vmul.f32 0.5, %v11192_v50  ;;  %v7668_v41 = vld [vmem:[#allocation2 + $0x1e0] sm:$0xff]  ;;  %v7669_v32 = vld [vmem:[#allocation2 + $0x1d8] sm:$0xff]  ;;  %v7670_v37 = vld [vmem:[#allocation2 + $0x1d0] sm:$0xff] }
 0x572   : > { %v1840_v58 = vmul.f32 %v1824_v40, %v8985_v16  ;;  %v1826_v46 = vadd.f32 1.0, %v1810_v19  ;;  %v1796_v55 = vsub.f32 1.0, %v1780_v38  ;;  %2193 = vmatpush1.msra.mxu1 %v7656_v26  ;;  %2294 = vmatpush1.msra.mxu0 %v7652_v10  ;;  %v1829_v23 = vadd.f32 1.0, %v1813_v27  ;;  %v7671_v5 = vld [vmem:[#allocation2 + $0x1c8] sm:$0xff]  ;;  %v7672_v9 = vld [vmem:[#allocation2 + $0x1c0] sm:$0xff]  ;;  %v7674_v34 = vld [vmem:[#allocation2 + $0x1b0] sm:$0xff] }
 0x573   : > { %v1831_v42 = vadd.f32 1.0, %v1815_v4  ;;  %v1798_v12 = vsub.f32 1.0, %v1782_v33  ;;  %2194 = vmatprep.subr.mxu1 %v7657_v52  ;;  %2295 = vmatprep.subr.mxu0 %v7653_v30  ;;  %v7675_v0 = vld [vmem:[#allocation2 + $0x1a8] sm:$0xff]  ;;  %v7676_v35 = vld [vmem:[#allocation2 + $0x1a0] sm:$0xff]  ;;  %v7677_v10 = vld [vmem:[#allocation2 + $0x198] sm:$0xff] }
 0x574   : > { %2061 = vmatmul.mubr.f32.gmra.mxu1 %v1840_v58  ;;  %v1842_v16 = vmul.f32 %v1826_v46, %v8998_v6  ;;  %v1812_v45 = vmul.f32 %v1796_v55, %v1476_v25  ;;  %2296 = vmatpush1.msra.mxu0 %v7654_v20  ;;  %v1845_v56 = vmul.f32 %v1829_v23, %v1429_v54  ;;  %v7673_v25 = vld [vmem:[#allocation2 + $0x1b8] sm:$0xff]  ;;  %v7678_v48 = vld [vmem:[#allocation2 + $0x190] sm:$0xff]  ;;  %v7679_v2 = vld [vmem:[#allocation2 + $0x188] sm:$0xff] }
 0x575   : > { %v1847_v29 = vmul.f32 %v1831_v42, %v1431_v28  ;;  %v1814_v59 = vmul.f32 %v1798_v12, %v1478_v18  ;;  %2195 = vmatpush1.msra.mxu1 %v7658_v39  ;;  %2297 = vmatprep.subr.mxu0 %v7655_v57  ;;  %v7680_v7 = vld [vmem:[#allocation2 + $0x180] sm:$0xff]  ;;  %v7681_v13 = vld [vmem:[#allocation2 + $0x178] sm:$0xff]  ;;  %v7682_v11 = vld [vmem:[#allocation2 + $0x170] sm:$0xff] }
 0x576   : > { %2150 = vmatmul.mubr.f32.gmra.mxu0 %v1842_v16  ;;  %v1828_v51 = vadd.f32 1.0, %v1812_v45  ;;  %2196 = vmatprep.subr.mxu1 %v7659_v44  ;;  %v7683_v30 = vld [vmem:[#allocation2 + $0x168] sm:$0xff]  ;;  %v7684_v63 = vld [vmem:[#allocation2 + $0x160] sm:$0xff]  ;;  %v7685_v22 = vld [vmem:[#allocation2 + $0x158] sm:$0xff] }
 0x577   : > { %2066 = vmatprep.mubr.f32.mxu1 %v1845_v56  ;;  %2155 = vmatprep.mubr.f32.mxu0 %v1847_v29  ;;  %v1830_v8 = vadd.f32 1.0, %v1814_v59  ;;  %v7686_v40 = vld [vmem:[#allocation2 + $0x150] sm:$0xff]  ;;  %v7687_v19 = vld [vmem:[#allocation2 + $0x148] sm:$0xff]  ;;  %v7688_v38 = vld [vmem:[#allocation2 + $0x140] sm:$0xff] }
 0x578   : > { %v1844_v6 = vmul.f32 %v1828_v51, %v1428_v43  ;;  %2197 = vmatpush1.msra.mxu1 %v7660_v60  ;;  %2298 = vmatpush1.msra.mxu0 %v7656_v26  ;;  %v7689_v20 = vld [vmem:[#allocation2 + $0x138] sm:$0xff]  ;;  %v7691_v27 = vld [vmem:[#allocation2 + $0x128] sm:$0xff]  ;;  %v7692_v4 = vld [vmem:[#allocation2 + $0x120] sm:$0xff] }
 0x579   : > { %v1846_v61 = vmul.f32 %v1830_v8, %v1430_v62  ;;  %2198 = vmatprep.subr.mxu1 %v7661_v36  ;;  %2299 = vmatprep.subr.mxu0 %v7657_v52  ;;  %v7693_v33 = vld [vmem:[#allocation2 + $0x118] sm:$0xff]  ;;  %v7694_v57 = vld [vmem:[#allocation2 + $0x110] sm:$0xff]  ;;  %v7695_v3 = vld [vmem:[#allocation2 + $0x108] sm:$0xff] }
 0x57a   : > { %2067 = vmatmul.mubr.f32.gmra.mxu1 %v1844_v6  ;;  %2300 = vmatpush1.msra.mxu0 %v7658_v39  ;;  %v7696_v54 = vld [vmem:[#allocation2 + $0x100] sm:$0xff]  ;;  %v9055_v26 = vld [vmem:[%s10980_s9 + $0x8] sm:$0xff] }
 0x57b   : > { %2156 = vmatmul.mubr.f32.gmra.mxu0 %v1846_v61  ;;  %2199 = vmatpush1.msra.mxu1 %v7662_v14  ;;  %v9048_v58 = vld [vmem:[%s10980_s9] sm:$0xff] }
 0x57c   : > { %2200 = vmatprep.subr.mxu1 %v7663_v1  ;;  %2301 = vmatprep.subr.mxu0 %v7659_v44  ;;  %v11193_v46 = vld [vmem:[#allocation39_spill] sm:$0xff]  ;;  %v11196_v44 = vld [vmem:[#allocation32_spill] sm:$0xff] }
 0x57d   : > { %2201 = vmatpush1.msra.mxu1 %v7664_v17  ;;  %2302 = vmatpush1.msra.mxu0 %v7660_v60  ;;  %v1979_v55 = vrot.slane %v9048_v58, %v11193_v46  ;;  %v1983_v31 = vrot.slane %v9055_v26, %v11193_v46  ;;  %v11194_v24 = vld [vmem:[#allocation31_spill] sm:$0xff]  ;;  %v11198_v60 = vld [vmem:[#allocation33_spill] sm:$0xff] }
 0x57e   : > { %2202 = vmatprep.subr.mxu1 %v7665_v15  ;;  %2303 = vmatprep.subr.mxu0 %v7661_v36  ;;  %v11200_v36 = vld [vmem:[#allocation34_spill] sm:$0xff] }
 0x57f   : > { %2203 = vmatpush2.msra.mxu1 %v7666_v53  ;;  %2304 = vmatpush1.msra.mxu0 %v7662_v14 }
 0x580   : > { %2204 = vmatprep.subr.mxu1 %v7667_v21  ;;  %2305 = vmatprep.subr.mxu0 %v7663_v1 }
 0x581   : > { %2205 = vmatpush2.msra.mxu1 %v7668_v41  ;;  %2306 = vmatpush1.msra.mxu0 %v7664_v17 }
 0x582   : > { %2206 = vmatprep.subr.mxu1 %v7669_v32  ;;  %2307 = vmatprep.subr.mxu0 %v7665_v15 }
 0x583   : > { %2207 = vmatpush2.msra.mxu1 %v7670_v37  ;;  %2308 = vmatpush2.msra.mxu0 %v7666_v53 }
 0x584   : > { %2208 = vmatprep.subr.mxu1 %v7671_v5  ;;  %2309 = vmatprep.subr.mxu0 %v7667_v21 }
 0x585   : > { %2209 = vmatpush2.msra.mxu1 %v7672_v9  ;;  %2310 = vmatpush2.msra.mxu0 %v7668_v41 }
 0x586   : > { %2210 = vmatprep.subr.mxu1 %v7673_v25  ;;  %2311 = vmatprep.subr.mxu0 %v7669_v32 }
 0x587   : > { %2211 = vmatpush2.msra.mxu1 %v7674_v34  ;;  %2312 = vmatpush2.msra.mxu0 %v7670_v37 }
 0x588   : > { %2212 = vmatprep.subr.mxu1 %v7675_v0  ;;  %2313 = vmatprep.subr.mxu0 %v7671_v5 }
 0x589   : > { %2213 = vmatpush2.msra.mxu1 %v7676_v35  ;;  %2314 = vmatpush2.msra.mxu0 %v7672_v9  ;;  %v11202_v9 = vld [vmem:[#allocation35_spill] sm:$0xff] }
 0x58a   : > { %2214 = vmatprep.subr.mxu1 %v7677_v10  ;;  %2315 = vmatprep.subr.mxu0 %v7673_v25 }
 0x58b   : > { %2215 = vmatpush2.msra.mxu1 %v7678_v48  ;;  %2316 = vmatpush2.msra.mxu0 %v7674_v34 }
 0x58c   : > { %2216 = vmatprep.subr.mxu1 %v7679_v2  ;;  %2317 = vmatprep.subr.mxu0 %v7675_v0 }
 0x58d   : > { %2217 = vmatpush2.msra.mxu1 %v7680_v7  ;;  %2318 = vmatpush2.msra.mxu0 %v7676_v35  ;;  %v11204_v35 = vld [vmem:[#allocation36_spill] sm:$0xff] }
 0x58e   : > { %2218 = vmatprep.subr.mxu1 %v7681_v13  ;;  %2319 = vmatprep.subr.mxu0 %v7677_v10 }
 0x58f   : > { %2219 = vmatpush2.msra.mxu1 %v7682_v11  ;;  %2320 = vmatpush2.msra.mxu0 %v7678_v48 }
 0x590   : > { %2220 = vmatprep.subr.mxu1 %v7683_v30  ;;  %2321 = vmatprep.subr.mxu0 %v7679_v2 }
 0x591   : > { %2221 = vmatpush2.msra.mxu1 %v7684_v63  ;;  %2322 = vmatpush2.msra.mxu0 %v7680_v7 }
 0x592   : > { %2222 = vmatprep.subr.mxu1 %v7685_v22  ;;  %2323 = vmatprep.subr.mxu0 %v7681_v13 }
 0x593   : > { %2223 = vmatpush2.msra.mxu1 %v7686_v40  ;;  %2324 = vmatpush2.msra.mxu0 %v7682_v11 }
 0x594   : > { %2224 = vmatprep.subr.mxu1 %v7687_v19  ;;  %2325 = vmatprep.subr.mxu0 %v7683_v30  ;;  %v11206_v30 = vld [vmem:[#allocation37_spill] sm:$0xff] }
 0x595   : > { %2225 = vmatpush2.msra.mxu1 %v7688_v38  ;;  %2326 = vmatpush2.msra.mxu0 %v7684_v63 }
 0x596   : > { %2226 = vmatprep.subr.mxu1 %v7689_v20  ;;  %2327 = vmatprep.subr.mxu0 %v7685_v22  ;;  %v11208_v22 = vld [vmem:[#allocation38_spill] sm:$0xff] }
 0x597   : > { %2227 = vmatpush2.msra.mxu1 %v7690_v49  ;;  %2328 = vmatpush2.msra.mxu0 %v7686_v40 }
 0x598   : > { %2228 = vmatprep.subr.mxu1 %v7691_v27  ;;  %2329 = vmatprep.subr.mxu0 %v7687_v19  ;;  %v2473_v19 = vld [vmem:[#allocation10 + $0x1e8] sm:$0xff] }
 0x599   : > { %2229 = vmatpush2.msra.mxu1 %v7692_v4  ;;  %2330 = vmatpush2.msra.mxu0 %v7688_v38  ;;  %v2475_v38 = vld [vmem:[#allocation10 + $0x1f8] sm:$0xff] }
 0x59a   : > { %2230 = vmatprep.subr.mxu1 %v7693_v33  ;;  %2331 = vmatprep.subr.mxu0 %v7689_v20  ;;  %v2472_v20 = vld [vmem:[#allocation10 + $0x1e0] sm:$0xff] }
 0x59b   : > { %2231 = vmatpush2.msra.mxu1 %v7694_v57  ;;  %2332 = vmatpush2.msra.mxu0 %v7690_v49  ;;  %v2469_v49 = vld [vmem:[#allocation10 + $0x1c8] sm:$0xff] }
 0x59c   : > { %2232 = vmatprep.subr.mxu1 %v7695_v3  ;;  %2333 = vmatprep.subr.mxu0 %v7691_v27  ;;  %v2468_v27 = vld [vmem:[#allocation10 + $0x1c0] sm:$0xff] }
 0x59d   : > { %2233 = vmatpush2.msra.mxu1 %v7696_v54  ;;  %2334 = vmatpush2.msra.mxu0 %v7692_v4  ;;  %v2465_v4 = vld [vmem:[#allocation10 + $0x1a8] sm:$0xff] }
 0x59e   : > { %2335 = vmatprep.subr.mxu0 %v7693_v33  ;;  %2562 = vmatprep.subr.mxu1 %v2473_v19  ;;  %v2464_v33 = vld [vmem:[#allocation10 + $0x1a0] sm:$0xff] }
 0x59f   : > { %2336 = vmatpush2.msra.mxu0 %v7694_v57  ;;  %v2461_v57 = vld [vmem:[#allocation10 + $0x188] sm:$0xff] }
 0x5a0   : > { %2337 = vmatprep.subr.mxu0 %v7695_v3  ;;  %v2460_v3 = vld [vmem:[#allocation10 + $0x180] sm:$0xff] }
 0x5a1   : > { %2338 = vmatpush2.msra.mxu0 %v7696_v54  ;;  %v2457_v54 = vld [vmem:[#allocation10 + $0x168] sm:$0xff] }
 0x5a2   : > { %2651 = vmatprep.subr.mxu0 %v2475_v38  ;;  %v2467_v38 = vld [vmem:[#allocation10 + $0x1b8] sm:$0xff] }
 0x618   : > { %v2050_v28 = vpop.f32.mrf.mxu1 }
 0x619   : > { %v2051_v23 = vadd.f32 %v2050_v28, %v1979_v55  ;;  %v2452_v28 = vld [vmem:[#allocation10 + $0x140] sm:$0xff] }
 0x61a   : > { %v2052_v12 = vpop.f32.mrf.mxu1 }
 0x61b   : > { %v2139_v42 = vpop.f32.mrf.mxu0  ;;  %v2053_v52 = vadd.f32 %v2052_v12, %v1983_v31  ;;  %v2445_v12 = vld [vmem:[#allocation10 + $0x108] sm:$0xff] }
 0x61c   : > { %v2140_v18 = vadd.f32 %v2139_v42, %v2051_v23  ;;  %v2449_v23 = vld [vmem:[#allocation10 + $0x128] sm:$0xff]  ;;  %v2448_v42 = vld [vmem:[#allocation10 + $0x120] sm:$0xff] }
 0x61d   : > { %v2141_v16 = vpop.f32.mrf.mxu0  ;;  %v2056_v45 = vpop.f32.mrf.mxu1 }
 0x61e   : > { %v2142_v56 = vadd.f32 %v2141_v16, %v2053_v52  ;;  %v2057_v29 = vadd.f32 %v2056_v45, %v1979_v55  ;;  %v9063_v50 = vadd.f32 %v2140_v18, %v11196_v44  ;;  %v2444_v52 = vld [vmem:[#allocation10 + $0x100] sm:$0xff]  ;;  %v2441_v18 = vld [vmem:[#allocation10 + $0xe8] sm:$0xff] }
 0x61f   : > { %v2145_v59 = vpop.f32.mrf.mxu0  ;;  %v2058_v39 = vpop.f32.mrf.mxu1  ;;  %v2440_v16 = vld [vmem:[#allocation10 + $0xe0] sm:$0xff]  ;;  %v2437_v45 = vld [vmem:[#allocation10 + $0xc8] sm:$0xff] }
 0x620   : > { %v9060_v43 = vadd.f32 %v2142_v56, %v11194_v24  ;;  %v2059_v51 = vadd.f32 %v2058_v39, %v1983_v31  ;;  %11197 = vst [vmem:[#allocation42_spill] sm:$0xff] %v9063_v50  ;;  %v2146_v62 = vadd.f32 %v2145_v59, %v2057_v29  ;;  %v2436_v56 = vld [vmem:[#allocation10 + $0xc0] sm:$0xff]  ;;  %v2433_v29 = vld [vmem:[#allocation10 + $0xa8] sm:$0xff] }
 0x621   : > { %v2147_v8 = vpop.f32.mrf.mxu0  ;;  %v2432_v59 = vld [vmem:[#allocation10 + $0xa0] sm:$0xff]  ;;  %v2429_v39 = vld [vmem:[#allocation10 + $0x88] sm:$0xff] }
 0x622   : > { %11195 = vst [vmem:[#allocation41_spill] sm:$0xff] %v9060_v43  ;;  %v2148_v6 = vadd.f32 %v2147_v8, %v2059_v51  ;;  %2234 = vmatprep.mubr.f32.mxu1 %v9060_v43  ;;  %v9071_v14 = vadd.f32 %v2146_v62, %v11200_v36  ;;  %v2428_v24 = vld [vmem:[#allocation10 + $0x80] sm:$0xff]  ;;  %v2425_v51 = vld [vmem:[#allocation10 + $0x68] sm:$0xff] }
 0x623   : > { %2235 = vmatmul.mubr.f32.vlgmr.msra.gmra.mxu1 %v9063_v50  ;;  %v2424_v44 = vld [vmem:[#allocation10 + $0x60] sm:$0xff]  ;;  %v2421_v62 = vld [vmem:[#allocation10 + $0x48] sm:$0xff] }
 0x624   : > { %v9068_v61 = vadd.f32 %v2148_v6, %v11198_v60  ;;  %11201 = vst [vmem:[#allocation44_spill] sm:$0xff] %v9071_v14  ;;  %2563 = vmatpush1.msra.mxu1 %v2472_v20  ;;  %v2420_v8 = vld [vmem:[#allocation10 + $0x40] sm:$0xff]  ;;  %v2417_v6 = vld [vmem:[#allocation10 + $0x28] sm:$0xff] }
 0x625   : > { %2564 = vmatprep.subr.mxu1 %v2469_v49  ;;  %v2416_v60 = vld [vmem:[#allocation10 + $0x20] sm:$0xff]  ;;  %v2413_v36 = vld [vmem:[#allocation10 + $0x8] sm:$0xff]  ;;  %v2466_v49 = vld [vmem:[#allocation10 + $0x1b0] sm:$0xff] }
 0x626   : > { %11199 = vst [vmem:[#allocation51_spill] sm:$0xff] %v9068_v61  ;;  %2240 = vmatprep.mubr.f32.mxu1 %v9068_v61  ;;  %2565 = vmatpush1.msra.mxu1 %v2468_v27  ;;  %v2463_v27 = vld [vmem:[#allocation10 + $0x198] sm:$0xff] }
 0x627   : > { %2241 = vmatmul.mubr.f32.gmra.mxu1 %v9071_v14  ;;  %2566 = vmatprep.subr.mxu1 %v2465_v4  ;;  %v2462_v4 = vld [vmem:[#allocation10 + $0x190] sm:$0xff] }
 0x628   : > { %2567 = vmatpush1.msra.mxu1 %v2464_v33  ;;  %v2459_v33 = vld [vmem:[#allocation10 + $0x178] sm:$0xff] }
 0x629   : > { %2568 = vmatprep.subr.mxu1 %v2461_v57  ;;  %v2458_v57 = vld [vmem:[#allocation10 + $0x170] sm:$0xff] }
 0x62a   : > { %2569 = vmatpush1.msra.mxu1 %v2460_v3  ;;  %v2455_v3 = vld [vmem:[#allocation10 + $0x158] sm:$0xff] }
 0x62b   : > { %2570 = vmatprep.subr.mxu1 %v2457_v54  ;;  %v2454_v54 = vld [vmem:[#allocation10 + $0x150] sm:$0xff] }
 0x634   : > { %v2062_v1 = vpop.f32.mrf.mxu1 }
 0x635   : > { %v2063_v17 = vadd.f32 %v2062_v1, %v1979_v55  ;;  %v2412_v1 = vld [vmem:[#allocation10] sm:$0xff] }
 0x636   : > { %v2151_v15 = vpop.f32.mrf.mxu0  ;;  %v2064_v53 = vpop.f32.mrf.mxu1 }
 0x637   : > { %v2065_v21 = vadd.f32 %v2064_v53, %v1983_v31  ;;  %v2152_v41 = vadd.f32 %v2151_v15, %v2063_v17  ;;  %v2537_v17 = vld [vmem:[#allocation10 + $0x3e8] sm:$0xff]  ;;  %v2536_v15 = vld [vmem:[#allocation10 + $0x3e0] sm:$0xff] }
 0x638   : > { %v2153_v32 = vpop.f32.mrf.mxu0  ;;  %v2533_v53 = vld [vmem:[#allocation10 + $0x3c8] sm:$0xff] }
 0x639   : > { %v2154_v37 = vadd.f32 %v2153_v32, %v2065_v21  ;;  %v9079_v10 = vadd.f32 %v2152_v41, %v11204_v35  ;;  %v2532_v21 = vld [vmem:[#allocation10 + $0x3c0] sm:$0xff]  ;;  %v2529_v41 = vld [vmem:[#allocation10 + $0x3a8] sm:$0xff] }
 0x63a   : > { %v2068_v5 = vpop.f32.mrf.mxu1  ;;  %v2528_v32 = vld [vmem:[#allocation10 + $0x3a0] sm:$0xff] }
 0x63b   : > { %v9076_v25 = vadd.f32 %v2154_v37, %v11202_v9  ;;  %v2069_v34 = vadd.f32 %v2068_v5, %v1979_v55  ;;  %v2157_v0 = vpop.f32.mrf.mxu0  ;;  %11205 = vst [vmem:[#allocation52_spill] sm:$0xff] %v9079_v10  ;;  %v2456_v55 = vld [vmem:[#allocation10 + $0x160] sm:$0xff] }
 0x63c   : > { %v2070_v48 = vpop.f32.mrf.mxu1  ;;  %2571 = vmatpush1.msra.mxu1 %v2456_v55  ;;  %v2451_v55 = vld [vmem:[#allocation10 + $0x138] sm:$0xff] }
 0x63d   : > { %11203 = vst [vmem:[#allocation49_spill] sm:$0xff] %v9076_v25  ;;  %v2071_v2 = vadd.f32 %v2070_v48, %v1983_v31  ;;  %2246 = vmatprep.mubr.f32.mxu1 %v9076_v25  ;;  %v2158_v7 = vadd.f32 %v2157_v0, %v2069_v34  ;;  %v2159_v13 = vpop.f32.mrf.mxu0  ;;  %v2453_v31 = vld [vmem:[#allocation10 + $0x148] sm:$0xff] }
 0x63e   : > { %2247 = vmatmul.mubr.f32.gmra.mxu1 %v9079_v10  ;;  %2572 = vmatprep.subr.mxu1 %v2453_v31  ;;  %v2450_v31 = vld [vmem:[#allocation10 + $0x130] sm:$0xff] }
 0x63f   : > { %v2160_v11 = vadd.f32 %v2159_v13, %v2071_v2  ;;  %v9087_v40 = vadd.f32 %v2158_v7, %v11208_v22  ;;  %2573 = vmatpush1.msra.mxu1 %v2452_v28  ;;  %v2474_v13 = vld [vmem:[#allocation10 + $0x1f0] sm:$0xff]  ;;  %v2447_v28 = vld [vmem:[#allocation10 + $0x118] sm:$0xff] }
 0x640   : > { %2574 = vmatprep.subr.mxu1 %v2449_v23  ;;  %v2470_v22 = vld [vmem:[#allocation10 + $0x1d0] sm:$0xff] }
 0x641   : > { %v9084_v63 = vadd.f32 %v2160_v11, %v11206_v30  ;;  %11209 = vst [vmem:[#allocation46_spill] sm:$0xff] %v9087_v40  ;;  %2575 = vmatpush1.msra.mxu1 %v2448_v42  ;;  %v2471_v30 = vld [vmem:[#allocation10 + $0x1d8] sm:$0xff]  ;;  %v2446_v23 = vld [vmem:[#allocation10 + $0x110] sm:$0xff] }
 0x642   : > { %2576 = vmatprep.subr.mxu1 %v2445_v12  ;;  %v2443_v42 = vld [vmem:[#allocation10 + $0xf8] sm:$0xff]  ;;  %v2442_v12 = vld [vmem:[#allocation10 + $0xf0] sm:$0xff] }
 0x643   : > { %11207 = vst [vmem:[#allocation50_spill] sm:$0xff] %v9084_v63  ;;  %2252 = vmatprep.mubr.f32.mxu1 %v9084_v63  ;;  %2577 = vmatpush1.msra.mxu1 %v2444_v52  ;;  %v2439_v52 = vld [vmem:[#allocation10 + $0xd8] sm:$0xff] }
 0x644   : > { %2253 = vmatmul.mubr.f32.gmra.mxu1 %v9087_v40  ;;  %2578 = vmatprep.subr.mxu1 %v2441_v18  ;;  %v2438_v18 = vld [vmem:[#allocation10 + $0xd0] sm:$0xff] }
 0x645   : > { %2579 = vmatpush1.msra.mxu1 %v2440_v16  ;;  %v2435_v16 = vld [vmem:[#allocation10 + $0xb8] sm:$0xff] }
 0x646   : > { %2580 = vmatprep.subr.mxu1 %v2437_v45  ;;  %v2434_v45 = vld [vmem:[#allocation10 + $0xb0] sm:$0xff] }
 0x647   : > { %2581 = vmatpush1.msra.mxu1 %v2436_v56 }
 0x648   : > { %2582 = vmatprep.subr.mxu1 %v2433_v29  ;;  %v2431_v29 = vld [vmem:[#allocation10 + $0x98] sm:$0xff] }
 0x649   : > { %2583 = vmatpush1.msra.mxu1 %v2432_v59  ;;  %v2430_v59 = vld [vmem:[#allocation10 + $0x90] sm:$0xff] }
 0x64a   : > { %2584 = vmatprep.subr.mxu1 %v2429_v39 }
 0x64b   : > { %2585 = vmatpush1.msra.mxu1 %v2428_v24 }
 0x64c   : > { %2586 = vmatprep.subr.mxu1 %v2425_v51  ;;  %v2427_v51 = vld [vmem:[#allocation10 + $0x78] sm:$0xff] }
 0x64d   : > { %2587 = vmatpush1.msra.mxu1 %v2424_v44 }
 0x64e   : > { %2588 = vmatprep.subr.mxu1 %v2421_v62  ;;  %v2426_v62 = vld [vmem:[#allocation10 + $0x70] sm:$0xff] }
 0x64f   : > { %2589 = vmatpush1.msra.mxu1 %v2420_v8  ;;  %v2423_v8 = vld [vmem:[#allocation10 + $0x58] sm:$0xff] }
 0x650   : > { %2590 = vmatprep.subr.mxu1 %v2417_v6 }
 0x651   : > { %2591 = vmatpush1.msra.mxu1 %v2416_v60 }
 0x652   : > { %2592 = vmatprep.subr.mxu1 %v2413_v36 }
 0x653   : > { %2593 = vmatpush1.msra.mxu1 %v2412_v1  ;;  %v2422_v1 = vld [vmem:[#allocation10 + $0x50] sm:$0xff] }
 0x654   : > { %2594 = vmatprep.subr.mxu1 %v2537_v17  ;;  %v2419_v17 = vld [vmem:[#allocation10 + $0x38] sm:$0xff] }
 0x655   : > { %2595 = vmatpush2.msra.mxu1 %v2536_v15 }
 0x656   : > { %2596 = vmatprep.subr.mxu1 %v2533_v53 }
 0x657   : > { %2597 = vmatpush2.msra.mxu1 %v2532_v21  ;;  %v2418_v21 = vld [vmem:[#allocation10 + $0x30] sm:$0xff] }
 0x658   : > { %2598 = vmatprep.subr.mxu1 %v2529_v41 }
 0x659   : > { %2599 = vmatpush2.msra.mxu1 %v2528_v32  ;;  %v2415_v32 = vld [vmem:[#allocation10 + $0x18] sm:$0xff] }
 0x6e3   : > { %v2236_v37 = vpop.f32.mrf.mxu1 }
 0x6e4   : > { %v9092_v5 = vsub.f32 %v9063_v50, %v2236_v37  ;;  %v2414_v37 = vld [vmem:[#allocation10 + $0x10] sm:$0xff] }
 0x6e5   : > { %v2238_v9 = vpop.f32.mrf.mxu1 }
 0x6e6   : > { %v9095_v34 = vsub.f32 %v9060_v43, %v2238_v9  ;;  %v2267_v48 = vmul.f32 %v9092_v5, %v9092_v5 }
 0x6e7   : > { %v2242_v0 = vpop.f32.mrf.mxu1 }
 0x6e8   : > { %v2268_v35 = vmul.f32 %v9095_v34, %v9095_v34  ;;  %v9102_v2 = vsub.f32 %v9071_v14, %v2242_v0  ;;  %v2539_v0 = vld [vmem:[#allocation10 + $0x3f8] sm:$0xff] }
 0x6e9   : > { %v2244_v7 = vpop.f32.mrf.mxu1 }
 0x6ea   : > { %v9105_v11 = vsub.f32 %v9068_v61, %v2244_v7  ;;  %2339 = vmatprep.mubr.f32.mxu0 %v2268_v35  ;;  %v2269_v20 = vmul.f32 %v9102_v2, %v9102_v2  ;;  %v2535_v7 = vld [vmem:[#allocation10 + $0x3d8] sm:$0xff] }
 0x6eb   : > { %2340 = vmatmul.mubr.f32.vlgmr.msra.gmra.mxu0 %v2267_v48  ;;  %v2538_v48 = vld [vmem:[#allocation10 + $0x3f0] sm:$0xff] }
 0x6ec   : > { %v2270_v19 = vmul.f32 %v9105_v11, %v9105_v11  ;;  %2652 = vmatpush1.msra.mxu0 %v2474_v13  ;;  %v2534_v13 = vld [vmem:[#allocation10 + $0x3d0] sm:$0xff] }
 0x6ed   : > { %2653 = vmatprep.subr.mxu0 %v2471_v30  ;;  %v2531_v30 = vld [vmem:[#allocation10 + $0x3b8] sm:$0xff] }
 0x6ee   : > { %2345 = vmatprep.mubr.f32.mxu0 %v2270_v19  ;;  %2654 = vmatpush1.msra.mxu0 %v2470_v22  ;;  %v2530_v22 = vld [vmem:[#allocation10 + $0x3b0] sm:$0xff]  ;;  %v2525_v19 = vld [vmem:[#allocation10 + $0x388] sm:$0xff] }
 0x6ef   : > { %2346 = vmatmul.mubr.f32.gmra.mxu0 %v2269_v20  ;;  %2655 = vmatprep.subr.mxu0 %v2467_v38  ;;  %v2527_v38 = vld [vmem:[#allocation10 + $0x398] sm:$0xff]  ;;  %v2524_v20 = vld [vmem:[#allocation10 + $0x380] sm:$0xff] }
 0x6f0   : > { %2656 = vmatpush1.msra.mxu0 %v2466_v49  ;;  %2600 = vmatprep.subr.mxu1 %v2525_v19  ;;  %v2526_v49 = vld [vmem:[#allocation10 + $0x390] sm:$0xff]  ;;  %v2481_v19 = vld [vmem:[#allocation10 + $0x228] sm:$0xff] }
 0x6f1   : > { %2657 = vmatprep.subr.mxu0 %v2463_v27  ;;  %v2521_v27 = vld [vmem:[#allocation10 + $0x368] sm:$0xff]  ;;  %2601 = vmatpush2.msra.mxu1 %v2524_v20  ;;  %v2480_v20 = vld [vmem:[#allocation10 + $0x220] sm:$0xff] }
 0x6f2   : > { %2658 = vmatpush1.msra.mxu0 %v2462_v4  ;;  %v2523_v4 = vld [vmem:[#allocation10 + $0x378] sm:$0xff]  ;;  %2602 = vmatprep.subr.mxu1 %v2521_v27  ;;  %v2477_v27 = vld [vmem:[#allocation10 + $0x208] sm:$0xff] }
 0x6f3   : > { %2659 = vmatprep.subr.mxu0 %v2459_v33  ;;  %v2520_v33 = vld [vmem:[#allocation10 + $0x360] sm:$0xff] }
 0x6f4   : > { %2660 = vmatpush1.msra.mxu0 %v2458_v57  ;;  %v2522_v57 = vld [vmem:[#allocation10 + $0x370] sm:$0xff]  ;;  %2603 = vmatpush2.msra.mxu1 %v2520_v33  ;;  %v2476_v33 = vld [vmem:[#allocation10 + $0x200] sm:$0xff] }
 0x6f5   : > { %2661 = vmatprep.subr.mxu0 %v2455_v3  ;;  %v2517_v3 = vld [vmem:[#allocation10 + $0x348] sm:$0xff] }
 0x6f6   : > { %2662 = vmatpush1.msra.mxu0 %v2454_v54  ;;  %v2519_v54 = vld [vmem:[#allocation10 + $0x358] sm:$0xff]  ;;  %2604 = vmatprep.subr.mxu1 %v2517_v3  ;;  %v3203_v3 = vld [vmem:[#allocation13 + $0xf8] sm:$0xff] }
 0x6f7   : > { %2663 = vmatprep.subr.mxu0 %v2451_v55  ;;  %v2516_v55 = vld [vmem:[#allocation10 + $0x340] sm:$0xff] }
 0x6f8   : > { %2664 = vmatpush1.msra.mxu0 %v2450_v31  ;;  %v2518_v31 = vld [vmem:[#allocation10 + $0x350] sm:$0xff]  ;;  %2605 = vmatpush2.msra.mxu1 %v2516_v55 }
 0x6f9   : > { %2665 = vmatprep.subr.mxu0 %v2447_v28  ;;  %v2513_v28 = vld [vmem:[#allocation10 + $0x328] sm:$0xff] }
 0x6fa   : > { %2666 = vmatpush1.msra.mxu0 %v2446_v23  ;;  %v2515_v23 = vld [vmem:[#allocation10 + $0x338] sm:$0xff]  ;;  %2606 = vmatprep.subr.mxu1 %v2513_v28 }
 0x6fb   : > { %2667 = vmatprep.subr.mxu0 %v2443_v42  ;;  %v2512_v42 = vld [vmem:[#allocation10 + $0x320] sm:$0xff] }
 0x6fc   : > { %2668 = vmatpush1.msra.mxu0 %v2442_v12  ;;  %v2514_v12 = vld [vmem:[#allocation10 + $0x330] sm:$0xff]  ;;  %2607 = vmatpush2.msra.mxu1 %v2512_v42 }
 0x6fd   : > { %2669 = vmatprep.subr.mxu0 %v2439_v52  ;;  %v2509_v52 = vld [vmem:[#allocation10 + $0x308] sm:$0xff] }
 0x6fe   : > { %v2248_v56 = vpop.f32.mrf.mxu1  ;;  %2670 = vmatpush1.msra.mxu0 %v2438_v18  ;;  %v2511_v18 = vld [vmem:[#allocation10 + $0x318] sm:$0xff]  ;;  %2608 = vmatprep.subr.mxu1 %v2509_v52 }
 0x6ff   : > { %2671 = vmatprep.subr.mxu0 %v2435_v16  ;;  %v9112_v39 = vsub.f32 %v9079_v10, %v2248_v56  ;;  %v2508_v16 = vld [vmem:[#allocation10 + $0x300] sm:$0xff]  ;;  %v2505_v56 = vld [vmem:[#allocation10 + $0x2e8] sm:$0xff] }
 0x700   : > { %v2250_v24 = vpop.f32.mrf.mxu1  ;;  %2672 = vmatpush1.msra.mxu0 %v2434_v45  ;;  %v2510_v45 = vld [vmem:[#allocation10 + $0x310] sm:$0xff]  ;;  %2609 = vmatpush2.msra.mxu1 %v2508_v16 }
 0x701   : > { %v9115_v44 = vsub.f32 %v9076_v25, %v2250_v24  ;;  %2673 = vmatprep.subr.mxu0 %v2431_v29  ;;  %v2271_v60 = vmul.f32 %v9112_v39, %v9112_v39  ;;  %v2507_v29 = vld [vmem:[#allocation10 + $0x2f8] sm:$0xff]  ;;  %2610 = vmatprep.subr.mxu1 %v2505_v56  ;;  %v2506_v24 = vld [vmem:[#allocation10 + $0x2f0] sm:$0xff] }
 0x702   : > { %2674 = vmatpush1.msra.mxu0 %v2430_v59  ;;  %v2504_v59 = vld [vmem:[#allocation10 + $0x2e0] sm:$0xff] }
 0x703   : > { %v2272_v6 = vmul.f32 %v9115_v44, %v9115_v44  ;;  %2675 = vmatprep.subr.mxu0 %v2427_v51  ;;  %2611 = vmatpush2.msra.mxu1 %v2504_v59  ;;  %v2501_v51 = vld [vmem:[#allocation10 + $0x2c8] sm:$0xff] }
 0x704   : > { %v2254_v36 = vpop.f32.mrf.mxu1  ;;  %2676 = vmatpush1.msra.mxu0 %v2426_v62  ;;  %v2503_v62 = vld [vmem:[#allocation10 + $0x2d8] sm:$0xff]  ;;  %2612 = vmatprep.subr.mxu1 %v2501_v51 }
 0x705   : > { %2351 = vmatprep.mubr.f32.mxu0 %v2272_v6  ;;  %2677 = vmatprep.subr.mxu0 %v2423_v8  ;;  %v9122_v15 = vsub.f32 %v9087_v40, %v2254_v36  ;;  %v2500_v8 = vld [vmem:[#allocation10 + $0x2c0] sm:$0xff]  ;;  %v2502_v6 = vld [vmem:[#allocation10 + $0x2d0] sm:$0xff]  ;;  %v2499_v36 = vld [vmem:[#allocation10 + $0x2b8] sm:$0xff] }
 0x706   : > { %v2256_v53 = vpop.f32.mrf.mxu1  ;;  %2352 = vmatmul.mubr.f32.gmra.mxu0 %v2271_v60  ;;  %2613 = vmatpush2.msra.mxu1 %v2500_v8  ;;  %v2497_v60 = vld [vmem:[#allocation10 + $0x2a8] sm:$0xff] }
 0x707   : > { %v9125_v41 = vsub.f32 %v9084_v63, %v2256_v53  ;;  %2678 = vmatpush1.msra.mxu0 %v2422_v1  ;;  %v2273_v35 = vmul.f32 %v9122_v15, %v9122_v15  ;;  %v2496_v1 = vld [vmem:[#allocation10 + $0x2a0] sm:$0xff]  ;;  %2614 = vmatprep.subr.mxu1 %v2497_v60  ;;  %v2493_v53 = vld [vmem:[#allocation10 + $0x288] sm:$0xff] }
 0x708   : > { %2679 = vmatprep.subr.mxu0 %v2419_v17  ;;  %v2498_v17 = vld [vmem:[#allocation10 + $0x2b0] sm:$0xff]  ;;  %2615 = vmatpush2.msra.mxu1 %v2496_v1 }
 0x709   : > { %v2274_v9 = vmul.f32 %v9125_v41, %v9125_v41  ;;  %2680 = vmatpush1.msra.mxu0 %v2418_v21  ;;  %v2495_v21 = vld [vmem:[#allocation10 + $0x298] sm:$0xff]  ;;  %2616 = vmatprep.subr.mxu1 %v2493_v53 }
 0x70a   : > { %2681 = vmatprep.subr.mxu0 %v2415_v32  ;;  %v2492_v32 = vld [vmem:[#allocation10 + $0x280] sm:$0xff] }
 0x70b   : > { %2357 = vmatprep.mubr.f32.mxu0 %v2274_v9  ;;  %2682 = vmatpush1.msra.mxu0 %v2414_v37  ;;  %v2494_v37 = vld [vmem:[#allocation10 + $0x290] sm:$0xff]  ;;  %v2489_v9 = vld [vmem:[#allocation10 + $0x268] sm:$0xff] }
 0x70c   : > { %2358 = vmatmul.mubr.f32.gmra.mxu0 %v2273_v35  ;;  %2683 = vmatprep.subr.mxu0 %v2539_v0  ;;  %v2491_v0 = vld [vmem:[#allocation10 + $0x278] sm:$0xff]  ;;  %v2488_v35 = vld [vmem:[#allocation10 + $0x260] sm:$0xff] }
 0x70d   : > { %2684 = vmatpush2.msra.mxu0 %v2538_v48  ;;  %v2490_v48 = vld [vmem:[#allocation10 + $0x270] sm:$0xff]  ;;  %2617 = vmatpush2.msra.mxu1 %v2492_v32 }
 0x70e   : > { %2685 = vmatprep.subr.mxu0 %v2535_v7  ;;  %v2485_v7 = vld [vmem:[#allocation10 + $0x248] sm:$0xff]  ;;  %2618 = vmatprep.subr.mxu1 %v2489_v9  ;;  %v3266_v9 = vld [vmem:[#allocation13 + $0x2f0] sm:$0xff] }
 0x70f   : > { %2686 = vmatpush2.msra.mxu0 %v2534_v13  ;;  %v2487_v13 = vld [vmem:[#allocation10 + $0x258] sm:$0xff]  ;;  %2619 = vmatpush2.msra.mxu1 %v2488_v35  ;;  %v3265_v35 = vld [vmem:[#allocation13 + $0x2e8] sm:$0xff] }
 0x710   : > { %2687 = vmatprep.subr.mxu0 %v2531_v30  ;;  %v2484_v30 = vld [vmem:[#allocation10 + $0x240] sm:$0xff]  ;;  %2620 = vmatprep.subr.mxu1 %v2485_v7 }
 0x711   : > { %2688 = vmatpush2.msra.mxu0 %v2530_v22  ;;  %v2486_v22 = vld [vmem:[#allocation10 + $0x250] sm:$0xff]  ;;  %2621 = vmatpush2.msra.mxu1 %v2484_v30  ;;  %v3264_v30 = vld [vmem:[#allocation13 + $0x2e0] sm:$0xff] }
 0x712   : > { %2689 = vmatprep.subr.mxu0 %v2527_v38  ;;  %v2483_v38 = vld [vmem:[#allocation10 + $0x238] sm:$0xff]  ;;  %2622 = vmatprep.subr.mxu1 %v2481_v19  ;;  %v3199_v19 = vld [vmem:[#allocation13 + $0xd8] sm:$0xff] }
 0x713   : > { %2690 = vmatpush2.msra.mxu0 %v2526_v49  ;;  %v2482_v49 = vld [vmem:[#allocation10 + $0x230] sm:$0xff]  ;;  %2623 = vmatpush2.msra.mxu1 %v2480_v20 }
 0x714   : > { %2691 = vmatprep.subr.mxu0 %v2523_v4  ;;  %v2479_v4 = vld [vmem:[#allocation10 + $0x218] sm:$0xff]  ;;  %2624 = vmatprep.subr.mxu1 %v2477_v27 }
 0x715   : > { %2692 = vmatpush2.msra.mxu0 %v2522_v57  ;;  %v2478_v57 = vld [vmem:[#allocation10 + $0x210] sm:$0xff]  ;;  %2625 = vmatpush2.msra.mxu1 %v2476_v33  ;;  %v3262_v27 = vld [vmem:[#allocation13 + $0x2d0] sm:$0xff] }
 0x716   : > { %2693 = vmatprep.subr.mxu0 %v2519_v54  ;;  %v3267_v54 = vld [vmem:[#allocation13 + $0x2f8] sm:$0xff]  ;;  %3308 = vmatprep.subr.mxu1 %v3203_v3  ;;  %v3261_v33 = vld [vmem:[#allocation13 + $0x2c8] sm:$0xff]  ;;  %v3260_v3 = vld [vmem:[#allocation13 + $0x2c0] sm:$0xff] }
 0x717   : > { %2694 = vmatpush2.msra.mxu0 %v2518_v31 }
 0x718   : > { %2695 = vmatprep.subr.mxu0 %v2515_v23 }
 0x719   : > { %2696 = vmatpush2.msra.mxu0 %v2514_v12 }
 0x71a   : > { %2697 = vmatprep.subr.mxu0 %v2511_v18 }
 0x71b   : > { %2698 = vmatpush2.msra.mxu0 %v2510_v45  ;;  %v11210_v45 = vld [vmem:[#allocation28_spill] sm:$0xff] }
 0x71c   : > { %2699 = vmatprep.subr.mxu0 %v2507_v29  ;;  %v9132_v56 = vsub.s32 4, %v11210_v45  ;;  %v11212_v29 = vld [vmem:[#allocation40_spill] sm:$0xff] }
 0x71d   : > { %2700 = vmatpush2.msra.mxu0 %v2506_v24  ;;  %v9136_v59 = vrot.slane %v9048_v58, %v11212_v29  ;;  %v9141_v51 = vrot.slane %v9055_v26, %v11212_v29 }
 0x71e   : > { %2701 = vmatprep.subr.mxu0 %v2503_v62  ;;  %11211 = vst [vmem:[#allocation47_spill] sm:$0xff] %v9132_v56  ;;  %v9151_v1 = vrot.slane %v9048_v58, %v9132_v56 }
 0x71f   : > { %2702 = vmatpush2.msra.mxu0 %v2502_v6  ;;  %v9146_v6 = vrot.slane %v9055_v26, %v9132_v56 }
 0x720   : > { %2703 = vmatprep.subr.mxu0 %v2499_v36 }
 0x721   : > { %2704 = vmatpush2.msra.mxu0 %v2498_v17 }
 0x722   : > { %2705 = vmatprep.subr.mxu0 %v2495_v21 }
 0x723   : > { %2706 = vmatpush2.msra.mxu0 %v2494_v37  ;;  %v3202_v37 = vld [vmem:[#allocation13 + $0xf0] sm:$0xff] }
 0x724   : > { %2707 = vmatprep.subr.mxu0 %v2491_v0  ;;  %v3201_v0 = vld [vmem:[#allocation13 + $0xe8] sm:$0xff] }
 0x725   : > { %2708 = vmatpush2.msra.mxu0 %v2490_v48 }
 0x726   : > { %2709 = vmatprep.subr.mxu0 %v2487_v13  ;;  %v3200_v13 = vld [vmem:[#allocation13 + $0xe0] sm:$0xff] }
 0x727   : > { %2710 = vmatpush2.msra.mxu0 %v2486_v22 }
 0x728   : > { %2711 = vmatprep.subr.mxu0 %v2483_v38  ;;  %v3263_v38 = vld [vmem:[#allocation13 + $0x2d8] sm:$0xff] }
 0x729   : > { %2712 = vmatpush2.msra.mxu0 %v2482_v49  ;;  %v3198_v49 = vld [vmem:[#allocation13 + $0xd0] sm:$0xff] }
 0x72a   : > { %2713 = vmatprep.subr.mxu0 %v2479_v4  ;;  %v3197_v4 = vld [vmem:[#allocation13 + $0xc8] sm:$0xff] }
 0x72b   : > { %2714 = vmatpush2.msra.mxu0 %v2478_v57  ;;  %v3196_v57 = vld [vmem:[#allocation13 + $0xc0] sm:$0xff] }
 0x72c   : > { %3397 = vmatprep.subr.mxu0 %v3267_v54 }
 0x7ab   : > { %v2341_v55 = vpop.f32.mrf.mxu0 }
 0x7ac   : > { %v2342_v31 = vadd.f32 1e-05, %v2341_v55 }
 0x7ad   : > { %v2343_v28 = vpop.f32.mrf.mxu0 }
 0x7ae   : > { %7361 = vrsqrt.f32 %v2342_v31  ;;  %v2344_v23 = vadd.f32 1e-05, %v2343_v28 }
 0x7af   : > { %v2347_v42 = vpop.f32.mrf.mxu0 }
 0x7b0   : > { %7363 = vrsqrt.f32 %v2344_v23  ;;  %v2348_v12 = vadd.f32 1e-05, %v2347_v42 }
 0x7b1   : > { %v2349_v52 = vpop.f32.mrf.mxu0 }
 0x7b2   : > { %7365 = vrsqrt.f32 %v2348_v12  ;;  %v2350_v18 = vadd.f32 1e-05, %v2349_v52 }
 0x7b4   : > { %7367 = vrsqrt.f32 %v2350_v18 }
 0x7bb   : > { %v7362_v16 = vpop.eup %7361 }
 0x7bc   : > { %v2372_v24 = vmul.f32 %v7362_v16, %v9092_v5 }
 0x7bd   : > { %v7364_v62 = vpop.eup %7363 }
 0x7be   : > { %v2373_v8 = vmul.f32 %v7364_v62, %v9095_v34  ;;  %v2388_v36 = vmul.f32 %v9136_v59, %v2372_v24 }
 0x7bf   : > { %v7366_v60 = vpop.eup %7365 }
 0x7c0   : > { %v2389_v5 = vmul.f32 %v9141_v51, %v2373_v8  ;;  %v2374_v17 = vmul.f32 %v7366_v60, %v9102_v2  ;;  %v2404_v32 = vadd.f32 %v9151_v1, %v2388_v36 }
 0x7c1   : > { %v7368_v53 = vpop.eup %7367 }
 0x7c2   : > { %v2405_v21 = vadd.f32 %v9146_v6, %v2389_v5  ;;  %v2375_v34 = vmul.f32 %v7368_v53, %v9105_v11  ;;  %v2390_v26 = vmul.f32 %v9136_v59, %v2374_v17 }
 0x7c4   : > { %2626 = vmatprep.mubr.f32.mxu1 %v2405_v21  ;;  %2715 = vmatprep.mubr.f32.mxu0 %v2405_v21  ;;  %v2391_v58 = vmul.f32 %v9141_v51, %v2375_v34  ;;  %v2406_v7 = vadd.f32 %v9151_v1, %v2390_v26  ;;  %v3259_v21 = vld [vmem:[#allocation13 + $0x2b8] sm:$0xff]  ;;  %v3194_v34 = vld [vmem:[#allocation13 + $0xb0] sm:$0xff] }
 0x7c5   : > { %2627 = vmatmul.mubr.f32.vlgmr.msra.gmra.mxu1 %v2404_v32  ;;  %2716 = vmatmul.mubr.f32.vlgmr.msra.gmra.mxu0 %v2404_v32  ;;  %v3193_v32 = vld [vmem:[#allocation13 + $0xa8] sm:$0xff]  ;;  %v3255_v26 = vld [vmem:[#allocation13 + $0x298] sm:$0xff] }
 0x7c6   : > { %v2353_v2 = vpop.f32.mrf.mxu0  ;;  %v2407_v48 = vadd.f32 %v9146_v6, %v2391_v58  ;;  %3309 = vmatpush1.msra.mxu1 %v3202_v37  ;;  %3398 = vmatpush1.msra.mxu0 %v3266_v9  ;;  %v3190_v37 = vld [vmem:[#allocation13 + $0x90] sm:$0xff]  ;;  %v3189_v58 = vld [vmem:[#allocation13 + $0x88] sm:$0xff] }
 0x7c7   : > { %v2354_v11 = vadd.f32 1e-05, %v2353_v2  ;;  %3310 = vmatprep.subr.mxu1 %v3201_v0  ;;  %3399 = vmatprep.subr.mxu0 %v3265_v35  ;;  %v3254_v9 = vld [vmem:[#allocation13 + $0x290] sm:$0xff]  ;;  %v3253_v0 = vld [vmem:[#allocation13 + $0x288] sm:$0xff]  ;;  %v3188_v35 = vld [vmem:[#allocation13 + $0x80] sm:$0xff] }
 0x7c8   : > { %v2355_v22 = vpop.f32.mrf.mxu0  ;;  %2632 = vmatprep.mubr.f32.mxu1 %v2407_v48  ;;  %2721 = vmatprep.mubr.f32.mxu0 %v2407_v48  ;;  %v3252_v2 = vld [vmem:[#allocation13 + $0x280] sm:$0xff]  ;;  %v3187_v48 = vld [vmem:[#allocation13 + $0x78] sm:$0xff] }
 0x7c9   : > { %7369 = vrsqrt.f32 %v2354_v11  ;;  %v2356_v20 = vadd.f32 1e-05, %v2355_v22  ;;  %2633 = vmatmul.mubr.f32.gmra.mxu1 %v2406_v7  ;;  %2722 = vmatmul.mubr.f32.gmra.mxu0 %v2406_v7  ;;  %v3251_v11 = vld [vmem:[#allocation13 + $0x278] sm:$0xff]  ;;  %v3186_v7 = vld [vmem:[#allocation13 + $0x70] sm:$0xff]  ;;  %v3249_v22 = vld [vmem:[#allocation13 + $0x268] sm:$0xff] }
 0x7ca   : > { %3311 = vmatpush1.msra.mxu1 %v3200_v13  ;;  %3400 = vmatpush1.msra.mxu0 %v3264_v30  ;;  %v3250_v13 = vld [vmem:[#allocation13 + $0x270] sm:$0xff]  ;;  %v3185_v30 = vld [vmem:[#allocation13 + $0x68] sm:$0xff] }
 0x7cb   : > { %7371 = vrsqrt.f32 %v2356_v20  ;;  %3312 = vmatprep.subr.mxu1 %v3199_v19  ;;  %3401 = vmatprep.subr.mxu0 %v3263_v38  ;;  %v3184_v19 = vld [vmem:[#allocation13 + $0x60] sm:$0xff]  ;;  %v3183_v20 = vld [vmem:[#allocation13 + $0x58] sm:$0xff] }
 0x7cc   : > { %v2359_v54 = vpop.f32.mrf.mxu0  ;;  %3313 = vmatpush1.msra.mxu1 %v3198_v49  ;;  %3402 = vmatpush1.msra.mxu0 %v3262_v27  ;;  %v3248_v38 = vld [vmem:[#allocation13 + $0x260] sm:$0xff]  ;;  %v3247_v49 = vld [vmem:[#allocation13 + $0x258] sm:$0xff]  ;;  %v3182_v27 = vld [vmem:[#allocation13 + $0x50] sm:$0xff] }
 0x7cd   : > { %v2360_v55 = vadd.f32 1e-05, %v2359_v54  ;;  %3314 = vmatprep.subr.mxu1 %v3197_v4  ;;  %3403 = vmatprep.subr.mxu0 %v3261_v33  ;;  %v3246_v4 = vld [vmem:[#allocation13 + $0x250] sm:$0xff]  ;;  %v3181_v33 = vld [vmem:[#allocation13 + $0x48] sm:$0xff]  ;;  %v3244_v54 = vld [vmem:[#allocation13 + $0x240] sm:$0xff] }
 0x7ce   : > { %v2361_v31 = vpop.f32.mrf.mxu0  ;;  %3315 = vmatpush1.msra.mxu1 %v3196_v57  ;;  %3404 = vmatpush1.msra.mxu0 %v3260_v3  ;;  %v3245_v57 = vld [vmem:[#allocation13 + $0x248] sm:$0xff]  ;;  %v3180_v3 = vld [vmem:[#allocation13 + $0x40] sm:$0xff] }
 0x7cf   : > { %7373 = vrsqrt.f32 %v2360_v55  ;;  %v2362_v28 = vadd.f32 1e-05, %v2361_v31  ;;  %3405 = vmatprep.subr.mxu0 %v3259_v21  ;;  %v3179_v55 = vld [vmem:[#allocation13 + $0x38] sm:$0xff]  ;;  %v3233_v21 = vld [vmem:[#allocation13 + $0x1e8] sm:$0xff] }
 0x7d0   : > { %v3243_v31 = vld [vmem:[#allocation13 + $0x238] sm:$0xff] }
 0x7d1   : > { %7375 = vrsqrt.f32 %v2362_v28  ;;  %v3178_v28 = vld [vmem:[#allocation13 + $0x30] sm:$0xff] }
 0x7d6   : > { %v7370_v23 = vpop.eup %7369 }
 0x7d7   : > { %v2376_v42 = vmul.f32 %v7370_v23, %v9112_v39  ;;  %v3242_v23 = vld [vmem:[#allocation13 + $0x230] sm:$0xff] }
 0x7d8   : > { %v7372_v12 = vpop.eup %7371 }
 0x7d9   : > { %v2377_v52 = vmul.f32 %v7372_v12, %v9115_v44  ;;  %v2392_v18 = vmul.f32 %v9136_v59, %v2376_v42  ;;  %v3177_v42 = vld [vmem:[#allocation13 + $0x28] sm:$0xff] }
 0x7da   : > { %v3241_v12 = vld [vmem:[#allocation13 + $0x228] sm:$0xff] }
 0x7db   : > { %v2393_v16 = vmul.f32 %v9141_v51, %v2377_v52  ;;  %v2408_v36 = vadd.f32 %v9151_v1, %v2392_v18  ;;  %v3176_v52 = vld [vmem:[#allocation13 + $0x20] sm:$0xff] }
 0x7dc   : > { %v7374_v24 = vpop.eup %7373  ;;  %v3240_v18 = vld [vmem:[#allocation13 + $0x220] sm:$0xff] }
 0x7dd   : > { %v2409_v62 = vadd.f32 %v9146_v6, %v2393_v16  ;;  %v2378_v8 = vmul.f32 %v7374_v24, %v9122_v15  ;;  %v3195_v15 = vld [vmem:[#allocation13 + $0xb8] sm:$0xff] }
 0x7de   : > { %v7376_v60 = vpop.eup %7375  ;;  %3316 = vmatprep.subr.mxu1 %v3195_v15  ;;  %v3175_v16 = vld [vmem:[#allocation13 + $0x18] sm:$0xff]  ;;  %v3298_v15 = vld [vmem:[#allocation13 + $0x3f0] sm:$0xff] }
 0x7df   : > { %2638 = vmatprep.mubr.f32.mxu1 %v2409_v62  ;;  %2727 = vmatprep.mubr.f32.mxu0 %v2409_v62  ;;  %v2379_v5 = vmul.f32 %v7376_v60, %v9125_v41  ;;  %v2394_v39 = vmul.f32 %v9136_v59, %v2378_v8  ;;  %v3258_v41 = vld [vmem:[#allocation13 + $0x2b0] sm:$0xff]  ;;  %v3257_v59 = vld [vmem:[#allocation13 + $0x2a8] sm:$0xff]  ;;  %v3239_v24 = vld [vmem:[#allocation13 + $0x218] sm:$0xff] }
 0x7e0   : > { %2639 = vmatmul.mubr.f32.gmra.mxu1 %v2408_v36  ;;  %2728 = vmatmul.mubr.f32.gmra.mxu0 %v2408_v36  ;;  %v3174_v62 = vld [vmem:[#allocation13 + $0x10] sm:$0xff]  ;;  %v3173_v60 = vld [vmem:[#allocation13 + $0x8] sm:$0xff] }
 0x7e1   : > { %v2395_v44 = vmul.f32 %v9141_v51, %v2379_v5  ;;  %v2410_v53 = vadd.f32 %v9151_v1, %v2394_v39  ;;  %3317 = vmatpush1.msra.mxu1 %v3194_v34  ;;  %3406 = vmatpush1.msra.mxu0 %v3258_v41  ;;  %v3192_v51 = vld [vmem:[#allocation13 + $0xa0] sm:$0xff]  ;;  %v3191_v1 = vld [vmem:[#allocation13 + $0x98] sm:$0xff]  ;;  %v3238_v8 = vld [vmem:[#allocation13 + $0x210] sm:$0xff] }
 0x7e2   : > { %3318 = vmatprep.subr.mxu1 %v3193_v32  ;;  %3407 = vmatprep.subr.mxu0 %v3257_v59  ;;  %v3237_v36 = vld [vmem:[#allocation13 + $0x208] sm:$0xff]  ;;  %v3172_v5 = vld [vmem:[#allocation13] sm:$0xff]  ;;  %v3231_v59 = vld [vmem:[#allocation13 + $0x1d8] sm:$0xff] }
 0x7e3   : > { %v2411_v17 = vadd.f32 %v9146_v6, %v2395_v44  ;;  %v3256_v6 = vld [vmem:[#allocation13 + $0x2a0] sm:$0xff]  ;;  %3319 = vmatpush1.msra.mxu1 %v3192_v51  ;;  %v3235_v44 = vld [vmem:[#allocation13 + $0x1f8] sm:$0xff]  ;;  %v3297_v34 = vld [vmem:[#allocation13 + $0x3e8] sm:$0xff] }
 0x7e4   : > { %3408 = vmatpush1.msra.mxu0 %v3256_v6  ;;  %3320 = vmatprep.subr.mxu1 %v3191_v1  ;;  %v3236_v39 = vld [vmem:[#allocation13 + $0x200] sm:$0xff]  ;;  %v3295_v51 = vld [vmem:[#allocation13 + $0x3d8] sm:$0xff]  ;;  %v3230_v6 = vld [vmem:[#allocation13 + $0x1d0] sm:$0xff] }
 0x7e5   : > { %2644 = vmatprep.mubr.f32.mxu1 %v2411_v17  ;;  %2733 = vmatprep.mubr.f32.mxu0 %v2411_v17  ;;  %v3299_v17 = vld [vmem:[#allocation13 + $0x3f8] sm:$0xff]  ;;  %v3232_v41 = vld [vmem:[#allocation13 + $0x1e0] sm:$0xff]  ;;  %v3294_v1 = vld [vmem:[#allocation13 + $0x3d0] sm:$0xff] }
 0x7e6   : > { %2645 = vmatmul.mubr.f32.gmra.mxu1 %v2410_v53  ;;  %2734 = vmatmul.mubr.f32.gmra.mxu0 %v2410_v53  ;;  %v3234_v53 = vld [vmem:[#allocation13 + $0x1f0] sm:$0xff]  ;;  %v3296_v32 = vld [vmem:[#allocation13 + $0x3e0] sm:$0xff] }
 0x7e7   : > { %3409 = vmatprep.subr.mxu0 %v3255_v26  ;;  %3321 = vmatpush1.msra.mxu1 %v3190_v37  ;;  %v3229_v26 = vld [vmem:[#allocation13 + $0x1c8] sm:$0xff] }
 0x7e8   : > { %3410 = vmatpush1.msra.mxu0 %v3254_v9  ;;  %3322 = vmatprep.subr.mxu1 %v3189_v58  ;;  %v3293_v37 = vld [vmem:[#allocation13 + $0x3c8] sm:$0xff]  ;;  %v3228_v9 = vld [vmem:[#allocation13 + $0x1c0] sm:$0xff] }
 0x7e9   : > { %3411 = vmatprep.subr.mxu0 %v3253_v0  ;;  %3323 = vmatpush1.msra.mxu1 %v3188_v35  ;;  %v3292_v58 = vld [vmem:[#allocation13 + $0x3c0] sm:$0xff]  ;;  %v3227_v0 = vld [vmem:[#allocation13 + $0x1b8] sm:$0xff] }
 0x7ea   : > { %3412 = vmatpush1.msra.mxu0 %v3252_v2  ;;  %3324 = vmatprep.subr.mxu1 %v3187_v48  ;;  %v3291_v35 = vld [vmem:[#allocation13 + $0x3b8] sm:$0xff]  ;;  %v3226_v2 = vld [vmem:[#allocation13 + $0x1b0] sm:$0xff] }
 0x7eb   : > { %3413 = vmatprep.subr.mxu0 %v3251_v11  ;;  %3325 = vmatpush1.msra.mxu1 %v3186_v7  ;;  %v3290_v48 = vld [vmem:[#allocation13 + $0x3b0] sm:$0xff]  ;;  %v3225_v11 = vld [vmem:[#allocation13 + $0x1a8] sm:$0xff] }
 0x7ec   : > { %3414 = vmatpush1.msra.mxu0 %v3250_v13  ;;  %3326 = vmatprep.subr.mxu1 %v3185_v30  ;;  %v3289_v7 = vld [vmem:[#allocation13 + $0x3a8] sm:$0xff]  ;;  %v3224_v13 = vld [vmem:[#allocation13 + $0x1a0] sm:$0xff] }
 0x7ed   : > { %3415 = vmatprep.subr.mxu0 %v3249_v22  ;;  %3327 = vmatpush1.msra.mxu1 %v3184_v19  ;;  %v3288_v30 = vld [vmem:[#allocation13 + $0x3a0] sm:$0xff]  ;;  %v3223_v22 = vld [vmem:[#allocation13 + $0x198] sm:$0xff] }
 0x7ee   : > { %3416 = vmatpush1.msra.mxu0 %v3248_v38  ;;  %3328 = vmatprep.subr.mxu1 %v3183_v20  ;;  %v3287_v19 = vld [vmem:[#allocation13 + $0x398] sm:$0xff]  ;;  %v3222_v38 = vld [vmem:[#allocation13 + $0x190] sm:$0xff] }
 0x7ef   : > { %3417 = vmatprep.subr.mxu0 %v3247_v49  ;;  %3329 = vmatpush1.msra.mxu1 %v3182_v27  ;;  %v3286_v20 = vld [vmem:[#allocation13 + $0x390] sm:$0xff]  ;;  %v3221_v49 = vld [vmem:[#allocation13 + $0x188] sm:$0xff] }
 0x7f0   : > { %3418 = vmatpush1.msra.mxu0 %v3246_v4  ;;  %3330 = vmatprep.subr.mxu1 %v3181_v33  ;;  %v3285_v27 = vld [vmem:[#allocation13 + $0x388] sm:$0xff]  ;;  %v3220_v4 = vld [vmem:[#allocation13 + $0x180] sm:$0xff] }
 0x7f1   : > { %3419 = vmatprep.subr.mxu0 %v3245_v57  ;;  %3331 = vmatpush1.msra.mxu1 %v3180_v3  ;;  %v3284_v33 = vld [vmem:[#allocation13 + $0x380] sm:$0xff]  ;;  %v3219_v57 = vld [vmem:[#allocation13 + $0x178] sm:$0xff] }
 0x7f2   : > { %3420 = vmatpush1.msra.mxu0 %v3244_v54  ;;  %3332 = vmatprep.subr.mxu1 %v3179_v55  ;;  %v3283_v3 = vld [vmem:[#allocation13 + $0x378] sm:$0xff]  ;;  %v3218_v54 = vld [vmem:[#allocation13 + $0x170] sm:$0xff] }
 0x7f3   : > { %3421 = vmatprep.subr.mxu0 %v3243_v31  ;;  %3333 = vmatpush1.msra.mxu1 %v3178_v28  ;;  %v3282_v55 = vld [vmem:[#allocation13 + $0x370] sm:$0xff]  ;;  %v3217_v31 = vld [vmem:[#allocation13 + $0x168] sm:$0xff] }
 0x7f4   : > { %3422 = vmatpush1.msra.mxu0 %v3242_v23  ;;  %3334 = vmatprep.subr.mxu1 %v3177_v42  ;;  %v3281_v28 = vld [vmem:[#allocation13 + $0x368] sm:$0xff]  ;;  %v3216_v23 = vld [vmem:[#allocation13 + $0x160] sm:$0xff] }
 0x7f5   : > { %3423 = vmatprep.subr.mxu0 %v3241_v12  ;;  %3335 = vmatpush1.msra.mxu1 %v3176_v52  ;;  %v3280_v42 = vld [vmem:[#allocation13 + $0x360] sm:$0xff]  ;;  %v3215_v12 = vld [vmem:[#allocation13 + $0x158] sm:$0xff] }
 0x7f6   : > { %3424 = vmatpush1.msra.mxu0 %v3240_v18  ;;  %3336 = vmatprep.subr.mxu1 %v3175_v16  ;;  %v3279_v52 = vld [vmem:[#allocation13 + $0x358] sm:$0xff]  ;;  %v3214_v18 = vld [vmem:[#allocation13 + $0x150] sm:$0xff] }
 0x7f7   : > { %3425 = vmatprep.subr.mxu0 %v3239_v24  ;;  %3337 = vmatpush1.msra.mxu1 %v3174_v62  ;;  %v3278_v16 = vld [vmem:[#allocation13 + $0x350] sm:$0xff]  ;;  %v3213_v24 = vld [vmem:[#allocation13 + $0x148] sm:$0xff] }
 0x7f8   : > { %3426 = vmatpush1.msra.mxu0 %v3238_v8  ;;  %3338 = vmatprep.subr.mxu1 %v3173_v60  ;;  %v3277_v62 = vld [vmem:[#allocation13 + $0x348] sm:$0xff]  ;;  %v3212_v8 = vld [vmem:[#allocation13 + $0x140] sm:$0xff] }
 0x7f9   : > { %3427 = vmatprep.subr.mxu0 %v3237_v36  ;;  %3339 = vmatpush1.msra.mxu1 %v3172_v5  ;;  %v3276_v60 = vld [vmem:[#allocation13 + $0x340] sm:$0xff]  ;;  %v3211_v36 = vld [vmem:[#allocation13 + $0x138] sm:$0xff] }
 0x7fa   : > { %3428 = vmatpush1.msra.mxu0 %v3236_v39  ;;  %3340 = vmatprep.subr.mxu1 %v3235_v44  ;;  %v3275_v5 = vld [vmem:[#allocation13 + $0x338] sm:$0xff]  ;;  %v3210_v39 = vld [vmem:[#allocation13 + $0x130] sm:$0xff] }
 0x7fb   : > { %3429 = vmatprep.subr.mxu0 %v3299_v17  ;;  %3341 = vmatpush2.msra.mxu1 %v3234_v53  ;;  %v3274_v44 = vld [vmem:[#allocation13 + $0x330] sm:$0xff]  ;;  %v3209_v17 = vld [vmem:[#allocation13 + $0x128] sm:$0xff] }
 0x7fc   : > { %3430 = vmatpush2.msra.mxu0 %v3298_v15  ;;  %3342 = vmatprep.subr.mxu1 %v3233_v21  ;;  %v3273_v53 = vld [vmem:[#allocation13 + $0x328] sm:$0xff]  ;;  %v3208_v15 = vld [vmem:[#allocation13 + $0x120] sm:$0xff] }
 0x7fd   : > { %3431 = vmatprep.subr.mxu0 %v3297_v34  ;;  %3343 = vmatpush2.msra.mxu1 %v3232_v41  ;;  %v3272_v21 = vld [vmem:[#allocation13 + $0x320] sm:$0xff]  ;;  %v3207_v34 = vld [vmem:[#allocation13 + $0x118] sm:$0xff] }
 0x7fe   : > { %3432 = vmatpush2.msra.mxu0 %v3296_v32  ;;  %3344 = vmatprep.subr.mxu1 %v3231_v59  ;;  %v3271_v41 = vld [vmem:[#allocation13 + $0x318] sm:$0xff]  ;;  %v3206_v32 = vld [vmem:[#allocation13 + $0x110] sm:$0xff] }
 0x7ff   : > { %3433 = vmatprep.subr.mxu0 %v3295_v51  ;;  %3345 = vmatpush2.msra.mxu1 %v3230_v6  ;;  %v3270_v59 = vld [vmem:[#allocation13 + $0x310] sm:$0xff]  ;;  %v3205_v51 = vld [vmem:[#allocation13 + $0x108] sm:$0xff] }
 0x800   : > { %3434 = vmatpush2.msra.mxu0 %v3294_v1  ;;  %3346 = vmatprep.subr.mxu1 %v3229_v26  ;;  %v3269_v6 = vld [vmem:[#allocation13 + $0x308] sm:$0xff]  ;;  %v3204_v1 = vld [vmem:[#allocation13 + $0x100] sm:$0xff] }
 0x801   : > { %3435 = vmatprep.subr.mxu0 %v3293_v37  ;;  %3347 = vmatpush2.msra.mxu1 %v3228_v9  ;;  %v3268_v26 = vld [vmem:[#allocation13 + $0x300] sm:$0xff]  ;;  %v7699_v37 = vld [vmem:[#allocation2 + $0xf8] sm:$0xff]  ;;  %v2540_v9 = vld [vmem:[#allocation11] sm:$0xf] }
 0x802   : > { %3436 = vmatpush2.msra.mxu0 %v3292_v58  ;;  %3348 = vmatprep.subr.mxu1 %v3227_v0  ;;  %v11213_v58 = vld [vmem:[#allocation29_spill] sm:$0xff] }
 0x803   : > { %3437 = vmatprep.subr.mxu0 %v3291_v35  ;;  %3349 = vmatpush2.msra.mxu1 %v3226_v2  ;;  %v9175_v0 = vrot.slane %v2540_v9, %v11213_v58  ;;  %v9178_v35 = vrot.slane %v2540_v9, %v11193_v46 }
 0x804   : > { %3438 = vmatpush2.msra.mxu0 %v3290_v48  ;;  %3350 = vmatprep.subr.mxu1 %v3225_v11  ;;  %v11214_v11 = vld [vmem:[#allocation30_spill] sm:$0xff] }
 0x805   : > { %3439 = vmatprep.subr.mxu0 %v3289_v7  ;;  %3351 = vmatpush2.msra.mxu1 %v3224_v13  ;;  %v9181_v7 = vrot.slane %v2540_v9, %v11214_v11 }
 0x806   : > { %3440 = vmatpush2.msra.mxu0 %v3288_v30  ;;  %3352 = vmatprep.subr.mxu1 %v3223_v22  ;;  %v9186_v22 = vrot.slane %v2540_v9, %v11212_v29 }
 0x807   : > { %3441 = vmatprep.subr.mxu0 %v3287_v19  ;;  %3353 = vmatpush2.msra.mxu1 %v3222_v38 }
 0x808   : > { %3442 = vmatpush2.msra.mxu0 %v3286_v20  ;;  %3354 = vmatprep.subr.mxu1 %v3221_v49 }
 0x809   : > { %3443 = vmatprep.subr.mxu0 %v3285_v27  ;;  %3355 = vmatpush2.msra.mxu1 %v3220_v4 }
 0x80a   : > { %3444 = vmatpush2.msra.mxu0 %v3284_v33  ;;  %3356 = vmatprep.subr.mxu1 %v3219_v57 }
 0x80b   : > { %3445 = vmatprep.subr.mxu0 %v3283_v3  ;;  %3357 = vmatpush2.msra.mxu1 %v3218_v54 }
 0x80c   : > { %3446 = vmatpush2.msra.mxu0 %v3282_v55  ;;  %3358 = vmatprep.subr.mxu1 %v3217_v31 }
 0x80d   : > { %3447 = vmatprep.subr.mxu0 %v3281_v28  ;;  %3359 = vmatpush2.msra.mxu1 %v3216_v23 }
 0x80e   : > { %3448 = vmatpush2.msra.mxu0 %v3280_v42  ;;  %3360 = vmatprep.subr.mxu1 %v3215_v12 }
 0x80f   : > { %3449 = vmatprep.subr.mxu0 %v3279_v52  ;;  %3361 = vmatpush2.msra.mxu1 %v3214_v18 }
 0x810   : > { %3450 = vmatpush2.msra.mxu0 %v3278_v16  ;;  %3362 = vmatprep.subr.mxu1 %v3213_v24 }
 0x811   : > { %3451 = vmatprep.subr.mxu0 %v3277_v62  ;;  %3363 = vmatpush2.msra.mxu1 %v3212_v8 }
 0x812   : > { %3452 = vmatpush2.msra.mxu0 %v3276_v60  ;;  %3364 = vmatprep.subr.mxu1 %v3211_v36 }
 0x813   : > { %3453 = vmatprep.subr.mxu0 %v3275_v5  ;;  %3365 = vmatpush2.msra.mxu1 %v3210_v39 }
 0x814   : > { %3454 = vmatpush2.msra.mxu0 %v3274_v44  ;;  %3366 = vmatprep.subr.mxu1 %v3209_v17 }
 0x815   : > { %3455 = vmatprep.subr.mxu0 %v3273_v53  ;;  %3367 = vmatpush2.msra.mxu1 %v3208_v15 }
 0x816   : > { %3456 = vmatpush2.msra.mxu0 %v3272_v21  ;;  %3368 = vmatprep.subr.mxu1 %v3207_v34 }
 0x817   : > { %3457 = vmatprep.subr.mxu0 %v3271_v41  ;;  %3369 = vmatpush2.msra.mxu1 %v3206_v32 }
 0x818   : > { %3458 = vmatpush2.msra.mxu0 %v3270_v59  ;;  %3370 = vmatprep.subr.mxu1 %v3205_v51 }
 0x819   : > { %3459 = vmatprep.subr.mxu0 %v3269_v6  ;;  %3371 = vmatpush2.msra.mxu1 %v3204_v1 }
 0x81a   : > { %3460 = vmatpush2.msra.mxu0 %v3268_v26  ;;  %3497 = vmatprep.subr.mxu1 %v7699_v37 }
 0x81b   : > { %3602 = vmatprep.subr.mxu0 %v7699_v37 }
 0x885   : > { %v2628_v2 = vpop.f32.mrf.mxu1  ;;  %v2717_v48 = vpop.f32.mrf.mxu0 }
 0x886   : > { %v2629_v13 = vadd.f32 %v2628_v2, %v9175_v0  ;;  %v2718_v30 = vadd.f32 %v2717_v48, %v9178_v35 }
 0x887   : > { %v2630_v19 = vpop.f32.mrf.mxu1  ;;  %v2719_v38 = vpop.f32.mrf.mxu0 }
 0x888   : > { %v2756_v20 = vmul.f32 0.70710677, %v2629_v13  ;;  %v2758_v49 = vmul.f32 0.70710677, %v2718_v30  ;;  %v2631_v27 = vadd.f32 %v2630_v19, %v9181_v7  ;;  %v2720_v57 = vadd.f32 %v2719_v38, %v9186_v22 }
 0x889   : > { %v2634_v18 = vpop.f32.mrf.mxu1  ;;  %v2723_v62 = vpop.f32.mrf.mxu0  ;;  %v9193_v34 = vmul.f32 0.5, %v2629_v13  ;;  %v9198_v1 = vmul.f32 0.5, %v2718_v30 }
 0x88a   : > { %v2804_v4 = vand.u32 2147483647, %v2756_v20  ;;  %v2806_v33 = vand.u32 2147483647, %v2758_v49  ;;  %v2757_v3 = vmul.f32 0.70710677, %v2631_v27  ;;  %v2635_v36 = vadd.f32 %v2634_v18, %v9175_v0 }
 0x88b   : > { %v2759_v52 = vmul.f32 0.70710677, %v2720_v57  ;;  %v2636_v5 = vpop.f32.mrf.mxu1  ;;  %vm2772_vm1 = vcmp.ge.f32.partialorder %v2756_v20, 0.0  ;;  %vm2774_vm2 = vcmp.ge.f32.partialorder %v2758_v49, 0.0  ;;  %v2724_v17 = vadd.f32 %v2723_v62, %v9178_v35  ;;  %v2725_v51 = vpop.f32.mrf.mxu0 }
 0x88c   : > { %v2820_v54 = vmul.f32 0.3275911, %v2804_v4  ;;  %v2822_v55 = vmul.f32 0.3275911, %v2806_v33  ;;  %v3028_v31 = vsub.f32 0.0, %v2804_v4  ;;  %v3030_v12 = vsub.f32 0.0, %v2806_v33 }
 0x88d   : > { %v2805_v28 = vand.u32 2147483647, %v2757_v3  ;;  %v2807_v60 = vand.u32 2147483647, %v2759_v52  ;;  %v2760_v44 = vmul.f32 0.70710677, %v2635_v36  ;;  %v2637_v21 = vadd.f32 %v2636_v5, %v9181_v7 }
 0x88e   : > { %v2836_v23 = vadd.f32 1.0, %v2820_v54  ;;  %v2838_v42 = vadd.f32 1.0, %v2822_v55  ;;  %v3044_v16 = vmul.f32 %v3028_v31, %v2804_v4  ;;  %v3046_v8 = vmul.f32 %v3030_v12, %v2806_v33 }
 0x88f   : > { %v3029_v24 = vsub.f32 0.0, %v2805_v28  ;;  %v2821_v39 = vmul.f32 0.3275911, %v2805_v28  ;;  %v2823_v32 = vmul.f32 0.3275911, %v2807_v60  ;;  %v3031_v59 = vsub.f32 0.0, %v2807_v60 }
 0x890   : > { %7377 = vrcp.f32 %v2836_v23  ;;  %v3060_v53 = vmul.f32 1.442695, %v3044_v16  ;;  %v3064_v41 = vmul.f32 1.442695, %v3046_v8  ;;  %v9196_v6 = vsel %vm2772_vm1, 1.0, %v11182_v47 }
 0x891   : > { %7379 = vrcp.f32 %v2838_v42  ;;  %v3045_v15 = vmul.f32 %v3029_v24, %v2805_v28  ;;  %v9201_v26 = vsel %vm2774_vm2, 1.0, %v11182_v47  ;;  %v2837_v37 = vadd.f32 1.0, %v2821_v39 }
 0x892   : > { %vm2773_vm3 = vcmp.ge.f32.partialorder %v2757_v3, 0.0  ;;  %vm2775_vm4 = vcmp.ge.f32.partialorder %v2759_v52, 0.0  ;;  %v2808_v9 = vand.u32 2147483647, %v2760_v44  ;;  %v2762_v2 = vmul.f32 0.70710677, %v2724_v17 }
 0x893   : > { %7381 = vpow2.f32 %v3060_v53  ;;  %v3062_v48 = vmul.f32 1.442695, %v3045_v15  ;;  %v2761_v13 = vmul.f32 0.70710677, %v2637_v21  ;;  %v9204_v19 = vadd.f32 %v2725_v51, %v9186_v22 }
 0x894   : > { %7383 = vpow2.f32 %v3064_v41  ;;  %v9206_v38 = vmul.f32 0.5, %v2631_v27  ;;  %v2839_v20 = vadd.f32 1.0, %v2823_v32  ;;  %v3047_v30 = vmul.f32 %v3031_v59, %v2807_v60 }
 0x895   : > { %v9209_v49 = vsel %vm2773_vm3, 1.0, %v11182_v47  ;;  %7385 = vrcp.f32 %v2837_v37  ;;  %v9211_v4 = vmul.f32 0.5, %v2720_v57  ;;  %v9214_v33 = vsel %vm2775_vm4, 1.0, %v11182_v47 }
 0x896   : > { %v9216_v3 = vmul.f32 0.5, %v2635_v36  ;;  %vm2776_vm5 = vcmp.ge.f32.partialorder %v2760_v44, 0.0  ;;  %v3032_v54 = vsub.f32 0.0, %v2808_v9  ;;  %v2810_v55 = vand.u32 2147483647, %v2762_v2 }
 0x897   : > { %7387 = vpow2.f32 %v3062_v48  ;;  %v9220_v27 = vmul.f32 0.5, %v2724_v17  ;;  %v2809_v28 = vand.u32 2147483647, %v2761_v13  ;;  %v9223_v23 = vmul.f32 0.70710677, %v9204_v19 }
 0x898   : > { %7389 = vrcp.f32 %v2839_v20  ;;  %v3066_v12 = vmul.f32 1.442695, %v3047_v30  ;;  %v9228_v52 = vmul.f32 0.5, %v2637_v21  ;;  %v9232_v16 = vsel %vm2776_vm5, 1.0, %v11182_v47 }
 0x899   : > { %v2824_v24 = vmul.f32 0.3275911, %v2808_v9  ;;  %vm2778_vm6 = vcmp.ge.f32.partialorder %v2762_v2, 0.0  ;;  %v3048_v8 = vmul.f32 %v3032_v54, %v2808_v9  ;;  %v2826_v60 = vmul.f32 0.3275911, %v2810_v55 }
 0x89a   : > { %v3034_v36 = vsub.f32 0.0, %v2810_v55  ;;  %v3033_v44 = vsub.f32 0.0, %v2809_v28  ;;  %v2811_v17 = vand.u32 2147483647, %v9223_v23  ;;  %7391 = vpow2.f32 %v3066_v12 }
 0x89b   : > { %v9240_v41 = vsel %vm2778_vm6, 1.0, %v11182_v47  ;;  %vm2777_vm7 = vcmp.ge.f32.partialorder %v2761_v13, 0.0  ;;  %v2840_v59 = vadd.f32 1.0, %v2824_v24  ;;  %v2825_v51 = vmul.f32 0.3275911, %v2809_v28 }
 0x89c   : > { %v3068_v48 = vmul.f32 1.442695, %v3048_v8  ;;  %v3050_v20 = vmul.f32 %v3034_v36, %v2810_v55  ;;  %v3049_v12 = vmul.f32 %v3033_v44, %v2809_v28  ;;  %v9252_v24 = vsel %vm2777_vm7, 1.0, %v11182_v47 }
 0x89d   : > { %v9218_v31 = vpop.eup %7377  ;;  %7393 = vrcp.f32 %v2840_v59  ;;  %v2841_v36 = vadd.f32 1.0, %v2825_v51  ;;  %vm2779_vm8 = vcmp.ge.f32.partialorder %v9223_v23, 0.0 }
 0x89e   : > { %v9225_v42 = vpop.eup %7379  ;;  %v2884_v57 = vmul.f32 1.0614054, %v9218_v31  ;;  %7395 = vpow2.f32 %v3068_v48  ;;  %v3072_v44 = vmul.f32 1.442695, %v3050_v20  ;;  %v3070_v56 = vmul.f32 1.442695, %v3049_v12 }
 0x89f   : > { %v2886_v18 = vmul.f32 1.0614054, %v9225_v42 }
 0x8a0   : > { %v2900_v62 = vadd.f32 -1.4531521, %v2884_v57  ;;  %v2640_v5 = vpop.f32.mrf.mxu1  ;;  %v2729_v15 = vpop.f32.mrf.mxu0  ;;  %v2842_v57 = vadd.f32 1.0, %v2826_v60 }
 0x8a1   : > { %v2902_v39 = vadd.f32 -1.4531521, %v2886_v18  ;;  %v9236_v53 = vadd.f32 %v2640_v5, %v9175_v0  ;;  %v9247_v30 = vadd.f32 %v2729_v15, %v9178_v35  ;;  %v3035_v18 = vsub.f32 0.0, %v2811_v17 }
 0x8a2   : > { %v2916_v21 = vmul.f32 %v9218_v31, %v2900_v62  ;;  %v2642_v9 = vpop.f32.mrf.mxu1  ;;  %v7382_v62 = vpop.eup %7381  ;;  %v2827_v15 = vmul.f32 0.3275911, %v2811_v17  ;;  %7397 = vrcp.f32 %v2842_v57 }
 0x8a3   : > { %11215 = vst [vmem:[#allocation48_spill] sm:$0xff] %v9236_v53  ;;  %v2918_v32 = vmul.f32 %v9225_v42, %v2902_v39  ;;  %v9244_v37 = vmul.f32 0.70710677, %v9236_v53  ;;  %11216 = vst [vmem:[#allocation43_spill] sm:$0xff] %v9247_v30  ;;  %v7384_v8 = vpop.eup %7383  ;;  %v2731_v13 = vpop.f32.mrf.mxu0  ;;  %v3051_v29 = vmul.f32 %v3035_v18, %v2811_v17  ;;  %7399 = vpow2.f32 %v3072_v44 }
 0x8a4   : > { %v2932_v2 = vadd.f32 1.4214138, %v2916_v21  ;;  %v2643_v21 = vadd.f32 %v2642_v9, %v9181_v7  ;;  %v9257_v60 = vpop.eup %7385  ;;  %v2843_v20 = vadd.f32 1.0, %v2827_v15  ;;  %v9275_v17 = vmul.f32 0.5, %v9204_v19 }
 0x8a5   : > { %v2934_v54 = vadd.f32 1.4214138, %v2918_v32  ;;  %v2812_v39 = vand.u32 2147483647, %v9244_v37  ;;  %v9260_v32 = vmul.f32 0.70710677, %v9247_v30  ;;  %v9262_v9 = vpop.eup %7387  ;;  %7401 = vrcp.f32 %v2841_v36 }
 0x8a6   : > { %v2948_v5 = vmul.f32 %v9218_v31, %v2932_v2  ;;  %v9266_v51 = vmul.f32 0.70710677, %v2643_v21  ;;  %v2646_v58 = vpop.f32.mrf.mxu1  ;;  %7403 = vpow2.f32 %v3070_v56  ;;  %v9283_v15 = vsel %vm2779_vm8, 1.0, %v11182_v47 }
 0x8a7   : > { %v2950_v55 = vmul.f32 %v9225_v42, %v2934_v54  ;;  %v3036_v59 = vsub.f32 0.0, %v2812_v39  ;;  %v2828_v46 = vmul.f32 0.3275911, %v2812_v39  ;;  %v2814_v12 = vand.u32 2147483647, %v9260_v32 }
 0x8a8   : > { %v2964_v28 = vadd.f32 -0.28449672, %v2948_v5  ;;  %v9268_v5 = vpop.eup %7389  ;;  %v2813_v11 = vand.u32 2147483647, %v9266_v51  ;;  %7405 = vrcp.f32 %v2843_v20  ;;  %v9292_v56 = vadd.f32 %v2646_v58, %v9175_v0 }
 0x8a9   : > { %v2966_v2 = vadd.f32 -0.28449672, %v2950_v55  ;;  %v9272_v55 = vadd.f32 %v2731_v13, %v9186_v22  ;;  %v3052_v44 = vmul.f32 %v3036_v59, %v2812_v39  ;;  %v9285_v13 = vpop.eup %7391  ;;  %v9294_v10 = vmul.f32 0.5, %v2643_v21 }
 0x8aa   : > { %v2980_v54 = vmul.f32 %v9218_v31, %v2964_v28  ;;  %v3074_v28 = vmul.f32 1.442695, %v3051_v29  ;;  %v2829_v40 = vmul.f32 0.3275911, %v2813_v11  ;;  %11217 = vst [vmem:[#allocation45_spill] sm:$0xff] %v9292_v56  ;;  %v3037_v39 = vsub.f32 0.0, %v2813_v11  ;;  %v9303_v58 = vpop.eup %7393 }
 0x8ab   : > { %v2982_v48 = vmul.f32 %v9225_v42, %v2966_v2  ;;  %v9289_v29 = vmul.f32 0.70710677, %v9272_v55  ;;  %v3076_v63 = vmul.f32 1.442695, %v3052_v44  ;;  %vm2781_vm9 = vcmp.ge.f32.partialorder %v9266_v51, 0.0 }
 0x8ac   : > { %v2996_v57 = vadd.f32 0.2548296, %v2980_v54  ;;  %v2844_v54 = vadd.f32 1.0, %v2828_v46  ;;  %7407 = vpow2.f32 %v3074_v28  ;;  %v3053_v44 = vmul.f32 %v3037_v39, %v2813_v11 }
 0x8ad   : > { %v2998_v18 = vadd.f32 0.2548296, %v2982_v48  ;;  %v3038_v48 = vsub.f32 0.0, %v2814_v12  ;;  %v2815_v46 = vand.u32 2147483647, %v9289_v29  ;;  %v9317_v11 = vsel %vm2781_vm9, 1.0, %v11182_v47 }
 0x8ae   : > { %v3012_v2 = vmul.f32 %v9218_v31, %v2996_v57  ;;  %v2735_v31 = vpop.f32.mrf.mxu0  ;;  %v2830_v57 = vmul.f32 0.3275911, %v2814_v12  ;;  %7409 = vrcp.f32 %v2844_v54  ;;  %v2648_v54 = vpop.f32.mrf.mxu1  ;;  %vm2783_vm10 = vcmp.ge.f32.partialorder %v9289_v29, 0.0 }
 0x8af   : > { %v3014_v19 = vmul.f32 %v9225_v42, %v2998_v18  ;;  %v9301_v20 = vadd.f32 %v2735_v31, %v9178_v35  ;;  %v3054_v0 = vmul.f32 %v3038_v48, %v2814_v12  ;;  %v2831_v18 = vmul.f32 0.3275911, %v2815_v46 }
 0x8b0   : > { %v3092_v36 = vmul.f32 %v7382_v62, %v3012_v2  ;;  %v9298_v62 = vmul.f32 0.70710677, %v9292_v56  ;;  %v3039_v28 = vsub.f32 0.0, %v2815_v46  ;;  %v9305_v2 = vpop.eup %7395  ;;  %v2846_v21 = vadd.f32 1.0, %v2830_v57  ;;  %v2737_v39 = vpop.f32.mrf.mxu0 }
 0x8b1   : > { %v3094_v23 = vmul.f32 %v7384_v8, %v3014_v19  ;;  %11219 = vst [vmem:[#allocation32_spill] sm:$0xff] %v9301_v20  ;;  %v2845_v8 = vadd.f32 1.0, %v2829_v40  ;;  %7411 = vpow2.f32 %v3076_v63  ;;  %v2847_v31 = vadd.f32 1.0, %v2831_v18 }
 0x8b2   : > { %v3108_v59 = vsub.f32 1.0, %v3092_v36  ;;  %11218 = vst [vmem:[#allocation31_spill] sm:$0xff] %v9298_v62  ;;  %v2816_v19 = vand.u32 2147483647, %v9298_v62  ;;  %v9309_v36 = vpop.eup %7397  ;;  %v9314_v25 = vmul.f32 0.70710677, %v9301_v20  ;;  %v9320_v51 = vadd.f32 %v2648_v54, %v9181_v7 }
 0x8b3   : > { %v3110_v42 = vsub.f32 1.0, %v3094_v23  ;;  %v3055_v23 = vmul.f32 %v3039_v28, %v2815_v46  ;;  %v3080_v57 = vmul.f32 1.442695, %v3054_v0  ;;  %7413 = vrcp.f32 %v2845_v8 }
 0x8b4   : > { %v3124_v35 = vmul.f32 %v3108_v59, %v9196_v6  ;;  %v2832_v12 = vmul.f32 0.3275911, %v2816_v19  ;;  %v3040_v48 = vsub.f32 0.0, %v2816_v19  ;;  %11220 = vst [vmem:[#allocation33_spill] sm:$0xff] %v9314_v25  ;;  %11221 = vst [vmem:[#allocation34_spill] sm:$0xff] %v9320_v51  ;;  %v9322_v6 = vpop.eup %7399  ;;  %7415 = vrcp.f32 %v2846_v21 }
 0x8b5   : > { %v3126_v40 = vmul.f32 %v3110_v42, %v9201_v26  ;;  %v3078_v63 = vmul.f32 1.442695, %v3053_v44  ;;  %v9325_v59 = vpop.eup %7401  ;;  %7417 = vrcp.f32 %v2847_v31  ;;  %v3082_v42 = vmul.f32 1.442695, %v3055_v23 }
 0x8b6   : > { %v3056_v26 = vmul.f32 %v3040_v48, %v2816_v19  ;;  %v3140_v46 = vadd.f32 1.0, %v3124_v35  ;;  %v2818_v0 = vand.u32 2147483647, %v9314_v25  ;;  %v9328_v18 = vpop.eup %7403  ;;  %v2848_v7 = vadd.f32 1.0, %v2832_v12 }
 0x8b7   : > { %v3142_v8 = vadd.f32 1.0, %v3126_v40  ;;  %v9331_v28 = vmul.f32 0.70710677, %v9320_v51  ;;  %v9334_v21 = vadd.f32 %v2737_v39, %v9186_v22  ;;  %v9336_v44 = vpop.eup %7405  ;;  %7419 = vpow2.f32 %v3080_v57 }
 0x8b8   : > { %v3084_v19 = vmul.f32 1.442695, %v3056_v26  ;;  %v2834_v54 = vmul.f32 0.3275911, %v2818_v0  ;;  %v2885_v35 = vmul.f32 1.0614054, %v9257_v60  ;;  %7421 = vpow2.f32 %v3078_v63 }
 0x8b9   : > { %11222 = vst [vmem:[#allocation35_spill] sm:$0xff] %v9331_v28  ;;  %11223 = vst [vmem:[#allocation36_spill] sm:$0xff] %v9334_v21  ;;  %v9340_v31 = vmul.f32 0.5, %v9272_v55  ;;  %v3042_v23 = vsub.f32 0.0, %v2818_v0  ;;  %v2817_v40 = vand.u32 2147483647, %v9331_v28  ;;  %v9343_v12 = vpop.eup %7407  ;;  %7423 = vpow2.f32 %v3082_v42 }
 0x8ba   : > { %v9348_v22 = vsel %vm2783_vm10, 1.0, %v11182_v47  ;;  %v2850_v48 = vadd.f32 1.0, %v2834_v54  ;;  %v9351_v57 = vmul.f32 0.70710677, %v9334_v21  ;;  %7425 = vrcp.f32 %v2848_v7 }
 0x8bb   : > { %v2833_v39 = vmul.f32 0.3275911, %v2817_v40  ;;  %v3041_v63 = vsub.f32 0.0, %v2817_v40  ;;  %v2901_v55 = vadd.f32 -1.4531521, %v2885_v35  ;;  %v9353_v26 = vpop.eup %7409  ;;  %v9356_v14 = vmul.f32 %v3140_v46, %v9193_v34 }
 0x8bc   : > { %11224 = vst [vmem:[#allocation37_spill] sm:$0xff] %v9351_v57  ;;  %v9359_v61 = vmul.f32 %v3142_v8, %v9198_v1  ;;  %7427 = vpow2.f32 %v3084_v19  ;;  %v2819_v29 = vand.u32 2147483647, %v9351_v57  ;;  %v3058_v42 = vmul.f32 %v3042_v23, %v2818_v0 }
 0x8bd   : > { %v2849_v54 = vadd.f32 1.0, %v2833_v39  ;;  %v3057_v50 = vmul.f32 %v3041_v63, %v2817_v40  ;;  %v2917_v43 = vmul.f32 %v9257_v60, %v2901_v55  ;;  %7429 = vrcp.f32 %v2850_v48 }
 0x8be   : > { %v2835_v7 = vmul.f32 0.3275911, %v2819_v29  ;;  %v3043_v45 = vsub.f32 0.0, %v2819_v29  ;;  %v2887_v35 = vmul.f32 1.0614054, %v9268_v5  ;;  %v9364_v20 = vpop.eup %7411  ;;  %vm2780_vm11 = vcmp.ge.f32.partialorder %v9244_v37, 0.0 }
 0x8bf   : > { %7431 = vrcp.f32 %v2849_v54  ;;  %v3086_v34 = vmul.f32 1.442695, %v3057_v50  ;;  %v2933_v46 = vadd.f32 1.4214138, %v2917_v43  ;;  %v2889_v1 = vmul.f32 1.0614054, %v9325_v59 }
 0x8c0   : > { %v2851_v8 = vadd.f32 1.0, %v2835_v7  ;;  %v3059_v19 = vmul.f32 %v3043_v45, %v2819_v29  ;;  %v2903_v56 = vadd.f32 -1.4531521, %v2887_v35  ;;  %v2891_v0 = vmul.f32 1.0614054, %v9336_v44  ;;  %v9368_v23 = vpop.eup %7413 }
 0x8c1   : > { %7433 = vpow2.f32 %v3086_v34  ;;  %v2949_v40 = vmul.f32 %v9257_v60, %v2933_v46  ;;  %v2905_v48 = vadd.f32 -1.4531521, %v2889_v1  ;;  %v2888_v39 = vmul.f32 1.0614054, %v9303_v58  ;;  %v9372_v63 = vpop.eup %7415 }
 0x8c2   : > { %v9374_v55 = vmul.f32 1.442695, %v3058_v42  ;;  %7435 = vrcp.f32 %v2851_v8  ;;  %v2919_v43 = vmul.f32 %v9268_v5, %v2903_v56  ;;  %v2907_v50 = vadd.f32 -1.4531521, %v2891_v0  ;;  %v9377_v45 = vpop.eup %7417 }
 0x8c3   : > { %v2965_v29 = vadd.f32 -0.28449672, %v2949_v40  ;;  %v2921_v54 = vmul.f32 %v9325_v59, %v2905_v48  ;;  %v2904_v7 = vadd.f32 -1.4531521, %v2888_v39  ;;  %v2890_v35 = vmul.f32 1.0614054, %v9309_v36 }
 0x8c4   : > { %v9381_v34 = vmul.f32 1.442695, %v3059_v19  ;;  %v2935_v46 = vadd.f32 1.4214138, %v2919_v43  ;;  %v2923_v1 = vmul.f32 %v9336_v44, %v2907_v50  ;;  %v2893_v42 = vmul.f32 1.0614054, %v9368_v23  ;;  %v9385_v21 = vpop.eup %7419 }
 0x8c5   : > { %11225 = vst [vmem:[#allocation38_spill] sm:$0xff] %v9385_v21  ;;  %v2981_v56 = vmul.f32 %v9257_v60, %v2965_v29  ;;  %v2937_v8 = vadd.f32 1.4214138, %v2921_v54  ;;  %v2920_v0 = vmul.f32 %v9303_v58, %v2904_v7  ;;  %v2906_v40 = vadd.f32 -1.4531521, %v2890_v35  ;;  %v9389_v51 = vpop.eup %7421 }
 0x8c6   : > { %v2951_v48 = vmul.f32 %v9268_v5, %v2935_v46  ;;  %v2939_v39 = vadd.f32 1.4214138, %v2923_v1  ;;  %v2909_v19 = vadd.f32 -1.4531521, %v2893_v42  ;;  %v2895_v43 = vmul.f32 1.0614054, %v9377_v45  ;;  %v9393_v30 = vpop.eup %7423 }
 0x8c7   : > { %v2997_v50 = vadd.f32 0.2548296, %v2981_v56  ;;  %v2953_v25 = vmul.f32 %v9325_v59, %v2937_v8  ;;  %v2936_v57 = vadd.f32 1.4214138, %v2920_v0  ;;  %v2922_v29 = vmul.f32 %v9309_v36, %v2906_v40  ;;  %v9397_v54 = vpop.eup %7425 }
 0x8c8   : > { %v2967_v7 = vadd.f32 -0.28449672, %v2951_v48  ;;  %v2955_v35 = vmul.f32 %v9336_v44, %v2939_v39  ;;  %v2925_v62 = vmul.f32 %v9368_v23, %v2909_v19  ;;  %v2911_v46 = vadd.f32 -1.4531521, %v2895_v43 }
 0x8c9   : > { %v9401_v1 = vpop.eup %7427  ;;  %v3013_v42 = vmul.f32 %v9257_v60, %v2997_v50  ;;  %v2969_v21 = vadd.f32 -0.28449672, %v2953_v25  ;;  %v2952_v56 = vmul.f32 %v9303_v58, %v2936_v57  ;;  %v2938_v28 = vadd.f32 1.4214138, %v2922_v29 }
 0x8ca   : > { %11226 = vst [vmem:[#allocation53_spill] sm:$0xff] %v9401_v1  ;;  %v2983_v8 = vmul.f32 %v9268_v5, %v2967_v7  ;;  %v2971_v0 = vadd.f32 -0.28449672, %v2955_v35  ;;  %v2941_v40 = vadd.f32 1.4214138, %v2925_v62  ;;  %v2927_v47 = vmul.f32 %v9377_v45, %v2911_v46  ;;  %v9407_v48 = vpop.eup %7429 }
 0x8cb   : > { %v3093_v39 = vmul.f32 %v9262_v9, %v3013_v42  ;;  %v2985_v19 = vmul.f32 %v9325_v59, %v2969_v21  ;;  %v2968_v43 = vadd.f32 -0.28449672, %v2952_v56  ;;  %v2954_v1 = vmul.f32 %v9309_v36, %v2938_v28 }
 0x8cc   : > { %v9412_v60 = vpop.eup %7431  ;;  %v2999_v25 = vadd.f32 0.2548296, %v2983_v8  ;;  %v2987_v57 = vmul.f32 %v9336_v44, %v2971_v0  ;;  %v2957_v50 = vmul.f32 %v9368_v23, %v2941_v40  ;;  %v2943_v29 = vadd.f32 1.4214138, %v2927_v47 }
 0x8cd   : > { %v3109_v62 = vsub.f32 1.0, %v3093_v39  ;;  %v3001_v7 = vadd.f32 0.2548296, %v2985_v19  ;;  %v2984_v35 = vmul.f32 %v9303_v58, %v2968_v43  ;;  %v2970_v46 = vadd.f32 -0.28449672, %v2954_v1 }
 0x8ce   : > { %v9417_v53 = vpop.eup %7433  ;;  %v3015_v9 = vmul.f32 %v9268_v5, %v2999_v25  ;;  %v3003_v21 = vadd.f32 0.2548296, %v2987_v57  ;;  %v2973_v42 = vadd.f32 -0.28449672, %v2957_v50  ;;  %v2959_v28 = vmul.f32 %v9377_v45, %v2943_v29 }
 0x8cf   : > { %v9421_v56 = vpop.eup %7435  ;;  %v3125_v8 = vmul.f32 %v3109_v62, %v9209_v49  ;;  %v3017_v0 = vmul.f32 %v9325_v59, %v3001_v7  ;;  %v3000_v47 = vadd.f32 0.2548296, %v2984_v35  ;;  %v2986_v40 = vmul.f32 %v9309_v36, %v2970_v46 }
 0x8d0   : > { %v3095_v39 = vmul.f32 %v9285_v13, %v3015_v9  ;;  %v3019_v1 = vmul.f32 %v9336_v44, %v3003_v21  ;;  %v2989_v19 = vmul.f32 %v9368_v23, %v2973_v42  ;;  %v2975_v5 = vadd.f32 -0.28449672, %v2959_v28 }
 0x8d1   : > { %v3141_v43 = vadd.f32 1.0, %v3125_v8  ;;  %v3097_v25 = vmul.f32 %v9328_v18, %v3017_v0  ;;  %v3016_v57 = vmul.f32 %v9303_v58, %v3000_v47  ;;  %v3002_v50 = vadd.f32 0.2548296, %v2986_v40 }
 0x8d2   : > { %v3111_v29 = vsub.f32 1.0, %v3095_v39  ;;  %v3099_v49 = vmul.f32 %v9343_v12, %v3019_v1  ;;  %v3005_v59 = vadd.f32 0.2548296, %v2989_v19  ;;  %v2991_v62 = vmul.f32 %v9377_v45, %v2975_v5 }
 0x8d3   : > { %v3157_v7 = vmul.f32 %v3141_v43, %v9206_v38  ;;  %v3113_v13 = vsub.f32 1.0, %v3097_v25  ;;  %v3096_v44 = vmul.f32 %v9305_v2, %v3016_v57  ;;  %v3018_v35 = vmul.f32 %v9309_v36, %v3002_v50  ;;  %v9457_v25 = vld [vmem:[#allocation2 + $0xd8] sm:$0xff] }
 0x8d4   : > { %v3127_v46 = vmul.f32 %v3111_v29, %v9214_v33  ;;  %v3115_v9 = vsub.f32 1.0, %v3099_v49  ;;  %v3021_v18 = vmul.f32 %v9368_v23, %v3005_v59  ;;  %v3007_v58 = vadd.f32 0.2548296, %v2991_v62  ;;  %v7704_v59 = vld [vmem:[#allocation2 + $0xd0] sm:$0xff] }
 0x8d5   : > { %3372 = vmatprep.mubr.f32.mxu1 %v3157_v7  ;;  %v3129_v21 = vmul.f32 %v3113_v13, %v9252_v24  ;;  %v3112_v12 = vsub.f32 1.0, %v3096_v44  ;;  %v3098_v42 = vmul.f32 %v9322_v6, %v3018_v35  ;;  %v2892_v28 = vmul.f32 1.0614054, %v9353_v26  ;;  %v7700_v24 = vld [vmem:[#allocation2 + $0xf0] sm:$0xff]  ;;  %v7705_v13 = vld [vmem:[#allocation2 + $0xc8] sm:$0xff] }
 0x8d6   : > { %v3143_v38 = vadd.f32 1.0, %v3127_v46  ;;  %3373 = vmatmul.mubr.f32.vlgmr.msra.gmra.mxu1 %v9356_v14  ;;  %v3131_v2 = vmul.f32 %v3115_v9, %v9283_v15  ;;  %v3101_v36 = vmul.f32 %v9389_v51, %v3021_v18  ;;  %v3023_v33 = vmul.f32 %v9377_v45, %v3007_v58  ;;  %v7701_v14 = vld [vmem:[#allocation2 + $0xe8] sm:$0xff]  ;;  %v7706_v9 = vld [vmem:[#allocation2 + $0xc0] sm:$0xff] }
 0x8d7   : > { %v3145_v8 = vadd.f32 1.0, %v3129_v21  ;;  %v3128_v23 = vmul.f32 %v3112_v12, %v9232_v16  ;;  %v3114_v0 = vsub.f32 1.0, %v3098_v42  ;;  %v2908_v47 = vadd.f32 -1.4531521, %v2892_v28  ;;  %3498 = vmatpush1.msra.mxu1 %v7700_v24  ;;  %v9451_v16 = vld [vmem:[#allocation2 + $0xe0] sm:$0xff]  ;;  %v7707_v12 = vld [vmem:[#allocation2 + $0xb8] sm:$0xff] }
 0x8d8   : > { %v3159_v6 = vmul.f32 %v3143_v38, %v9211_v4  ;;  %v3147_v40 = vadd.f32 1.0, %v3131_v2  ;;  %v3117_v39 = vsub.f32 1.0, %v3101_v36  ;;  %v3103_v1 = vmul.f32 %v9393_v30, %v3023_v33  ;;  %3499 = vmatprep.subr.mxu1 %v7701_v14  ;;  %v7708_v38 = vld [vmem:[#allocation2 + $0xb0] sm:$0xff] }
 0x8d9   : > { %v3161_v15 = vmul.f32 %v3145_v8, %v9228_v52  ;;  %v3144_v51 = vadd.f32 1.0, %v3128_v23  ;;  %v3130_v45 = vmul.f32 %v3114_v0, %v9240_v41  ;;  %v2924_v19 = vmul.f32 %v9353_v26, %v2908_v47  ;;  %3500 = vmatpush1.msra.mxu1 %v9451_v16  ;;  %v7709_v23 = vld [vmem:[#allocation2 + $0xa8] sm:$0xff]  ;;  %v7710_v0 = vld [vmem:[#allocation2 + $0xa0] sm:$0xff] }
 0x8da   : > { %3461 = vmatprep.mubr.f32.mxu0 %v3159_v6  ;;  %v3163_v4 = vmul.f32 %v3147_v40, %v9275_v17  ;;  %v3133_v5 = vmul.f32 %v3117_v39, %v9317_v11  ;;  %v3119_v43 = vsub.f32 1.0, %v3103_v1  ;;  %v2894_v30 = vmul.f32 1.0614054, %v9372_v63  ;;  %3501 = vmatprep.subr.mxu1 %v9457_v25  ;;  %v7711_v39 = vld [vmem:[#allocation2 + $0x98] sm:$0xff] }
 0x8db   : > { %3462 = vmatmul.mubr.f32.vlgmr.msra.gmra.mxu0 %v9359_v61  ;;  %3378 = vmatprep.mubr.f32.mxu1 %v3161_v15  ;;  %v3160_v52 = vmul.f32 %v3144_v51, %v9216_v3  ;;  %v3146_v41 = vadd.f32 1.0, %v3130_v45  ;;  %v2940_v57 = vadd.f32 1.4214138, %v2924_v19  ;;  %v2897_v50 = vmul.f32 1.0614054, %v9412_v60 }
 0x8dc   : > { %3467 = vmatprep.mubr.f32.mxu0 %v3163_v4  ;;  %v3149_v17 = vadd.f32 1.0, %v3133_v5  ;;  %v3135_v11 = vmul.f32 %v3119_v43, %v9348_v22  ;;  %v2910_v29 = vadd.f32 -1.4531521, %v2894_v30  ;;  %v2899_v49 = vmul.f32 1.0614054, %v9421_v56  ;;  %3502 = vmatpush1.msra.mxu1 %v7704_v59  ;;  %v9489_v4 = vld [vmem:[#allocation2 + $0x88] sm:$0xff] }
 0x8dd   : > { %3379 = vmatmul.mubr.f32.gmra.mxu1 %v3160_v52  ;;  %v3162_v62 = vmul.f32 %v3146_v41, %v9220_v27  ;;  %v2956_v61 = vmul.f32 %v9353_v26, %v2940_v57  ;;  %v2913_v7 = vadd.f32 -1.4531521, %v2897_v50  ;;  %v2896_v3 = vmul.f32 1.0614054, %v9397_v54  ;;  %3503 = vmatprep.subr.mxu1 %v7705_v13  ;;  %v9494_v43 = vld [vmem:[#allocation2 + $0x80] sm:$0xff]  ;;  %v9500_v41 = vld [vmem:[#allocation2 + $0x78] sm:$0xff] }
 0x8de   : > { %v3165_v44 = vmul.f32 %v3149_v17, %v9294_v10  ;;  %v3151_v35 = vadd.f32 1.0, %v3135_v11  ;;  %v2926_v22 = vmul.f32 %v9372_v63, %v2910_v29  ;;  %v2915_v46 = vadd.f32 -1.4531521, %v2899_v49  ;;  %3504 = vmatpush1.msra.mxu1 %v7706_v9  ;;  %3603 = vmatpush1.msra.mxu0 %v7700_v24  ;;  %v9505_v17 = vld [vmem:[#allocation2 + $0x70] sm:$0xff] }
 0x8df   : > { %3468 = vmatmul.mubr.f32.gmra.mxu0 %v3162_v62  ;;  %v2972_v18 = vadd.f32 -0.28449672, %v2956_v61  ;;  %v2929_v27 = vmul.f32 %v9412_v60, %v2913_v7  ;;  %v2912_v58 = vadd.f32 -1.4531521, %v2896_v3  ;;  %v2898_v21 = vmul.f32 1.0614054, %v9407_v48  ;;  %3505 = vmatprep.subr.mxu1 %v7707_v12 }
 0x8e0   : > { %7437 = vpow2.f32 %v9381_v34  ;;  %3384 = vmatprep.mubr.f32.mxu1 %v3165_v44  ;;  %v3167_v10 = vmul.f32 %v3151_v35, %v9340_v31  ;;  %v2942_v42 = vadd.f32 1.4214138, %v2926_v22  ;;  %v2931_v28 = vmul.f32 %v9421_v56, %v2915_v46  ;;  %3506 = vmatpush1.msra.mxu1 %v7708_v38  ;;  %v11227_v62 = vld [vmem:[#allocation48_spill] sm:$0xff]  ;;  %v9517_v35 = vld [vmem:[#allocation2 + $0x60] sm:$0xff] }
 0x8e1   : > { %v2988_v2 = vmul.f32 %v9353_v26, %v2972_v18  ;;  %v2945_v36 = vadd.f32 1.4214138, %v2929_v27  ;;  %v2928_v33 = vmul.f32 %v9397_v54, %v2912_v58  ;;  %v2914_v8 = vadd.f32 -1.4531521, %v2898_v21  ;;  %3507 = vmatprep.subr.mxu1 %v7709_v23  ;;  %3604 = vmatprep.subr.mxu0 %v7701_v14  ;;  %v9522_v27 = vld [vmem:[#allocation2 + $0x58] sm:$0xff] }
 0x8e2   : > { %7439 = vpow2.f32 %v9374_v55  ;;  %3473 = vmatprep.mubr.f32.mxu0 %v3167_v10  ;;  %v2958_v34 = vmul.f32 %v9372_v63, %v2942_v42  ;;  %v2947_v31 = vadd.f32 1.4214138, %v2931_v28  ;;  %3508 = vmatpush1.msra.mxu1 %v7710_v0  ;;  %v9483_v55 = vld [vmem:[#allocation2 + $0x90] sm:$0xff]  ;;  %vm2782_vm12 = vcmp.ge.f32.partialorder %v9260_v32, 0.0  ;;  %v11230_v58 = vld [vmem:[#allocation38_spill] sm:$0xff]  ;;  %v9536_v32 = vld [vmem:[#allocation2 + $0x48] sm:$0xff] }
 0x8e3   : > { %v3004_v47 = vadd.f32 0.2548296, %v2988_v2  ;;  %v2961_v24 = vmul.f32 %v9412_v60, %v2945_v36  ;;  %v2944_v6 = vadd.f32 1.4214138, %v2928_v33  ;;  %v2930_v40 = vmul.f32 %v9407_v48, %v2914_v8  ;;  %3509 = vmatprep.subr.mxu1 %v7711_v39  ;;  %3605 = vmatpush1.msra.mxu0 %v9451_v16  ;;  %v9531_v10 = vld [vmem:[#allocation2 + $0x50] sm:$0xff]  ;;  %v11231_v36 = vld [vmem:[#allocation31_spill] sm:$0xff] }
 0x8e4   : > { %v2974_v1 = vadd.f32 -0.28449672, %v2958_v34  ;;  %v2963_v14 = vmul.f32 %v9421_v56, %v2947_v31  ;;  %3510 = vmatpush1.msra.mxu1 %v9483_v55  ;;  %3606 = vmatprep.subr.mxu0 %v9457_v25  ;;  %v2748_v61 = vmul.f32 0.5, %v11227_v62  ;;  %v11228_v7 = vmov -1.0   ;;  %v11233_v31 = vld [vmem:[#allocation53_spill] sm:$0xff] }
 0x8e5   : > { %v3020_v15 = vmul.f32 %v9353_v26, %v3004_v47  ;;  %v2977_v51 = vadd.f32 -0.28449672, %v2961_v24  ;;  %v2960_v45 = vmul.f32 %v9397_v54, %v2944_v6  ;;  %v2946_v19 = vadd.f32 1.4214138, %v2930_v40  ;;  %3511 = vmatprep.subr.mxu1 %v9489_v4  ;;  %3607 = vmatpush1.msra.mxu0 %v7704_v59  ;;  %v9509_v59 = vld [vmem:[#allocation2 + $0x68] sm:$0xff]  ;;  %v9548_v24 = vld [vmem:[#allocation2 + $0x38] sm:$0xff] }
 0x8e6   : > { %v2990_v16 = vmul.f32 %v9372_v63, %v2974_v1  ;;  %v2979_v5 = vadd.f32 -0.28449672, %v2963_v14  ;;  %3512 = vmatpush1.msra.mxu1 %v9494_v43  ;;  %3608 = vmatprep.subr.mxu0 %v7705_v13  ;;  %v2796_v3 = vsel %vm2780_vm11, 1.0, %v11228_v7  ;;  %v2798_v37 = vsel %vm2782_vm12, 1.0, %v11228_v7  ;;  %v11234_v6 = vld [vmem:[#allocation33_spill] sm:$0xff] }
 0x8e7   : > { %v3100_v26 = vmul.f32 %v9364_v20, %v3020_v15  ;;  %v2993_v30 = vmul.f32 %v9412_v60, %v2977_v51  ;;  %v2976_v25 = vadd.f32 -0.28449672, %v2960_v45  ;;  %v2962_v52 = vmul.f32 %v9407_v48, %v2946_v19  ;;  %3513 = vmatprep.subr.mxu1 %v9500_v41  ;;  %3609 = vmatpush1.msra.mxu0 %v7706_v9  ;;  %v9556_v14 = vld [vmem:[#allocation2 + $0x30] sm:$0xff]  ;;  %v9563_v45 = vld [vmem:[#allocation2 + $0x28] sm:$0xff]  ;;  %v11235_v19 = vld [vmem:[#allocation43_spill] sm:$0xff] }
 0x8e8   : > { %v3006_v57 = vadd.f32 0.2548296, %v2990_v16  ;;  %v2995_v50 = vmul.f32 %v9421_v56, %v2979_v5  ;;  %3514 = vmatpush1.msra.mxu1 %v9505_v17  ;;  %3610 = vmatprep.subr.mxu0 %v7707_v12  ;;  %vm2784_vm14 = vcmp.ge.f32.partialorder %v11231_v36, 0.0  ;;  %vm2786_vm0 = vcmp.ge.f32.partialorder %v11234_v6, 0.0  ;;  %v7739_v36 = vld [vmem:[#allocation2 + $0x1b8] sm:$0xff]  ;;  %v7753_v6 = vld [vmem:[#allocation2 + $0x148] sm:$0xff] }
 0x8e9   : > { %v3116_v20 = vsub.f32 1.0, %v3100_v26  ;;  %v3009_v11 = vadd.f32 0.2548296, %v2993_v30  ;;  %v2992_v29 = vmul.f32 %v9397_v54, %v2976_v25  ;;  %v2978_v49 = vadd.f32 -0.28449672, %v2962_v52  ;;  %3515 = vmatprep.subr.mxu1 %v9509_v59  ;;  %3611 = vmatpush1.msra.mxu0 %v7708_v38  ;;  %v9570_v26 = vld [vmem:[#allocation2 + $0x20] sm:$0xff] }
 0x8ea   : > { %v3022_v13 = vmul.f32 %v9372_v63, %v3006_v57  ;;  %v3011_v44 = vadd.f32 0.2548296, %v2995_v50  ;;  %3516 = vmatpush1.msra.mxu1 %v9517_v35  ;;  %3612 = vmatprep.subr.mxu0 %v7709_v23  ;;  %v11229_v63 = vld [vmem:[#allocation35_spill] sm:$0xff]  ;;  %v2800_v16 = vsel %vm2784_vm14, 1.0, %v11228_v7  ;;  %v11236_v30 = vld [vmem:[#allocation34_spill] sm:$0xff] }
 0x8eb   : > { %v3132_v22 = vmul.f32 %v3116_v20, %v2796_v3  ;;  %v3025_v46 = vmul.f32 %v9412_v60, %v3009_v11  ;;  %v3008_v9 = vadd.f32 0.2548296, %v2992_v29  ;;  %v2994_v18 = vmul.f32 %v9407_v48, %v2978_v49  ;;  %3517 = vmatprep.subr.mxu1 %v9522_v27  ;;  %3613 = vmatpush1.msra.mxu0 %v7710_v0  ;;  %v9542_v23 = vld [vmem:[#allocation2 + $0x40] sm:$0xff]  ;;  %v7727_v50 = vld [vmem:[#allocation2 + $0x18] sm:$0xff]  ;;  %v11237_v11 = vld [vmem:[#allocation36_spill] sm:$0xff] }
 0x8ec   : > { %vm2785_vm13 = vcmp.ge.f32.partialorder %v11229_v63, 0.0  ;;  %v3102_v21 = vmul.f32 %v11230_v58, %v3022_v13  ;;  %v3027_v12 = vmul.f32 %v9421_v56, %v3011_v44  ;;  %3518 = vmatpush1.msra.mxu1 %v9531_v10  ;;  %3614 = vmatprep.subr.mxu0 %v7711_v39  ;;  %v11232_v56 = vld [vmem:[#allocation37_spill] sm:$0xff]  ;;  %v2753_v25 = vmul.f32 0.5, %v11236_v30 }
 0x8ed   : > { %v7438_v60 = vpop.eup %7437  ;;  %v3148_v42 = vadd.f32 1.0, %v3132_v22  ;;  %v3105_v28 = vmul.f32 %v9417_v53, %v3025_v46  ;;  %v3024_v38 = vmul.f32 %v9397_v54, %v3008_v9  ;;  %v3010_v2 = vadd.f32 0.2548296, %v2994_v18  ;;  %3519 = vmatprep.subr.mxu1 %v9536_v32  ;;  %3615 = vmatpush1.msra.mxu0 %v9483_v55  ;;  %v7729_v46 = vld [vmem:[#allocation2 + $0x8] sm:$0xff]  ;;  %v7730_v9 = vld [vmem:[#allocation2] sm:$0xff] }
 0x8ee   : > { %vm2787_vm15 = vcmp.ge.f32.partialorder %v11232_v56, 0.0  ;;  %v3118_v33 = vsub.f32 1.0, %v3102_v21  ;;  %v3107_v8 = vmul.f32 %v7438_v60, %v3027_v12  ;;  %3520 = vmatpush1.msra.mxu1 %v9542_v23  ;;  %3616 = vmatprep.subr.mxu0 %v9489_v4  ;;  %v2801_v40 = vsel %vm2785_vm13, 1.0, %v11228_v7  ;;  %v11239_v18 = vld [vmem:[#allocation32_spill] sm:$0xff]  ;;  %v7731_v21 = vld [vmem:[#allocation2 + $0x1f8] sm:$0xff] }
 0x8ef   : > { %v7440_v53 = vpop.eup %7439  ;;  %v3164_v54 = vmul.f32 %v3148_v42, %v2748_v61  ;;  %v3121_v34 = vsub.f32 1.0, %v3105_v28  ;;  %v3104_v0 = vmul.f32 %v11233_v31, %v3024_v38  ;;  %v3026_v47 = vmul.f32 %v9407_v48, %v3010_v2  ;;  %3521 = vmatprep.subr.mxu1 %v9548_v24  ;;  %3617 = vmatpush1.msra.mxu0 %v9494_v43  ;;  %v7728_v61 = vld [vmem:[#allocation2 + $0x10] sm:$0xff]  ;;  %v7733_v60 = vld [vmem:[#allocation2 + $0x1e8] sm:$0xff]  ;;  %v7734_v42 = vld [vmem:[#allocation2 + $0x1e0] sm:$0xff] }
 0x8f0   : > { %v3134_v39 = vmul.f32 %v3118_v33, %v2798_v37  ;;  %v3123_v1 = vsub.f32 1.0, %v3107_v8  ;;  %3522 = vmatpush1.msra.mxu1 %v9556_v14  ;;  %3618 = vmatprep.subr.mxu0 %v9500_v41  ;;  %v2803_v48 = vsel %vm2787_vm15, 1.0, %v11228_v7  ;;  %v2750_v4 = vmul.f32 0.5, %v11235_v19  ;;  %v7736_v28 = vld [vmem:[#allocation2 + $0x1d0] sm:$0xff]  ;;  %v7737_v38 = vld [vmem:[#allocation2 + $0x1c8] sm:$0xff]  ;;  %v7738_v2 = vld [vmem:[#allocation2 + $0x1c0] sm:$0xff] }
 0x8f1   : > { %3385 = vmatmul.mubr.f32.gmra.mxu1 %v3164_v54  ;;  %v3137_v55 = vmul.f32 %v3121_v34, %v2801_v40  ;;  %v3120_v15 = vsub.f32 1.0, %v3104_v0  ;;  %v3106_v51 = vmul.f32 %v7440_v53, %v3026_v47  ;;  %3523 = vmatprep.subr.mxu1 %v9563_v45  ;;  %v2802_v20 = vsel %vm2786_vm0, 1.0, %v11228_v7  ;;  %v7741_v56 = vld [vmem:[#allocation2 + $0x1a8] sm:$0xff]  ;;  %v7743_v33 = vld [vmem:[#allocation2 + $0x198] sm:$0xff]  ;;  %v7744_v8 = vld [vmem:[#allocation2 + $0x190] sm:$0xff] }
 0x8f2   : > { %v3150_v5 = vadd.f32 1.0, %v3134_v39  ;;  %v3139_v43 = vmul.f32 %v3123_v1, %v2803_v48  ;;  %3524 = vmatpush1.msra.mxu1 %v9570_v26  ;;  %3619 = vmatpush1.msra.mxu0 %v9505_v17  ;;  %v2755_v29 = vmul.f32 0.5, %v11237_v11  ;;  %v11238_v17 = vld [vmem:[#allocation45_spill] sm:$0xff]  ;;  %v2754_v37 = vmul.f32 0.5, %v11239_v18  ;;  %v7746_v53 = vld [vmem:[#allocation2 + $0x180] sm:$0xff]  ;;  %v7747_v54 = vld [vmem:[#allocation2 + $0x178] sm:$0xff] }
 0x8f3   : > { %v3153_v52 = vadd.f32 1.0, %v3137_v55  ;;  %v3136_v41 = vmul.f32 %v3120_v15, %v2800_v16  ;;  %v3122_v57 = vsub.f32 1.0, %v3106_v51  ;;  %3525 = vmatprep.subr.mxu1 %v7727_v50  ;;  %3620 = vmatprep.subr.mxu0 %v9509_v59  ;;  %v2752_v3 = vmul.f32 0.5, %v11238_v17  ;;  %v7748_v34 = vld [vmem:[#allocation2 + $0x170] sm:$0xff]  ;;  %v7749_v31 = vld [vmem:[#allocation2 + $0x168] sm:$0xff]  ;;  %v7750_v0 = vld [vmem:[#allocation2 + $0x160] sm:$0xff] }
 0x8f4   : > { %v3166_v49 = vmul.f32 %v3150_v5, %v2750_v4  ;;  %v3155_v62 = vadd.f32 1.0, %v3139_v43  ;;  %3526 = vmatpush1.msra.mxu1 %v7728_v61  ;;  %3621 = vmatpush1.msra.mxu0 %v9517_v35  ;;  %v7732_v35 = vld [vmem:[#allocation2 + $0x1f0] sm:$0xff]  ;;  %v7751_v47 = vld [vmem:[#allocation2 + $0x158] sm:$0xff]  ;;  %v7754_v40 = vld [vmem:[#allocation2 + $0x140] sm:$0xff] }
 0x8f5   : > { %v3169_v13 = vmul.f32 %v3153_v52, %v2753_v25  ;;  %v3152_v44 = vadd.f32 1.0, %v3136_v41  ;;  %v3138_v22 = vmul.f32 %v3122_v57, %v2802_v20  ;;  %3527 = vmatprep.subr.mxu1 %v7729_v46  ;;  %3622 = vmatprep.subr.mxu0 %v9522_v27  ;;  %v7735_v27 = vld [vmem:[#allocation2 + $0x1d8] sm:$0xff]  ;;  %v7756_v1 = vld [vmem:[#allocation2 + $0x130] sm:$0xff]  ;;  %v7758_v48 = vld [vmem:[#allocation2 + $0x120] sm:$0xff] }
 0x8f6   : > { %3474 = vmatmul.mubr.f32.gmra.mxu0 %v3166_v49  ;;  %v3171_v59 = vmul.f32 %v3155_v62, %v2755_v29  ;;  %3528 = vmatpush1.msra.mxu1 %v7730_v9  ;;  %v7755_v39 = vld [vmem:[#allocation2 + $0x138] sm:$0xff]  ;;  %v7760_v15 = vld [vmem:[#allocation2 + $0x110] sm:$0xff]  ;;  %v7761_v51 = vld [vmem:[#allocation2 + $0x108] sm:$0xff] }
 0x8f7   : > { %3390 = vmatprep.mubr.f32.mxu1 %v3169_v13  ;;  %v3168_v63 = vmul.f32 %v3152_v44, %v2752_v3  ;;  %v3154_v58 = vadd.f32 1.0, %v3138_v22  ;;  %3529 = vmatprep.subr.mxu1 %v7731_v21  ;;  %v7759_v55 = vld [vmem:[#allocation2 + $0x118] sm:$0xff]  ;;  %v11240_v19 = vld [vmem:[#allocation28_spill] sm:$0xff]  ;;  %v7763_v16 = vld [vmem:[%s10980_s9] sm:$0xff] }
 0x8f8   : > { %3479 = vmatprep.mubr.f32.mxu0 %v3171_v59  ;;  %3530 = vmatpush2.msra.mxu1 %v7732_v35  ;;  %v9592_v4 = vsub.s32 5, %v11240_v19  ;;  %v11242_v17 = vld [vmem:[#allocation41_spill] sm:$0xff]  ;;  %v11244_v44 = vld [vmem:[#allocation42_spill] sm:$0xff]  ;;  %v11246_v18 = vld [vmem:[#allocation51_spill] sm:$0xff] }
 0x8f9   : > { %3391 = vmatmul.mubr.f32.gmra.mxu1 %v3168_v63  ;;  %v3170_v12 = vmul.f32 %v3154_v58, %v2754_v37  ;;  %3531 = vmatprep.subr.mxu1 %v7733_v60  ;;  %v11248_v63 = vld [vmem:[#allocation44_spill] sm:$0xff] }
 0x8fa   : > { %3532 = vmatpush2.msra.mxu1 %v7734_v42  ;;  %3623 = vmatpush1.msra.mxu0 %v9531_v10  ;;  %v7740_v10 = vld [vmem:[#allocation2 + $0x1b0] sm:$0xff]  ;;  %11241 = vst [vmem:[#allocation48_spill] sm:$0xff] %v9592_v4  ;;  %v3303_v5 = vrot.slane %v7763_v16, %v9592_v4  ;;  %v3785_v19 = vld [vmem:[#allocation5 + $0x568] sm:$0xff]  ;;  %v3784_v16 = vld [vmem:[#allocation5 + $0x560] sm:$0xff] }
 0x8fb   : > { %3480 = vmatmul.mubr.f32.gmra.mxu0 %v3170_v12  ;;  %3533 = vmatprep.subr.mxu1 %v7735_v27 }
 0x8fc   : > { %3534 = vmatpush2.msra.mxu1 %v7736_v28  ;;  %3624 = vmatprep.subr.mxu0 %v9536_v32  ;;  %v7742_v32 = vld [vmem:[#allocation2 + $0x1a0] sm:$0xff] }
 0x8fd   : > { %3535 = vmatprep.subr.mxu1 %v7737_v38  ;;  %3625 = vmatpush1.msra.mxu0 %v9542_v23  ;;  %v7745_v23 = vld [vmem:[#allocation2 + $0x188] sm:$0xff] }
 0x8fe   : > { %3536 = vmatpush2.msra.mxu1 %v7738_v2  ;;  %3626 = vmatprep.subr.mxu0 %v9548_v24  ;;  %v7752_v24 = vld [vmem:[#allocation2 + $0x150] sm:$0xff] }
 0x8ff   : > { %3537 = vmatprep.subr.mxu1 %v7739_v36  ;;  %3627 = vmatpush1.msra.mxu0 %v9556_v14  ;;  %v7757_v14 = vld [vmem:[#allocation2 + $0x128] sm:$0xff] }
 0x900   : > { %3538 = vmatpush2.msra.mxu1 %v7740_v10  ;;  %3628 = vmatprep.subr.mxu0 %v9563_v45  ;;  %v7762_v45 = vld [vmem:[#allocation2 + $0x100] sm:$0xff] }
 0x901   : > { %3539 = vmatprep.subr.mxu1 %v7741_v56  ;;  %3629 = vmatpush1.msra.mxu0 %v9570_v26  ;;  %v7764_v26 = vld [vmem:[%s10980_s9 + $0x8] sm:$0xff] }
 0x902   : > { %3540 = vmatpush2.msra.mxu1 %v7742_v32  ;;  %3630 = vmatprep.subr.mxu0 %v7727_v50  ;;  %v3307_v30 = vrot.slane %v7764_v26, %v9592_v4  ;;  %v3777_v26 = vld [vmem:[#allocation5 + $0x528] sm:$0xff] }
 0x903   : > { %3541 = vmatprep.subr.mxu1 %v7743_v33  ;;  %3631 = vmatpush1.msra.mxu0 %v7728_v61 }
 0x904   : > { %3542 = vmatpush2.msra.mxu1 %v7744_v8  ;;  %3632 = vmatprep.subr.mxu0 %v7729_v46 }
 0x905   : > { %3543 = vmatprep.subr.mxu1 %v7745_v23  ;;  %3633 = vmatpush1.msra.mxu0 %v7730_v9 }
 0x906   : > { %3544 = vmatpush2.msra.mxu1 %v7746_v53  ;;  %3634 = vmatprep.subr.mxu0 %v7731_v21 }
 0x907   : > { %3545 = vmatprep.subr.mxu1 %v7747_v54  ;;  %3635 = vmatpush2.msra.mxu0 %v7732_v35 }
 0x908   : > { %3546 = vmatpush2.msra.mxu1 %v7748_v34  ;;  %3636 = vmatprep.subr.mxu0 %v7733_v60 }
 0x909   : > { %3547 = vmatprep.subr.mxu1 %v7749_v31  ;;  %3637 = vmatpush2.msra.mxu0 %v7734_v42 }
 0x90a   : > { %3548 = vmatpush2.msra.mxu1 %v7750_v0  ;;  %3638 = vmatprep.subr.mxu0 %v7735_v27 }
 0x90b   : > { %3549 = vmatprep.subr.mxu1 %v7751_v47  ;;  %3639 = vmatpush2.msra.mxu0 %v7736_v28 }
 0x90c   : > { %3550 = vmatpush2.msra.mxu1 %v7752_v24  ;;  %3640 = vmatprep.subr.mxu0 %v7737_v38 }
 0x90d   : > { %3551 = vmatprep.subr.mxu1 %v7753_v6  ;;  %3641 = vmatpush2.msra.mxu0 %v7738_v2 }
 0x90e   : > { %3552 = vmatpush2.msra.mxu1 %v7754_v40  ;;  %3642 = vmatprep.subr.mxu0 %v7739_v36 }
 0x90f   : > { %3553 = vmatprep.subr.mxu1 %v7755_v39  ;;  %3643 = vmatpush2.msra.mxu0 %v7740_v10  ;;  %v11250_v10 = vld [vmem:[#allocation49_spill] sm:$0xff] }
 0x910   : > { %3554 = vmatpush2.msra.mxu1 %v7756_v1  ;;  %3644 = vmatprep.subr.mxu0 %v7741_v56 }
 0x911   : > { %3555 = vmatprep.subr.mxu1 %v7757_v14  ;;  %3645 = vmatpush2.msra.mxu0 %v7742_v32 }
 0x912   : > { %3556 = vmatpush2.msra.mxu1 %v7758_v48  ;;  %3646 = vmatprep.subr.mxu0 %v7743_v33 }
 0x913   : > { %3557 = vmatprep.subr.mxu1 %v7759_v55  ;;  %3647 = vmatpush2.msra.mxu0 %v7744_v8  ;;  %v11252_v8 = vld [vmem:[#allocation52_spill] sm:$0xff] }
 0x914   : > { %3558 = vmatpush2.msra.mxu1 %v7760_v15  ;;  %3648 = vmatprep.subr.mxu0 %v7745_v23 }
 0x915   : > { %3559 = vmatprep.subr.mxu1 %v7761_v51  ;;  %3649 = vmatpush2.msra.mxu0 %v7746_v53 }
 0x916   : > { %3560 = vmatpush2.msra.mxu1 %v7762_v45  ;;  %3650 = vmatprep.subr.mxu0 %v7747_v54 }
 0x917   : > { %3651 = vmatpush2.msra.mxu0 %v7748_v34 }
 0x918   : > { %3652 = vmatprep.subr.mxu0 %v7749_v31 }
 0x919   : > { %3653 = vmatpush2.msra.mxu0 %v7750_v0  ;;  %v11254_v0 = vld [vmem:[#allocation50_spill] sm:$0xff] }
 0x91a   : > { %3654 = vmatprep.subr.mxu0 %v7751_v47 }
 0x91b   : > { %3655 = vmatpush2.msra.mxu0 %v7752_v24  ;;  %v11256_v24 = vld [vmem:[#allocation46_spill] sm:$0xff] }
 0x91c   : > { %3656 = vmatprep.subr.mxu0 %v7753_v6 }
 0x91d   : > { %3657 = vmatpush2.msra.mxu0 %v7754_v40  ;;  %v3801_v40 = vld [vmem:[#allocation5 + $0x5e8] sm:$0xff] }
 0x91e   : > { %3658 = vmatprep.subr.mxu0 %v7755_v39  ;;  %v3803_v39 = vld [vmem:[#allocation5 + $0x5f8] sm:$0xff]  ;;  %3891 = vmatprep.subr.mxu1 %v3801_v40 }
 0x91f   : > { %3659 = vmatpush2.msra.mxu0 %v7756_v1  ;;  %v3800_v1 = vld [vmem:[#allocation5 + $0x5e0] sm:$0xff] }
 0x920   : > { %3660 = vmatprep.subr.mxu0 %v7757_v14  ;;  %v3797_v14 = vld [vmem:[#allocation5 + $0x5c8] sm:$0xff] }
 0x921   : > { %3661 = vmatpush2.msra.mxu0 %v7758_v48  ;;  %v3796_v48 = vld [vmem:[#allocation5 + $0x5c0] sm:$0xff] }
 0x922   : > { %3662 = vmatprep.subr.mxu0 %v7759_v55  ;;  %v3793_v55 = vld [vmem:[#allocation5 + $0x5a8] sm:$0xff] }
 0x923   : > { %3663 = vmatpush2.msra.mxu0 %v7760_v15  ;;  %v3792_v15 = vld [vmem:[#allocation5 + $0x5a0] sm:$0xff] }
 0x924   : > { %3664 = vmatprep.subr.mxu0 %v7761_v51  ;;  %v3789_v51 = vld [vmem:[#allocation5 + $0x588] sm:$0xff] }
 0x925   : > { %3665 = vmatpush2.msra.mxu0 %v7762_v45  ;;  %v3788_v45 = vld [vmem:[#allocation5 + $0x580] sm:$0xff] }
 0x926   : > { %3980 = vmatprep.subr.mxu0 %v3803_v39  ;;  %v3794_v39 = vld [vmem:[#allocation5 + $0x5b0] sm:$0xff] }
 0x996   : > { %v3374_v43 = vpop.f32.mrf.mxu1 }
 0x997   : > { %v3375_v52 = vadd.f32 %v3374_v43, %v3303_v5  ;;  %v3780_v43 = vld [vmem:[#allocation5 + $0x540] sm:$0xff] }
 0x998   : > { %v3376_v25 = vpop.f32.mrf.mxu1 }
 0x999   : > { %v3377_v41 = vadd.f32 %v3376_v25, %v3307_v30  ;;  %v3773_v25 = vld [vmem:[#allocation5 + $0x508] sm:$0xff] }
 0x99b   : > { %v3463_v57 = vpop.f32.mrf.mxu0 }
 0x99c   : > { %v3464_v50 = vadd.f32 %v3463_v57, %v3375_v52  ;;  %v3772_v52 = vld [vmem:[#allocation5 + $0x500] sm:$0xff] }
 0x99d   : > { %v3465_v20 = vpop.f32.mrf.mxu0  ;;  %v3380_v11 = vpop.f32.mrf.mxu1  ;;  %v3768_v57 = vld [vmem:[#allocation5 + $0x4e0] sm:$0xff] }
 0x99e   : > { %v3466_v29 = vadd.f32 %v3465_v20, %v3377_v41  ;;  %v3381_v49 = vadd.f32 %v3380_v11, %v3303_v5  ;;  %v9606_v22 = vadd.f32 %v3464_v50, %v11244_v44  ;;  %v3769_v41 = vld [vmem:[#allocation5 + $0x4e8] sm:$0xff]  ;;  %v3764_v20 = vld [vmem:[#allocation5 + $0x4c0] sm:$0xff] }
 0x99f   : > { %v3469_v62 = vpop.f32.mrf.mxu0  ;;  %v3382_v61 = vpop.f32.mrf.mxu1  ;;  %v3765_v50 = vld [vmem:[#allocation5 + $0x4c8] sm:$0xff]  ;;  %v3748_v44 = vld [vmem:[#allocation5 + $0x440] sm:$0xff] }
 0x9a0   : > { %v9603_v3 = vadd.f32 %v3466_v29, %v11242_v17  ;;  %v3383_v13 = vadd.f32 %v3382_v61, %v3307_v30  ;;  %11245 = vst [vmem:[#allocation38_spill] sm:$0xff] %v9606_v22  ;;  %v3470_v46 = vadd.f32 %v3469_v62, %v3381_v49  ;;  %v3761_v11 = vld [vmem:[#allocation5 + $0x4a8] sm:$0xff]  ;;  %v3760_v29 = vld [vmem:[#allocation5 + $0x4a0] sm:$0xff] }
 0x9a1   : > { %v3471_v59 = vpop.f32.mrf.mxu0  ;;  %v3757_v49 = vld [vmem:[#allocation5 + $0x488] sm:$0xff]  ;;  %v3756_v62 = vld [vmem:[#allocation5 + $0x480] sm:$0xff] }
 0x9a2   : > { %11243 = vst [vmem:[#allocation35_spill] sm:$0xff] %v9603_v3  ;;  %v3472_v9 = vadd.f32 %v3471_v59, %v3383_v13  ;;  %3561 = vmatprep.mubr.f32.mxu1 %v9603_v3  ;;  %v9614_v58 = vadd.f32 %v3470_v46, %v11248_v63  ;;  %v3753_v61 = vld [vmem:[#allocation5 + $0x468] sm:$0xff]  ;;  %v3752_v17 = vld [vmem:[#allocation5 + $0x460] sm:$0xff] }
 0x9a3   : > { %3562 = vmatmul.mubr.f32.vlgmr.msra.gmra.mxu1 %v9606_v22  ;;  %v3749_v13 = vld [vmem:[#allocation5 + $0x448] sm:$0xff]  ;;  %v3744_v59 = vld [vmem:[#allocation5 + $0x420] sm:$0xff] }
 0x9a4   : > { %v9611_v37 = vadd.f32 %v3472_v9, %v11246_v18  ;;  %11249 = vst [vmem:[#allocation37_spill] sm:$0xff] %v9614_v58  ;;  %3892 = vmatpush1.msra.mxu1 %v3800_v1  ;;  %v3745_v46 = vld [vmem:[#allocation5 + $0x428] sm:$0xff]  ;;  %v3740_v18 = vld [vmem:[#allocation5 + $0x400] sm:$0xff]  ;;  %v3791_v1 = vld [vmem:[#allocation5 + $0x598] sm:$0xff] }
 0x9a5   : > { %3893 = vmatprep.subr.mxu1 %v3797_v14  ;;  %v3741_v9 = vld [vmem:[#allocation5 + $0x408] sm:$0xff]  ;;  %v3790_v14 = vld [vmem:[#allocation5 + $0x590] sm:$0xff] }
 0x9a6   : > { %11247 = vst [vmem:[#allocation31_spill] sm:$0xff] %v9611_v37  ;;  %3567 = vmatprep.mubr.f32.mxu1 %v9611_v37  ;;  %3894 = vmatpush1.msra.mxu1 %v3796_v48  ;;  %v3865_v63 = vld [vmem:[#allocation5 + $0x7e8] sm:$0xff]  ;;  %v3787_v48 = vld [vmem:[#allocation5 + $0x578] sm:$0xff] }
 0x9a7   : > { %3568 = vmatmul.mubr.f32.gmra.mxu1 %v9614_v58  ;;  %3895 = vmatprep.subr.mxu1 %v3793_v55  ;;  %v3786_v55 = vld [vmem:[#allocation5 + $0x570] sm:$0xff] }
 0x9a8   : > { %3896 = vmatpush1.msra.mxu1 %v3792_v15  ;;  %v3783_v15 = vld [vmem:[#allocation5 + $0x558] sm:$0xff] }
 0x9a9   : > { %3897 = vmatprep.subr.mxu1 %v3789_v51  ;;  %v3782_v51 = vld [vmem:[#allocation5 + $0x550] sm:$0xff] }
 0x9aa   : > { %3898 = vmatpush1.msra.mxu1 %v3788_v45  ;;  %v3779_v45 = vld [vmem:[#allocation5 + $0x538] sm:$0xff] }
 0x9ab   : > { %3899 = vmatprep.subr.mxu1 %v3785_v19  ;;  %v3778_v19 = vld [vmem:[#allocation5 + $0x530] sm:$0xff] }
 0x9ac   : > { %3900 = vmatpush1.msra.mxu1 %v3784_v16  ;;  %v3775_v16 = vld [vmem:[#allocation5 + $0x518] sm:$0xff] }
 0x9b1   : > { %v3386_v21 = vpop.f32.mrf.mxu1 }
 0x9b2   : > { %v3387_v12 = vadd.f32 %v3386_v21, %v3303_v5  ;;  %v3864_v21 = vld [vmem:[#allocation5 + $0x7e0] sm:$0xff] }
 0x9b3   : > { %v3388_v35 = vpop.f32.mrf.mxu1 }
 0x9b4   : > { %v3389_v60 = vadd.f32 %v3388_v35, %v3307_v30  ;;  %v3861_v35 = vld [vmem:[#allocation5 + $0x7c8] sm:$0xff] }
 0x9b6   : > { %v3475_v42 = vpop.f32.mrf.mxu0 }
 0x9b7   : > { %v3476_v27 = vadd.f32 %v3475_v42, %v3387_v12  ;;  %v3860_v12 = vld [vmem:[#allocation5 + $0x7c0] sm:$0xff] }
 0x9b8   : > { %v3477_v28 = vpop.f32.mrf.mxu0  ;;  %v3856_v42 = vld [vmem:[#allocation5 + $0x7a0] sm:$0xff] }
 0x9b9   : > { %v3478_v38 = vadd.f32 %v3477_v28, %v3389_v60  ;;  %v3392_v2 = vpop.f32.mrf.mxu1  ;;  %v9622_v23 = vadd.f32 %v3476_v27, %v11252_v8  ;;  %v3857_v60 = vld [vmem:[#allocation5 + $0x7a8] sm:$0xff] }
 0x9ba   : > { %v3393_v36 = vadd.f32 %v3392_v2, %v3303_v5  ;;  %v3781_v5 = vld [vmem:[#allocation5 + $0x548] sm:$0xff] }
 0x9bb   : > { %v9619_v56 = vadd.f32 %v3478_v38, %v11250_v10  ;;  %v3481_v32 = vpop.f32.mrf.mxu0  ;;  %v3394_v33 = vpop.f32.mrf.mxu1  ;;  %11253 = vst [vmem:[#allocation33_spill] sm:$0xff] %v9622_v23  ;;  %3901 = vmatprep.subr.mxu1 %v3781_v5  ;;  %v3774_v5 = vld [vmem:[#allocation5 + $0x510] sm:$0xff] }
 0x9bc   : > { %v3395_v53 = vadd.f32 %v3394_v33, %v3307_v30  ;;  %v3482_v54 = vadd.f32 %v3481_v32, %v3393_v36  ;;  %v3776_v30 = vld [vmem:[#allocation5 + $0x520] sm:$0xff]  ;;  %3902 = vmatpush1.msra.mxu1 %v3780_v43  ;;  %v3771_v43 = vld [vmem:[#allocation5 + $0x4f8] sm:$0xff] }
 0x9bd   : > { %11251 = vst [vmem:[#allocation53_spill] sm:$0xff] %v9619_v56  ;;  %v3483_v34 = vpop.f32.mrf.mxu0  ;;  %3573 = vmatprep.mubr.f32.mxu1 %v9619_v56  ;;  %3903 = vmatprep.subr.mxu1 %v3777_v26  ;;  %v3770_v26 = vld [vmem:[#allocation5 + $0x4f0] sm:$0xff] }
 0x9be   : > { %v3484_v31 = vadd.f32 %v3483_v34, %v3395_v53  ;;  %3574 = vmatmul.mubr.f32.gmra.mxu1 %v9622_v23  ;;  %v9630_v6 = vadd.f32 %v3482_v54, %v11256_v24  ;;  %v3802_v53 = vld [vmem:[#allocation5 + $0x5f0] sm:$0xff]  ;;  %v3799_v34 = vld [vmem:[#allocation5 + $0x5d8] sm:$0xff] }
 0x9bf   : > { %3904 = vmatpush1.msra.mxu1 %v3776_v30  ;;  %v3795_v24 = vld [vmem:[#allocation5 + $0x5b8] sm:$0xff] }
 0x9c0   : > { %v9627_v47 = vadd.f32 %v3484_v31, %v11254_v0  ;;  %11257 = vst [vmem:[#allocation34_spill] sm:$0xff] %v9630_v6  ;;  %3905 = vmatprep.subr.mxu1 %v3773_v25  ;;  %v3798_v31 = vld [vmem:[#allocation5 + $0x5d0] sm:$0xff]  ;;  %v3767_v30 = vld [vmem:[#allocation5 + $0x4d8] sm:$0xff] }
 0x9c1   : > { %3906 = vmatpush1.msra.mxu1 %v3772_v52  ;;  %v3766_v25 = vld [vmem:[#allocation5 + $0x4d0] sm:$0xff]  ;;  %v3763_v52 = vld [vmem:[#allocation5 + $0x4b8] sm:$0xff] }
 0x9c2   : > { %11255 = vst [vmem:[#allocation43_spill] sm:$0xff] %v9627_v47  ;;  %3579 = vmatprep.mubr.f32.mxu1 %v9627_v47  ;;  %3907 = vmatprep.subr.mxu1 %v3769_v41  ;;  %v3762_v41 = vld [vmem:[#allocation5 + $0x4b0] sm:$0xff] }
 0x9c3   : > { %3580 = vmatmul.mubr.f32.gmra.mxu1 %v9630_v6 }
 0x9c4   : > { %3908 = vmatpush1.msra.mxu1 %v3768_v57 }
 0x9c5   : > { %3909 = vmatprep.subr.mxu1 %v3765_v50  ;;  %v3759_v50 = vld [vmem:[#allocation5 + $0x498] sm:$0xff] }
 0x9c6   : > { %3910 = vmatpush1.msra.mxu1 %v3764_v20  ;;  %v3758_v20 = vld [vmem:[#allocation5 + $0x490] sm:$0xff] }
 0x9c7   : > { %3911 = vmatprep.subr.mxu1 %v3761_v11 }
 0x9c8   : > { %3912 = vmatpush1.msra.mxu1 %v3760_v29 }
 0x9c9   : > { %3913 = vmatprep.subr.mxu1 %v3757_v49  ;;  %v3755_v49 = vld [vmem:[#allocation5 + $0x478] sm:$0xff] }
 0x9ca   : > { %3914 = vmatpush1.msra.mxu1 %v3756_v62 }
 0x9cb   : > { %3915 = vmatprep.subr.mxu1 %v3753_v61  ;;  %v3754_v61 = vld [vmem:[#allocation5 + $0x470] sm:$0xff] }
 0x9cc   : > { %3916 = vmatpush1.msra.mxu1 %v3752_v17  ;;  %v3751_v17 = vld [vmem:[#allocation5 + $0x458] sm:$0xff] }
 0x9cd   : > { %3917 = vmatprep.subr.mxu1 %v3749_v13 }
 0x9ce   : > { %3918 = vmatpush1.msra.mxu1 %v3748_v44 }
 0x9cf   : > { %3919 = vmatprep.subr.mxu1 %v3745_v46 }
 0x9d0   : > { %3920 = vmatpush1.msra.mxu1 %v3744_v59  ;;  %v3750_v59 = vld [vmem:[#allocation5 + $0x450] sm:$0xff] }
 0x9d1   : > { %3921 = vmatprep.subr.mxu1 %v3741_v9 }
 0x9d2   : > { %3922 = vmatpush1.msra.mxu1 %v3740_v18 }
 0x9d3   : > { %3923 = vmatprep.subr.mxu1 %v3865_v63  ;;  %v3747_v63 = vld [vmem:[#allocation5 + $0x438] sm:$0xff] }
 0x9d4   : > { %3924 = vmatpush2.msra.mxu1 %v3864_v21 }
 0x9d5   : > { %3925 = vmatprep.subr.mxu1 %v3861_v35  ;;  %v3746_v35 = vld [vmem:[#allocation5 + $0x430] sm:$0xff] }
 0x9d6   : > { %3926 = vmatpush2.msra.mxu1 %v3860_v12  ;;  %v3743_v12 = vld [vmem:[#allocation5 + $0x418] sm:$0xff] }
 0x9d7   : > { %3927 = vmatprep.subr.mxu1 %v3857_v60 }
 0x9d8   : > { %3928 = vmatpush2.msra.mxu1 %v3856_v42 }
 0xa63   : > { %v3563_v27 = vpop.f32.mrf.mxu1 }
 0xa64   : > { %v9635_v28 = vsub.f32 %v9606_v22, %v3563_v27  ;;  %v3742_v27 = vld [vmem:[#allocation5 + $0x410] sm:$0xff] }
 0xa65   : > { %v3565_v38 = vpop.f32.mrf.mxu1 }
 0xa66   : > { %v9638_v2 = vsub.f32 %v9603_v3, %v3565_v38  ;;  %v3594_v32 = vmul.f32 %v9635_v28, %v9635_v28  ;;  %v3867_v38 = vld [vmem:[#allocation5 + $0x7f8] sm:$0xff] }
 0xa67   : > { %v3569_v36 = vpop.f32.mrf.mxu1 }
 0xa68   : > { %v3595_v10 = vmul.f32 %v9638_v2, %v9638_v2  ;;  %v9645_v33 = vsub.f32 %v9614_v58, %v3569_v36  ;;  %v3866_v36 = vld [vmem:[#allocation5 + $0x7f0] sm:$0xff] }
 0xa69   : > { %v3571_v8 = vpop.f32.mrf.mxu1 }
 0xa6a   : > { %v9648_v54 = vsub.f32 %v9611_v37, %v3571_v8  ;;  %3666 = vmatprep.mubr.f32.mxu0 %v3595_v10  ;;  %v3596_v40 = vmul.f32 %v9645_v33, %v9645_v33  ;;  %v3863_v10 = vld [vmem:[#allocation5 + $0x7d8] sm:$0xff] }
 0xa6b   : > { %3667 = vmatmul.mubr.f32.vlgmr.msra.gmra.mxu0 %v3594_v32  ;;  %v3862_v32 = vld [vmem:[#allocation5 + $0x7d0] sm:$0xff]  ;;  %v3859_v8 = vld [vmem:[#allocation5 + $0x7b8] sm:$0xff] }
 0xa6c   : > { %v3597_v0 = vmul.f32 %v9648_v54, %v9648_v54  ;;  %3981 = vmatpush1.msra.mxu0 %v3802_v53  ;;  %v3858_v53 = vld [vmem:[#allocation5 + $0x7b0] sm:$0xff] }
 0xa6d   : > { %3982 = vmatprep.subr.mxu0 %v3799_v34  ;;  %v3853_v34 = vld [vmem:[#allocation5 + $0x788] sm:$0xff] }
 0xa6e   : > { %3672 = vmatprep.mubr.f32.mxu0 %v3597_v0  ;;  %3983 = vmatpush1.msra.mxu0 %v3798_v31  ;;  %v3855_v31 = vld [vmem:[#allocation5 + $0x798] sm:$0xff]  ;;  %v3852_v0 = vld [vmem:[#allocation5 + $0x780] sm:$0xff] }
 0xa6f   : > { %3673 = vmatmul.mubr.f32.gmra.mxu0 %v3596_v40  ;;  %3984 = vmatprep.subr.mxu0 %v3795_v24  ;;  %v3854_v24 = vld [vmem:[#allocation5 + $0x790] sm:$0xff]  ;;  %v3849_v40 = vld [vmem:[#allocation5 + $0x768] sm:$0xff] }
 0xa70   : > { %3985 = vmatpush1.msra.mxu0 %v3794_v39  ;;  %3929 = vmatprep.subr.mxu1 %v3853_v34  ;;  %v3851_v39 = vld [vmem:[#allocation5 + $0x778] sm:$0xff]  ;;  %v3808_v34 = vld [vmem:[#allocation5 + $0x620] sm:$0xff] }
 0xa71   : > { %3986 = vmatprep.subr.mxu0 %v3791_v1  ;;  %3930 = vmatpush2.msra.mxu1 %v3852_v0  ;;  %v3848_v1 = vld [vmem:[#allocation5 + $0x760] sm:$0xff]  ;;  %v3805_v0 = vld [vmem:[#allocation5 + $0x608] sm:$0xff] }
 0xa72   : > { %3987 = vmatpush1.msra.mxu0 %v3790_v14  ;;  %v3850_v14 = vld [vmem:[#allocation5 + $0x770] sm:$0xff]  ;;  %3931 = vmatprep.subr.mxu1 %v3849_v40  ;;  %v3804_v40 = vld [vmem:[#allocation5 + $0x600] sm:$0xff] }
 0xa73   : > { %3988 = vmatprep.subr.mxu0 %v3787_v48  ;;  %v3845_v48 = vld [vmem:[#allocation5 + $0x748] sm:$0xff]  ;;  %3932 = vmatpush2.msra.mxu1 %v3848_v1  ;;  %v4533_v1 = vld [vmem:[#allocation8 + $0x4f8] sm:$0xff] }
 0xa74   : > { %3989 = vmatpush1.msra.mxu0 %v3786_v55  ;;  %v3847_v55 = vld [vmem:[#allocation5 + $0x758] sm:$0xff]  ;;  %3933 = vmatprep.subr.mxu1 %v3845_v48 }
 0xa75   : > { %3990 = vmatprep.subr.mxu0 %v3783_v15  ;;  %v3844_v15 = vld [vmem:[#allocation5 + $0x740] sm:$0xff] }
 0xa76   : > { %3991 = vmatpush1.msra.mxu0 %v3782_v51  ;;  %v3846_v51 = vld [vmem:[#allocation5 + $0x750] sm:$0xff]  ;;  %3934 = vmatpush2.msra.mxu1 %v3844_v15 }
 0xa77   : > { %3992 = vmatprep.subr.mxu0 %v3779_v45  ;;  %v3841_v45 = vld [vmem:[#allocation5 + $0x728] sm:$0xff] }
 0xa78   : > { %3993 = vmatpush1.msra.mxu0 %v3778_v19  ;;  %v3843_v19 = vld [vmem:[#allocation5 + $0x738] sm:$0xff]  ;;  %3935 = vmatprep.subr.mxu1 %v3841_v45 }
 0xa79   : > { %3994 = vmatprep.subr.mxu0 %v3775_v16  ;;  %v3840_v16 = vld [vmem:[#allocation5 + $0x720] sm:$0xff] }
 0xa7a   : > { %3995 = vmatpush1.msra.mxu0 %v3774_v5  ;;  %v3842_v5 = vld [vmem:[#allocation5 + $0x730] sm:$0xff]  ;;  %3936 = vmatpush2.msra.mxu1 %v3840_v16 }
 0xa7b   : > { %3996 = vmatprep.subr.mxu0 %v3771_v43  ;;  %v3837_v43 = vld [vmem:[#allocation5 + $0x708] sm:$0xff] }
 0xa7c   : > { %3997 = vmatpush1.msra.mxu0 %v3770_v26  ;;  %v3839_v26 = vld [vmem:[#allocation5 + $0x718] sm:$0xff]  ;;  %3937 = vmatprep.subr.mxu1 %v3837_v43  ;;  %v7020_v43 = vld [vmem:[%s10980_s9 + $0x10] sm:$0xff] }
 0xa7d   : > { %3998 = vmatprep.subr.mxu0 %v3767_v30  ;;  %v3836_v30 = vld [vmem:[#allocation5 + $0x700] sm:$0xff] }
 0xa7e   : > { %v3575_v57 = vpop.f32.mrf.mxu1  ;;  %3999 = vmatpush1.msra.mxu0 %v3766_v25  ;;  %v3838_v25 = vld [vmem:[#allocation5 + $0x710] sm:$0xff]  ;;  %3938 = vmatpush2.msra.mxu1 %v3836_v30 }
 0xa7f   : > { %4000 = vmatprep.subr.mxu0 %v3763_v52  ;;  %v9655_v11 = vsub.f32 %v9622_v23, %v3575_v57  ;;  %v3833_v52 = vld [vmem:[#allocation5 + $0x6e8] sm:$0xff]  ;;  %v3832_v57 = vld [vmem:[#allocation5 + $0x6e0] sm:$0xff] }
 0xa80   : > { %v3577_v29 = vpop.f32.mrf.mxu1  ;;  %4001 = vmatpush1.msra.mxu0 %v3762_v41  ;;  %v3835_v41 = vld [vmem:[#allocation5 + $0x6f8] sm:$0xff]  ;;  %3939 = vmatprep.subr.mxu1 %v3833_v52 }
 0xa81   : > { %v9658_v62 = vsub.f32 %v9619_v56, %v3577_v29  ;;  %4002 = vmatprep.subr.mxu0 %v3759_v50  ;;  %v3598_v46 = vmul.f32 %v9655_v11, %v9655_v11  ;;  %v3834_v50 = vld [vmem:[#allocation5 + $0x6f0] sm:$0xff]  ;;  %3940 = vmatpush2.msra.mxu1 %v3832_v57  ;;  %v3831_v29 = vld [vmem:[#allocation5 + $0x6d8] sm:$0xff] }
 0xa82   : > { %4003 = vmatpush1.msra.mxu0 %v3758_v20  ;;  %v3829_v20 = vld [vmem:[#allocation5 + $0x6c8] sm:$0xff] }
 0xa83   : > { %v3599_v13 = vmul.f32 %v9658_v62, %v9658_v62  ;;  %v3581_v44 = vpop.f32.mrf.mxu1  ;;  %4004 = vmatprep.subr.mxu0 %v3755_v49  ;;  %v3828_v49 = vld [vmem:[#allocation5 + $0x6c0] sm:$0xff]  ;;  %3941 = vmatprep.subr.mxu1 %v3829_v20 }
 0xa84   : > { %4005 = vmatpush1.msra.mxu0 %v3754_v61  ;;  %v9665_v9 = vsub.f32 %v9630_v6, %v3581_v44  ;;  %v3830_v61 = vld [vmem:[#allocation5 + $0x6d0] sm:$0xff]  ;;  %3942 = vmatpush2.msra.mxu1 %v3828_v49  ;;  %v3824_v44 = vld [vmem:[#allocation5 + $0x6a0] sm:$0xff] }
 0xa85   : > { %v3583_v18 = vpop.f32.mrf.mxu1  ;;  %3678 = vmatprep.mubr.f32.mxu0 %v3599_v13  ;;  %4006 = vmatprep.subr.mxu0 %v3751_v17  ;;  %v3825_v17 = vld [vmem:[#allocation5 + $0x6a8] sm:$0xff]  ;;  %v3827_v13 = vld [vmem:[#allocation5 + $0x6b8] sm:$0xff] }
 0xa86   : > { %v9668_v21 = vsub.f32 %v9627_v47, %v3583_v18  ;;  %3679 = vmatmul.mubr.f32.gmra.mxu0 %v3598_v46  ;;  %v3600_v42 = vmul.f32 %v9665_v9, %v9665_v9  ;;  %3943 = vmatprep.subr.mxu1 %v3825_v17  ;;  %v3826_v46 = vld [vmem:[#allocation5 + $0x6b0] sm:$0xff]  ;;  %v3823_v18 = vld [vmem:[#allocation5 + $0x698] sm:$0xff] }
 0xa87   : > { %4007 = vmatpush1.msra.mxu0 %v3750_v59  ;;  %v3821_v59 = vld [vmem:[#allocation5 + $0x688] sm:$0xff]  ;;  %3944 = vmatpush2.msra.mxu1 %v3824_v44 }
 0xa88   : > { %v3601_v60 = vmul.f32 %v9668_v21, %v9668_v21  ;;  %4008 = vmatprep.subr.mxu0 %v3747_v63  ;;  %v3820_v63 = vld [vmem:[#allocation5 + $0x680] sm:$0xff]  ;;  %3945 = vmatprep.subr.mxu1 %v3821_v59 }
 0xa89   : > { %4009 = vmatpush1.msra.mxu0 %v3746_v35  ;;  %v3822_v35 = vld [vmem:[#allocation5 + $0x690] sm:$0xff]  ;;  %3946 = vmatpush2.msra.mxu1 %v3820_v63 }
 0xa8a   : > { %3684 = vmatprep.mubr.f32.mxu0 %v3601_v60  ;;  %4010 = vmatprep.subr.mxu0 %v3743_v12  ;;  %v3817_v12 = vld [vmem:[#allocation5 + $0x668] sm:$0xff]  ;;  %v3819_v60 = vld [vmem:[#allocation5 + $0x678] sm:$0xff] }
 0xa8b   : > { %3685 = vmatmul.mubr.f32.gmra.mxu0 %v3600_v42  ;;  %v3816_v42 = vld [vmem:[#allocation5 + $0x660] sm:$0xff]  ;;  %3947 = vmatprep.subr.mxu1 %v3817_v12  ;;  %v4596_v12 = vld [vmem:[#allocation8 + $0x6f0] sm:$0xff] }
 0xa8c   : > { %4011 = vmatpush1.msra.mxu0 %v3742_v27  ;;  %v3818_v27 = vld [vmem:[#allocation5 + $0x670] sm:$0xff]  ;;  %3948 = vmatpush2.msra.mxu1 %v3816_v42 }
 0xa8d   : > { %4012 = vmatprep.subr.mxu0 %v3867_v38  ;;  %v3813_v38 = vld [vmem:[#allocation5 + $0x648] sm:$0xff]  ;;  %v4531_v42 = vld [vmem:[#allocation8 + $0x4e8] sm:$0xff] }
 0xa8e   : > { %4013 = vmatpush2.msra.mxu0 %v3866_v36  ;;  %v3815_v36 = vld [vmem:[#allocation5 + $0x658] sm:$0xff]  ;;  %3949 = vmatprep.subr.mxu1 %v3813_v38 }
 0xa8f   : > { %4014 = vmatprep.subr.mxu0 %v3863_v10  ;;  %v3812_v10 = vld [vmem:[#allocation5 + $0x640] sm:$0xff] }
 0xa90   : > { %4015 = vmatpush2.msra.mxu0 %v3862_v32  ;;  %v3814_v32 = vld [vmem:[#allocation5 + $0x650] sm:$0xff]  ;;  %3950 = vmatpush2.msra.mxu1 %v3812_v10  ;;  %v4530_v10 = vld [vmem:[#allocation8 + $0x4e0] sm:$0xff] }
 0xa91   : > { %4016 = vmatprep.subr.mxu0 %v3859_v8  ;;  %v3809_v8 = vld [vmem:[#allocation5 + $0x628] sm:$0xff] }
 0xa92   : > { %4017 = vmatpush2.msra.mxu0 %v3858_v53  ;;  %v3811_v53 = vld [vmem:[#allocation5 + $0x638] sm:$0xff]  ;;  %3951 = vmatprep.subr.mxu1 %v3809_v8 }
 0xa93   : > { %4018 = vmatprep.subr.mxu0 %v3855_v31  ;;  %v3810_v31 = vld [vmem:[#allocation5 + $0x630] sm:$0xff]  ;;  %3952 = vmatpush2.msra.mxu1 %v3808_v34  ;;  %v4593_v34 = vld [vmem:[#allocation8 + $0x6d8] sm:$0xff] }
 0xa94   : > { %4019 = vmatpush2.msra.mxu0 %v3854_v24  ;;  %v3807_v24 = vld [vmem:[#allocation5 + $0x618] sm:$0xff]  ;;  %3953 = vmatprep.subr.mxu1 %v3805_v0 }
 0xa95   : > { %4020 = vmatprep.subr.mxu0 %v3851_v39  ;;  %v3806_v39 = vld [vmem:[#allocation5 + $0x610] sm:$0xff]  ;;  %3954 = vmatpush2.msra.mxu1 %v3804_v40  ;;  %v4528_v0 = vld [vmem:[#allocation8 + $0x4d0] sm:$0xff] }
 0xa96   : > { %4021 = vmatpush2.msra.mxu0 %v3850_v14  ;;  %v4597_v14 = vld [vmem:[#allocation8 + $0x6f8] sm:$0xff]  ;;  %4638 = vmatprep.subr.mxu1 %v4533_v1  ;;  %v4527_v40 = vld [vmem:[#allocation8 + $0x4c8] sm:$0xff] }
 0xa97   : > { %4022 = vmatprep.subr.mxu0 %v3847_v55 }
 0xa98   : > { %4023 = vmatpush2.msra.mxu0 %v3846_v51 }
 0xa99   : > { %4024 = vmatprep.subr.mxu0 %v3843_v19 }
 0xa9a   : > { %4025 = vmatpush2.msra.mxu0 %v3842_v5 }
 0xa9b   : > { %4026 = vmatprep.subr.mxu0 %v3839_v26  ;;  %v7021_v26 = vld [vmem:[%s10980_s9 + $0x18] sm:$0xff] }
 0xa9c   : > { %4027 = vmatpush2.msra.mxu0 %v3838_v25  ;;  %v11258_v25 = vld [vmem:[#allocation29_spill] sm:$0xff] }
 0xa9d   : > { %4028 = vmatprep.subr.mxu0 %v3835_v41  ;;  %v9681_v52 = vrot.slane %v7020_v43, %v11258_v25  ;;  %v9685_v57 = vrot.slane %v7021_v26, %v11258_v25 }
 0xa9e   : > { %4029 = vmatpush2.msra.mxu0 %v3834_v50 }
 0xa9f   : > { %4030 = vmatprep.subr.mxu0 %v3831_v29  ;;  %v11259_v29 = vld [vmem:[#allocation30_spill] sm:$0xff] }
 0xaa0   : > { %4031 = vmatpush2.msra.mxu0 %v3830_v61  ;;  %v9689_v49 = vrot.slane %v7021_v26, %v11259_v29 }
 0xaa1   : > { %4032 = vmatprep.subr.mxu0 %v3827_v13  ;;  %v9693_v13 = vrot.slane %v7020_v43, %v11259_v29 }
 0xaa2   : > { %4033 = vmatpush2.msra.mxu0 %v3826_v46 }
 0xaa3   : > { %4034 = vmatprep.subr.mxu0 %v3823_v18 }
 0xaa4   : > { %4035 = vmatpush2.msra.mxu0 %v3822_v35  ;;  %v4532_v35 = vld [vmem:[#allocation8 + $0x4f0] sm:$0xff] }
 0xaa5   : > { %4036 = vmatprep.subr.mxu0 %v3819_v60 }
 0xaa6   : > { %4037 = vmatpush2.msra.mxu0 %v3818_v27  ;;  %v4595_v27 = vld [vmem:[#allocation8 + $0x6e8] sm:$0xff] }
 0xaa7   : > { %4038 = vmatprep.subr.mxu0 %v3815_v36 }
 0xaa8   : > { %4039 = vmatpush2.msra.mxu0 %v3814_v32  ;;  %v4594_v32 = vld [vmem:[#allocation8 + $0x6e0] sm:$0xff] }
 0xaa9   : > { %4040 = vmatprep.subr.mxu0 %v3811_v53  ;;  %v4529_v53 = vld [vmem:[#allocation8 + $0x4d8] sm:$0xff] }
 0xaaa   : > { %4041 = vmatpush2.msra.mxu0 %v3810_v31 }
 0xaab   : > { %4042 = vmatprep.subr.mxu0 %v3807_v24  ;;  %v4592_v24 = vld [vmem:[#allocation8 + $0x6d0] sm:$0xff] }
 0xaac   : > { %4043 = vmatpush2.msra.mxu0 %v3806_v39  ;;  %v4591_v39 = vld [vmem:[#allocation8 + $0x6c8] sm:$0xff] }
 0xaad   : > { %4727 = vmatprep.subr.mxu0 %v4597_v14  ;;  %v4526_v14 = vld [vmem:[#allocation8 + $0x4c0] sm:$0xff] }
 0xb2b   : > { %v3668_v48 = vpop.f32.mrf.mxu0 }
 0xb2c   : > { %v3669_v55 = vadd.f32 1e-05, %v3668_v48  ;;  %v4590_v48 = vld [vmem:[#allocation8 + $0x6c0] sm:$0xff] }
 0xb2d   : > { %v3670_v15 = vpop.f32.mrf.mxu0 }
 0xb2e   : > { %7441 = vrsqrt.f32 %v3669_v55  ;;  %v3671_v51 = vadd.f32 1e-05, %v3670_v15 }
 0xb2f   : > { %v3674_v45 = vpop.f32.mrf.mxu0 }
 0xb30   : > { %7443 = vrsqrt.f32 %v3671_v51  ;;  %v3675_v19 = vadd.f32 1e-05, %v3674_v45 }
 0xb31   : > { %v3676_v16 = vpop.f32.mrf.mxu0 }
 0xb32   : > { %7445 = vrsqrt.f32 %v3675_v19  ;;  %v3677_v5 = vadd.f32 1e-05, %v3676_v16 }
 0xb34   : > { %7447 = vrsqrt.f32 %v3677_v5 }
 0xb3b   : > { %v7442_v30 = vpop.eup %7441 }
 0xb3c   : > { %v3699_v41 = vmul.f32 %v7442_v30, %v9635_v28 }
 0xb3d   : > { %v7444_v50 = vpop.eup %7443 }
 0xb3e   : > { %v3700_v20 = vmul.f32 %v7444_v50, %v9638_v2  ;;  %v3715_v17 = vmul.f32 %v9681_v52, %v3699_v41 }
 0xb3f   : > { %v7446_v61 = vpop.eup %7445 }
 0xb40   : > { %v3716_v44 = vmul.f32 %v9685_v57, %v3700_v20  ;;  %v3701_v46 = vmul.f32 %v7446_v61, %v9645_v33  ;;  %v3731_v2 = vadd.f32 %v9693_v13, %v3715_v17 }
 0xb41   : > { %v7448_v28 = vpop.eup %7447 }
 0xb42   : > { %v3732_v59 = vadd.f32 %v9689_v49, %v3716_v44  ;;  %v3702_v18 = vmul.f32 %v7448_v28, %v9648_v54  ;;  %v3717_v63 = vmul.f32 %v9681_v52, %v3701_v46  ;;  %v4589_v28 = vld [vmem:[#allocation8 + $0x6b8] sm:$0xff] }
 0xb44   : > { %3955 = vmatprep.mubr.f32.mxu1 %v3732_v59  ;;  %4044 = vmatprep.mubr.f32.mxu0 %v3732_v59  ;;  %v3718_v60 = vmul.f32 %v9685_v57, %v3702_v18  ;;  %v3733_v36 = vadd.f32 %v9693_v13, %v3717_v63  ;;  %v4588_v59 = vld [vmem:[#allocation8 + $0x6b0] sm:$0xff]  ;;  %v4587_v18 = vld [vmem:[#allocation8 + $0x6a8] sm:$0xff] }
 0xb45   : > { %3956 = vmatmul.mubr.f32.vlgmr.msra.gmra.mxu1 %v3731_v2  ;;  %4045 = vmatmul.mubr.f32.vlgmr.msra.gmra.mxu0 %v3731_v2  ;;  %v4585_v2 = vld [vmem:[#allocation8 + $0x698] sm:$0xff]  ;;  %v4520_v63 = vld [vmem:[#allocation8 + $0x490] sm:$0xff] }
 0xb46   : > { %v3680_v33 = vpop.f32.mrf.mxu0  ;;  %v3734_v38 = vadd.f32 %v9689_v49, %v3718_v60  ;;  %4639 = vmatpush1.msra.mxu1 %v4532_v35  ;;  %4728 = vmatpush1.msra.mxu0 %v4596_v12  ;;  %v4584_v35 = vld [vmem:[#allocation8 + $0x690] sm:$0xff]  ;;  %v4519_v12 = vld [vmem:[#allocation8 + $0x488] sm:$0xff] }
 0xb47   : > { %v3681_v54 = vadd.f32 1e-05, %v3680_v33  ;;  %4640 = vmatprep.subr.mxu1 %v4531_v42  ;;  %4729 = vmatprep.subr.mxu0 %v4595_v27  ;;  %v4583_v60 = vld [vmem:[#allocation8 + $0x688] sm:$0xff]  ;;  %v4518_v42 = vld [vmem:[#allocation8 + $0x480] sm:$0xff]  ;;  %v4517_v33 = vld [vmem:[#allocation8 + $0x478] sm:$0xff] }
 0xb48   : > { %v3682_v8 = vpop.f32.mrf.mxu0  ;;  %3961 = vmatprep.mubr.f32.mxu1 %v3734_v38  ;;  %4050 = vmatprep.mubr.f32.mxu0 %v3734_v38  ;;  %v4582_v27 = vld [vmem:[#allocation8 + $0x680] sm:$0xff]  ;;  %v4581_v38 = vld [vmem:[#allocation8 + $0x678] sm:$0xff] }
 0xb49   : > { %7449 = vrsqrt.f32 %v3681_v54  ;;  %v3683_v31 = vadd.f32 1e-05, %v3682_v8  ;;  %3962 = vmatmul.mubr.f32.gmra.mxu1 %v3733_v36  ;;  %4051 = vmatmul.mubr.f32.gmra.mxu0 %v3733_v36  ;;  %v4516_v54 = vld [vmem:[#allocation8 + $0x470] sm:$0xff]  ;;  %v4514_v8 = vld [vmem:[#allocation8 + $0x460] sm:$0xff] }
 0xb4a   : > { %4641 = vmatpush1.msra.mxu1 %v4530_v10  ;;  %4730 = vmatpush1.msra.mxu0 %v4594_v32  ;;  %v4580_v36 = vld [vmem:[#allocation8 + $0x670] sm:$0xff]  ;;  %v4515_v10 = vld [vmem:[#allocation8 + $0x468] sm:$0xff] }
 0xb4b   : > { %7451 = vrsqrt.f32 %v3683_v31  ;;  %v3686_v1 = vpop.f32.mrf.mxu0  ;;  %4642 = vmatprep.subr.mxu1 %v4529_v53  ;;  %4731 = vmatprep.subr.mxu0 %v4593_v34  ;;  %v4579_v32 = vld [vmem:[#allocation8 + $0x668] sm:$0xff]  ;;  %v4578_v53 = vld [vmem:[#allocation8 + $0x660] sm:$0xff]  ;;  %v4513_v34 = vld [vmem:[#allocation8 + $0x458] sm:$0xff] }
 0xb4c   : > { %v3687_v55 = vadd.f32 1e-05, %v3686_v1  ;;  %4643 = vmatpush1.msra.mxu1 %v4528_v0  ;;  %4732 = vmatpush1.msra.mxu0 %v4592_v24  ;;  %v4577_v31 = vld [vmem:[#allocation8 + $0x658] sm:$0xff]  ;;  %v4512_v0 = vld [vmem:[#allocation8 + $0x450] sm:$0xff]  ;;  %v4510_v1 = vld [vmem:[#allocation8 + $0x440] sm:$0xff] }
 0xb4d   : > { %v3688_v15 = vpop.f32.mrf.mxu0  ;;  %4644 = vmatprep.subr.mxu1 %v4527_v40  ;;  %4733 = vmatprep.subr.mxu0 %v4591_v39  ;;  %v4576_v24 = vld [vmem:[#allocation8 + $0x650] sm:$0xff]  ;;  %v4511_v40 = vld [vmem:[#allocation8 + $0x448] sm:$0xff] }
 0xb4e   : > { %7453 = vrsqrt.f32 %v3687_v55  ;;  %v3689_v51 = vadd.f32 1e-05, %v3688_v15  ;;  %4645 = vmatpush1.msra.mxu1 %v4526_v14  ;;  %4734 = vmatpush1.msra.mxu0 %v4590_v48  ;;  %v4575_v39 = vld [vmem:[#allocation8 + $0x648] sm:$0xff]  ;;  %v4574_v14 = vld [vmem:[#allocation8 + $0x640] sm:$0xff]  ;;  %v4509_v48 = vld [vmem:[#allocation8 + $0x438] sm:$0xff] }
 0xb4f   : > { %4735 = vmatprep.subr.mxu0 %v4589_v28  ;;  %v4573_v55 = vld [vmem:[#allocation8 + $0x638] sm:$0xff]  ;;  %v4508_v15 = vld [vmem:[#allocation8 + $0x430] sm:$0xff]  ;;  %v4627_v28 = vld [vmem:[#allocation8 + $0x7e8] sm:$0xff] }
 0xb50   : > { %7455 = vrsqrt.f32 %v3689_v51  ;;  %4736 = vmatpush1.msra.mxu0 %v4588_v59  ;;  %v4572_v51 = vld [vmem:[#allocation8 + $0x630] sm:$0xff]  ;;  %v4626_v59 = vld [vmem:[#allocation8 + $0x7e0] sm:$0xff] }
 0xb51   : > { %4737 = vmatprep.subr.mxu0 %v4587_v18  ;;  %v4625_v18 = vld [vmem:[#allocation8 + $0x7d8] sm:$0xff] }
 0xb56   : > { %v7450_v45 = vpop.eup %7449 }
 0xb57   : > { %v3703_v19 = vmul.f32 %v7450_v45, %v9655_v11  ;;  %v4507_v45 = vld [vmem:[#allocation8 + $0x428] sm:$0xff] }
 0xb58   : > { %v7452_v16 = vpop.eup %7451 }
 0xb59   : > { %v3704_v5 = vmul.f32 %v7452_v16, %v9658_v62  ;;  %v3719_v43 = vmul.f32 %v9681_v52, %v3703_v19  ;;  %v4571_v19 = vld [vmem:[#allocation8 + $0x628] sm:$0xff]  ;;  %v4506_v16 = vld [vmem:[#allocation8 + $0x420] sm:$0xff] }
 0xb5b   : > { %v7454_v26 = vpop.eup %7453  ;;  %v3720_v30 = vmul.f32 %v9685_v57, %v3704_v5  ;;  %v3735_v61 = vadd.f32 %v9693_v13, %v3719_v43  ;;  %v4570_v5 = vld [vmem:[#allocation8 + $0x620] sm:$0xff]  ;;  %v4505_v43 = vld [vmem:[#allocation8 + $0x418] sm:$0xff] }
 0xb5c   : > { %v3705_v41 = vmul.f32 %v7454_v26, %v9665_v9  ;;  %v4525_v9 = vld [vmem:[#allocation8 + $0x4b8] sm:$0xff] }
 0xb5d   : > { %v7456_v50 = vpop.eup %7455  ;;  %v3736_v20 = vadd.f32 %v9689_v49, %v3720_v30  ;;  %4646 = vmatprep.subr.mxu1 %v4525_v9  ;;  %v4569_v26 = vld [vmem:[#allocation8 + $0x618] sm:$0xff]  ;;  %v4504_v30 = vld [vmem:[#allocation8 + $0x410] sm:$0xff]  ;;  %v4563_v9 = vld [vmem:[#allocation8 + $0x5e8] sm:$0xff] }
 0xb5e   : > { %v3706_v17 = vmul.f32 %v7456_v50, %v9668_v21  ;;  %v3721_v11 = vmul.f32 %v9681_v52, %v3705_v41  ;;  %v4524_v21 = vld [vmem:[#allocation8 + $0x4b0] sm:$0xff]  ;;  %v4523_v52 = vld [vmem:[#allocation8 + $0x4a8] sm:$0xff] }
 0xb5f   : > { %3967 = vmatprep.mubr.f32.mxu1 %v3736_v20  ;;  %4056 = vmatprep.mubr.f32.mxu0 %v3736_v20  ;;  %v4568_v41 = vld [vmem:[#allocation8 + $0x610] sm:$0xff]  ;;  %v4503_v50 = vld [vmem:[#allocation8 + $0x408] sm:$0xff] }
 0xb60   : > { %3968 = vmatmul.mubr.f32.gmra.mxu1 %v3735_v61  ;;  %4057 = vmatmul.mubr.f32.gmra.mxu0 %v3735_v61  ;;  %v3722_v62 = vmul.f32 %v9685_v57, %v3706_v17  ;;  %v3737_v46 = vadd.f32 %v9693_v13, %v3721_v11  ;;  %v4522_v57 = vld [vmem:[#allocation8 + $0x4a0] sm:$0xff]  ;;  %v4521_v13 = vld [vmem:[#allocation8 + $0x498] sm:$0xff]  ;;  %v4567_v20 = vld [vmem:[#allocation8 + $0x608] sm:$0xff] }
 0xb61   : > { %4647 = vmatpush1.msra.mxu1 %v4524_v21  ;;  %v4502_v61 = vld [vmem:[#allocation8 + $0x400] sm:$0xff]  ;;  %v4565_v11 = vld [vmem:[#allocation8 + $0x5f8] sm:$0xff] }
 0xb62   : > { %v3738_v44 = vadd.f32 %v9689_v49, %v3722_v62  ;;  %4648 = vmatprep.subr.mxu1 %v4523_v52  ;;  %v4586_v49 = vld [vmem:[#allocation8 + $0x6a0] sm:$0xff]  ;;  %v4629_v62 = vld [vmem:[#allocation8 + $0x7f8] sm:$0xff] }
 0xb63   : > { %4649 = vmatpush1.msra.mxu1 %v4522_v57  ;;  %4738 = vmatpush1.msra.mxu0 %v4586_v49  ;;  %v4566_v17 = vld [vmem:[#allocation8 + $0x600] sm:$0xff]  ;;  %v4561_v52 = vld [vmem:[#allocation8 + $0x5d8] sm:$0xff]  ;;  %v4560_v57 = vld [vmem:[#allocation8 + $0x5d0] sm:$0xff] }
 0xb64   : > { %3973 = vmatprep.mubr.f32.mxu1 %v3738_v44  ;;  %4062 = vmatprep.mubr.f32.mxu0 %v3738_v44  ;;  %v4564_v44 = vld [vmem:[#allocation8 + $0x5f0] sm:$0xff]  ;;  %v4562_v21 = vld [vmem:[#allocation8 + $0x5e0] sm:$0xff] }
 0xb65   : > { %3974 = vmatmul.mubr.f32.gmra.mxu1 %v3737_v46  ;;  %4063 = vmatmul.mubr.f32.gmra.mxu0 %v3737_v46  ;;  %v4628_v46 = vld [vmem:[#allocation8 + $0x7f0] sm:$0xff] }
 0xb66   : > { %4650 = vmatprep.subr.mxu1 %v4521_v13  ;;  %4739 = vmatprep.subr.mxu0 %v4585_v2  ;;  %v4624_v49 = vld [vmem:[#allocation8 + $0x7d0] sm:$0xff]  ;;  %v4559_v13 = vld [vmem:[#allocation8 + $0x5c8] sm:$0xff] }
 0xb67   : > { %4651 = vmatpush1.msra.mxu1 %v4520_v63  ;;  %4740 = vmatpush1.msra.mxu0 %v4584_v35  ;;  %v4623_v2 = vld [vmem:[#allocation8 + $0x7c8] sm:$0xff]  ;;  %v4558_v63 = vld [vmem:[#allocation8 + $0x5c0] sm:$0xff] }
 0xb68   : > { %4652 = vmatprep.subr.mxu1 %v4519_v12  ;;  %4741 = vmatprep.subr.mxu0 %v4583_v60  ;;  %v4622_v35 = vld [vmem:[#allocation8 + $0x7c0] sm:$0xff]  ;;  %v4557_v12 = vld [vmem:[#allocation8 + $0x5b8] sm:$0xff] }
 0xb69   : > { %4653 = vmatpush1.msra.mxu1 %v4518_v42  ;;  %4742 = vmatpush1.msra.mxu0 %v4582_v27  ;;  %v4621_v60 = vld [vmem:[#allocation8 + $0x7b8] sm:$0xff]  ;;  %v4556_v42 = vld [vmem:[#allocation8 + $0x5b0] sm:$0xff] }
 0xb6a   : > { %4654 = vmatprep.subr.mxu1 %v4517_v33  ;;  %4743 = vmatprep.subr.mxu0 %v4581_v38  ;;  %v4620_v27 = vld [vmem:[#allocation8 + $0x7b0] sm:$0xff]  ;;  %v4555_v33 = vld [vmem:[#allocation8 + $0x5a8] sm:$0xff] }
 0xb6b   : > { %4655 = vmatpush1.msra.mxu1 %v4516_v54  ;;  %4744 = vmatpush1.msra.mxu0 %v4580_v36  ;;  %v4619_v38 = vld [vmem:[#allocation8 + $0x7a8] sm:$0xff]  ;;  %v4554_v54 = vld [vmem:[#allocation8 + $0x5a0] sm:$0xff] }
 0xb6c   : > { %4656 = vmatprep.subr.mxu1 %v4515_v10  ;;  %4745 = vmatprep.subr.mxu0 %v4579_v32  ;;  %v4618_v36 = vld [vmem:[#allocation8 + $0x7a0] sm:$0xff]  ;;  %v4553_v10 = vld [vmem:[#allocation8 + $0x598] sm:$0xff] }
 0xb6d   : > { %4657 = vmatpush1.msra.mxu1 %v4514_v8  ;;  %4746 = vmatpush1.msra.mxu0 %v4578_v53  ;;  %v4617_v32 = vld [vmem:[#allocation8 + $0x798] sm:$0xff]  ;;  %v4552_v8 = vld [vmem:[#allocation8 + $0x590] sm:$0xff] }
 0xb6e   : > { %4658 = vmatprep.subr.mxu1 %v4513_v34  ;;  %4747 = vmatprep.subr.mxu0 %v4577_v31  ;;  %v4616_v53 = vld [vmem:[#allocation8 + $0x790] sm:$0xff]  ;;  %v4551_v34 = vld [vmem:[#allocation8 + $0x588] sm:$0xff] }
 0xb6f   : > { %4659 = vmatpush1.msra.mxu1 %v4512_v0  ;;  %4748 = vmatpush1.msra.mxu0 %v4576_v24  ;;  %v4615_v31 = vld [vmem:[#allocation8 + $0x788] sm:$0xff]  ;;  %v4550_v0 = vld [vmem:[#allocation8 + $0x580] sm:$0xff] }
 0xb70   : > { %4660 = vmatprep.subr.mxu1 %v4511_v40  ;;  %4749 = vmatprep.subr.mxu0 %v4575_v39  ;;  %v4614_v24 = vld [vmem:[#allocation8 + $0x780] sm:$0xff]  ;;  %v4549_v40 = vld [vmem:[#allocation8 + $0x578] sm:$0xff] }
 0xb71   : > { %4661 = vmatpush1.msra.mxu1 %v4510_v1  ;;  %4750 = vmatpush1.msra.mxu0 %v4574_v14  ;;  %v4613_v39 = vld [vmem:[#allocation8 + $0x778] sm:$0xff]  ;;  %v4548_v1 = vld [vmem:[#allocation8 + $0x570] sm:$0xff] }
 0xb72   : > { %4662 = vmatprep.subr.mxu1 %v4509_v48  ;;  %4751 = vmatprep.subr.mxu0 %v4573_v55  ;;  %v4612_v14 = vld [vmem:[#allocation8 + $0x770] sm:$0xff]  ;;  %v4547_v48 = vld [vmem:[#allocation8 + $0x568] sm:$0xff] }
 0xb73   : > { %4663 = vmatpush1.msra.mxu1 %v4508_v15  ;;  %4752 = vmatpush1.msra.mxu0 %v4572_v51  ;;  %v4611_v55 = vld [vmem:[#allocation8 + $0x768] sm:$0xff]  ;;  %v4546_v15 = vld [vmem:[#allocation8 + $0x560] sm:$0xff] }
 0xb74   : > { %4664 = vmatprep.subr.mxu1 %v4507_v45  ;;  %4753 = vmatprep.subr.mxu0 %v4571_v19  ;;  %v4610_v51 = vld [vmem:[#allocation8 + $0x760] sm:$0xff]  ;;  %v4545_v45 = vld [vmem:[#allocation8 + $0x558] sm:$0xff] }
 0xb75   : > { %4665 = vmatpush1.msra.mxu1 %v4506_v16  ;;  %4754 = vmatpush1.msra.mxu0 %v4570_v5  ;;  %v4609_v19 = vld [vmem:[#allocation8 + $0x758] sm:$0xff]  ;;  %v4544_v16 = vld [vmem:[#allocation8 + $0x550] sm:$0xff] }
 0xb76   : > { %4666 = vmatprep.subr.mxu1 %v4505_v43  ;;  %4755 = vmatprep.subr.mxu0 %v4569_v26  ;;  %v4608_v5 = vld [vmem:[#allocation8 + $0x750] sm:$0xff]  ;;  %v4543_v43 = vld [vmem:[#allocation8 + $0x548] sm:$0xff] }
 0xb77   : > { %4667 = vmatpush1.msra.mxu1 %v4504_v30  ;;  %4756 = vmatpush1.msra.mxu0 %v4568_v41  ;;  %v4607_v26 = vld [vmem:[#allocation8 + $0x748] sm:$0xff]  ;;  %v4542_v30 = vld [vmem:[#allocation8 + $0x540] sm:$0xff] }
 0xb78   : > { %4668 = vmatprep.subr.mxu1 %v4503_v50  ;;  %4757 = vmatprep.subr.mxu0 %v4567_v20  ;;  %v4606_v41 = vld [vmem:[#allocation8 + $0x740] sm:$0xff]  ;;  %v4541_v50 = vld [vmem:[#allocation8 + $0x538] sm:$0xff] }
 0xb79   : > { %4669 = vmatpush1.msra.mxu1 %v4502_v61  ;;  %4758 = vmatpush1.msra.mxu0 %v4566_v17  ;;  %v4605_v20 = vld [vmem:[#allocation8 + $0x738] sm:$0xff]  ;;  %v4540_v61 = vld [vmem:[#allocation8 + $0x530] sm:$0xff] }
 0xb7a   : > { %4670 = vmatprep.subr.mxu1 %v4565_v11  ;;  %4759 = vmatprep.subr.mxu0 %v4629_v62  ;;  %v4604_v17 = vld [vmem:[#allocation8 + $0x730] sm:$0xff]  ;;  %v4539_v11 = vld [vmem:[#allocation8 + $0x528] sm:$0xff] }
 0xb7b   : > { %4671 = vmatpush2.msra.mxu1 %v4564_v44  ;;  %4760 = vmatpush2.msra.mxu0 %v4628_v46  ;;  %v4603_v62 = vld [vmem:[#allocation8 + $0x728] sm:$0xff]  ;;  %v4538_v44 = vld [vmem:[#allocation8 + $0x520] sm:$0xff] }
 0xb7c   : > { %4672 = vmatprep.subr.mxu1 %v4563_v9  ;;  %4761 = vmatprep.subr.mxu0 %v4627_v28  ;;  %v4602_v46 = vld [vmem:[#allocation8 + $0x720] sm:$0xff]  ;;  %v4537_v9 = vld [vmem:[#allocation8 + $0x518] sm:$0xff] }
 0xb7d   : > { %4673 = vmatpush2.msra.mxu1 %v4562_v21  ;;  %4762 = vmatpush2.msra.mxu0 %v4626_v59  ;;  %v4601_v28 = vld [vmem:[#allocation8 + $0x718] sm:$0xff]  ;;  %v4536_v21 = vld [vmem:[#allocation8 + $0x510] sm:$0xff] }
 0xb7e   : > { %4674 = vmatprep.subr.mxu1 %v4561_v52  ;;  %4763 = vmatprep.subr.mxu0 %v4625_v18  ;;  %v4600_v59 = vld [vmem:[#allocation8 + $0x710] sm:$0xff]  ;;  %v4535_v52 = vld [vmem:[#allocation8 + $0x508] sm:$0xff] }
 0xb7f   : > { %4675 = vmatpush2.msra.mxu1 %v4560_v57  ;;  %4764 = vmatpush2.msra.mxu0 %v4624_v49  ;;  %v4599_v18 = vld [vmem:[#allocation8 + $0x708] sm:$0xff]  ;;  %v4534_v57 = vld [vmem:[#allocation8 + $0x500] sm:$0xff] }
 0xb80   : > { %4676 = vmatprep.subr.mxu1 %v4559_v13  ;;  %4765 = vmatprep.subr.mxu0 %v4623_v2  ;;  %v4598_v49 = vld [vmem:[#allocation8 + $0x700] sm:$0xff]  ;;  %v7765_v13 = vld [vmem:[#allocation2 + $0xf8] sm:$0xff]  ;;  %v3869_v2 = vld [vmem:[#allocation7 + $0x4] sm:$0xf] }
 0xb81   : > { %4677 = vmatpush2.msra.mxu1 %v4558_v63  ;;  %4766 = vmatpush2.msra.mxu0 %v4622_v35  ;;  %v9717_v63 = vrot.slane %v3869_v2, %v11258_v25  ;;  %v11260_v35 = vld [vmem:[#allocation39_spill] sm:$0xff] }
 0xb82   : > { %4678 = vmatprep.subr.mxu1 %v4557_v12  ;;  %4767 = vmatprep.subr.mxu0 %v4621_v60  ;;  %v9720_v12 = vrot.slane %v3869_v2, %v11260_v35 }
 0xb83   : > { %4679 = vmatpush2.msra.mxu1 %v4556_v42  ;;  %4768 = vmatpush2.msra.mxu0 %v4620_v27  ;;  %v9723_v27 = vrot.slane %v3869_v2, %v11259_v29 }
 0xb84   : > { %4680 = vmatprep.subr.mxu1 %v4555_v33  ;;  %4769 = vmatprep.subr.mxu0 %v4619_v38 }
 0xb85   : > { %4681 = vmatpush2.msra.mxu1 %v4554_v54  ;;  %4770 = vmatpush2.msra.mxu0 %v4618_v36  ;;  %v11261_v54 = vld [vmem:[#allocation40_spill] sm:$0xff] }
 0xb86   : > { %4682 = vmatprep.subr.mxu1 %v4553_v10  ;;  %4771 = vmatprep.subr.mxu0 %v4617_v32  ;;  %v9728_v36 = vrot.slane %v3869_v2, %v11261_v54 }
 0xb87   : > { %4683 = vmatpush2.msra.mxu1 %v4552_v8  ;;  %4772 = vmatpush2.msra.mxu0 %v4616_v53 }
 0xb88   : > { %4684 = vmatprep.subr.mxu1 %v4551_v34  ;;  %4773 = vmatprep.subr.mxu0 %v4615_v31 }
 0xb89   : > { %4685 = vmatpush2.msra.mxu1 %v4550_v0  ;;  %4774 = vmatpush2.msra.mxu0 %v4614_v24 }
 0xb8a   : > { %4686 = vmatprep.subr.mxu1 %v4549_v40  ;;  %4775 = vmatprep.subr.mxu0 %v4613_v39 }
 0xb8b   : > { %4687 = vmatpush2.msra.mxu1 %v4548_v1  ;;  %4776 = vmatpush2.msra.mxu0 %v4612_v14 }
 0xb8c   : > { %4688 = vmatprep.subr.mxu1 %v4547_v48  ;;  %4777 = vmatprep.subr.mxu0 %v4611_v55 }
 0xb8d   : > { %4689 = vmatpush2.msra.mxu1 %v4546_v15  ;;  %4778 = vmatpush2.msra.mxu0 %v4610_v51 }
 0xb8e   : > { %4690 = vmatprep.subr.mxu1 %v4545_v45  ;;  %4779 = vmatprep.subr.mxu0 %v4609_v19 }
 0xb8f   : > { %4691 = vmatpush2.msra.mxu1 %v4544_v16  ;;  %4780 = vmatpush2.msra.mxu0 %v4608_v5 }
 0xb90   : > { %4692 = vmatprep.subr.mxu1 %v4543_v43  ;;  %4781 = vmatprep.subr.mxu0 %v4607_v26 }
 0xb91   : > { %4693 = vmatpush2.msra.mxu1 %v4542_v30  ;;  %4782 = vmatpush2.msra.mxu0 %v4606_v41 }
 0xb92   : > { %4694 = vmatprep.subr.mxu1 %v4541_v50  ;;  %4783 = vmatprep.subr.mxu0 %v4605_v20 }
 0xb93   : > { %4695 = vmatpush2.msra.mxu1 %v4540_v61  ;;  %4784 = vmatpush2.msra.mxu0 %v4604_v17 }
 0xb94   : > { %4696 = vmatprep.subr.mxu1 %v4539_v11  ;;  %4785 = vmatprep.subr.mxu0 %v4603_v62 }
 0xb95   : > { %4697 = vmatpush2.msra.mxu1 %v4538_v44  ;;  %4786 = vmatpush2.msra.mxu0 %v4602_v46 }
 0xb96   : > { %4698 = vmatprep.subr.mxu1 %v4537_v9  ;;  %4787 = vmatprep.subr.mxu0 %v4601_v28 }
 0xb97   : > { %4699 = vmatpush2.msra.mxu1 %v4536_v21  ;;  %4788 = vmatpush2.msra.mxu0 %v4600_v59 }
 0xb98   : > { %4700 = vmatprep.subr.mxu1 %v4535_v52  ;;  %4789 = vmatprep.subr.mxu0 %v4599_v18 }
 0xb99   : > { %4701 = vmatpush2.msra.mxu1 %v4534_v57  ;;  %4790 = vmatpush2.msra.mxu0 %v4598_v49 }
 0xb9a   : > { %4824 = vmatprep.subr.mxu1 %v7765_v13  ;;  %4929 = vmatprep.subr.mxu0 %v7765_v13 }
 0xc05   : > { %v3957_v60 = vpop.f32.mrf.mxu1  ;;  %v4046_v42 = vpop.f32.mrf.mxu0 }
 0xc06   : > { %v3958_v33 = vadd.f32 %v3957_v60, %v9717_v63  ;;  %v4047_v38 = vadd.f32 %v4046_v42, %v9720_v12 }
 0xc07   : > { %v3959_v10 = vpop.f32.mrf.mxu1  ;;  %v4048_v32 = vpop.f32.mrf.mxu0 }
 0xc08   : > { %v4085_v8 = vmul.f32 0.70710677, %v3958_v33  ;;  %v4087_v53 = vmul.f32 0.70710677, %v4047_v38  ;;  %v3960_v34 = vadd.f32 %v3959_v10, %v9723_v27  ;;  %v4049_v24 = vadd.f32 %v4048_v32, %v9728_v36 }
 0xc09   : > { %v3963_v19 = vpop.f32.mrf.mxu1  ;;  %v4052_v43 = vpop.f32.mrf.mxu0  ;;  %v9735_v46 = vmul.f32 0.5, %v3958_v33  ;;  %v9740_v18 = vmul.f32 0.5, %v4047_v38 }
 0xc0a   : > { %v4133_v31 = vand.u32 2147483647, %v4085_v8  ;;  %v4135_v0 = vand.u32 2147483647, %v4087_v53  ;;  %v4086_v40 = vmul.f32 0.70710677, %v3960_v34  ;;  %v3964_v41 = vadd.f32 %v3963_v19, %v9717_v63 }
 0xc0b   : > { %v4088_v45 = vmul.f32 0.70710677, %v4049_v24  ;;  %v3965_v50 = vpop.f32.mrf.mxu1  ;;  %vm4101_vm1 = vcmp.ge.f32.partialorder %v4085_v8, 0.0  ;;  %vm4103_vm2 = vcmp.ge.f32.partialorder %v4087_v53, 0.0  ;;  %v4053_v17 = vadd.f32 %v4052_v43, %v9720_v12  ;;  %v4054_v59 = vpop.f32.mrf.mxu0 }
 0xc0c   : > { %v4149_v39 = vmul.f32 0.3275911, %v4133_v31  ;;  %v4151_v1 = vmul.f32 0.3275911, %v4135_v0  ;;  %v4357_v14 = vsub.f32 0.0, %v4133_v31  ;;  %v4359_v51 = vsub.f32 0.0, %v4135_v0 }
 0xc0d   : > { %v4134_v48 = vand.u32 2147483647, %v4086_v40  ;;  %v4136_v30 = vand.u32 2147483647, %v4088_v45  ;;  %v4089_v61 = vmul.f32 0.70710677, %v3964_v41  ;;  %v3966_v44 = vadd.f32 %v3965_v50, %v9723_v27 }
 0xc0e   : > { %v4165_v55 = vadd.f32 1.0, %v4149_v39  ;;  %v4167_v15 = vadd.f32 1.0, %v4151_v1  ;;  %v4373_v16 = vmul.f32 %v4357_v14, %v4133_v31  ;;  %v4375_v26 = vmul.f32 %v4359_v51, %v4135_v0 }
 0xc0f   : > { %v4358_v5 = vsub.f32 0.0, %v4134_v48  ;;  %v4150_v20 = vmul.f32 0.3275911, %v4134_v48  ;;  %v4152_v28 = vmul.f32 0.3275911, %v4136_v30  ;;  %v4360_v21 = vsub.f32 0.0, %v4136_v30 }
 0xc10   : > { %7457 = vrcp.f32 %v4165_v55  ;;  %v4389_v11 = vmul.f32 1.442695, %v4373_v16  ;;  %v4393_v9 = vmul.f32 1.442695, %v4375_v26  ;;  %v9738_v52 = vsel %vm4101_vm1, 1.0, %v11228_v7 }
 0xc11   : > { %7459 = vrcp.f32 %v4167_v15  ;;  %v4374_v62 = vmul.f32 %v4358_v5, %v4134_v48  ;;  %v9743_v57 = vsel %vm4103_vm2, 1.0, %v11228_v7  ;;  %v4166_v49 = vadd.f32 1.0, %v4150_v20 }
 0xc12   : > { %vm4102_vm3 = vcmp.ge.f32.partialorder %v4086_v40, 0.0  ;;  %vm4104_vm4 = vcmp.ge.f32.partialorder %v4088_v45, 0.0  ;;  %v4137_v13 = vand.u32 2147483647, %v4089_v61  ;;  %v4091_v2 = vmul.f32 0.70710677, %v4053_v17 }
 0xc13   : > { %7461 = vpow2.f32 %v4389_v11  ;;  %v4391_v60 = vmul.f32 1.442695, %v4374_v62  ;;  %v4090_v42 = vmul.f32 0.70710677, %v3966_v44  ;;  %v9746_v33 = vadd.f32 %v4054_v59, %v9728_v36 }
 0xc14   : > { %7463 = vpow2.f32 %v4393_v9  ;;  %v9748_v10 = vmul.f32 0.5, %v3960_v34  ;;  %v4168_v32 = vadd.f32 1.0, %v4152_v28  ;;  %v4376_v38 = vmul.f32 %v4360_v21, %v4136_v30 }
 0xc15   : > { %v9751_v8 = vsel %vm4102_vm3, 1.0, %v11228_v7  ;;  %7465 = vrcp.f32 %v4166_v49  ;;  %v9753_v53 = vmul.f32 0.5, %v4049_v24  ;;  %v9756_v31 = vsel %vm4104_vm4, 1.0, %v11228_v7 }
 0xc16   : > { %v9758_v0 = vmul.f32 0.5, %v3964_v41  ;;  %vm4105_vm5 = vcmp.ge.f32.partialorder %v4089_v61, 0.0  ;;  %v4361_v40 = vsub.f32 0.0, %v4137_v13  ;;  %v4139_v39 = vand.u32 2147483647, %v4091_v2 }
 0xc17   : > { %7467 = vpow2.f32 %v4391_v60  ;;  %v9762_v34 = vmul.f32 0.5, %v4053_v17  ;;  %v4138_v14 = vand.u32 2147483647, %v4090_v42  ;;  %v9765_v48 = vmul.f32 0.70710677, %v9746_v33 }
 0xc18   : > { %7469 = vrcp.f32 %v4168_v32  ;;  %v4395_v15 = vmul.f32 1.442695, %v4376_v38  ;;  %v9770_v51 = vmul.f32 0.5, %v3966_v44  ;;  %v9774_v19 = vsel %vm4105_vm5, 1.0, %v11228_v7 }
 0xc19   : > { %v4153_v16 = vmul.f32 0.3275911, %v4137_v13  ;;  %vm4107_vm6 = vcmp.ge.f32.partialorder %v4091_v2, 0.0  ;;  %v4377_v43 = vmul.f32 %v4361_v40, %v4137_v13  ;;  %v4155_v26 = vmul.f32 0.3275911, %v4139_v39 }
 0xc1a   : > { %v4363_v30 = vsub.f32 0.0, %v4139_v39  ;;  %v4362_v20 = vsub.f32 0.0, %v4138_v14  ;;  %v4140_v61 = vand.u32 2147483647, %v9765_v48  ;;  %7471 = vpow2.f32 %v4395_v15 }
 0xc1b   : > { %v9782_v44 = vsel %vm4107_vm6, 1.0, %v11228_v7  ;;  %vm4106_vm7 = vcmp.ge.f32.partialorder %v4090_v42, 0.0  ;;  %v4169_v28 = vadd.f32 1.0, %v4153_v16  ;;  %v4154_v21 = vmul.f32 0.3275911, %v4138_v14 }
 0xc1c   : > { %v4397_v2 = vmul.f32 1.442695, %v4377_v43  ;;  %v4379_v60 = vmul.f32 %v4363_v30, %v4139_v39  ;;  %v4171_v40 = vadd.f32 1.0, %v4155_v26  ;;  %v4364_v15 = vsub.f32 0.0, %v4140_v61 }
 0xc1d   : > { %v9760_v1 = vpop.eup %7457  ;;  %v9794_v16 = vsel %vm4106_vm7, 1.0, %v11228_v7  ;;  %7473 = vrcp.f32 %v4169_v28  ;;  %v4170_v30 = vadd.f32 1.0, %v4154_v21  ;;  %vm4108_vm8 = vcmp.ge.f32.partialorder %v9765_v48, 0.0 }
 0xc1e   : > { %v9767_v55 = vpop.eup %7459  ;;  %v4213_v24 = vmul.f32 1.0614054, %v9760_v1  ;;  %7475 = vpow2.f32 %v4397_v2  ;;  %v4380_v4 = vmul.f32 %v4364_v15, %v4140_v61 }
 0xc1f   : > { %v4215_v45 = vmul.f32 1.0614054, %v9767_v55  ;;  %7477 = vrcp.f32 %v4171_v40 }
 0xc20   : > { %v4229_v5 = vadd.f32 -1.4531521, %v4213_v24  ;;  %v3969_v41 = vpop.f32.mrf.mxu1  ;;  %v4058_v11 = vpop.f32.mrf.mxu0  ;;  %v4378_v24 = vmul.f32 %v4362_v20, %v4138_v14  ;;  %v4401_v20 = vmul.f32 1.442695, %v4379_v60 }
 0xc21   : > { %v4231_v50 = vadd.f32 -1.4531521, %v4215_v45  ;;  %v9778_v17 = vadd.f32 %v3969_v41, %v9717_v63  ;;  %v9789_v32 = vadd.f32 %v4058_v11, %v9720_v12  ;;  %v7462_v45 = vpop.eup %7461  ;;  %v4156_v11 = vmul.f32 0.3275911, %v4140_v61 }
 0xc22   : > { %v4245_v62 = vmul.f32 %v9760_v1, %v4229_v5  ;;  %v3971_v49 = vpop.f32.mrf.mxu1  ;;  %v7464_v43 = vpop.eup %7463  ;;  %7479 = vpow2.f32 %v4401_v20  ;;  %v9817_v61 = vmul.f32 0.5, %v9746_v33 }
 0xc23   : > { %11262 = vst [vmem:[#allocation36_spill] sm:$0xff] %v9778_v17  ;;  %v4247_v9 = vmul.f32 %v9767_v55, %v4231_v50  ;;  %v9786_v59 = vmul.f32 0.70710677, %v9778_v17  ;;  %11263 = vst [vmem:[#allocation45_spill] sm:$0xff] %v9789_v32  ;;  %v3972_v50 = vadd.f32 %v3971_v49, %v9723_v27  ;;  %v9799_v26 = vpop.eup %7465  ;;  %v4060_v42 = vpop.f32.mrf.mxu0  ;;  %v4172_v60 = vadd.f32 1.0, %v4156_v11 }
 0xc24   : > { %v4261_v13 = vadd.f32 1.4214138, %v4245_v62  ;;  %v9802_v62 = vmul.f32 0.70710677, %v9789_v32  ;;  %v9804_v49 = vpop.eup %7467  ;;  %7481 = vrcp.f32 %v4170_v30  ;;  %v9825_v11 = vsel %vm4108_vm8, 1.0, %v11228_v7 }
 0xc25   : > { %v4263_v38 = vadd.f32 1.4214138, %v4247_v9  ;;  %v4141_v41 = vand.u32 2147483647, %v9786_v59  ;;  %v9808_v21 = vmul.f32 0.70710677, %v3972_v50  ;;  %v3975_v54 = vpop.f32.mrf.mxu1 }
 0xc26   : > { %v4277_v5 = vmul.f32 %v9760_v1, %v4261_v13  ;;  %v4399_v13 = vmul.f32 1.442695, %v4378_v24  ;;  %v4143_v24 = vand.u32 2147483647, %v9802_v62  ;;  %v9836_v23 = vmul.f32 0.5, %v3972_v50 }
 0xc27   : > { %v4279_v39 = vmul.f32 %v9767_v55, %v4263_v38  ;;  %v4365_v28 = vsub.f32 0.0, %v4141_v41  ;;  %v4157_v29 = vmul.f32 0.3275911, %v4141_v41  ;;  %v4142_v25 = vand.u32 2147483647, %v9808_v21 }
 0xc28   : > { %v4293_v14 = vadd.f32 -0.28449672, %v4277_v5  ;;  %v9810_v5 = vpop.eup %7469  ;;  %7483 = vpow2.f32 %v4399_v13  ;;  %v4064_v13 = vpop.f32.mrf.mxu0  ;;  %vm4110_vm9 = vcmp.ge.f32.partialorder %v9808_v21, 0.0  ;;  %vm4109_vm11 = vcmp.ge.f32.partialorder %v9786_v59, 0.0 }
 0xc29   : > { %v4295_v9 = vadd.f32 -0.28449672, %v4279_v39  ;;  %v9814_v39 = vadd.f32 %v4060_v42, %v9728_v36  ;;  %v4381_v20 = vmul.f32 %v4365_v28, %v4141_v41  ;;  %v9827_v42 = vpop.eup %7471  ;;  %7485 = vrcp.f32 %v4172_v60 }
 0xc2a   : > { %v4309_v38 = vmul.f32 %v9760_v1, %v4293_v14  ;;  %v4403_v14 = vmul.f32 1.442695, %v4380_v4  ;;  %v4158_v6 = vmul.f32 0.3275911, %v4142_v25  ;;  %v4366_v41 = vsub.f32 0.0, %v4142_v25 }
 0xc2b   : > { %v4311_v2 = vmul.f32 %v9767_v55, %v4295_v9  ;;  %v9831_v4 = vmul.f32 0.70710677, %v9814_v39  ;;  %v4405_v47 = vmul.f32 1.442695, %v4381_v20  ;;  %v9843_v60 = vadd.f32 %v4064_v13, %v9720_v12 }
 0xc2c   : > { %v4325_v40 = vadd.f32 0.2548296, %v4309_v38  ;;  %v4173_v38 = vadd.f32 1.0, %v4157_v29  ;;  %7487 = vpow2.f32 %v4403_v14  ;;  %v4382_v20 = vmul.f32 %v4366_v41, %v4142_v25  ;;  %v4066_v41 = vpop.f32.mrf.mxu0 }
 0xc2d   : > { %v4327_v15 = vadd.f32 0.2548296, %v4311_v2  ;;  %v4367_v2 = vsub.f32 0.0, %v4143_v24  ;;  %v4144_v29 = vand.u32 2147483647, %v9831_v4  ;;  %11266 = vst [vmem:[#allocation41_spill] sm:$0xff] %v9843_v60 }
 0xc2e   : > { %v4341_v9 = vmul.f32 %v9760_v1, %v4325_v40  ;;  %v9834_v1 = vadd.f32 %v3975_v54, %v9717_v63  ;;  %v4159_v40 = vmul.f32 0.3275911, %v4143_v24  ;;  %7489 = vrcp.f32 %v4173_v38  ;;  %v9845_v63 = vpop.eup %7473  ;;  %v3977_v38 = vpop.f32.mrf.mxu1 }
 0xc2f   : > { %v4343_v33 = vmul.f32 %v9767_v55, %v4327_v15  ;;  %v4383_v54 = vmul.f32 %v4367_v2, %v4143_v24  ;;  %v4160_v15 = vmul.f32 0.3275911, %v4144_v29  ;;  %v4368_v14 = vsub.f32 0.0, %v4144_v29 }
 0xc30   : > { %v4421_v30 = vmul.f32 %v7462_v45, %v4341_v9  ;;  %11264 = vst [vmem:[#allocation32_spill] sm:$0xff] %v9834_v1  ;;  %v9840_v45 = vmul.f32 0.70710677, %v9834_v1  ;;  %v9847_v9 = vpop.eup %7475  ;;  %v4175_v50 = vadd.f32 1.0, %v4159_v40  ;;  %7491 = vpow2.f32 %v4405_v47 }
 0xc31   : > { %v4423_v48 = vmul.f32 %v7464_v43, %v4343_v33  ;;  %v4174_v43 = vadd.f32 1.0, %v4158_v6  ;;  %v4176_v13 = vadd.f32 1.0, %v4160_v15  ;;  %v9856_v56 = vmul.f32 0.70710677, %v9843_v60 }
 0xc32   : > { %v4437_v28 = vsub.f32 1.0, %v4421_v30  ;;  %11265 = vst [vmem:[#allocation28_spill] sm:$0xff] %v9840_v45  ;;  %v4145_v33 = vand.u32 2147483647, %v9840_v45  ;;  %v9851_v30 = vpop.eup %7477  ;;  %v4409_v40 = vmul.f32 1.442695, %v4383_v54  ;;  %v9862_v21 = vadd.f32 %v3977_v38, %v9723_v27 }
 0xc33   : > { %v4439_v55 = vsub.f32 1.0, %v4423_v48  ;;  %v4384_v48 = vmul.f32 %v4368_v14, %v4144_v29  ;;  %11267 = vst [vmem:[#allocation42_spill] sm:$0xff] %v9856_v56  ;;  %v9859_v25 = vsel %vm4110_vm9, 1.0, %v11228_v7  ;;  %7493 = vrcp.f32 %v4174_v43 }
 0xc34   : > { %v4453_v12 = vmul.f32 %v4437_v28, %v9738_v52  ;;  %v4161_v24 = vmul.f32 0.3275911, %v4145_v33  ;;  %v4369_v2 = vsub.f32 0.0, %v4145_v33  ;;  %11268 = vst [vmem:[#allocation51_spill] sm:$0xff] %v9862_v21  ;;  %v9864_v52 = vpop.eup %7479  ;;  %7495 = vrcp.f32 %v4175_v50 }
 0xc35   : > { %v4455_v6 = vmul.f32 %v4439_v55, %v9743_v57  ;;  %v4407_v47 = vmul.f32 1.442695, %v4382_v20  ;;  %vm4112_vm10 = vcmp.ge.f32.partialorder %v9831_v4, 0.0  ;;  %v9867_v28 = vpop.eup %7481  ;;  %7497 = vrcp.f32 %v4176_v13 }
 0xc36   : > { %v4385_v57 = vmul.f32 %v4369_v2, %v4145_v33  ;;  %v4469_v29 = vadd.f32 1.0, %v4453_v12  ;;  %v4411_v55 = vmul.f32 1.442695, %v4384_v48  ;;  %v4147_v54 = vand.u32 2147483647, %v9856_v56  ;;  %v9870_v15 = vpop.eup %7483 }
 0xc37   : > { %v4471_v43 = vadd.f32 1.0, %v4455_v6  ;;  %v4177_v27 = vadd.f32 1.0, %v4161_v24  ;;  %v9873_v14 = vmul.f32 0.70710677, %v9862_v21  ;;  %v9876_v50 = vadd.f32 %v4066_v41, %v9728_v36  ;;  %v9878_v20 = vpop.eup %7485 }
 0xc38   : > { %7499 = vpow2.f32 %v4409_v40  ;;  %v4413_v33 = vmul.f32 1.442695, %v4385_v57  ;;  %v4163_v38 = vmul.f32 0.3275911, %v4147_v54  ;;  %v4214_v12 = vmul.f32 1.0614054, %v9799_v26 }
 0xc39   : > { %11269 = vst [vmem:[#allocation44_spill] sm:$0xff] %v9873_v14  ;;  %11270 = vst [vmem:[#allocation49_spill] sm:$0xff] %v9876_v50  ;;  %7501 = vpow2.f32 %v4407_v47  ;;  %v9882_v13 = vmul.f32 0.5, %v9814_v39  ;;  %v4371_v48 = vsub.f32 0.0, %v4147_v54  ;;  %v4146_v6 = vand.u32 2147483647, %v9873_v14  ;;  %v9885_v24 = vpop.eup %7487 }
 0xc3a   : > { %v9890_v36 = vsel %vm4112_vm10, 1.0, %v11228_v7  ;;  %7503 = vpow2.f32 %v4411_v55  ;;  %v4179_v2 = vadd.f32 1.0, %v4163_v38  ;;  %v9893_v40 = vmul.f32 0.70710677, %v9876_v50 }
 0xc3b   : > { %7505 = vrcp.f32 %v4177_v27  ;;  %v4162_v41 = vmul.f32 0.3275911, %v4146_v6  ;;  %v4370_v47 = vsub.f32 0.0, %v4146_v6  ;;  %v4230_v39 = vadd.f32 -1.4531521, %v4214_v12  ;;  %v9895_v57 = vpop.eup %7489 }
 0xc3c   : > { %11271 = vst [vmem:[#allocation52_spill] sm:$0xff] %v9893_v40  ;;  %v9898_v58 = vmul.f32 %v4469_v29, %v9735_v46  ;;  %v9901_v37 = vmul.f32 %v4471_v43, %v9740_v18  ;;  %7507 = vpow2.f32 %v4413_v33  ;;  %v4148_v4 = vand.u32 2147483647, %v9893_v40 }
 0xc3d   : > { %v4387_v55 = vmul.f32 %v4371_v48, %v4147_v54  ;;  %v4178_v38 = vadd.f32 1.0, %v4162_v41  ;;  %v4386_v22 = vmul.f32 %v4370_v47, %v4146_v6  ;;  %v4246_v3 = vmul.f32 %v9799_v26, %v4230_v39  ;;  %v9906_v60 = vpop.eup %7491 }
 0xc3e   : > { %7509 = vrcp.f32 %v4179_v2  ;;  %v4164_v27 = vmul.f32 0.3275911, %v4148_v4  ;;  %v4372_v35 = vsub.f32 0.0, %v4148_v4  ;;  %v4216_v12 = vmul.f32 1.0614054, %v9810_v5 }
 0xc3f   : > { %7511 = vrcp.f32 %v4178_v38  ;;  %v4415_v46 = vmul.f32 1.442695, %v4386_v22  ;;  %v4262_v29 = vadd.f32 1.4214138, %v4246_v3  ;;  %v4218_v18 = vmul.f32 1.0614054, %v9867_v28 }
 0xc40   : > { %v4180_v43 = vadd.f32 1.0, %v4164_v27  ;;  %v4388_v33 = vmul.f32 %v4372_v35, %v4148_v4  ;;  %v4232_v1 = vadd.f32 -1.4531521, %v4216_v12  ;;  %v4220_v54 = vmul.f32 1.0614054, %v9878_v20  ;;  %v9910_v48 = vpop.eup %7493 }
 0xc41   : > { %7513 = vpow2.f32 %v4415_v46  ;;  %v4278_v6 = vmul.f32 %v9799_v26, %v4262_v29  ;;  %v4234_v2 = vadd.f32 -1.4531521, %v4218_v18  ;;  %v4217_v41 = vmul.f32 1.0614054, %v9845_v63  ;;  %v9914_v47 = vpop.eup %7495 }
 0xc42   : > { %v9916_v39 = vmul.f32 1.442695, %v4387_v55  ;;  %7515 = vrcp.f32 %v4180_v43  ;;  %v4248_v3 = vmul.f32 %v9810_v5, %v4232_v1  ;;  %v4236_v22 = vadd.f32 -1.4531521, %v4220_v54  ;;  %v9919_v35 = vpop.eup %7497 }
 0xc43   : > { %v4294_v4 = vadd.f32 -0.28449672, %v4278_v6  ;;  %v4250_v38 = vmul.f32 %v9867_v28, %v4234_v2  ;;  %v4233_v27 = vadd.f32 -1.4531521, %v4217_v41  ;;  %v4219_v12 = vmul.f32 1.0614054, %v9851_v30 }
 0xc44   : > { %v9923_v46 = vmul.f32 1.442695, %v4388_v33  ;;  %v4264_v29 = vadd.f32 1.4214138, %v4248_v3  ;;  %v4252_v18 = vmul.f32 %v9878_v20, %v4236_v22  ;;  %v4222_v55 = vmul.f32 1.0614054, %v9910_v48 }
 0xc45   : > { %v9927_v50 = vpop.eup %7499  ;;  %v4310_v1 = vmul.f32 %v9799_v26, %v4294_v4  ;;  %v4266_v43 = vadd.f32 1.4214138, %v4250_v38  ;;  %v4249_v54 = vmul.f32 %v9845_v63, %v4233_v27  ;;  %v4235_v6 = vadd.f32 -1.4531521, %v4219_v12 }
 0xc46   : > { %11272 = vst [vmem:[#allocation50_spill] sm:$0xff] %v9927_v50  ;;  %v9931_v21 = vpop.eup %7501  ;;  %v4280_v2 = vmul.f32 %v9810_v5, %v4264_v29  ;;  %v4268_v41 = vadd.f32 1.4214138, %v4252_v18  ;;  %v4238_v33 = vadd.f32 -1.4531521, %v4222_v55  ;;  %7517 = vpow2.f32 %v9923_v46 }
 0xc47   : > { %v4224_v3 = vmul.f32 1.0614054, %v9919_v35  ;;  %v9935_v32 = vpop.eup %7503  ;;  %v4326_v22 = vadd.f32 0.2548296, %v4310_v1  ;;  %v4282_v56 = vmul.f32 %v9867_v28, %v4266_v43  ;;  %v4265_v40 = vadd.f32 1.4214138, %v4249_v54 }
 0xc48   : > { %v4251_v4 = vmul.f32 %v9851_v30, %v4235_v6  ;;  %v9939_v38 = vpop.eup %7505  ;;  %v4296_v27 = vadd.f32 -0.28449672, %v4280_v2  ;;  %v4284_v12 = vmul.f32 %v9878_v20, %v4268_v41  ;;  %v4254_v45 = vmul.f32 %v9910_v48, %v4238_v33 }
 0xc49   : > { %v4240_v29 = vadd.f32 -1.4531521, %v4224_v3  ;;  %v9943_v18 = vpop.eup %7507  ;;  %v4342_v55 = vmul.f32 %v9799_v26, %v4326_v22  ;;  %v4298_v50 = vadd.f32 -0.28449672, %v4282_v56  ;;  %v4281_v1 = vmul.f32 %v9845_v63, %v4265_v40 }
 0xc4a   : > { %11273 = vst [vmem:[#allocation46_spill] sm:$0xff] %v9943_v18  ;;  %v4267_v14 = vadd.f32 1.4214138, %v4251_v4  ;;  %v4312_v43 = vmul.f32 %v9810_v5, %v4296_v27  ;;  %v4300_v54 = vadd.f32 -0.28449672, %v4284_v12  ;;  %7519 = vpow2.f32 %v9916_v39  ;;  %v10025_v39 = vld [vmem:[#allocation2 + $0x90] sm:$0xff] }
 0xc4b   : > { %v4270_v6 = vadd.f32 1.4214138, %v4254_v45  ;;  %v4256_v7 = vmul.f32 %v9919_v35, %v4240_v29  ;;  %v9949_v2 = vpop.eup %7509  ;;  %v4422_v41 = vmul.f32 %v9804_v49, %v4342_v55  ;;  %v4314_v33 = vmul.f32 %v9867_v28, %v4298_v50 }
 0xc4c   : > { %v4297_v3 = vadd.f32 -0.28449672, %v4281_v1  ;;  %v4283_v18 = vmul.f32 %v9851_v30, %v4267_v14  ;;  %v9954_v26 = vpop.eup %7511  ;;  %v4328_v56 = vadd.f32 0.2548296, %v4312_v43  ;;  %v4316_v40 = vmul.f32 %v9878_v20, %v4300_v54 }
 0xc4d   : > { %v4286_v22 = vmul.f32 %v9910_v48, %v4270_v6  ;;  %v4272_v4 = vadd.f32 1.4214138, %v4256_v7  ;;  %v4438_v45 = vsub.f32 1.0, %v4422_v41  ;;  %v4330_v27 = vadd.f32 0.2548296, %v4314_v33 }
 0xc4e   : > { %v4313_v12 = vmul.f32 %v9845_v63, %v4297_v3  ;;  %v4299_v29 = vadd.f32 -0.28449672, %v4283_v18  ;;  %v9959_v17 = vpop.eup %7513  ;;  %v4344_v49 = vmul.f32 %v9810_v5, %v4328_v56  ;;  %v4332_v50 = vadd.f32 0.2548296, %v4316_v40 }
 0xc4f   : > { %v4302_v55 = vadd.f32 -0.28449672, %v4286_v22  ;;  %v4288_v14 = vmul.f32 %v9919_v35, %v4272_v4  ;;  %v9963_v1 = vpop.eup %7515  ;;  %v4454_v43 = vmul.f32 %v4438_v45, %v9751_v8  ;;  %v4346_v54 = vmul.f32 %v9867_v28, %v4330_v27 }
 0xc50   : > { %v4329_v7 = vadd.f32 0.2548296, %v4313_v12  ;;  %v4315_v6 = vmul.f32 %v9851_v30, %v4299_v29  ;;  %v4424_v41 = vmul.f32 %v9827_v42, %v4344_v49  ;;  %v4348_v18 = vmul.f32 %v9878_v20, %v4332_v50 }
 0xc51   : > { %v4318_v33 = vmul.f32 %v9910_v48, %v4302_v55  ;;  %v4304_v5 = vadd.f32 -0.28449672, %v4288_v14  ;;  %v4470_v3 = vadd.f32 1.0, %v4454_v43  ;;  %v4426_v56 = vmul.f32 %v9870_v15, %v4346_v54 }
 0xc52   : > { %v4345_v40 = vmul.f32 %v9845_v63, %v4329_v7  ;;  %v4331_v22 = vadd.f32 0.2548296, %v4315_v6  ;;  %v4440_v4 = vsub.f32 1.0, %v4424_v41  ;;  %v4428_v8 = vmul.f32 %v9885_v24, %v4348_v18 }
 0xc53   : > { %v4334_v28 = vadd.f32 0.2548296, %v4318_v33  ;;  %v4320_v45 = vmul.f32 %v9919_v35, %v4304_v5  ;;  %v4486_v27 = vmul.f32 %v4470_v3, %v9748_v10  ;;  %v4442_v42 = vsub.f32 1.0, %v4426_v56  ;;  %v9999_v56 = vld [vmem:[#allocation2 + $0xd8] sm:$0xff] }
 0xc54   : > { %v4425_v20 = vmul.f32 %v9847_v9, %v4345_v40  ;;  %v4347_v12 = vmul.f32 %v9851_v30, %v4331_v22  ;;  %v4456_v29 = vmul.f32 %v4440_v4, %v9756_v31  ;;  %v4444_v49 = vsub.f32 1.0, %v4428_v8 }
 0xc55   : > { %v4350_v15 = vmul.f32 %v9910_v48, %v4334_v28  ;;  %v4336_v63 = vadd.f32 0.2548296, %v4320_v45  ;;  %4702 = vmatprep.mubr.f32.mxu1 %v4486_v27  ;;  %v4458_v50 = vmul.f32 %v4442_v42, %v9794_v16  ;;  %v4221_v14 = vmul.f32 1.0614054, %v9895_v57  ;;  %v7766_v16 = vld [vmem:[#allocation2 + $0xf0] sm:$0xff]  ;;  %v7771_v42 = vld [vmem:[#allocation2 + $0xc8] sm:$0xff] }
 0xc56   : > { %v4441_v24 = vsub.f32 1.0, %v4425_v20  ;;  %v4427_v55 = vmul.f32 %v9864_v52, %v4347_v12  ;;  %v4472_v10 = vadd.f32 1.0, %v4456_v29  ;;  %4703 = vmatmul.mubr.f32.vlgmr.msra.gmra.mxu1 %v9898_v58  ;;  %v4460_v9 = vmul.f32 %v4444_v49, %v9825_v11  ;;  %v7767_v58 = vld [vmem:[#allocation2 + $0xe8] sm:$0xff]  ;;  %v7770_v28 = vld [vmem:[#allocation2 + $0xd0] sm:$0xff]  ;;  %v7772_v49 = vld [vmem:[#allocation2 + $0xc0] sm:$0xff] }
 0xc57   : > { %v4430_v30 = vmul.f32 %v9931_v21, %v4350_v15  ;;  %v4352_v31 = vmul.f32 %v9919_v35, %v4336_v63  ;;  %v4474_v43 = vadd.f32 1.0, %v4458_v50  ;;  %v4237_v7 = vadd.f32 -1.4531521, %v4221_v14  ;;  %4825 = vmatpush1.msra.mxu1 %v7766_v16 }
 0xc58   : > { %v4457_v48 = vmul.f32 %v4441_v24, %v9774_v19  ;;  %v4443_v54 = vsub.f32 1.0, %v4427_v55  ;;  %v4488_v52 = vmul.f32 %v4472_v10, %v9753_v53  ;;  %v4476_v6 = vadd.f32 1.0, %v4460_v9  ;;  %4826 = vmatprep.subr.mxu1 %v7767_v58  ;;  %v9993_v19 = vld [vmem:[#allocation2 + $0xe0] sm:$0xff]  ;;  %v7773_v24 = vld [vmem:[#allocation2 + $0xb8] sm:$0xff]  ;;  %v7774_v10 = vld [vmem:[#allocation2 + $0xb0] sm:$0xff] }
 0xc59   : > { %v4446_v41 = vsub.f32 1.0, %v4430_v30  ;;  %v4432_v18 = vmul.f32 %v9935_v32, %v4352_v31  ;;  %v4490_v11 = vmul.f32 %v4474_v43, %v9770_v51  ;;  %v4253_v33 = vmul.f32 %v9895_v57, %v4237_v7  ;;  %4827 = vmatpush1.msra.mxu1 %v9993_v19 }
 0xc5a   : > { %v4473_v21 = vadd.f32 1.0, %v4457_v48  ;;  %v4459_v35 = vmul.f32 %v4443_v54, %v9782_v44  ;;  %4791 = vmatprep.mubr.f32.mxu0 %v4488_v52  ;;  %v4492_v53 = vmul.f32 %v4476_v6, %v9817_v61  ;;  %v4223_v32 = vmul.f32 1.0614054, %v9914_v47  ;;  %4828 = vmatprep.subr.mxu1 %v9999_v56  ;;  %v7775_v48 = vld [vmem:[#allocation2 + $0xa8] sm:$0xff]  ;;  %v7776_v54 = vld [vmem:[#allocation2 + $0xa0] sm:$0xff] }
 0xc5b   : > { %v4462_v5 = vmul.f32 %v4446_v41, %v9859_v25  ;;  %v4448_v3 = vsub.f32 1.0, %v4432_v18  ;;  %4792 = vmatmul.mubr.f32.vlgmr.msra.gmra.mxu0 %v9901_v37  ;;  %4708 = vmatprep.mubr.f32.mxu1 %v4490_v11  ;;  %v4269_v40 = vadd.f32 1.4214138, %v4253_v33  ;;  %v4226_v22 = vmul.f32 1.0614054, %v9954_v26  ;;  %v7777_v41 = vld [vmem:[#allocation2 + $0x98] sm:$0xff] }
 0xc5c   : > { %v4489_v51 = vmul.f32 %v4473_v21, %v9758_v0  ;;  %v4475_v44 = vadd.f32 1.0, %v4459_v35  ;;  %4797 = vmatprep.mubr.f32.mxu0 %v4492_v53  ;;  %v4239_v4 = vadd.f32 -1.4531521, %v4223_v32  ;;  %v4228_v8 = vmul.f32 1.0614054, %v9963_v1  ;;  %4829 = vmatpush1.msra.mxu1 %v7770_v28  ;;  %v10031_v53 = vld [vmem:[#allocation2 + $0x88] sm:$0xff] }
 0xc5d   : > { %v4478_v61 = vadd.f32 1.0, %v4462_v5  ;;  %v4464_v25 = vmul.f32 %v4448_v3, %v9890_v36  ;;  %v4285_v37 = vmul.f32 %v9895_v57, %v4269_v40  ;;  %v4242_v27 = vadd.f32 -1.4531521, %v4226_v22  ;;  %4830 = vmatprep.subr.mxu1 %v7771_v42  ;;  %4930 = vmatpush1.msra.mxu0 %v7766_v16  ;;  %v10036_v3 = vld [vmem:[#allocation2 + $0x80] sm:$0xff] }
 0xc5e   : > { %4709 = vmatmul.mubr.f32.gmra.mxu1 %v4489_v51  ;;  %v4491_v45 = vmul.f32 %v4475_v44, %v9762_v34  ;;  %v4225_v0 = vmul.f32 1.0614054, %v9939_v38  ;;  %v4255_v36 = vmul.f32 %v9914_v47, %v4239_v4  ;;  %v4244_v29 = vadd.f32 -1.4531521, %v4228_v8  ;;  %4931 = vmatprep.subr.mxu0 %v7767_v58  ;;  %v10042_v44 = vld [vmem:[#allocation2 + $0x78] sm:$0xff] }
 0xc5f   : > { %v4494_v20 = vmul.f32 %v4478_v61, %v9836_v23  ;;  %v4480_v12 = vadd.f32 1.0, %v4464_v25  ;;  %4831 = vmatpush1.msra.mxu1 %v7772_v49  ;;  %v4301_v15 = vadd.f32 -0.28449672, %v4285_v37  ;;  %v4258_v34 = vmul.f32 %v9954_v26, %v4242_v27  ;;  %4932 = vmatpush1.msra.mxu0 %v9993_v19  ;;  %v10047_v61 = vld [vmem:[#allocation2 + $0x70] sm:$0xff] }
 0xc60   : > { %4798 = vmatmul.mubr.f32.gmra.mxu0 %v4491_v45  ;;  %v4241_v63 = vadd.f32 -1.4531521, %v4225_v0  ;;  %v4227_v50 = vmul.f32 1.0614054, %v9949_v2  ;;  %4832 = vmatprep.subr.mxu1 %v7773_v24  ;;  %v4271_v55 = vadd.f32 1.4214138, %v4255_v36  ;;  %v4260_v14 = vmul.f32 %v9963_v1, %v4244_v29 }
 0xc61   : > { %4714 = vmatprep.mubr.f32.mxu1 %v4494_v20  ;;  %v4496_v23 = vmul.f32 %v4480_v12, %v9882_v13  ;;  %4833 = vmatpush1.msra.mxu1 %v7774_v10  ;;  %v4317_v9 = vmul.f32 %v9895_v57, %v4301_v15  ;;  %v4274_v30 = vadd.f32 1.4214138, %v4258_v34  ;;  %vm4111_vm12 = vcmp.ge.f32.partialorder %v9802_v62, 0.0  ;;  %v11274_v45 = vld [vmem:[#allocation36_spill] sm:$0xff]  ;;  %v10059_v12 = vld [vmem:[#allocation2 + $0x60] sm:$0xff]  ;;  %v10064_v34 = vld [vmem:[#allocation2 + $0x58] sm:$0xff] }
 0xc62   : > { %v4257_v31 = vmul.f32 %v9939_v38, %v4241_v63  ;;  %v4243_v43 = vadd.f32 -1.4531521, %v4227_v50  ;;  %4834 = vmatprep.subr.mxu1 %v7775_v48  ;;  %v4287_v46 = vmul.f32 %v9914_v47, %v4271_v55  ;;  %v4276_v13 = vadd.f32 1.4214138, %v4260_v14  ;;  %4933 = vmatprep.subr.mxu0 %v9999_v56  ;;  %v11277_v63 = vld [vmem:[#allocation50_spill] sm:$0xff]  ;;  %v10078_v62 = vld [vmem:[#allocation2 + $0x48] sm:$0xff] }
 0xc63   : > { %4803 = vmatprep.mubr.f32.mxu0 %v4496_v23  ;;  %4835 = vmatpush1.msra.mxu1 %v7776_v54  ;;  %v4333_v7 = vadd.f32 0.2548296, %v4317_v9  ;;  %v4290_v16 = vmul.f32 %v9954_v26, %v4274_v30  ;;  %v4077_v37 = vmul.f32 0.5, %v11274_v45  ;;  %v11275_v27 = vmov -1.0   ;;  %v10073_v23 = vld [vmem:[#allocation2 + $0x50] sm:$0xff]  ;;  %v11278_v30 = vld [vmem:[#allocation28_spill] sm:$0xff] }
 0xc64   : > { %v4273_v52 = vadd.f32 1.4214138, %v4257_v31  ;;  %v4259_v6 = vmul.f32 %v9949_v2, %v4243_v43  ;;  %4836 = vmatprep.subr.mxu1 %v7777_v41  ;;  %v4303_v18 = vadd.f32 -0.28449672, %v4287_v46  ;;  %v4292_v58 = vmul.f32 %v9963_v1, %v4276_v13  ;;  %4934 = vmatpush1.msra.mxu0 %v7770_v28  ;;  %v10051_v28 = vld [vmem:[#allocation2 + $0x68] sm:$0xff]  ;;  %v11280_v13 = vld [vmem:[#allocation46_spill] sm:$0xff] }
 0xc65   : > { %4837 = vmatpush1.msra.mxu1 %v10025_v39  ;;  %v4349_v11 = vmul.f32 %v9895_v57, %v4333_v7  ;;  %v4306_v21 = vadd.f32 -0.28449672, %v4290_v16  ;;  %4935 = vmatprep.subr.mxu0 %v7771_v42  ;;  %v4125_v0 = vsel %vm4109_vm11, 1.0, %v11275_v27  ;;  %v4127_v59 = vsel %vm4111_vm12, 1.0, %v11275_v27  ;;  %v10090_v16 = vld [vmem:[#allocation2 + $0x38] sm:$0xff] }
 0xc66   : > { %v4289_v35 = vmul.f32 %v9939_v38, %v4273_v52  ;;  %v4275_v33 = vadd.f32 1.4214138, %v4259_v6  ;;  %4838 = vmatprep.subr.mxu1 %v10031_v53  ;;  %v4319_v19 = vmul.f32 %v9914_v47, %v4303_v18  ;;  %v4308_v5 = vadd.f32 -0.28449672, %v4292_v58  ;;  %4936 = vmatpush1.msra.mxu0 %v7772_v49  ;;  %v11281_v52 = vld [vmem:[#allocation42_spill] sm:$0xff]  ;;  %v10098_v58 = vld [vmem:[#allocation2 + $0x30] sm:$0xff] }
 0xc67   : > { %4839 = vmatpush1.msra.mxu1 %v10036_v3  ;;  %v4429_v57 = vmul.f32 %v9906_v60, %v4349_v11  ;;  %v4322_v32 = vmul.f32 %v9954_v26, %v4306_v21  ;;  %4937 = vmatprep.subr.mxu0 %v7773_v24  ;;  %vm4113_vm14 = vcmp.ge.f32.partialorder %v11278_v30, 0.0  ;;  %vm4115_vm0 = vcmp.ge.f32.partialorder %v11281_v52, 0.0  ;;  %v7805_v30 = vld [vmem:[#allocation2 + $0x1b8] sm:$0xff]  ;;  %v7819_v52 = vld [vmem:[#allocation2 + $0x148] sm:$0xff] }
 0xc68   : > { %v4305_v56 = vadd.f32 -0.28449672, %v4289_v35  ;;  %v4291_v51 = vmul.f32 %v9949_v2, %v4275_v33  ;;  %4840 = vmatprep.subr.mxu1 %v10042_v44  ;;  %v4335_v40 = vadd.f32 0.2548296, %v4319_v19  ;;  %v4324_v22 = vmul.f32 %v9963_v1, %v4308_v5  ;;  %4938 = vmatpush1.msra.mxu0 %v7774_v10  ;;  %v10105_v35 = vld [vmem:[#allocation2 + $0x28] sm:$0xff]  ;;  %v11282_v33 = vld [vmem:[#allocation45_spill] sm:$0xff] }
 0xc69   : > { %4841 = vmatpush1.msra.mxu1 %v10047_v61  ;;  %v4445_v60 = vsub.f32 1.0, %v4429_v57  ;;  %v4338_v25 = vadd.f32 0.2548296, %v4322_v32  ;;  %4939 = vmatprep.subr.mxu0 %v7775_v48  ;;  %v10084_v48 = vld [vmem:[#allocation2 + $0x40] sm:$0xff]  ;;  %v4129_v19 = vsel %vm4113_vm14, 1.0, %v11275_v27 }
 0xc6a   : > { %v4321_v4 = vmul.f32 %v9939_v38, %v4305_v56  ;;  %v4307_v8 = vadd.f32 -0.28449672, %v4291_v51  ;;  %4842 = vmatprep.subr.mxu1 %v10051_v28  ;;  %v4351_v42 = vmul.f32 %v9914_v47, %v4335_v40  ;;  %v4340_v20 = vadd.f32 0.2548296, %v4324_v22  ;;  %4940 = vmatpush1.msra.mxu0 %v7776_v54  ;;  %v11276_v47 = vld [vmem:[#allocation44_spill] sm:$0xff]  ;;  %v10112_v57 = vld [vmem:[#allocation2 + $0x20] sm:$0xff] }
 0xc6b   : > { %4843 = vmatpush1.msra.mxu1 %v10059_v12  ;;  %v4461_v36 = vmul.f32 %v4445_v60, %v4125_v0  ;;  %v4354_v29 = vmul.f32 %v9954_v26, %v4338_v25  ;;  %vm4114_vm13 = vcmp.ge.f32.partialorder %v11276_v47, 0.0  ;;  %4941 = vmatprep.subr.mxu0 %v7777_v41  ;;  %v7518_v26 = vpop.eup %7517  ;;  %v11283_v32 = vld [vmem:[#allocation51_spill] sm:$0xff]  ;;  %v7793_v22 = vld [vmem:[#allocation2 + $0x18] sm:$0xff]  ;;  %v4131_v60 = vsel %vm4115_vm0, 1.0, %v11275_v27  ;;  %v11284_v25 = vld [vmem:[#allocation49_spill] sm:$0xff] }
 0xc6c   : > { %v4337_v49 = vadd.f32 0.2548296, %v4321_v4  ;;  %v4323_v15 = vmul.f32 %v9949_v2, %v4307_v8  ;;  %4844 = vmatprep.subr.mxu1 %v10064_v34  ;;  %v4431_v50 = vmul.f32 %v11277_v63, %v4351_v42  ;;  %v4356_v24 = vmul.f32 %v9963_v1, %v4340_v20  ;;  %4942 = vmatpush1.msra.mxu0 %v10025_v39  ;;  %v11279_v1 = vld [vmem:[#allocation52_spill] sm:$0xff] }
 0xc6d   : > { %4845 = vmatpush1.msra.mxu1 %v10073_v23  ;;  %v4477_v55 = vadd.f32 1.0, %v4461_v36  ;;  %v4434_v14 = vmul.f32 %v9959_v17, %v4354_v29  ;;  %vm4116_vm15 = vcmp.ge.f32.partialorder %v11279_v1, 0.0  ;;  %4943 = vmatprep.subr.mxu0 %v10031_v53  ;;  %v7520_v17 = vpop.eup %7519  ;;  %v4130_v6 = vsel %vm4114_vm13, 1.0, %v11275_v27  ;;  %v7795_v29 = vld [vmem:[#allocation2 + $0x8] sm:$0xff] }
 0xc6e   : > { %v4353_v10 = vmul.f32 %v9939_v38, %v4337_v49  ;;  %v4339_v9 = vadd.f32 0.2548296, %v4323_v15  ;;  %4846 = vmatprep.subr.mxu1 %v10078_v62  ;;  %v4447_v31 = vsub.f32 1.0, %v4431_v50  ;;  %v4436_v43 = vmul.f32 %v7518_v26, %v4356_v24  ;;  %4944 = vmatpush1.msra.mxu0 %v10036_v3  ;;  %v7796_v49 = vld [vmem:[#allocation2] sm:$0xff]  ;;  %v11286_v15 = vld [vmem:[#allocation41_spill] sm:$0xff]  ;;  %v7797_v50 = vld [vmem:[#allocation2 + $0x1f8] sm:$0xff] }
 0xc6f   : > { %4847 = vmatpush1.msra.mxu1 %v10084_v48  ;;  %v4493_v38 = vmul.f32 %v4477_v55, %v4077_v37  ;;  %v4450_v46 = vsub.f32 1.0, %v4434_v14  ;;  %4945 = vmatprep.subr.mxu0 %v10042_v44  ;;  %v4079_v53 = vmul.f32 0.5, %v11282_v33  ;;  %v4082_v56 = vmul.f32 0.5, %v11283_v32  ;;  %v7794_v37 = vld [vmem:[#allocation2 + $0x10] sm:$0xff]  ;;  %v7799_v26 = vld [vmem:[#allocation2 + $0x1e8] sm:$0xff]  ;;  %v7800_v55 = vld [vmem:[#allocation2 + $0x1e0] sm:$0xff] }
 0xc70   : > { %v4433_v54 = vmul.f32 %v11280_v13, %v4353_v10  ;;  %v4355_v7 = vmul.f32 %v9949_v2, %v4339_v9  ;;  %4848 = vmatprep.subr.mxu1 %v10090_v16  ;;  %v4463_v41 = vmul.f32 %v4447_v31, %v4127_v59  ;;  %v4452_v18 = vsub.f32 1.0, %v4436_v43  ;;  %4946 = vmatpush1.msra.mxu0 %v10047_v61  ;;  %v11285_v61 = vld [vmem:[#allocation32_spill] sm:$0xff]  ;;  %v7802_v14 = vld [vmem:[#allocation2 + $0x1d0] sm:$0xff]  ;;  %v7804_v9 = vld [vmem:[#allocation2 + $0x1c0] sm:$0xff] }
 0xc71   : > { %4849 = vmatpush1.msra.mxu1 %v10098_v58  ;;  %v4132_v2 = vsel %vm4116_vm15, 1.0, %v11275_v27  ;;  %v4466_v39 = vmul.f32 %v4450_v46, %v4130_v6  ;;  %4947 = vmatprep.subr.mxu0 %v10051_v28  ;;  %v4084_v4 = vmul.f32 0.5, %v11284_v25  ;;  %v4081_v0 = vmul.f32 0.5, %v11285_v61  ;;  %v7803_v10 = vld [vmem:[#allocation2 + $0x1c8] sm:$0xff]  ;;  %v7809_v31 = vld [vmem:[#allocation2 + $0x198] sm:$0xff]  ;;  %v7810_v43 = vld [vmem:[#allocation2 + $0x190] sm:$0xff] }
 0xc72   : > { %4715 = vmatmul.mubr.f32.gmra.mxu1 %v4493_v38  ;;  %v4449_v11 = vsub.f32 1.0, %v4433_v54  ;;  %v4435_v21 = vmul.f32 %v7520_v17, %v4355_v7  ;;  %4850 = vmatprep.subr.mxu1 %v10105_v35  ;;  %v4479_v5 = vadd.f32 1.0, %v4463_v41  ;;  %v4468_v3 = vmul.f32 %v4452_v18, %v4132_v2  ;;  %v7807_v1 = vld [vmem:[#allocation2 + $0x1a8] sm:$0xff]  ;;  %v7812_v17 = vld [vmem:[#allocation2 + $0x180] sm:$0xff]  ;;  %v7813_v38 = vld [vmem:[#allocation2 + $0x178] sm:$0xff] }
 0xc73   : > { %4851 = vmatpush1.msra.mxu1 %v10112_v57  ;;  %v4482_v51 = vadd.f32 1.0, %v4466_v39  ;;  %4948 = vmatpush1.msra.mxu0 %v10059_v12  ;;  %v4083_v59 = vmul.f32 0.5, %v11286_v15  ;;  %v7798_v12 = vld [vmem:[#allocation2 + $0x1f0] sm:$0xff]  ;;  %v7815_v13 = vld [vmem:[#allocation2 + $0x168] sm:$0xff]  ;;  %v7816_v54 = vld [vmem:[#allocation2 + $0x160] sm:$0xff] }
 0xc74   : > { %v4465_v44 = vmul.f32 %v4449_v11, %v4129_v19  ;;  %v4451_v40 = vsub.f32 1.0, %v4435_v21  ;;  %4852 = vmatprep.subr.mxu1 %v7793_v22  ;;  %v4495_v8 = vmul.f32 %v4479_v5, %v4079_v53  ;;  %v4484_v45 = vadd.f32 1.0, %v4468_v3  ;;  %4949 = vmatprep.subr.mxu0 %v10064_v34  ;;  %v7801_v34 = vld [vmem:[#allocation2 + $0x1d8] sm:$0xff]  ;;  %v7814_v46 = vld [vmem:[#allocation2 + $0x170] sm:$0xff]  ;;  %v7820_v6 = vld [vmem:[#allocation2 + $0x140] sm:$0xff] }
 0xc75   : > { %4853 = vmatpush1.msra.mxu1 %v7794_v37  ;;  %v4498_v42 = vmul.f32 %v4482_v51, %v4082_v56  ;;  %4950 = vmatpush1.msra.mxu0 %v10073_v23  ;;  %v7806_v23 = vld [vmem:[#allocation2 + $0x1b0] sm:$0xff]  ;;  %v7817_v7 = vld [vmem:[#allocation2 + $0x158] sm:$0xff]  ;;  %v7824_v2 = vld [vmem:[#allocation2 + $0x120] sm:$0xff] }
 0xc76   : > { %v4481_v20 = vadd.f32 1.0, %v4465_v44  ;;  %v4467_v36 = vmul.f32 %v4451_v40, %v4131_v60  ;;  %4854 = vmatprep.subr.mxu1 %v7795_v29  ;;  %4804 = vmatmul.mubr.f32.gmra.mxu0 %v4495_v8  ;;  %v4500_v28 = vmul.f32 %v4484_v45, %v4084_v4  ;;  %v7821_v41 = vld [vmem:[#allocation2 + $0x138] sm:$0xff]  ;;  %v7822_v18 = vld [vmem:[#allocation2 + $0x130] sm:$0xff]  ;;  %v7827_v21 = vld [vmem:[#allocation2 + $0x108] sm:$0xff] }
 0xc77   : > { %4855 = vmatpush1.msra.mxu1 %v7796_v49  ;;  %4720 = vmatprep.mubr.f32.mxu1 %v4498_v42  ;;  %v7825_v39 = vld [vmem:[#allocation2 + $0x118] sm:$0xff]  ;;  %v7826_v11 = vld [vmem:[#allocation2 + $0x110] sm:$0xff]  ;;  %v11287_v53 = vld [vmem:[#allocation39_spill] sm:$0xff] }
 0xc78   : > { %v4497_v47 = vmul.f32 %v4481_v20, %v4081_v0  ;;  %v4483_v63 = vadd.f32 1.0, %v4467_v36  ;;  %4856 = vmatprep.subr.mxu1 %v7797_v50  ;;  %4809 = vmatprep.mubr.f32.mxu0 %v4500_v28  ;;  %v10136_v33 = vld [vmem:[%s10980_s9 + $0x10] sm:$0xff]  ;;  %v10143_v3 = vld [vmem:[%s10980_s9 + $0x18] sm:$0xff] }
 0xc79   : > { %4857 = vmatpush2.msra.mxu1 %v7798_v12  ;;  %4951 = vmatprep.subr.mxu0 %v10078_v62  ;;  %v7808_v62 = vld [vmem:[#allocation2 + $0x1a0] sm:$0xff]  ;;  %v4633_v19 = vrot.slane %v10136_v33, %v11287_v53  ;;  %v11290_v42 = vld [vmem:[#allocation38_spill] sm:$0xff] }
 0xc7a   : > { %4721 = vmatmul.mubr.f32.gmra.mxu1 %v4497_v47  ;;  %v4499_v24 = vmul.f32 %v4483_v63, %v4083_v59  ;;  %4858 = vmatprep.subr.mxu1 %v7799_v26  ;;  %v11294_v59 = vld [vmem:[#allocation37_spill] sm:$0xff] }
 0xc7b   : > { %4859 = vmatpush2.msra.mxu1 %v7800_v55  ;;  %4952 = vmatpush1.msra.mxu0 %v10084_v48  ;;  %v7811_v48 = vld [vmem:[#allocation2 + $0x188] sm:$0xff] }
 0xc7c   : > { %4810 = vmatmul.mubr.f32.gmra.mxu0 %v4499_v24  ;;  %4860 = vmatprep.subr.mxu1 %v7801_v34 }
 0xc7d   : > { %4861 = vmatpush2.msra.mxu1 %v7802_v14  ;;  %4953 = vmatprep.subr.mxu0 %v10090_v16  ;;  %v7818_v16 = vld [vmem:[#allocation2 + $0x150] sm:$0xff] }
 0xc7e   : > { %4862 = vmatprep.subr.mxu1 %v7803_v10  ;;  %4954 = vmatpush1.msra.mxu0 %v10098_v58  ;;  %v7823_v58 = vld [vmem:[#allocation2 + $0x128] sm:$0xff] }
 0xc7f   : > { %4863 = vmatpush2.msra.mxu1 %v7804_v9  ;;  %4955 = vmatprep.subr.mxu0 %v10105_v35  ;;  %v7828_v35 = vld [vmem:[#allocation2 + $0x100] sm:$0xff] }
 0xc80   : > { %4864 = vmatprep.subr.mxu1 %v7805_v30  ;;  %4956 = vmatpush1.msra.mxu0 %v10112_v57  ;;  %v4637_v57 = vrot.slane %v10143_v3, %v11287_v53 }
 0xc81   : > { %4865 = vmatpush2.msra.mxu1 %v7806_v23  ;;  %4957 = vmatprep.subr.mxu0 %v7793_v22 }
 0xc82   : > { %4866 = vmatprep.subr.mxu1 %v7807_v1  ;;  %4958 = vmatpush1.msra.mxu0 %v7794_v37  ;;  %v11288_v37 = vld [vmem:[#allocation35_spill] sm:$0xff] }
 0xc83   : > { %4867 = vmatpush2.msra.mxu1 %v7808_v62  ;;  %4959 = vmatprep.subr.mxu0 %v7795_v29 }
 0xc84   : > { %4868 = vmatprep.subr.mxu1 %v7809_v31  ;;  %4960 = vmatpush1.msra.mxu0 %v7796_v49  ;;  %v11292_v49 = vld [vmem:[#allocation31_spill] sm:$0xff] }
 0xc85   : > { %4869 = vmatpush2.msra.mxu1 %v7810_v43  ;;  %4961 = vmatprep.subr.mxu0 %v7797_v50 }
 0xc86   : > { %4870 = vmatprep.subr.mxu1 %v7811_v48  ;;  %4962 = vmatpush2.msra.mxu0 %v7798_v12 }
 0xc87   : > { %4871 = vmatpush2.msra.mxu1 %v7812_v17  ;;  %4963 = vmatprep.subr.mxu0 %v7799_v26 }
 0xc88   : > { %4872 = vmatprep.subr.mxu1 %v7813_v38  ;;  %4964 = vmatpush2.msra.mxu0 %v7800_v55 }
 0xc89   : > { %4873 = vmatpush2.msra.mxu1 %v7814_v46  ;;  %4965 = vmatprep.subr.mxu0 %v7801_v34 }
 0xc8a   : > { %4874 = vmatprep.subr.mxu1 %v7815_v13  ;;  %4966 = vmatpush2.msra.mxu0 %v7802_v14 }
 0xc8b   : > { %4875 = vmatpush2.msra.mxu1 %v7816_v54  ;;  %4967 = vmatprep.subr.mxu0 %v7803_v10 }
 0xc8c   : > { %4876 = vmatprep.subr.mxu1 %v7817_v7  ;;  %4968 = vmatpush2.msra.mxu0 %v7804_v9 }
 0xc8d   : > { %4877 = vmatpush2.msra.mxu1 %v7818_v16  ;;  %4969 = vmatprep.subr.mxu0 %v7805_v30  ;;  %v11296_v30 = vld [vmem:[#allocation53_spill] sm:$0xff] }
 0xc8e   : > { %4878 = vmatprep.subr.mxu1 %v7819_v52  ;;  %4970 = vmatpush2.msra.mxu0 %v7806_v23 }
 0xc8f   : > { %4879 = vmatpush2.msra.mxu1 %v7820_v6  ;;  %4971 = vmatprep.subr.mxu0 %v7807_v1 }
 0xc90   : > { %4880 = vmatprep.subr.mxu1 %v7821_v41  ;;  %4972 = vmatpush2.msra.mxu0 %v7808_v62 }
 0xc91   : > { %4881 = vmatpush2.msra.mxu1 %v7822_v18  ;;  %4973 = vmatprep.subr.mxu0 %v7809_v31  ;;  %v11298_v31 = vld [vmem:[#allocation33_spill] sm:$0xff] }
 0xc92   : > { %4882 = vmatprep.subr.mxu1 %v7823_v58  ;;  %4974 = vmatpush2.msra.mxu0 %v7810_v43 }
 0xc93   : > { %4883 = vmatpush2.msra.mxu1 %v7824_v2  ;;  %4975 = vmatprep.subr.mxu0 %v7811_v48 }
 0xc94   : > { %4884 = vmatprep.subr.mxu1 %v7825_v39  ;;  %4976 = vmatpush2.msra.mxu0 %v7812_v17 }
 0xc95   : > { %4885 = vmatpush2.msra.mxu1 %v7826_v11  ;;  %4977 = vmatprep.subr.mxu0 %v7813_v38 }
 0xc96   : > { %4886 = vmatprep.subr.mxu1 %v7827_v21  ;;  %4978 = vmatpush2.msra.mxu0 %v7814_v46 }
 0xc97   : > { %4887 = vmatpush2.msra.mxu1 %v7828_v35  ;;  %4979 = vmatprep.subr.mxu0 %v7815_v13  ;;  %v11300_v13 = vld [vmem:[#allocation43_spill] sm:$0xff] }
 0xc98   : > { %4980 = vmatpush2.msra.mxu0 %v7816_v54 }
 0xc99   : > { %4981 = vmatprep.subr.mxu0 %v7817_v7  ;;  %v11302_v7 = vld [vmem:[#allocation34_spill] sm:$0xff] }
 0xc9a   : > { %4982 = vmatpush2.msra.mxu0 %v7818_v16 }
 0xc9b   : > { %4983 = vmatprep.subr.mxu0 %v7819_v52  ;;  %v5128_v52 = vld [vmem:[#allocation10 + $0x5e8] sm:$0xff] }
 0xc9c   : > { %4984 = vmatpush2.msra.mxu0 %v7820_v6  ;;  %v5130_v6 = vld [vmem:[#allocation10 + $0x5f8] sm:$0xff]  ;;  %5218 = vmatprep.subr.mxu1 %v5128_v52 }
 0xc9d   : > { %4985 = vmatprep.subr.mxu0 %v7821_v41  ;;  %v5127_v41 = vld [vmem:[#allocation10 + $0x5e0] sm:$0xff] }
 0xc9e   : > { %4986 = vmatpush2.msra.mxu0 %v7822_v18  ;;  %v5124_v18 = vld [vmem:[#allocation10 + $0x5c8] sm:$0xff] }
 0xc9f   : > { %4987 = vmatprep.subr.mxu0 %v7823_v58  ;;  %v5123_v58 = vld [vmem:[#allocation10 + $0x5c0] sm:$0xff] }
 0xca0   : > { %4988 = vmatpush2.msra.mxu0 %v7824_v2  ;;  %v5120_v2 = vld [vmem:[#allocation10 + $0x5a8] sm:$0xff] }
 0xca1   : > { %4989 = vmatprep.subr.mxu0 %v7825_v39  ;;  %v5119_v39 = vld [vmem:[#allocation10 + $0x5a0] sm:$0xff] }
 0xca2   : > { %4990 = vmatpush2.msra.mxu0 %v7826_v11  ;;  %v5116_v11 = vld [vmem:[#allocation10 + $0x588] sm:$0xff] }
 0xca3   : > { %4991 = vmatprep.subr.mxu0 %v7827_v21  ;;  %v5115_v21 = vld [vmem:[#allocation10 + $0x580] sm:$0xff] }
 0xca4   : > { %4992 = vmatpush2.msra.mxu0 %v7828_v35  ;;  %v5112_v35 = vld [vmem:[#allocation10 + $0x568] sm:$0xff] }
 0xca5   : > { %5307 = vmatprep.subr.mxu0 %v5130_v6  ;;  %v5122_v6 = vld [vmem:[#allocation10 + $0x5b8] sm:$0xff] }
 0xd16   : > { %v4704_v5 = vpop.f32.mrf.mxu1 }
 0xd17   : > { %v4705_v56 = vadd.f32 %v4704_v5, %v4633_v19  ;;  %v5108_v5 = vld [vmem:[#allocation10 + $0x548] sm:$0xff] }
 0xd18   : > { %v4706_v32 = vpop.f32.mrf.mxu1 }
 0xd19   : > { %v4707_v51 = vadd.f32 %v4706_v32, %v4637_v57  ;;  %v5104_v32 = vld [vmem:[#allocation10 + $0x528] sm:$0xff] }
 0xd1b   : > { %v4793_v44 = vpop.f32.mrf.mxu0 }
 0xd1c   : > { %v4794_v40 = vadd.f32 %v4793_v44, %v4705_v56  ;;  %v5103_v56 = vld [vmem:[#allocation10 + $0x520] sm:$0xff] }
 0xd1d   : > { %v4795_v22 = vpop.f32.mrf.mxu0  ;;  %v5099_v44 = vld [vmem:[#allocation10 + $0x500] sm:$0xff] }
 0xd1e   : > { %v4710_v60 = vpop.f32.mrf.mxu1  ;;  %v4796_v25 = vadd.f32 %v4795_v22, %v4707_v51  ;;  %v10151_v20 = vadd.f32 %v4794_v40, %v11290_v42  ;;  %v5100_v51 = vld [vmem:[#allocation10 + $0x508] sm:$0xff]  ;;  %v5095_v22 = vld [vmem:[#allocation10 + $0x4e0] sm:$0xff] }
 0xd1f   : > { %v4711_v4 = vadd.f32 %v4710_v60, %v4633_v19  ;;  %v5096_v40 = vld [vmem:[#allocation10 + $0x4e8] sm:$0xff]  ;;  %v5079_v42 = vld [vmem:[#allocation10 + $0x460] sm:$0xff] }
 0xd20   : > { %v4799_v8 = vpop.f32.mrf.mxu0  ;;  %v4712_v45 = vpop.f32.mrf.mxu1  ;;  %v10148_v61 = vadd.f32 %v4796_v25, %v11288_v37  ;;  %11291 = vst [vmem:[#allocation44_spill] sm:$0xff] %v10151_v20  ;;  %v5092_v60 = vld [vmem:[#allocation10 + $0x4c8] sm:$0xff]  ;;  %v5091_v25 = vld [vmem:[#allocation10 + $0x4c0] sm:$0xff] }
 0xd21   : > { %v4713_v0 = vadd.f32 %v4712_v45, %v4637_v57  ;;  %v4800_v36 = vadd.f32 %v4799_v8, %v4711_v4  ;;  %v5088_v4 = vld [vmem:[#allocation10 + $0x4a8] sm:$0xff]  ;;  %v5087_v8 = vld [vmem:[#allocation10 + $0x4a0] sm:$0xff] }
 0xd22   : > { %11289 = vst [vmem:[#allocation36_spill] sm:$0xff] %v10148_v61  ;;  %v4801_v29 = vpop.f32.mrf.mxu0  ;;  %4888 = vmatprep.mubr.f32.mxu1 %v10148_v61  ;;  %v5084_v45 = vld [vmem:[#allocation10 + $0x488] sm:$0xff]  ;;  %v5083_v37 = vld [vmem:[#allocation10 + $0x480] sm:$0xff] }
 0xd23   : > { %v4802_v28 = vadd.f32 %v4801_v29, %v4713_v0  ;;  %4889 = vmatmul.mubr.f32.vlgmr.msra.gmra.mxu1 %v10151_v20  ;;  %v10159_v47 = vadd.f32 %v4800_v36, %v11294_v59  ;;  %v5080_v0 = vld [vmem:[#allocation10 + $0x468] sm:$0xff]  ;;  %v5075_v29 = vld [vmem:[#allocation10 + $0x440] sm:$0xff] }
 0xd24   : > { %5219 = vmatpush1.msra.mxu1 %v5127_v41  ;;  %v5076_v36 = vld [vmem:[#allocation10 + $0x448] sm:$0xff] }
 0xd25   : > { %v10156_v15 = vadd.f32 %v4802_v28, %v11292_v49  ;;  %11295 = vst [vmem:[#allocation28_spill] sm:$0xff] %v10159_v47  ;;  %5220 = vmatprep.subr.mxu1 %v5124_v18  ;;  %v5072_v28 = vld [vmem:[#allocation10 + $0x428] sm:$0xff]  ;;  %v5071_v49 = vld [vmem:[#allocation10 + $0x420] sm:$0xff]  ;;  %v5121_v18 = vld [vmem:[#allocation10 + $0x5b0] sm:$0xff] }
 0xd26   : > { %5221 = vmatpush1.msra.mxu1 %v5123_v58  ;;  %v5068_v59 = vld [vmem:[#allocation10 + $0x408] sm:$0xff]  ;;  %v5118_v58 = vld [vmem:[#allocation10 + $0x598] sm:$0xff] }
 0xd27   : > { %11293 = vst [vmem:[#allocation50_spill] sm:$0xff] %v10156_v15  ;;  %4894 = vmatprep.mubr.f32.mxu1 %v10156_v15  ;;  %5222 = vmatprep.subr.mxu1 %v5120_v2  ;;  %v5117_v2 = vld [vmem:[#allocation10 + $0x590] sm:$0xff] }
 0xd28   : > { %4895 = vmatmul.mubr.f32.gmra.mxu1 %v10159_v47 }
 0xd29   : > { %5223 = vmatpush1.msra.mxu1 %v5119_v39  ;;  %v5114_v39 = vld [vmem:[#allocation10 + $0x578] sm:$0xff] }
 0xd2a   : > { %5224 = vmatprep.subr.mxu1 %v5116_v11  ;;  %v5113_v11 = vld [vmem:[#allocation10 + $0x570] sm:$0xff] }
 0xd2b   : > { %5225 = vmatpush1.msra.mxu1 %v5115_v21  ;;  %v5110_v21 = vld [vmem:[#allocation10 + $0x558] sm:$0xff] }
 0xd2c   : > { %5226 = vmatprep.subr.mxu1 %v5112_v35  ;;  %v5109_v35 = vld [vmem:[#allocation10 + $0x550] sm:$0xff] }
 0xd32   : > { %v4716_v63 = vpop.f32.mrf.mxu1 }
 0xd33   : > { %v4717_v12 = vadd.f32 %v4716_v63, %v4633_v19  ;;  %v5067_v63 = vld [vmem:[#allocation10 + $0x400] sm:$0xff] }
 0xd34   : > { %v4718_v50 = vpop.f32.mrf.mxu1 }
 0xd35   : > { %v4719_v24 = vadd.f32 %v4718_v50, %v4637_v57  ;;  %v5192_v50 = vld [vmem:[#allocation10 + $0x7e8] sm:$0xff] }
 0xd36   : > { %v4805_v26 = vpop.f32.mrf.mxu0 }
 0xd37   : > { %v4806_v55 = vadd.f32 %v4805_v26, %v4717_v12  ;;  %v5191_v12 = vld [vmem:[#allocation10 + $0x7e0] sm:$0xff] }
 0xd38   : > { %v4807_v34 = vpop.f32.mrf.mxu0  ;;  %v5187_v26 = vld [vmem:[#allocation10 + $0x7c0] sm:$0xff] }
 0xd39   : > { %v4808_v14 = vadd.f32 %v4807_v34, %v4719_v24  ;;  %v10167_v43 = vadd.f32 %v4806_v55, %v11298_v31  ;;  %v5188_v24 = vld [vmem:[#allocation10 + $0x7c8] sm:$0xff]  ;;  %v5183_v34 = vld [vmem:[#allocation10 + $0x7a0] sm:$0xff] }
 0xd3a   : > { %v4722_v10 = vpop.f32.mrf.mxu1  ;;  %v5184_v55 = vld [vmem:[#allocation10 + $0x7a8] sm:$0xff] }
 0xd3b   : > { %v4723_v9 = vadd.f32 %v4722_v10, %v4633_v19  ;;  %v10164_v23 = vadd.f32 %v4808_v14, %v11296_v30  ;;  %11299 = vst [vmem:[#allocation46_spill] sm:$0xff] %v10167_v43  ;;  %v5111_v19 = vld [vmem:[#allocation10 + $0x560] sm:$0xff] }
 0xd3c   : > { %v4811_v1 = vpop.f32.mrf.mxu0  ;;  %v4724_v62 = vpop.f32.mrf.mxu1  ;;  %5227 = vmatpush1.msra.mxu1 %v5111_v19  ;;  %v5106_v19 = vld [vmem:[#allocation10 + $0x538] sm:$0xff] }
 0xd3d   : > { %11297 = vst [vmem:[#allocation52_spill] sm:$0xff] %v10164_v23  ;;  %v4725_v48 = vadd.f32 %v4724_v62, %v4637_v57  ;;  %v4812_v17 = vadd.f32 %v4811_v1, %v4723_v9  ;;  %4900 = vmatprep.mubr.f32.mxu1 %v10164_v23  ;;  %v5107_v57 = vld [vmem:[#allocation10 + $0x540] sm:$0xff]  ;;  %5228 = vmatprep.subr.mxu1 %v5108_v5  ;;  %v5105_v5 = vld [vmem:[#allocation10 + $0x530] sm:$0xff] }
 0xd3e   : > { %v4813_v38 = vpop.f32.mrf.mxu0  ;;  %4901 = vmatmul.mubr.f32.gmra.mxu1 %v10167_v43 }
 0xd3f   : > { %v4814_v46 = vadd.f32 %v4813_v38, %v4725_v48  ;;  %v10175_v16 = vadd.f32 %v4812_v17, %v11302_v7  ;;  %5229 = vmatpush1.msra.mxu1 %v5107_v57  ;;  %v5129_v38 = vld [vmem:[#allocation10 + $0x5f0] sm:$0xff]  ;;  %v5102_v57 = vld [vmem:[#allocation10 + $0x518] sm:$0xff] }
 0xd40   : > { %5230 = vmatprep.subr.mxu1 %v5104_v32  ;;  %v5125_v7 = vld [vmem:[#allocation10 + $0x5d0] sm:$0xff] }
 0xd41   : > { %v10172_v54 = vadd.f32 %v4814_v46, %v11300_v13  ;;  %11303 = vst [vmem:[#allocation45_spill] sm:$0xff] %v10175_v16  ;;  %5231 = vmatpush1.msra.mxu1 %v5103_v56  ;;  %v5126_v13 = vld [vmem:[#allocation10 + $0x5d8] sm:$0xff]  ;;  %v5101_v32 = vld [vmem:[#allocation10 + $0x510] sm:$0xff] }
 0xd42   : > { %5232 = vmatprep.subr.mxu1 %v5100_v51  ;;  %v5098_v56 = vld [vmem:[#allocation10 + $0x4f8] sm:$0xff]  ;;  %v5097_v51 = vld [vmem:[#allocation10 + $0x4f0] sm:$0xff] }
 0xd43   : > { %11301 = vst [vmem:[#allocation42_spill] sm:$0xff] %v10172_v54  ;;  %4906 = vmatprep.mubr.f32.mxu1 %v10172_v54  ;;  %5233 = vmatpush1.msra.mxu1 %v5099_v44  ;;  %v5094_v44 = vld [vmem:[#allocation10 + $0x4d8] sm:$0xff] }
 0xd44   : > { %4907 = vmatmul.mubr.f32.gmra.mxu1 %v10175_v16  ;;  %5234 = vmatprep.subr.mxu1 %v5096_v40  ;;  %v5093_v40 = vld [vmem:[#allocation10 + $0x4d0] sm:$0xff] }
 0xd45   : > { %5235 = vmatpush1.msra.mxu1 %v5095_v22  ;;  %v5090_v22 = vld [vmem:[#allocation10 + $0x4b8] sm:$0xff] }
 0xd46   : > { %5236 = vmatprep.subr.mxu1 %v5092_v60  ;;  %v5089_v60 = vld [vmem:[#allocation10 + $0x4b0] sm:$0xff] }
 0xd47   : > { %5237 = vmatpush1.msra.mxu1 %v5091_v25 }
 0xd48   : > { %5238 = vmatprep.subr.mxu1 %v5088_v4  ;;  %v5086_v4 = vld [vmem:[#allocation10 + $0x498] sm:$0xff] }
 0xd49   : > { %5239 = vmatpush1.msra.mxu1 %v5087_v8  ;;  %v5085_v8 = vld [vmem:[#allocation10 + $0x490] sm:$0xff] }
 0xd4a   : > { %5240 = vmatprep.subr.mxu1 %v5084_v45 }
 0xd4b   : > { %5241 = vmatpush1.msra.mxu1 %v5083_v37 }
 0xd4c   : > { %5242 = vmatprep.subr.mxu1 %v5080_v0  ;;  %v5082_v0 = vld [vmem:[#allocation10 + $0x478] sm:$0xff] }
 0xd4d   : > { %5243 = vmatpush1.msra.mxu1 %v5079_v42 }
 0xd4e   : > { %5244 = vmatprep.subr.mxu1 %v5076_v36  ;;  %v5081_v36 = vld [vmem:[#allocation10 + $0x470] sm:$0xff] }
 0xd4f   : > { %5245 = vmatpush1.msra.mxu1 %v5075_v29  ;;  %v5078_v29 = vld [vmem:[#allocation10 + $0x458] sm:$0xff] }
 0xd50   : > { %5246 = vmatprep.subr.mxu1 %v5072_v28 }
 0xd51   : > { %5247 = vmatpush1.msra.mxu1 %v5071_v49 }
 0xd52   : > { %5248 = vmatprep.subr.mxu1 %v5068_v59 }
 0xd53   : > { %5249 = vmatpush1.msra.mxu1 %v5067_v63  ;;  %v5077_v63 = vld [vmem:[#allocation10 + $0x450] sm:$0xff] }
 0xd54   : > { %5250 = vmatprep.subr.mxu1 %v5192_v50 }
 0xd55   : > { %5251 = vmatpush2.msra.mxu1 %v5191_v12 }
 0xd56   : > { %5252 = vmatprep.subr.mxu1 %v5188_v24  ;;  %v5074_v24 = vld [vmem:[#allocation10 + $0x438] sm:$0xff] }
 0xd57   : > { %5253 = vmatpush2.msra.mxu1 %v5187_v26 }
 0xd58   : > { %5254 = vmatprep.subr.mxu1 %v5184_v55  ;;  %v5073_v55 = vld [vmem:[#allocation10 + $0x430] sm:$0xff] }
 0xd59   : > { %5255 = vmatpush2.msra.mxu1 %v5183_v34  ;;  %v5070_v34 = vld [vmem:[#allocation10 + $0x418] sm:$0xff] }
 0xde3   : > { %v4890_v14 = vpop.f32.mrf.mxu1 }
 0xde4   : > { %v10180_v10 = vsub.f32 %v10151_v20, %v4890_v14 }
 0xde5   : > { %v4892_v9 = vpop.f32.mrf.mxu1 }
 0xde6   : > { %v10183_v30 = vsub.f32 %v10148_v61, %v4892_v9  ;;  %v4921_v31 = vmul.f32 %v10180_v10, %v10180_v10 }
 0xde8   : > { %v4896_v1 = vpop.f32.mrf.mxu1  ;;  %v4922_v62 = vmul.f32 %v10183_v30, %v10183_v30 }
 0xde9   : > { %v10190_v48 = vsub.f32 %v10159_v47, %v4896_v1  ;;  %v5069_v1 = vld [vmem:[#allocation10 + $0x410] sm:$0xff] }
 0xdea   : > { %v4898_v17 = vpop.f32.mrf.mxu1  ;;  %4993 = vmatprep.mubr.f32.mxu0 %v4922_v62  ;;  %v5194_v62 = vld [vmem:[#allocation10 + $0x7f8] sm:$0xff] }
 0xdeb   : > { %v10193_v46 = vsub.f32 %v10156_v15, %v4898_v17  ;;  %4994 = vmatmul.mubr.f32.vlgmr.msra.gmra.mxu0 %v4921_v31  ;;  %v4923_v41 = vmul.f32 %v10190_v48, %v10190_v48  ;;  %v5193_v31 = vld [vmem:[#allocation10 + $0x7f0] sm:$0xff]  ;;  %v5190_v17 = vld [vmem:[#allocation10 + $0x7d8] sm:$0xff] }
 0xdec   : > { %5308 = vmatpush1.msra.mxu0 %v5129_v38  ;;  %v5189_v38 = vld [vmem:[#allocation10 + $0x7d0] sm:$0xff] }
 0xded   : > { %v4924_v52 = vmul.f32 %v10193_v46, %v10193_v46  ;;  %5309 = vmatprep.subr.mxu0 %v5126_v13  ;;  %v5186_v13 = vld [vmem:[#allocation10 + $0x7b8] sm:$0xff] }
 0xdee   : > { %5310 = vmatpush1.msra.mxu0 %v5125_v7  ;;  %v5185_v7 = vld [vmem:[#allocation10 + $0x7b0] sm:$0xff] }
 0xdef   : > { %4999 = vmatprep.mubr.f32.mxu0 %v4924_v52  ;;  %5311 = vmatprep.subr.mxu0 %v5122_v6  ;;  %v5180_v52 = vld [vmem:[#allocation10 + $0x788] sm:$0xff]  ;;  %v5182_v6 = vld [vmem:[#allocation10 + $0x798] sm:$0xff] }
 0xdf0   : > { %5000 = vmatmul.mubr.f32.gmra.mxu0 %v4923_v41  ;;  %v5179_v41 = vld [vmem:[#allocation10 + $0x780] sm:$0xff]  ;;  %5256 = vmatprep.subr.mxu1 %v5180_v52  ;;  %v5136_v52 = vld [vmem:[#allocation10 + $0x628] sm:$0xff] }
 0xdf1   : > { %5312 = vmatpush1.msra.mxu0 %v5121_v18  ;;  %v5181_v18 = vld [vmem:[#allocation10 + $0x790] sm:$0xff]  ;;  %5257 = vmatpush2.msra.mxu1 %v5179_v41  ;;  %v5135_v41 = vld [vmem:[#allocation10 + $0x620] sm:$0xff] }
 0xdf2   : > { %5313 = vmatprep.subr.mxu0 %v5118_v58  ;;  %v5176_v58 = vld [vmem:[#allocation10 + $0x768] sm:$0xff] }
 0xdf3   : > { %5314 = vmatpush1.msra.mxu0 %v5117_v2  ;;  %v5178_v2 = vld [vmem:[#allocation10 + $0x778] sm:$0xff]  ;;  %5258 = vmatprep.subr.mxu1 %v5176_v58  ;;  %v5132_v58 = vld [vmem:[#allocation10 + $0x608] sm:$0xff] }
 0xdf4   : > { %5315 = vmatprep.subr.mxu0 %v5114_v39  ;;  %v5175_v39 = vld [vmem:[#allocation10 + $0x760] sm:$0xff] }
 0xdf5   : > { %5316 = vmatpush1.msra.mxu0 %v5113_v11  ;;  %v5177_v11 = vld [vmem:[#allocation10 + $0x770] sm:$0xff]  ;;  %5259 = vmatpush2.msra.mxu1 %v5175_v39  ;;  %v5131_v39 = vld [vmem:[#allocation10 + $0x600] sm:$0xff] }
 0xdf6   : > { %5317 = vmatprep.subr.mxu0 %v5110_v21  ;;  %v5172_v21 = vld [vmem:[#allocation10 + $0x748] sm:$0xff] }
 0xdf7   : > { %5318 = vmatpush1.msra.mxu0 %v5109_v35  ;;  %v5174_v35 = vld [vmem:[#allocation10 + $0x758] sm:$0xff]  ;;  %5260 = vmatprep.subr.mxu1 %v5172_v21  ;;  %v5860_v21 = vld [vmem:[#allocation13 + $0x4f8] sm:$0xff] }
 0xdf8   : > { %5319 = vmatprep.subr.mxu0 %v5106_v19  ;;  %v5171_v19 = vld [vmem:[#allocation10 + $0x740] sm:$0xff] }
 0xdf9   : > { %5320 = vmatpush1.msra.mxu0 %v5105_v5  ;;  %v5173_v5 = vld [vmem:[#allocation10 + $0x750] sm:$0xff]  ;;  %5261 = vmatpush2.msra.mxu1 %v5171_v19 }
 0xdfa   : > { %5321 = vmatprep.subr.mxu0 %v5102_v57  ;;  %v5168_v57 = vld [vmem:[#allocation10 + $0x728] sm:$0xff] }
 0xdfb   : > { %5322 = vmatpush1.msra.mxu0 %v5101_v32  ;;  %v5170_v32 = vld [vmem:[#allocation10 + $0x738] sm:$0xff]  ;;  %5262 = vmatprep.subr.mxu1 %v5168_v57 }
 0xdfc   : > { %5323 = vmatprep.subr.mxu0 %v5098_v56  ;;  %v5167_v56 = vld [vmem:[#allocation10 + $0x720] sm:$0xff] }
 0xdfd   : > { %5324 = vmatpush1.msra.mxu0 %v5097_v51  ;;  %v5169_v51 = vld [vmem:[#allocation10 + $0x730] sm:$0xff]  ;;  %5263 = vmatpush2.msra.mxu1 %v5167_v56 }
 0xdfe   : > { %5325 = vmatprep.subr.mxu0 %v5094_v44  ;;  %v4902_v25 = vpop.f32.mrf.mxu1  ;;  %v5164_v44 = vld [vmem:[#allocation10 + $0x708] sm:$0xff] }
 0xdff   : > { %5326 = vmatpush1.msra.mxu0 %v5093_v40  ;;  %v10200_v45 = vsub.f32 %v10167_v43, %v4902_v25  ;;  %v5166_v40 = vld [vmem:[#allocation10 + $0x718] sm:$0xff]  ;;  %5264 = vmatprep.subr.mxu1 %v5164_v44  ;;  %v5160_v25 = vld [vmem:[#allocation10 + $0x6e8] sm:$0xff] }
 0xe00   : > { %5327 = vmatprep.subr.mxu0 %v5090_v22  ;;  %v4904_v37 = vpop.f32.mrf.mxu1  ;;  %v5163_v22 = vld [vmem:[#allocation10 + $0x700] sm:$0xff] }
 0xe01   : > { %5328 = vmatpush1.msra.mxu0 %v5089_v60  ;;  %v10203_v42 = vsub.f32 %v10164_v23, %v4904_v37  ;;  %v4925_v59 = vmul.f32 %v10200_v45, %v10200_v45  ;;  %v5165_v60 = vld [vmem:[#allocation10 + $0x710] sm:$0xff]  ;;  %5265 = vmatpush2.msra.mxu1 %v5163_v22 }
 0xe02   : > { %5329 = vmatprep.subr.mxu0 %v5086_v4  ;;  %v5162_v4 = vld [vmem:[#allocation10 + $0x6f8] sm:$0xff]  ;;  %5266 = vmatprep.subr.mxu1 %v5160_v25  ;;  %v5161_v37 = vld [vmem:[#allocation10 + $0x6f0] sm:$0xff] }
 0xe03   : > { %5330 = vmatpush1.msra.mxu0 %v5085_v8  ;;  %v4926_v28 = vmul.f32 %v10203_v42, %v10203_v42  ;;  %v5159_v8 = vld [vmem:[#allocation10 + $0x6e0] sm:$0xff] }
 0xe04   : > { %v4908_v49 = vpop.f32.mrf.mxu1  ;;  %5331 = vmatprep.subr.mxu0 %v5082_v0  ;;  %5267 = vmatpush2.msra.mxu1 %v5159_v8  ;;  %v5156_v0 = vld [vmem:[#allocation10 + $0x6c8] sm:$0xff] }
 0xe05   : > { %5332 = vmatpush1.msra.mxu0 %v5081_v36  ;;  %v10210_v50 = vsub.f32 %v10175_v16, %v4908_v49  ;;  %5005 = vmatprep.mubr.f32.mxu0 %v4926_v28  ;;  %v5158_v36 = vld [vmem:[#allocation10 + $0x6d8] sm:$0xff]  ;;  %v5157_v28 = vld [vmem:[#allocation10 + $0x6d0] sm:$0xff]  ;;  %v5152_v49 = vld [vmem:[#allocation10 + $0x6a8] sm:$0xff] }
 0xe06   : > { %v4910_v12 = vpop.f32.mrf.mxu1  ;;  %5333 = vmatprep.subr.mxu0 %v5078_v29  ;;  %5006 = vmatmul.mubr.f32.gmra.mxu0 %v4925_v59  ;;  %v5155_v29 = vld [vmem:[#allocation10 + $0x6c0] sm:$0xff]  ;;  %v5154_v59 = vld [vmem:[#allocation10 + $0x6b8] sm:$0xff] }
 0xe07   : > { %v10213_v26 = vsub.f32 %v10172_v54, %v4910_v12  ;;  %5334 = vmatpush1.msra.mxu0 %v5077_v63  ;;  %v4927_v9 = vmul.f32 %v10210_v50, %v10210_v50  ;;  %5268 = vmatprep.subr.mxu1 %v5156_v0  ;;  %v5151_v63 = vld [vmem:[#allocation10 + $0x6a0] sm:$0xff]  ;;  %v5153_v12 = vld [vmem:[#allocation10 + $0x6b0] sm:$0xff] }
 0xe08   : > { %5335 = vmatprep.subr.mxu0 %v5074_v24  ;;  %5269 = vmatpush2.msra.mxu1 %v5155_v29  ;;  %v5148_v24 = vld [vmem:[#allocation10 + $0x688] sm:$0xff] }
 0xe09   : > { %v4928_v14 = vmul.f32 %v10213_v26, %v10213_v26  ;;  %5336 = vmatpush1.msra.mxu0 %v5073_v55  ;;  %5270 = vmatprep.subr.mxu1 %v5152_v49  ;;  %v5150_v55 = vld [vmem:[#allocation10 + $0x698] sm:$0xff] }
 0xe0a   : > { %5337 = vmatprep.subr.mxu0 %v5070_v34  ;;  %5271 = vmatpush2.msra.mxu1 %v5151_v63  ;;  %v5147_v34 = vld [vmem:[#allocation10 + $0x680] sm:$0xff] }
 0xe0b   : > { %5011 = vmatprep.mubr.f32.mxu0 %v4928_v14  ;;  %5338 = vmatpush1.msra.mxu0 %v5069_v1  ;;  %v5149_v14 = vld [vmem:[#allocation10 + $0x690] sm:$0xff]  ;;  %v5146_v1 = vld [vmem:[#allocation10 + $0x678] sm:$0xff] }
 0xe0c   : > { %5012 = vmatmul.mubr.f32.gmra.mxu0 %v4927_v9  ;;  %5339 = vmatprep.subr.mxu0 %v5194_v62  ;;  %v5144_v9 = vld [vmem:[#allocation10 + $0x668] sm:$0xff]  ;;  %v5143_v62 = vld [vmem:[#allocation10 + $0x660] sm:$0xff] }
 0xe0d   : > { %5340 = vmatpush2.msra.mxu0 %v5193_v31  ;;  %5272 = vmatprep.subr.mxu1 %v5148_v24  ;;  %v5145_v31 = vld [vmem:[#allocation10 + $0x670] sm:$0xff] }
 0xe0e   : > { %5341 = vmatprep.subr.mxu0 %v5190_v17  ;;  %5273 = vmatpush2.msra.mxu1 %v5147_v34  ;;  %v5140_v17 = vld [vmem:[#allocation10 + $0x648] sm:$0xff]  ;;  %v5859_v34 = vld [vmem:[#allocation13 + $0x4f0] sm:$0xff] }
 0xe0f   : > { %5342 = vmatpush2.msra.mxu0 %v5189_v38  ;;  %v5142_v38 = vld [vmem:[#allocation10 + $0x658] sm:$0xff]  ;;  %5274 = vmatprep.subr.mxu1 %v5144_v9  ;;  %v5858_v9 = vld [vmem:[#allocation13 + $0x4e8] sm:$0xff] }
 0xe10   : > { %5343 = vmatprep.subr.mxu0 %v5186_v13  ;;  %v5139_v13 = vld [vmem:[#allocation10 + $0x640] sm:$0xff]  ;;  %5275 = vmatpush2.msra.mxu1 %v5143_v62 }
 0xe11   : > { %5344 = vmatpush2.msra.mxu0 %v5185_v7  ;;  %v5141_v7 = vld [vmem:[#allocation10 + $0x650] sm:$0xff]  ;;  %5276 = vmatprep.subr.mxu1 %v5140_v17  ;;  %v5857_v17 = vld [vmem:[#allocation13 + $0x4e0] sm:$0xff] }
 0xe12   : > { %5345 = vmatprep.subr.mxu0 %v5182_v6  ;;  %v5138_v6 = vld [vmem:[#allocation10 + $0x638] sm:$0xff]  ;;  %5277 = vmatpush2.msra.mxu1 %v5139_v13 }
 0xe13   : > { %5346 = vmatpush2.msra.mxu0 %v5181_v18  ;;  %v5137_v18 = vld [vmem:[#allocation10 + $0x630] sm:$0xff]  ;;  %5278 = vmatprep.subr.mxu1 %v5136_v52  ;;  %v5920_v52 = vld [vmem:[#allocation13 + $0x6d8] sm:$0xff] }
 0xe14   : > { %5347 = vmatprep.subr.mxu0 %v5178_v2  ;;  %v5134_v2 = vld [vmem:[#allocation10 + $0x618] sm:$0xff]  ;;  %5279 = vmatpush2.msra.mxu1 %v5135_v41 }
 0xe15   : > { %5348 = vmatpush2.msra.mxu0 %v5177_v11  ;;  %v5133_v11 = vld [vmem:[#allocation10 + $0x610] sm:$0xff]  ;;  %5280 = vmatprep.subr.mxu1 %v5132_v58  ;;  %v5855_v41 = vld [vmem:[#allocation13 + $0x4d0] sm:$0xff] }
 0xe16   : > { %5349 = vmatprep.subr.mxu0 %v5174_v35  ;;  %5281 = vmatpush2.msra.mxu1 %v5131_v39  ;;  %v5924_v35 = vld [vmem:[#allocation13 + $0x6f8] sm:$0xff]  ;;  %v5854_v58 = vld [vmem:[#allocation13 + $0x4c8] sm:$0xff] }
 0xe17   : > { %5350 = vmatpush2.msra.mxu0 %v5173_v5  ;;  %5965 = vmatprep.subr.mxu1 %v5860_v21  ;;  %v5917_v21 = vld [vmem:[#allocation13 + $0x6c0] sm:$0xff] }
 0xe18   : > { %5351 = vmatprep.subr.mxu0 %v5170_v32 }
 0xe19   : > { %5352 = vmatpush2.msra.mxu0 %v5169_v51 }
 0xe1a   : > { %5353 = vmatprep.subr.mxu0 %v5166_v40 }
 0xe1b   : > { %5354 = vmatpush2.msra.mxu0 %v5165_v60  ;;  %v11304_v60 = vld [vmem:[#allocation40_spill] sm:$0xff] }
 0xe1c   : > { %5355 = vmatprep.subr.mxu0 %v5162_v4  ;;  %v10221_v25 = vrot.slane %v10136_v33, %v11304_v60  ;;  %v10226_v8 = vrot.slane %v10143_v3, %v11304_v60 }
 0xe1d   : > { %5356 = vmatpush2.msra.mxu0 %v5161_v37 }
 0xe1e   : > { %5357 = vmatprep.subr.mxu0 %v5158_v36  ;;  %v11305_v36 = vld [vmem:[#allocation47_spill] sm:$0xff] }
 0xe1f   : > { %5358 = vmatpush2.msra.mxu0 %v5157_v28  ;;  %v10231_v29 = vrot.slane %v10143_v3, %v11305_v36 }
 0xe20   : > { %5359 = vmatprep.subr.mxu0 %v5154_v59  ;;  %v10236_v59 = vrot.slane %v10136_v33, %v11305_v36 }
 0xe21   : > { %5360 = vmatpush2.msra.mxu0 %v5153_v12 }
 0xe22   : > { %5361 = vmatprep.subr.mxu0 %v5150_v55 }
 0xe23   : > { %5362 = vmatpush2.msra.mxu0 %v5149_v14  ;;  %v5923_v14 = vld [vmem:[#allocation13 + $0x6f0] sm:$0xff] }
 0xe24   : > { %5363 = vmatprep.subr.mxu0 %v5146_v1  ;;  %v5922_v1 = vld [vmem:[#allocation13 + $0x6e8] sm:$0xff] }
 0xe25   : > { %5364 = vmatpush2.msra.mxu0 %v5145_v31 }
 0xe26   : > { %5365 = vmatprep.subr.mxu0 %v5142_v38  ;;  %v5921_v38 = vld [vmem:[#allocation13 + $0x6e0] sm:$0xff] }
 0xe27   : > { %5366 = vmatpush2.msra.mxu0 %v5141_v7  ;;  %v5856_v7 = vld [vmem:[#allocation13 + $0x4d8] sm:$0xff] }
 0xe28   : > { %5367 = vmatprep.subr.mxu0 %v5138_v6 }
 0xe29   : > { %5368 = vmatpush2.msra.mxu0 %v5137_v18  ;;  %v5919_v18 = vld [vmem:[#allocation13 + $0x6d0] sm:$0xff] }
 0xe2a   : > { %5369 = vmatprep.subr.mxu0 %v5134_v2  ;;  %v5918_v2 = vld [vmem:[#allocation13 + $0x6c8] sm:$0xff] }
 0xe2b   : > { %5370 = vmatpush2.msra.mxu0 %v5133_v11  ;;  %v5853_v11 = vld [vmem:[#allocation13 + $0x4c0] sm:$0xff] }
 0xe2c   : > { %6054 = vmatprep.subr.mxu0 %v5924_v35 }
 0xeab   : > { %v4995_v19 = vpop.f32.mrf.mxu0 }
 0xeac   : > { %v4996_v5 = vadd.f32 1e-05, %v4995_v19 }
 0xead   : > { %v4997_v57 = vpop.f32.mrf.mxu0 }
 0xeae   : > { %7521 = vrsqrt.f32 %v4996_v5  ;;  %v4998_v32 = vadd.f32 1e-05, %v4997_v57 }
 0xeb0   : > { %v5001_v56 = vpop.f32.mrf.mxu0  ;;  %7523 = vrsqrt.f32 %v4998_v32 }
 0xeb1   : > { %v5002_v51 = vadd.f32 1e-05, %v5001_v56 }
 0xeb2   : > { %v5003_v44 = vpop.f32.mrf.mxu0 }
 0xeb3   : > { %7525 = vrsqrt.f32 %v5002_v51  ;;  %v5004_v40 = vadd.f32 1e-05, %v5003_v44 }
 0xeb5   : > { %7527 = vrsqrt.f32 %v5004_v40 }
 0xebb   : > { %v7522_v22 = vpop.eup %7521 }
 0xebc   : > { %v5026_v4 = vmul.f32 %v7522_v22, %v10180_v10 }
 0xebd   : > { %v7524_v37 = vpop.eup %7523 }
 0xebe   : > { %v5027_v0 = vmul.f32 %v7524_v37, %v10183_v30  ;;  %v5042_v49 = vmul.f32 %v10221_v25, %v5026_v4 }
 0xec0   : > { %v7526_v28 = vpop.eup %7525  ;;  %v5043_v10 = vmul.f32 %v10226_v8, %v5027_v0  ;;  %v5058_v55 = vadd.f32 %v10236_v59, %v5042_v49 }
 0xec1   : > { %v5028_v63 = vmul.f32 %v7526_v28, %v10190_v48 }
 0xec2   : > { %v7528_v12 = vpop.eup %7527  ;;  %v5059_v24 = vadd.f32 %v10231_v29, %v5043_v10 }
 0xec3   : > { %v5029_v30 = vmul.f32 %v7528_v12, %v10193_v46  ;;  %v5044_v3 = vmul.f32 %v10221_v25, %v5028_v63  ;;  %v5916_v63 = vld [vmem:[#allocation13 + $0x6b8] sm:$0xff]  ;;  %v5915_v12 = vld [vmem:[#allocation13 + $0x6b0] sm:$0xff] }
 0xec4   : > { %5282 = vmatprep.mubr.f32.mxu1 %v5059_v24  ;;  %5371 = vmatprep.mubr.f32.mxu0 %v5059_v24  ;;  %v5914_v24 = vld [vmem:[#allocation13 + $0x6a8] sm:$0xff] }
 0xec5   : > { %v5045_v33 = vmul.f32 %v10226_v8, %v5029_v30  ;;  %5283 = vmatmul.mubr.f32.vlgmr.msra.gmra.mxu1 %v5058_v55  ;;  %5372 = vmatmul.mubr.f32.vlgmr.msra.gmra.mxu0 %v5058_v55  ;;  %v5060_v31 = vadd.f32 %v10236_v59, %v5044_v3  ;;  %v5912_v30 = vld [vmem:[#allocation13 + $0x698] sm:$0xff]  ;;  %v5847_v55 = vld [vmem:[#allocation13 + $0x490] sm:$0xff] }
 0xec6   : > { %v5007_v48 = vpop.f32.mrf.mxu0  ;;  %5966 = vmatpush1.msra.mxu1 %v5859_v34  ;;  %6055 = vmatpush1.msra.mxu0 %v5923_v14  ;;  %v5911_v3 = vld [vmem:[#allocation13 + $0x690] sm:$0xff]  ;;  %v5846_v34 = vld [vmem:[#allocation13 + $0x488] sm:$0xff] }
 0xec7   : > { %v5061_v62 = vadd.f32 %v10231_v29, %v5045_v33  ;;  %v5008_v46 = vadd.f32 1e-05, %v5007_v48  ;;  %5967 = vmatprep.subr.mxu1 %v5858_v9  ;;  %6056 = vmatprep.subr.mxu0 %v5922_v1  ;;  %v5910_v14 = vld [vmem:[#allocation13 + $0x688] sm:$0xff]  ;;  %v5845_v33 = vld [vmem:[#allocation13 + $0x480] sm:$0xff]  ;;  %v5844_v1 = vld [vmem:[#allocation13 + $0x478] sm:$0xff] }
 0xec8   : > { %v5009_v13 = vpop.f32.mrf.mxu0  ;;  %5968 = vmatpush1.msra.mxu1 %v5857_v17  ;;  %6057 = vmatpush1.msra.mxu0 %v5921_v38  ;;  %v5909_v9 = vld [vmem:[#allocation13 + $0x680] sm:$0xff]  ;;  %v5908_v48 = vld [vmem:[#allocation13 + $0x678] sm:$0xff]  ;;  %v5906_v17 = vld [vmem:[#allocation13 + $0x668] sm:$0xff] }
 0xec9   : > { %5288 = vmatprep.mubr.f32.mxu1 %v5061_v62  ;;  %5377 = vmatprep.mubr.f32.mxu0 %v5061_v62  ;;  %7529 = vrsqrt.f32 %v5008_v46  ;;  %v5010_v6 = vadd.f32 1e-05, %v5009_v13  ;;  %v5843_v62 = vld [vmem:[#allocation13 + $0x470] sm:$0xff]  ;;  %v5841_v38 = vld [vmem:[#allocation13 + $0x460] sm:$0xff] }
 0xeca   : > { %5289 = vmatmul.mubr.f32.gmra.mxu1 %v5060_v31  ;;  %5378 = vmatmul.mubr.f32.gmra.mxu0 %v5060_v31  ;;  %v5907_v46 = vld [vmem:[#allocation13 + $0x670] sm:$0xff]  ;;  %v5842_v31 = vld [vmem:[#allocation13 + $0x468] sm:$0xff]  ;;  %v5905_v13 = vld [vmem:[#allocation13 + $0x660] sm:$0xff] }
 0xecb   : > { %7531 = vrsqrt.f32 %v5010_v6  ;;  %5969 = vmatprep.subr.mxu1 %v5856_v7  ;;  %6058 = vmatprep.subr.mxu0 %v5920_v52  ;;  %v5840_v7 = vld [vmem:[#allocation13 + $0x458] sm:$0xff]  ;;  %v5839_v6 = vld [vmem:[#allocation13 + $0x450] sm:$0xff] }
 0xecc   : > { %v5013_v39 = vpop.f32.mrf.mxu0  ;;  %5970 = vmatpush1.msra.mxu1 %v5855_v41  ;;  %6059 = vmatpush1.msra.mxu0 %v5919_v18  ;;  %v5904_v52 = vld [vmem:[#allocation13 + $0x658] sm:$0xff]  ;;  %v5903_v41 = vld [vmem:[#allocation13 + $0x650] sm:$0xff]  ;;  %v5838_v18 = vld [vmem:[#allocation13 + $0x448] sm:$0xff] }
 0xecd   : > { %v5014_v35 = vadd.f32 1e-05, %v5013_v39  ;;  %5971 = vmatprep.subr.mxu1 %v5854_v58  ;;  %6060 = vmatprep.subr.mxu0 %v5918_v2  ;;  %v5902_v58 = vld [vmem:[#allocation13 + $0x648] sm:$0xff]  ;;  %v5837_v2 = vld [vmem:[#allocation13 + $0x440] sm:$0xff] }
 0xece   : > { %v5015_v19 = vpop.f32.mrf.mxu0  ;;  %5972 = vmatpush1.msra.mxu1 %v5853_v11  ;;  %6061 = vmatpush1.msra.mxu0 %v5917_v21  ;;  %v5901_v39 = vld [vmem:[#allocation13 + $0x640] sm:$0xff]  ;;  %v5836_v11 = vld [vmem:[#allocation13 + $0x438] sm:$0xff] }
 0xecf   : > { %7533 = vrsqrt.f32 %v5014_v35  ;;  %v5016_v5 = vadd.f32 1e-05, %v5015_v19  ;;  %6062 = vmatprep.subr.mxu0 %v5916_v63  ;;  %v5900_v21 = vld [vmem:[#allocation13 + $0x638] sm:$0xff]  ;;  %v5835_v35 = vld [vmem:[#allocation13 + $0x430] sm:$0xff]  ;;  %v5889_v63 = vld [vmem:[#allocation13 + $0x5e0] sm:$0xff] }
 0xed0   : > { %6063 = vmatpush1.msra.mxu0 %v5915_v12  ;;  %v5899_v19 = vld [vmem:[#allocation13 + $0x630] sm:$0xff]  ;;  %v5888_v12 = vld [vmem:[#allocation13 + $0x5d8] sm:$0xff] }
 0xed1   : > { %7535 = vrsqrt.f32 %v5016_v5  ;;  %6064 = vmatprep.subr.mxu0 %v5914_v24  ;;  %v5834_v5 = vld [vmem:[#allocation13 + $0x428] sm:$0xff]  ;;  %v5887_v24 = vld [vmem:[#allocation13 + $0x5d0] sm:$0xff] }
 0xed6   : > { %v7530_v57 = vpop.eup %7529 }
 0xed7   : > { %v5030_v32 = vmul.f32 %v7530_v57, %v10200_v45  ;;  %v5898_v57 = vld [vmem:[#allocation13 + $0x628] sm:$0xff] }
 0xed8   : > { %v7532_v56 = vpop.eup %7531 }
 0xed9   : > { %v5031_v51 = vmul.f32 %v7532_v56, %v10203_v42  ;;  %v5046_v44 = vmul.f32 %v10221_v25, %v5030_v32  ;;  %v5833_v32 = vld [vmem:[#allocation13 + $0x420] sm:$0xff] }
 0xeda   : > { %v5897_v56 = vld [vmem:[#allocation13 + $0x620] sm:$0xff] }
 0xedb   : > { %v5047_v22 = vmul.f32 %v10226_v8, %v5031_v51  ;;  %v5062_v36 = vadd.f32 %v10236_v59, %v5046_v44  ;;  %v5832_v51 = vld [vmem:[#allocation13 + $0x418] sm:$0xff] }
 0xedc   : > { %v7534_v40 = vpop.eup %7533  ;;  %v5896_v44 = vld [vmem:[#allocation13 + $0x618] sm:$0xff] }
 0xedd   : > { %v5032_v4 = vmul.f32 %v7534_v40, %v10210_v50  ;;  %v5063_v0 = vadd.f32 %v10231_v29, %v5047_v22  ;;  %v5852_v50 = vld [vmem:[#allocation13 + $0x4b8] sm:$0xff]  ;;  %v5831_v40 = vld [vmem:[#allocation13 + $0x410] sm:$0xff] }
 0xede   : > { %v7536_v37 = vpop.eup %7535  ;;  %5973 = vmatprep.subr.mxu1 %v5852_v50  ;;  %v5895_v22 = vld [vmem:[#allocation13 + $0x610] sm:$0xff]  ;;  %v5954_v50 = vld [vmem:[#allocation13 + $0x7e8] sm:$0xff] }
 0xedf   : > { %v5033_v28 = vmul.f32 %v7536_v37, %v10213_v26  ;;  %5294 = vmatprep.mubr.f32.mxu1 %v5063_v0  ;;  %5383 = vmatprep.mubr.f32.mxu0 %v5063_v0  ;;  %v5048_v45 = vmul.f32 %v10221_v25, %v5032_v4  ;;  %v5851_v26 = vld [vmem:[#allocation13 + $0x4b0] sm:$0xff]  ;;  %v5850_v25 = vld [vmem:[#allocation13 + $0x4a8] sm:$0xff]  ;;  %v5829_v0 = vld [vmem:[#allocation13 + $0x400] sm:$0xff] }
 0xee0   : > { %5295 = vmatmul.mubr.f32.gmra.mxu1 %v5062_v36  ;;  %5384 = vmatmul.mubr.f32.gmra.mxu0 %v5062_v36  ;;  %v5830_v4 = vld [vmem:[#allocation13 + $0x408] sm:$0xff]  ;;  %v5893_v36 = vld [vmem:[#allocation13 + $0x600] sm:$0xff] }
 0xee1   : > { %v5049_v42 = vmul.f32 %v10226_v8, %v5033_v28  ;;  %v5064_v10 = vadd.f32 %v10236_v59, %v5048_v45  ;;  %5974 = vmatpush1.msra.mxu1 %v5851_v26  ;;  %v5849_v8 = vld [vmem:[#allocation13 + $0x4a0] sm:$0xff]  ;;  %v5848_v59 = vld [vmem:[#allocation13 + $0x498] sm:$0xff]  ;;  %v5894_v37 = vld [vmem:[#allocation13 + $0x608] sm:$0xff] }
 0xee2   : > { %5975 = vmatprep.subr.mxu1 %v5850_v25  ;;  %v5892_v28 = vld [vmem:[#allocation13 + $0x5f8] sm:$0xff]  ;;  %v5953_v26 = vld [vmem:[#allocation13 + $0x7e0] sm:$0xff] }
 0xee3   : > { %v5065_v49 = vadd.f32 %v10231_v29, %v5049_v42  ;;  %v5913_v29 = vld [vmem:[#allocation13 + $0x6a0] sm:$0xff]  ;;  %5976 = vmatpush1.msra.mxu1 %v5849_v8  ;;  %v5956_v45 = vld [vmem:[#allocation13 + $0x7f8] sm:$0xff]  ;;  %v5891_v42 = vld [vmem:[#allocation13 + $0x5f0] sm:$0xff] }
 0xee4   : > { %6065 = vmatpush1.msra.mxu0 %v5913_v29  ;;  %5977 = vmatprep.subr.mxu1 %v5848_v59  ;;  %v5952_v25 = vld [vmem:[#allocation13 + $0x7d8] sm:$0xff]  ;;  %v5951_v8 = vld [vmem:[#allocation13 + $0x7d0] sm:$0xff]  ;;  %v5886_v29 = vld [vmem:[#allocation13 + $0x5c8] sm:$0xff] }
 0xee5   : > { %5300 = vmatprep.mubr.f32.mxu1 %v5065_v49  ;;  %5389 = vmatprep.mubr.f32.mxu0 %v5065_v49  ;;  %v5955_v49 = vld [vmem:[#allocation13 + $0x7f0] sm:$0xff]  ;;  %v5950_v59 = vld [vmem:[#allocation13 + $0x7c8] sm:$0xff] }
 0xee6   : > { %5301 = vmatmul.mubr.f32.gmra.mxu1 %v5064_v10  ;;  %5390 = vmatmul.mubr.f32.gmra.mxu0 %v5064_v10  ;;  %v5890_v10 = vld [vmem:[#allocation13 + $0x5e8] sm:$0xff] }
 0xee7   : > { %6066 = vmatprep.subr.mxu0 %v5912_v30  ;;  %5978 = vmatpush1.msra.mxu1 %v5847_v55  ;;  %v5885_v30 = vld [vmem:[#allocation13 + $0x5c0] sm:$0xff] }
 0xee8   : > { %6067 = vmatpush1.msra.mxu0 %v5911_v3  ;;  %5979 = vmatprep.subr.mxu1 %v5846_v34  ;;  %v5949_v55 = vld [vmem:[#allocation13 + $0x7c0] sm:$0xff]  ;;  %v5884_v3 = vld [vmem:[#allocation13 + $0x5b8] sm:$0xff] }
 0xee9   : > { %6068 = vmatprep.subr.mxu0 %v5910_v14  ;;  %5980 = vmatpush1.msra.mxu1 %v5845_v33  ;;  %v5948_v34 = vld [vmem:[#allocation13 + $0x7b8] sm:$0xff]  ;;  %v5883_v14 = vld [vmem:[#allocation13 + $0x5b0] sm:$0xff] }
 0xeea   : > { %6069 = vmatpush1.msra.mxu0 %v5909_v9  ;;  %5981 = vmatprep.subr.mxu1 %v5844_v1  ;;  %v5947_v33 = vld [vmem:[#allocation13 + $0x7b0] sm:$0xff]  ;;  %v5882_v9 = vld [vmem:[#allocation13 + $0x5a8] sm:$0xff] }
 0xeeb   : > { %6070 = vmatprep.subr.mxu0 %v5908_v48  ;;  %5982 = vmatpush1.msra.mxu1 %v5843_v62  ;;  %v5946_v1 = vld [vmem:[#allocation13 + $0x7a8] sm:$0xff]  ;;  %v5881_v48 = vld [vmem:[#allocation13 + $0x5a0] sm:$0xff] }
 0xeec   : > { %6071 = vmatpush1.msra.mxu0 %v5907_v46  ;;  %5983 = vmatprep.subr.mxu1 %v5842_v31  ;;  %v5945_v62 = vld [vmem:[#allocation13 + $0x7a0] sm:$0xff]  ;;  %v5880_v46 = vld [vmem:[#allocation13 + $0x598] sm:$0xff] }
 0xeed   : > { %6072 = vmatprep.subr.mxu0 %v5906_v17  ;;  %5984 = vmatpush1.msra.mxu1 %v5841_v38  ;;  %v5944_v31 = vld [vmem:[#allocation13 + $0x798] sm:$0xff]  ;;  %v5879_v17 = vld [vmem:[#allocation13 + $0x590] sm:$0xff] }
 0xeee   : > { %6073 = vmatpush1.msra.mxu0 %v5905_v13  ;;  %5985 = vmatprep.subr.mxu1 %v5840_v7  ;;  %v5943_v38 = vld [vmem:[#allocation13 + $0x790] sm:$0xff]  ;;  %v5878_v13 = vld [vmem:[#allocation13 + $0x588] sm:$0xff] }
 0xeef   : > { %6074 = vmatprep.subr.mxu0 %v5904_v52  ;;  %5986 = vmatpush1.msra.mxu1 %v5839_v6  ;;  %v5942_v7 = vld [vmem:[#allocation13 + $0x788] sm:$0xff]  ;;  %v5877_v52 = vld [vmem:[#allocation13 + $0x580] sm:$0xff] }
 0xef0   : > { %6075 = vmatpush1.msra.mxu0 %v5903_v41  ;;  %5987 = vmatprep.subr.mxu1 %v5838_v18  ;;  %v5941_v6 = vld [vmem:[#allocation13 + $0x780] sm:$0xff]  ;;  %v5876_v41 = vld [vmem:[#allocation13 + $0x578] sm:$0xff] }
 0xef1   : > { %6076 = vmatprep.subr.mxu0 %v5902_v58  ;;  %5988 = vmatpush1.msra.mxu1 %v5837_v2  ;;  %v5940_v18 = vld [vmem:[#allocation13 + $0x778] sm:$0xff]  ;;  %v5875_v58 = vld [vmem:[#allocation13 + $0x570] sm:$0xff] }
 0xef2   : > { %6077 = vmatpush1.msra.mxu0 %v5901_v39  ;;  %5989 = vmatprep.subr.mxu1 %v5836_v11  ;;  %v5939_v2 = vld [vmem:[#allocation13 + $0x770] sm:$0xff]  ;;  %v5874_v39 = vld [vmem:[#allocation13 + $0x568] sm:$0xff] }
 0xef3   : > { %6078 = vmatprep.subr.mxu0 %v5900_v21  ;;  %5990 = vmatpush1.msra.mxu1 %v5835_v35  ;;  %v5938_v11 = vld [vmem:[#allocation13 + $0x768] sm:$0xff]  ;;  %v5873_v21 = vld [vmem:[#allocation13 + $0x560] sm:$0xff] }
 0xef4   : > { %6079 = vmatpush1.msra.mxu0 %v5899_v19  ;;  %5991 = vmatprep.subr.mxu1 %v5834_v5  ;;  %v5937_v35 = vld [vmem:[#allocation13 + $0x760] sm:$0xff]  ;;  %v5872_v19 = vld [vmem:[#allocation13 + $0x558] sm:$0xff] }
 0xef5   : > { %6080 = vmatprep.subr.mxu0 %v5898_v57  ;;  %5992 = vmatpush1.msra.mxu1 %v5833_v32  ;;  %v5936_v5 = vld [vmem:[#allocation13 + $0x758] sm:$0xff]  ;;  %v5871_v57 = vld [vmem:[#allocation13 + $0x550] sm:$0xff] }
 0xef6   : > { %6081 = vmatpush1.msra.mxu0 %v5897_v56  ;;  %5993 = vmatprep.subr.mxu1 %v5832_v51  ;;  %v5935_v32 = vld [vmem:[#allocation13 + $0x750] sm:$0xff]  ;;  %v5870_v56 = vld [vmem:[#allocation13 + $0x548] sm:$0xff] }
 0xef7   : > { %6082 = vmatprep.subr.mxu0 %v5896_v44  ;;  %5994 = vmatpush1.msra.mxu1 %v5831_v40  ;;  %v5934_v51 = vld [vmem:[#allocation13 + $0x748] sm:$0xff]  ;;  %v5869_v44 = vld [vmem:[#allocation13 + $0x540] sm:$0xff] }
 0xef8   : > { %6083 = vmatpush1.msra.mxu0 %v5895_v22  ;;  %5995 = vmatprep.subr.mxu1 %v5830_v4  ;;  %v5933_v40 = vld [vmem:[#allocation13 + $0x740] sm:$0xff]  ;;  %v5868_v22 = vld [vmem:[#allocation13 + $0x538] sm:$0xff] }
 0xef9   : > { %6084 = vmatprep.subr.mxu0 %v5894_v37  ;;  %5996 = vmatpush1.msra.mxu1 %v5829_v0  ;;  %v5932_v4 = vld [vmem:[#allocation13 + $0x738] sm:$0xff]  ;;  %v5867_v37 = vld [vmem:[#allocation13 + $0x530] sm:$0xff] }
 0xefa   : > { %6085 = vmatpush1.msra.mxu0 %v5893_v36  ;;  %5997 = vmatprep.subr.mxu1 %v5892_v28  ;;  %v5931_v0 = vld [vmem:[#allocation13 + $0x730] sm:$0xff]  ;;  %v5866_v36 = vld [vmem:[#allocation13 + $0x528] sm:$0xff] }
 0xefb   : > { %6086 = vmatprep.subr.mxu0 %v5956_v45  ;;  %5998 = vmatpush2.msra.mxu1 %v5891_v42  ;;  %v5930_v28 = vld [vmem:[#allocation13 + $0x728] sm:$0xff]  ;;  %v5865_v45 = vld [vmem:[#allocation13 + $0x520] sm:$0xff] }
 0xefc   : > { %6087 = vmatpush2.msra.mxu0 %v5955_v49  ;;  %5999 = vmatprep.subr.mxu1 %v5890_v10  ;;  %v5929_v42 = vld [vmem:[#allocation13 + $0x720] sm:$0xff]  ;;  %v5864_v49 = vld [vmem:[#allocation13 + $0x518] sm:$0xff] }
 0xefd   : > { %6088 = vmatprep.subr.mxu0 %v5954_v50  ;;  %6000 = vmatpush2.msra.mxu1 %v5889_v63  ;;  %v5928_v10 = vld [vmem:[#allocation13 + $0x718] sm:$0xff]  ;;  %v5863_v50 = vld [vmem:[#allocation13 + $0x510] sm:$0xff] }
 0xefe   : > { %6089 = vmatpush2.msra.mxu0 %v5953_v26  ;;  %6001 = vmatprep.subr.mxu1 %v5888_v12  ;;  %v5927_v63 = vld [vmem:[#allocation13 + $0x710] sm:$0xff]  ;;  %v5862_v26 = vld [vmem:[#allocation13 + $0x508] sm:$0xff] }
 0xeff   : > { %6090 = vmatprep.subr.mxu0 %v5952_v25  ;;  %6002 = vmatpush2.msra.mxu1 %v5887_v24  ;;  %v5926_v12 = vld [vmem:[#allocation13 + $0x708] sm:$0xff]  ;;  %v5861_v25 = vld [vmem:[#allocation13 + $0x500] sm:$0xff] }
 0xf00   : > { %6091 = vmatpush2.msra.mxu0 %v5951_v8  ;;  %6003 = vmatprep.subr.mxu1 %v5886_v29  ;;  %v5925_v24 = vld [vmem:[#allocation13 + $0x700] sm:$0xff]  ;;  %v7831_v8 = vld [vmem:[#allocation2 + $0xf8] sm:$0xff]  ;;  %v5196_v29 = vld [vmem:[#allocation11 + $0x4] sm:$0xf] }
 0xf01   : > { %6092 = vmatprep.subr.mxu0 %v5950_v59  ;;  %6004 = vmatpush2.msra.mxu1 %v5885_v30  ;;  %v6182_v59 = vld [vmem:[#allocation14 + $0xf8] sm:$0xff]  ;;  %v11306_v30 = vld [vmem:[#allocation29_spill] sm:$0xff] }
 0xf02   : > { %6093 = vmatpush2.msra.mxu0 %v5949_v55  ;;  %6005 = vmatprep.subr.mxu1 %v5884_v3  ;;  %v10260_v55 = vrot.slane %v5196_v29, %v11306_v30  ;;  %v10263_v3 = vrot.slane %v5196_v29, %v11287_v53 }
 0xf03   : > { %6094 = vmatprep.subr.mxu0 %v5948_v34  ;;  %6006 = vmatpush2.msra.mxu1 %v5883_v14 }
 0xf04   : > { %6095 = vmatpush2.msra.mxu0 %v5947_v33  ;;  %6007 = vmatprep.subr.mxu1 %v5882_v9  ;;  %v11307_v33 = vld [vmem:[#allocation30_spill] sm:$0xff] }
 0xf05   : > { %6096 = vmatprep.subr.mxu0 %v5946_v1  ;;  %6008 = vmatpush2.msra.mxu1 %v5881_v48  ;;  %v10266_v9 = vrot.slane %v5196_v29, %v11307_v33 }
 0xf06   : > { %6097 = vmatpush2.msra.mxu0 %v5945_v62  ;;  %6009 = vmatprep.subr.mxu1 %v5880_v46  ;;  %v10271_v62 = vrot.slane %v5196_v29, %v11304_v60 }
 0xf07   : > { %6098 = vmatprep.subr.mxu0 %v5944_v31  ;;  %6010 = vmatpush2.msra.mxu1 %v5879_v17 }
 0xf08   : > { %6099 = vmatpush2.msra.mxu0 %v5943_v38  ;;  %6011 = vmatprep.subr.mxu1 %v5878_v13 }
 0xf09   : > { %6100 = vmatprep.subr.mxu0 %v5942_v7  ;;  %6012 = vmatpush2.msra.mxu1 %v5877_v52 }
 0xf0a   : > { %6101 = vmatpush2.msra.mxu0 %v5941_v6  ;;  %6013 = vmatprep.subr.mxu1 %v5876_v41 }
 0xf0b   : > { %6102 = vmatprep.subr.mxu0 %v5940_v18  ;;  %6014 = vmatpush2.msra.mxu1 %v5875_v58 }
 0xf0c   : > { %6103 = vmatpush2.msra.mxu0 %v5939_v2  ;;  %6015 = vmatprep.subr.mxu1 %v5874_v39 }
 0xf0d   : > { %6104 = vmatprep.subr.mxu0 %v5938_v11  ;;  %6016 = vmatpush2.msra.mxu1 %v5873_v21 }
 0xf0e   : > { %6105 = vmatpush2.msra.mxu0 %v5937_v35  ;;  %6017 = vmatprep.subr.mxu1 %v5872_v19 }
 0xf0f   : > { %6106 = vmatprep.subr.mxu0 %v5936_v5  ;;  %6018 = vmatpush2.msra.mxu1 %v5871_v57 }
 0xf10   : > { %6107 = vmatpush2.msra.mxu0 %v5935_v32  ;;  %6019 = vmatprep.subr.mxu1 %v5870_v56 }
 0xf11   : > { %6108 = vmatprep.subr.mxu0 %v5934_v51  ;;  %6020 = vmatpush2.msra.mxu1 %v5869_v44 }
 0xf12   : > { %6109 = vmatpush2.msra.mxu0 %v5933_v40  ;;  %6021 = vmatprep.subr.mxu1 %v5868_v22 }
 0xf13   : > { %6110 = vmatprep.subr.mxu0 %v5932_v4  ;;  %6022 = vmatpush2.msra.mxu1 %v5867_v37 }
 0xf14   : > { %6111 = vmatpush2.msra.mxu0 %v5931_v0  ;;  %6023 = vmatprep.subr.mxu1 %v5866_v36 }
 0xf15   : > { %6112 = vmatprep.subr.mxu0 %v5930_v28  ;;  %6024 = vmatpush2.msra.mxu1 %v5865_v45 }
 0xf16   : > { %6113 = vmatpush2.msra.mxu0 %v5929_v42  ;;  %6025 = vmatprep.subr.mxu1 %v5864_v49 }
 0xf17   : > { %6114 = vmatprep.subr.mxu0 %v5928_v10  ;;  %6026 = vmatpush2.msra.mxu1 %v5863_v50 }
 0xf18   : > { %6115 = vmatpush2.msra.mxu0 %v5927_v63  ;;  %6027 = vmatprep.subr.mxu1 %v5862_v26 }
 0xf19   : > { %6116 = vmatprep.subr.mxu0 %v5926_v12  ;;  %6028 = vmatpush2.msra.mxu1 %v5861_v25 }
 0xf1a   : > { %6117 = vmatpush2.msra.mxu0 %v5925_v24  ;;  %6228 = vmatprep.subr.mxu1 %v6182_v59 }
 0xf1b   : > { %6321 = vmatprep.subr.mxu0 %v7831_v8 }
 0xf85   : > { %v5284_v34 = vpop.f32.mrf.mxu1  ;;  %v5373_v14 = vpop.f32.mrf.mxu0 }
 0xf86   : > { %v5285_v1 = vadd.f32 %v5284_v34, %v10260_v55  ;;  %v5374_v48 = vadd.f32 %v5373_v14, %v10263_v3 }
 0xf87   : > { %v5286_v46 = vpop.f32.mrf.mxu1  ;;  %v5375_v31 = vpop.f32.mrf.mxu0 }
 0xf88   : > { %v5412_v17 = vmul.f32 0.70710677, %v5285_v1  ;;  %v5414_v38 = vmul.f32 0.70710677, %v5374_v48  ;;  %v5287_v13 = vadd.f32 %v5286_v46, %v10266_v9  ;;  %v5376_v52 = vadd.f32 %v5375_v31, %v10271_v62 }
 0xf89   : > { %v10278_v28 = vmul.f32 0.5, %v5285_v1  ;;  %v10283_v63 = vmul.f32 0.5, %v5374_v48 }
 0xf8a   : > { %v5460_v53 = vand.u32 2147483647, %v5412_v17  ;;  %v5462_v7 = vand.u32 2147483647, %v5414_v38  ;;  %v5413_v6 = vmul.f32 0.70710677, %v5287_v13  ;;  %v5290_v35 = vpop.f32.mrf.mxu1  ;;  %v5379_v57 = vpop.f32.mrf.mxu0 }
 0xf8b   : > { %v5415_v60 = vmul.f32 0.70710677, %v5376_v52  ;;  %v5291_v51 = vadd.f32 %v5290_v35, %v10260_v55  ;;  %vm5428_vm1 = vcmp.ge.f32.partialorder %v5412_v17, 0.0  ;;  %vm5430_vm2 = vcmp.ge.f32.partialorder %v5414_v38, 0.0 }
 0xf8c   : > { %v5476_v41 = vmul.f32 0.3275911, %v5460_v53  ;;  %v5478_v18 = vmul.f32 0.3275911, %v5462_v7  ;;  %v5684_v58 = vsub.f32 0.0, %v5460_v53  ;;  %v5686_v21 = vsub.f32 0.0, %v5462_v7  ;;  %v5292_v44 = vpop.f32.mrf.mxu1  ;;  %v5381_v10 = vpop.f32.mrf.mxu0 }
 0xf8d   : > { %v5461_v2 = vand.u32 2147483647, %v5413_v6  ;;  %v5463_v56 = vand.u32 2147483647, %v5415_v60  ;;  %v5416_v22 = vmul.f32 0.70710677, %v5291_v51  ;;  %v5380_v4 = vadd.f32 %v5379_v57, %v10263_v3 }
 0xf8e   : > { %v5492_v39 = vadd.f32 1.0, %v5476_v41  ;;  %v5494_v11 = vadd.f32 1.0, %v5478_v18  ;;  %v5700_v19 = vmul.f32 %v5684_v58, %v5460_v53  ;;  %v5702_v32 = vmul.f32 %v5686_v21, %v5462_v7 }
 0xf8f   : > { %v5685_v5 = vsub.f32 0.0, %v5461_v2  ;;  %v5477_v40 = vmul.f32 0.3275911, %v5461_v2  ;;  %v5293_v36 = vadd.f32 %v5292_v44, %v10266_v9  ;;  %v5479_v42 = vmul.f32 0.3275911, %v5463_v56 }
 0xf90   : > { %7537 = vrcp.f32 %v5492_v39  ;;  %v5716_v37 = vmul.f32 1.442695, %v5700_v19  ;;  %v5720_v45 = vmul.f32 1.442695, %v5702_v32  ;;  %v5687_v49 = vsub.f32 0.0, %v5463_v56 }
 0xf91   : > { %7539 = vrcp.f32 %v5494_v11  ;;  %v5701_v0 = vmul.f32 %v5685_v5, %v5461_v2  ;;  %v10281_v50 = vsel %vm5428_vm1, 1.0, %v11275_v27  ;;  %v10286_v26 = vsel %vm5430_vm2, 1.0, %v11275_v27 }
 0xf92   : > { %v5493_v12 = vadd.f32 1.0, %v5477_v40  ;;  %vm5429_vm3 = vcmp.ge.f32.partialorder %v5413_v6, 0.0  ;;  %vm5431_vm4 = vcmp.ge.f32.partialorder %v5415_v60, 0.0  ;;  %v5464_v25 = vand.u32 2147483647, %v5416_v22 }
 0xf93   : > { %v5418_v24 = vmul.f32 0.70710677, %v5380_v4  ;;  %7541 = vpow2.f32 %v5716_v37  ;;  %v5718_v8 = vmul.f32 1.442695, %v5701_v0  ;;  %v5417_v29 = vmul.f32 0.70710677, %v5293_v36 }
 0xf94   : > { %v10289_v59 = vadd.f32 %v5381_v10, %v10271_v62  ;;  %7543 = vpow2.f32 %v5720_v45  ;;  %v10291_v34 = vmul.f32 0.5, %v5287_v13  ;;  %v5495_v14 = vadd.f32 1.0, %v5479_v42 }
 0xf95   : > { %v5703_v1 = vmul.f32 %v5687_v49, %v5463_v56  ;;  %v10294_v48 = vsel %vm5429_vm3, 1.0, %v11275_v27  ;;  %7545 = vrcp.f32 %v5493_v12  ;;  %v10296_v46 = vmul.f32 0.5, %v5376_v52 }
 0xf96   : > { %v10299_v31 = vsel %vm5431_vm4, 1.0, %v11275_v27  ;;  %v10301_v17 = vmul.f32 0.5, %v5291_v51  ;;  %vm5432_vm5 = vcmp.ge.f32.partialorder %v5416_v22, 0.0  ;;  %v5688_v38 = vsub.f32 0.0, %v5464_v25 }
 0xf97   : > { %v5466_v53 = vand.u32 2147483647, %v5418_v24  ;;  %7547 = vpow2.f32 %v5718_v8  ;;  %v10305_v13 = vmul.f32 0.5, %v5380_v4  ;;  %v5465_v6 = vand.u32 2147483647, %v5417_v29 }
 0xf98   : > { %v10308_v41 = vmul.f32 0.70710677, %v10289_v59  ;;  %7549 = vrcp.f32 %v5495_v14  ;;  %v5722_v58 = vmul.f32 1.442695, %v5703_v1  ;;  %v10313_v2 = vmul.f32 0.5, %v5293_v36 }
 0xf99   : > { %v10317_v11 = vsel %vm5432_vm5, 1.0, %v11275_v27  ;;  %v5480_v21 = vmul.f32 0.3275911, %v5464_v25  ;;  %vm5434_vm6 = vcmp.ge.f32.partialorder %v5418_v24, 0.0  ;;  %v5704_v35 = vmul.f32 %v5688_v38, %v5464_v25 }
 0xf9a   : > { %v5482_v19 = vmul.f32 0.3275911, %v5466_v53  ;;  %v5690_v5 = vsub.f32 0.0, %v5466_v53  ;;  %v5689_v56 = vsub.f32 0.0, %v5465_v6  ;;  %v5467_v51 = vand.u32 2147483647, %v10308_v41 }
 0xf9b   : > { %7551 = vpow2.f32 %v5722_v58  ;;  %v10325_v4 = vsel %vm5434_vm6, 1.0, %v11275_v27  ;;  %vm5433_vm7 = vcmp.ge.f32.partialorder %v5417_v29, 0.0  ;;  %v5496_v0 = vadd.f32 1.0, %v5480_v21 }
 0xf9c   : > { %v5481_v36 = vmul.f32 0.3275911, %v5465_v6  ;;  %v5724_v10 = vmul.f32 1.442695, %v5704_v35  ;;  %v5706_v12 = vmul.f32 %v5690_v5, %v5466_v53  ;;  %v5498_v8 = vadd.f32 1.0, %v5482_v19 }
 0xf9d   : > { %v10303_v7 = vpop.eup %7537  ;;  %v5705_v14 = vmul.f32 %v5689_v56, %v5465_v6  ;;  %v5691_v1 = vsub.f32 0.0, %v5467_v51  ;;  %v10337_v58 = vsel %vm5433_vm7, 1.0, %v11275_v27  ;;  %7553 = vrcp.f32 %v5496_v0 }
 0xf9e   : > { %v10310_v18 = vpop.eup %7539  ;;  %v5540_v52 = vmul.f32 1.0614054, %v10303_v7  ;;  %v5497_v35 = vadd.f32 1.0, %v5481_v36  ;;  %v5483_v5 = vmul.f32 0.3275911, %v5467_v51  ;;  %7555 = vpow2.f32 %v5724_v10 }
 0xf9f   : > { %v5542_v39 = vmul.f32 1.0614054, %v10310_v18  ;;  %7557 = vrcp.f32 %v5498_v8  ;;  %vm5435_vm8 = vcmp.ge.f32.partialorder %v10308_v41, 0.0 }
 0xfa0   : > { %v5556_v60 = vadd.f32 -1.4531521, %v5540_v52  ;;  %v5296_v57 = vpop.f32.mrf.mxu1  ;;  %v5385_v40 = vpop.f32.mrf.mxu0 }
 0xfa1   : > { %v5558_v32 = vadd.f32 -1.4531521, %v5542_v39  ;;  %v10321_v44 = vadd.f32 %v5296_v57, %v10260_v55  ;;  %v10332_v25 = vadd.f32 %v5385_v40, %v10263_v3  ;;  %v7542_v38 = vpop.eup %7541  ;;  %v5728_v57 = vmul.f32 1.442695, %v5706_v12 }
 0xfa2   : > { %v5572_v22 = vmul.f32 %v10303_v7, %v5556_v60  ;;  %v5298_v42 = vpop.f32.mrf.mxu1  ;;  %v7544_v60 = vpop.eup %7543  ;;  %v5726_v40 = vmul.f32 1.442695, %v5705_v14  ;;  %v5499_v12 = vadd.f32 1.0, %v5483_v5  ;;  %v10368_v5 = vsel %vm5435_vm8, 1.0, %v11275_v27 }
 0xfa3   : > { %11308 = vst [vmem:[#allocation51_spill] sm:$0xff] %v10321_v44  ;;  %v5574_v37 = vmul.f32 %v10310_v18, %v5558_v32  ;;  %v10329_v45 = vmul.f32 0.70710677, %v10321_v44  ;;  %11309 = vst [vmem:[#allocation49_spill] sm:$0xff] %v10332_v25  ;;  %v5299_v21 = vadd.f32 %v5298_v42, %v10266_v9  ;;  %v10342_v19 = vpop.eup %7545  ;;  %v10345_v32 = vmul.f32 0.70710677, %v10332_v25  ;;  %v5387_v29 = vpop.f32.mrf.mxu0 }
 0xfa4   : > { %v5588_v49 = vadd.f32 1.4214138, %v5572_v22  ;;  %v5707_v22 = vmul.f32 %v5691_v1, %v5467_v51  ;;  %7559 = vpow2.f32 %v5728_v57  ;;  %v10360_v51 = vmul.f32 0.5, %v10289_v59 }
 0xfa5   : > { %v5590_v24 = vadd.f32 1.4214138, %v5574_v37  ;;  %v5468_v39 = vand.u32 2147483647, %v10329_v45  ;;  %v10347_v37 = vpop.eup %7547  ;;  %v10351_v36 = vmul.f32 0.70710677, %v5299_v21  ;;  %7561 = vrcp.f32 %v5497_v35 }
 0xfa6   : > { %v5604_v52 = vmul.f32 %v10303_v7, %v5588_v49  ;;  %v10353_v49 = vpop.eup %7549  ;;  %v5470_v14 = vand.u32 2147483647, %v10345_v32  ;;  %v5302_v30 = vpop.f32.mrf.mxu1  ;;  %7563 = vpow2.f32 %v5726_v40  ;;  %v10379_v54 = vmul.f32 0.5, %v5299_v21 }
 0xfa7   : > { %v5606_v53 = vmul.f32 %v10310_v18, %v5590_v24  ;;  %v5692_v0 = vsub.f32 0.0, %v5468_v39  ;;  %v5484_v24 = vmul.f32 0.3275911, %v5468_v39  ;;  %7565 = vrcp.f32 %v5499_v12  ;;  %v5391_v40 = vpop.f32.mrf.mxu0 }
 0xfa8   : > { %v5620_v6 = vadd.f32 -0.28449672, %v5604_v52  ;;  %v10357_v52 = vadd.f32 %v5387_v29, %v10271_v62  ;;  %v10370_v29 = vpop.eup %7551  ;;  %vm5437_vm9 = vcmp.ge.f32.partialorder %v10351_v36, 0.0  ;;  %vm5436_vm11 = vcmp.ge.f32.partialorder %v10329_v45, 0.0 }
 0xfa9   : > { %v5622_v56 = vadd.f32 -0.28449672, %v5606_v53  ;;  %v5730_v53 = vmul.f32 1.442695, %v5707_v22  ;;  %v5708_v57 = vmul.f32 %v5692_v0, %v5468_v39  ;;  %vm5438_vm12 = vcmp.ge.f32.partialorder %v10345_v32, 0.0 }
 0xfaa   : > { %v5636_v42 = vmul.f32 %v10303_v7, %v5620_v6  ;;  %v5469_v6 = vand.u32 2147483647, %v10351_v36  ;;  %v10374_v35 = vmul.f32 0.70710677, %v10357_v52  ;;  %v10402_v36 = vsel %vm5437_vm9, 1.0, %v11275_v27 }
 0xfab   : > { %v5638_v10 = vmul.f32 %v10310_v18, %v5622_v56  ;;  %7567 = vpow2.f32 %v5730_v53  ;;  %v5732_v16 = vmul.f32 1.442695, %v5708_v57 }
 0xfac   : > { %v5652_v8 = vadd.f32 0.2548296, %v5636_v42  ;;  %v5500_v42 = vadd.f32 1.0, %v5484_v24  ;;  %v5485_v33 = vmul.f32 0.3275911, %v5469_v6  ;;  %v5693_v39 = vsub.f32 0.0, %v5469_v6 }
 0xfad   : > { %v5654_v1 = vadd.f32 0.2548296, %v5638_v10  ;;  %v5694_v10 = vsub.f32 0.0, %v5470_v14  ;;  %v10386_v24 = vadd.f32 %v5391_v40, %v10263_v3  ;;  %vm5439_vm10 = vcmp.ge.f32.partialorder %v10374_v35, 0.0 }
 0xfae   : > { %v5668_v56 = vmul.f32 %v10303_v7, %v5652_v8  ;;  %v10377_v7 = vadd.f32 %v5302_v30, %v10260_v55  ;;  %v5486_v8 = vmul.f32 0.3275911, %v5470_v14  ;;  %7569 = vrcp.f32 %v5500_v42  ;;  %v10388_v30 = vpop.eup %7553  ;;  %v5304_v42 = vpop.f32.mrf.mxu1 }
 0xfaf   : > { %v5670_v59 = vmul.f32 %v10310_v18, %v5654_v1  ;;  %v5471_v18 = vand.u32 2147483647, %v10374_v35  ;;  %11312 = vst [vmem:[#allocation39_spill] sm:$0xff] %v10386_v24  ;;  %v5710_v55 = vmul.f32 %v5694_v10, %v5470_v14  ;;  %v5709_v57 = vmul.f32 %v5693_v39, %v5469_v6  ;;  %v5393_v39 = vpop.f32.mrf.mxu0 }
 0xfb0   : > { %v5748_v22 = vmul.f32 %v7542_v38, %v5668_v56  ;;  %11310 = vst [vmem:[#allocation32_spill] sm:$0xff] %v10377_v7  ;;  %v10383_v38 = vmul.f32 0.70710677, %v10377_v7  ;;  %v10390_v56 = vpop.eup %7555  ;;  %v5502_v21 = vadd.f32 1.0, %v5486_v8  ;;  %7571 = vpow2.f32 %v5732_v16 }
 0xfb1   : > { %v5750_v41 = vmul.f32 %v7544_v60, %v5670_v59  ;;  %v5501_v60 = vadd.f32 1.0, %v5485_v33  ;;  %v5487_v1 = vmul.f32 0.3275911, %v5471_v18  ;;  %v5695_v53 = vsub.f32 0.0, %v5471_v18 }
 0xfb2   : > { %v5764_v0 = vsub.f32 1.0, %v5748_v22  ;;  %11311 = vst [vmem:[#allocation41_spill] sm:$0xff] %v10383_v38  ;;  %v5472_v59 = vand.u32 2147483647, %v10383_v38  ;;  %v10394_v22 = vpop.eup %7557  ;;  %v10399_v43 = vmul.f32 0.70710677, %v10386_v24  ;;  %v10405_v6 = vadd.f32 %v5304_v42, %v10266_v9 }
 0xfb3   : > { %v5766_v12 = vsub.f32 1.0, %v5750_v41  ;;  %v5503_v40 = vadd.f32 1.0, %v5487_v1  ;;  %v5711_v41 = vmul.f32 %v5695_v53, %v5471_v18  ;;  %v5736_v8 = vmul.f32 1.442695, %v5710_v55 }
 0xfb4   : > { %v5780_v3 = vmul.f32 %v5764_v0, %v10281_v50  ;;  %v5488_v14 = vmul.f32 0.3275911, %v5472_v59  ;;  %v5696_v10 = vsub.f32 0.0, %v5472_v59  ;;  %11313 = vst [vmem:[#allocation35_spill] sm:$0xff] %v10399_v43  ;;  %7573 = vrcp.f32 %v5501_v60  ;;  %11314 = vst [vmem:[#allocation38_spill] sm:$0xff] %v10405_v6  ;;  %v10407_v50 = vpop.eup %7559 }
 0xfb5   : > { %v5782_v33 = vmul.f32 %v5766_v12, %v10286_v26  ;;  %7575 = vrcp.f32 %v5502_v21  ;;  %v5734_v16 = vmul.f32 1.442695, %v5709_v57  ;;  %v10410_v0 = vpop.eup %7561  ;;  %v5738_v12 = vmul.f32 1.442695, %v5711_v41 }
 0xfb6   : > { %v5712_v26 = vmul.f32 %v5696_v10, %v5472_v59  ;;  %v5796_v18 = vadd.f32 1.0, %v5780_v3  ;;  %7577 = vrcp.f32 %v5503_v40  ;;  %v5474_v55 = vand.u32 2147483647, %v10399_v43  ;;  %v10413_v1 = vpop.eup %7563 }
 0xfb7   : > { %v5798_v60 = vadd.f32 1.0, %v5782_v33  ;;  %v5504_v9 = vadd.f32 1.0, %v5488_v14  ;;  %v10416_v53 = vmul.f32 0.70710677, %v10405_v6  ;;  %v10419_v21 = vadd.f32 %v5393_v39, %v10271_v62  ;;  %v10421_v57 = vpop.eup %7565 }
 0xfb8   : > { %7579 = vpow2.f32 %v5736_v8  ;;  %v5740_v59 = vmul.f32 1.442695, %v5712_v26  ;;  %v5490_v42 = vmul.f32 0.3275911, %v5474_v55  ;;  %v5541_v3 = vmul.f32 1.0614054, %v10342_v19  ;;  %v10428_v14 = vpop.eup %7567 }
 0xfb9   : > { %11315 = vst [vmem:[#allocation31_spill] sm:$0xff] %v10416_v53  ;;  %11316 = vst [vmem:[#allocation37_spill] sm:$0xff] %v10419_v21  ;;  %7581 = vpow2.f32 %v5734_v16  ;;  %v10425_v40 = vmul.f32 0.5, %v10357_v52  ;;  %v5698_v41 = vsub.f32 0.0, %v5474_v55  ;;  %v5473_v33 = vand.u32 2147483647, %v10416_v53 }
 0xfba   : > { %v10433_v62 = vsel %vm5439_vm10, 1.0, %v11275_v27  ;;  %7583 = vpow2.f32 %v5738_v12  ;;  %v5506_v10 = vadd.f32 1.0, %v5490_v42  ;;  %v10436_v8 = vmul.f32 0.70710677, %v10419_v21 }
 0xfbb   : > { %7585 = vrcp.f32 %v5504_v9  ;;  %v5489_v39 = vmul.f32 0.3275911, %v5473_v33  ;;  %v5697_v16 = vsub.f32 0.0, %v5473_v33  ;;  %v5557_v52 = vadd.f32 -1.4531521, %v5541_v3  ;;  %v10438_v26 = vpop.eup %7569 }
 0xfbc   : > { %11317 = vst [vmem:[#allocation53_spill] sm:$0xff] %v10436_v8  ;;  %v10441_v23 = vmul.f32 %v5796_v18, %v10278_v28  ;;  %v10444_v47 = vmul.f32 %v5798_v60, %v10283_v63  ;;  %7587 = vpow2.f32 %v5740_v59  ;;  %v5475_v35 = vand.u32 2147483647, %v10436_v8 }
 0xfbd   : > { %v5714_v12 = vmul.f32 %v5698_v41, %v5474_v55  ;;  %v5505_v42 = vadd.f32 1.0, %v5489_v39  ;;  %v5713_v15 = vmul.f32 %v5697_v16, %v5473_v33  ;;  %v5573_v20 = vmul.f32 %v10342_v19, %v5557_v52  ;;  %v10449_v24 = vpop.eup %7571 }
 0xfbe   : > { %7589 = vrcp.f32 %v5506_v10  ;;  %v5491_v9 = vmul.f32 0.3275911, %v5475_v35  ;;  %v5699_v61 = vsub.f32 0.0, %v5475_v35  ;;  %v5543_v3 = vmul.f32 1.0614054, %v10353_v49 }
 0xfbf   : > { %7591 = vrcp.f32 %v5505_v42  ;;  %v5742_v28 = vmul.f32 1.442695, %v5713_v15  ;;  %v5589_v18 = vadd.f32 1.4214138, %v5573_v20  ;;  %v5545_v63 = vmul.f32 1.0614054, %v10410_v0 }
 0xfc0   : > { %v5507_v60 = vadd.f32 1.0, %v5491_v9  ;;  %v5715_v59 = vmul.f32 %v5699_v61, %v5475_v35  ;;  %v5559_v7 = vadd.f32 -1.4531521, %v5543_v3  ;;  %v5547_v55 = vmul.f32 1.0614054, %v10421_v57 }
 0xfc1   : > { %v10453_v41 = vpop.eup %7573  ;;  %7593 = vpow2.f32 %v5742_v28  ;;  %v5605_v33 = vmul.f32 %v10342_v19, %v5589_v18  ;;  %v5561_v10 = vadd.f32 -1.4531521, %v5545_v63  ;;  %v5544_v39 = vmul.f32 1.0614054, %v10388_v30 }
 0xfc2   : > { %v10457_v16 = vpop.eup %7575  ;;  %v10459_v52 = vmul.f32 1.442695, %v5714_v12  ;;  %7595 = vrcp.f32 %v5507_v60  ;;  %v5575_v20 = vmul.f32 %v10353_v49, %v5559_v7  ;;  %v5563_v15 = vadd.f32 -1.4531521, %v5547_v55 }
 0xfc3   : > { %v10462_v61 = vpop.eup %7577  ;;  %v5621_v35 = vadd.f32 -0.28449672, %v5605_v33  ;;  %v5577_v42 = vmul.f32 %v10410_v0, %v5561_v10  ;;  %v5560_v9 = vadd.f32 -1.4531521, %v5544_v39  ;;  %v5546_v3 = vmul.f32 1.0614054, %v10394_v22 }
 0xfc4   : > { %v10466_v28 = vmul.f32 1.442695, %v5715_v59  ;;  %v5591_v18 = vadd.f32 1.4214138, %v5575_v20  ;;  %v5579_v63 = vmul.f32 %v10421_v57, %v5563_v15  ;;  %v5549_v12 = vmul.f32 1.0614054, %v10453_v41 }
 0xfc5   : > { %v10470_v21 = vpop.eup %7579  ;;  %v5637_v7 = vmul.f32 %v10342_v19, %v5621_v35  ;;  %v5593_v60 = vadd.f32 1.4214138, %v5577_v42  ;;  %v5576_v55 = vmul.f32 %v10388_v30, %v5560_v9  ;;  %v5562_v33 = vadd.f32 -1.4531521, %v5546_v3 }
 0xfc6   : > { %11318 = vst [vmem:[#allocation33_spill] sm:$0xff] %v10470_v21  ;;  %v10474_v6 = vpop.eup %7581  ;;  %v5607_v10 = vmul.f32 %v10353_v49, %v5591_v18  ;;  %v5595_v39 = vadd.f32 1.4214138, %v5579_v63  ;;  %v5565_v59 = vadd.f32 -1.4531521, %v5549_v12  ;;  %7597 = vpow2.f32 %v10466_v28 }
 0xfc7   : > { %v5551_v20 = vmul.f32 1.0614054, %v10462_v61  ;;  %v10478_v25 = vpop.eup %7583  ;;  %v5653_v15 = vadd.f32 0.2548296, %v5637_v7  ;;  %v5609_v43 = vmul.f32 %v10410_v0, %v5593_v60  ;;  %v5592_v8 = vadd.f32 1.4214138, %v5576_v55 }
 0xfc8   : > { %v5578_v35 = vmul.f32 %v10394_v22, %v5562_v33  ;;  %v10482_v42 = vpop.eup %7585  ;;  %v5623_v9 = vadd.f32 -0.28449672, %v5607_v10  ;;  %v5611_v3 = vmul.f32 %v10421_v57, %v5595_v39  ;;  %v5581_v38 = vmul.f32 %v10453_v41, %v5565_v59 }
 0xfc9   : > { %v5567_v18 = vadd.f32 -1.4531521, %v5551_v20  ;;  %v10486_v63 = vpop.eup %7587  ;;  %v5669_v12 = vmul.f32 %v10342_v19, %v5653_v15  ;;  %v5625_v21 = vadd.f32 -0.28449672, %v5609_v43  ;;  %v5608_v7 = vmul.f32 %v10388_v30, %v5592_v8 }
 0xfca   : > { %11319 = vst [vmem:[#allocation43_spill] sm:$0xff] %v10486_v63  ;;  %v5594_v53 = vadd.f32 1.4214138, %v5578_v35  ;;  %v5639_v60 = vmul.f32 %v10353_v49, %v5623_v9  ;;  %v5627_v55 = vadd.f32 -0.28449672, %v5611_v3  ;;  %7599 = vpow2.f32 %v10459_v52 }
 0xfcb   : > { %v5597_v33 = vadd.f32 1.4214138, %v5581_v38  ;;  %v5583_v27 = vmul.f32 %v10462_v61, %v5567_v18  ;;  %v10492_v10 = vpop.eup %7589  ;;  %v5749_v39 = vmul.f32 %v10347_v37, %v5669_v12  ;;  %v5641_v59 = vmul.f32 %v10410_v0, %v5625_v21 }
 0xfcc   : > { %v5624_v20 = vadd.f32 -0.28449672, %v5608_v7  ;;  %v5610_v63 = vmul.f32 %v10394_v22, %v5594_v53  ;;  %v10497_v19 = vpop.eup %7591  ;;  %v5655_v43 = vadd.f32 0.2548296, %v5639_v60  ;;  %v5643_v8 = vmul.f32 %v10421_v57, %v5627_v55 }
 0xfcd   : > { %v5613_v15 = vmul.f32 %v10453_v41, %v5597_v33  ;;  %v5599_v35 = vadd.f32 1.4214138, %v5583_v27  ;;  %v5765_v38 = vsub.f32 1.0, %v5749_v39  ;;  %v5657_v9 = vadd.f32 0.2548296, %v5641_v59 }
 0xfce   : > { %v5640_v3 = vmul.f32 %v10388_v30, %v5624_v20  ;;  %v5626_v18 = vadd.f32 -0.28449672, %v5610_v63  ;;  %v10502_v44 = vpop.eup %7593  ;;  %v5671_v37 = vmul.f32 %v10353_v49, %v5655_v43  ;;  %v5659_v21 = vadd.f32 0.2548296, %v5643_v8 }
 0xfcf   : > { %v5629_v12 = vadd.f32 -0.28449672, %v5613_v15  ;;  %v5615_v53 = vmul.f32 %v10462_v61, %v5599_v35  ;;  %v10506_v7 = vpop.eup %7595  ;;  %v5781_v60 = vmul.f32 %v5765_v38, %v10294_v48  ;;  %v5673_v55 = vmul.f32 %v10410_v0, %v5657_v9 }
 0xfd0   : > { %v5656_v27 = vadd.f32 0.2548296, %v5640_v3  ;;  %v5642_v33 = vmul.f32 %v10394_v22, %v5626_v18  ;;  %v5751_v39 = vmul.f32 %v10370_v29, %v5671_v37  ;;  %v5675_v63 = vmul.f32 %v10421_v57, %v5659_v21  ;;  %v6181_v21 = vld [vmem:[#allocation14 + $0xf0] sm:$0xff] }
 0xfd1   : > { %v5645_v59 = vmul.f32 %v10453_v41, %v5629_v12  ;;  %v5631_v49 = vadd.f32 -0.28449672, %v5615_v53  ;;  %v5797_v20 = vadd.f32 1.0, %v5781_v60  ;;  %v5753_v43 = vmul.f32 %v10413_v1, %v5673_v55  ;;  %v6180_v60 = vld [vmem:[#allocation14 + $0xe8] sm:$0xff] }
 0xfd2   : > { %v5672_v8 = vmul.f32 %v10388_v30, %v5656_v27  ;;  %v5658_v15 = vadd.f32 0.2548296, %v5642_v33  ;;  %v5767_v35 = vsub.f32 1.0, %v5751_v39  ;;  %v5755_v48 = vmul.f32 %v10428_v14, %v5675_v63 }
 0xfd3   : > { %v5661_v0 = vadd.f32 0.2548296, %v5645_v59  ;;  %v5647_v38 = vmul.f32 %v10462_v61, %v5631_v49  ;;  %v5813_v9 = vmul.f32 %v5797_v20, %v10291_v34  ;;  %v5769_v29 = vsub.f32 1.0, %v5753_v43 }
 0xfd4   : > { %v5752_v57 = vmul.f32 %v10390_v56, %v5672_v8  ;;  %v5674_v3 = vmul.f32 %v10394_v22, %v5658_v15  ;;  %v5783_v18 = vmul.f32 %v5767_v35, %v10299_v31  ;;  %v5771_v37 = vsub.f32 1.0, %v5755_v48 }
 0xfd5   : > { %v5677_v1 = vmul.f32 %v10453_v41, %v5661_v0  ;;  %v5663_v30 = vadd.f32 0.2548296, %v5647_v38  ;;  %6029 = vmatprep.mubr.f32.mxu1 %v5813_v9  ;;  %v5785_v14 = vmul.f32 %v5769_v29, %v10337_v58  ;;  %v5548_v34 = vmul.f32 1.0614054, %v10438_v26  ;;  %v6179_v41 = vld [vmem:[#allocation14 + $0xe0] sm:$0xff]  ;;  %v6174_v29 = vld [vmem:[#allocation14 + $0xb8] sm:$0xff] }
 0xfd6   : > { %v5768_v12 = vsub.f32 1.0, %v5752_v57  ;;  %v5754_v53 = vmul.f32 %v10407_v50, %v5674_v3  ;;  %v5799_v55 = vadd.f32 1.0, %v5783_v18  ;;  %6030 = vmatmul.mubr.f32.vlgmr.msra.gmra.mxu1 %v10441_v23  ;;  %v5787_v56 = vmul.f32 %v5771_v37, %v10368_v5  ;;  %v6178_v50 = vld [vmem:[#allocation14 + $0xd8] sm:$0xff]  ;;  %v6175_v0 = vld [vmem:[#allocation14 + $0xc0] sm:$0xff]  ;;  %v6173_v18 = vld [vmem:[#allocation14 + $0xb0] sm:$0xff] }
 0xfd7   : > { %v5757_v31 = vmul.f32 %v10474_v6, %v5677_v1  ;;  %v5679_v22 = vmul.f32 %v10462_v61, %v5663_v30  ;;  %v5801_v27 = vadd.f32 1.0, %v5785_v14  ;;  %v5564_v39 = vadd.f32 -1.4531521, %v5548_v34  ;;  %6229 = vmatpush1.msra.mxu1 %v6181_v21  ;;  %v6172_v21 = vld [vmem:[#allocation14 + $0xa8] sm:$0xff]  ;;  %v6171_v14 = vld [vmem:[#allocation14 + $0xa0] sm:$0xff] }
 0xfd8   : > { %v5784_v33 = vmul.f32 %v5768_v12, %v10317_v11  ;;  %v5770_v58 = vsub.f32 1.0, %v5754_v53  ;;  %v5815_v63 = vmul.f32 %v5799_v55, %v10296_v46  ;;  %v5803_v59 = vadd.f32 1.0, %v5787_v56  ;;  %6230 = vmatprep.subr.mxu1 %v6180_v60  ;;  %v6177_v11 = vld [vmem:[#allocation14 + $0xd0] sm:$0xff]  ;;  %v10549_v12 = vld [vmem:[#allocation2 + $0xf0] sm:$0xff] }
 0xfd9   : > { %v5773_v49 = vsub.f32 1.0, %v5757_v31  ;;  %v5759_v23 = vmul.f32 %v10478_v25, %v5679_v22  ;;  %v5817_v5 = vmul.f32 %v5801_v27, %v10313_v2  ;;  %v5580_v20 = vmul.f32 %v10438_v26, %v5564_v39  ;;  %6231 = vmatpush1.msra.mxu1 %v6179_v41  ;;  %v6176_v25 = vld [vmem:[#allocation14 + $0xc8] sm:$0xff]  ;;  %v6170_v31 = vld [vmem:[#allocation14 + $0x98] sm:$0xff] }
 0xfda   : > { %v5800_v6 = vadd.f32 1.0, %v5784_v33  ;;  %v5786_v61 = vmul.f32 %v5770_v58, %v10325_v4  ;;  %6118 = vmatprep.mubr.f32.mxu0 %v5815_v63  ;;  %v5819_v43 = vmul.f32 %v5803_v59, %v10360_v51  ;;  %v5550_v15 = vmul.f32 1.0614054, %v10457_v16  ;;  %6232 = vmatprep.subr.mxu1 %v6178_v50  ;;  %v6169_v58 = vld [vmem:[#allocation14 + $0x90] sm:$0xff]  ;;  %v10559_v39 = vld [vmem:[#allocation2 + $0xe8] sm:$0xff]  ;;  %v6168_v50 = vld [vmem:[#allocation14 + $0x88] sm:$0xff] }
 0xfdb   : > { %v5789_v8 = vmul.f32 %v5773_v49, %v10402_v36  ;;  %v5775_v46 = vsub.f32 1.0, %v5759_v23  ;;  %6119 = vmatmul.mubr.f32.vlgmr.msra.gmra.mxu0 %v10444_v47  ;;  %6035 = vmatprep.mubr.f32.mxu1 %v5817_v5  ;;  %v5596_v35 = vadd.f32 1.4214138, %v5580_v20  ;;  %v5553_v48 = vmul.f32 1.0614054, %v10497_v19  ;;  %v6167_v5 = vld [vmem:[#allocation14 + $0x80] sm:$0xff] }
 0xfdc   : > { %v5816_v2 = vmul.f32 %v5800_v6, %v10301_v17  ;;  %v5802_v4 = vadd.f32 1.0, %v5786_v61  ;;  %6124 = vmatprep.mubr.f32.mxu0 %v5819_v43  ;;  %v5566_v36 = vadd.f32 -1.4531521, %v5550_v15  ;;  %v5555_v9 = vmul.f32 1.0614054, %v10506_v7  ;;  %6233 = vmatpush1.msra.mxu1 %v6177_v11  ;;  %v10566_v6 = vld [vmem:[#allocation2 + $0xe0] sm:$0xff] }
 0xfdd   : > { %v5805_v38 = vadd.f32 1.0, %v5789_v8  ;;  %v5791_v51 = vmul.f32 %v5775_v46, %v10433_v62  ;;  %v5612_v57 = vmul.f32 %v10438_v26, %v5596_v35  ;;  %v5569_v17 = vadd.f32 -1.4531521, %v5553_v48  ;;  %6234 = vmatprep.subr.mxu1 %v6176_v25  ;;  %6322 = vmatpush1.msra.mxu0 %v10549_v12  ;;  %v6166_v20 = vld [vmem:[#allocation14 + $0x78] sm:$0xff]  ;;  %v10570_v11 = vld [vmem:[#allocation2 + $0xd8] sm:$0xff]  ;;  %v6165_v25 = vld [vmem:[#allocation14 + $0x70] sm:$0xff] }
 0xfde   : > { %6036 = vmatmul.mubr.f32.gmra.mxu1 %v5816_v2  ;;  %v5818_v47 = vmul.f32 %v5802_v4, %v10305_v13  ;;  %v5552_v3 = vmul.f32 1.0614054, %v10482_v42  ;;  %v5582_v62 = vmul.f32 %v10457_v16, %v5566_v36  ;;  %v5571_v30 = vadd.f32 -1.4531521, %v5555_v9  ;;  %6323 = vmatprep.subr.mxu0 %v10559_v39  ;;  %v10575_v2 = vld [vmem:[#allocation2 + $0xd0] sm:$0xff]  ;;  %v6164_v48 = vld [vmem:[#allocation14 + $0x68] sm:$0xff] }
 0xfdf   : > { %v5821_v37 = vmul.f32 %v5805_v38, %v10379_v54  ;;  %v5807_v1 = vadd.f32 1.0, %v5791_v51  ;;  %6235 = vmatpush1.msra.mxu1 %v6175_v0  ;;  %v5628_v13 = vadd.f32 -0.28449672, %v5612_v57  ;;  %v5585_v53 = vmul.f32 %v10497_v19, %v5569_v17  ;;  %6324 = vmatpush1.msra.mxu0 %v10566_v6  ;;  %v10580_v0 = vld [vmem:[#allocation2 + $0xc8] sm:$0xff]  ;;  %v6163_v9 = vld [vmem:[#allocation14 + $0x60] sm:$0xff] }
 0xfe0   : > { %6125 = vmatmul.mubr.f32.gmra.mxu0 %v5818_v47  ;;  %v5568_v34 = vadd.f32 -1.4531521, %v5552_v3  ;;  %v5554_v60 = vmul.f32 1.0614054, %v10492_v10  ;;  %6236 = vmatprep.subr.mxu1 %v6174_v29  ;;  %v5598_v55 = vadd.f32 1.4214138, %v5582_v62  ;;  %v5587_v56 = vmul.f32 %v10506_v7, %v5571_v30 }
 0xfe1   : > { %6041 = vmatprep.mubr.f32.mxu1 %v5821_v37  ;;  %v5823_v54 = vmul.f32 %v5807_v1, %v10425_v40  ;;  %6237 = vmatpush1.msra.mxu1 %v6173_v18  ;;  %v5644_v22 = vmul.f32 %v10438_v26, %v5628_v13  ;;  %v5601_v41 = vadd.f32 1.4214138, %v5585_v53  ;;  %v10586_v29 = vld [vmem:[#allocation2 + $0xc0] sm:$0xff]  ;;  %v6162_v17 = vld [vmem:[#allocation14 + $0x58] sm:$0xff]  ;;  %v10591_v3 = vld [vmem:[#allocation2 + $0xb8] sm:$0xff]  ;;  %v11321_v13 = vmov -1.0  }
 0xfe2   : > { %v5584_v27 = vmul.f32 %v10482_v42, %v5568_v34  ;;  %v5570_v33 = vadd.f32 -1.4531521, %v5554_v60  ;;  %6238 = vmatprep.subr.mxu1 %v6172_v21  ;;  %v5614_v40 = vmul.f32 %v10457_v16, %v5598_v55  ;;  %v5603_v28 = vadd.f32 1.4214138, %v5587_v56  ;;  %6325 = vmatprep.subr.mxu0 %v10570_v11  ;;  %v6161_v62 = vld [vmem:[#allocation14 + $0x50] sm:$0xff]  ;;  %v10595_v30 = vld [vmem:[#allocation2 + $0xb0] sm:$0xff] }
 0xfe3   : > { %6130 = vmatprep.mubr.f32.mxu0 %v5823_v54  ;;  %6239 = vmatpush1.msra.mxu1 %v6171_v14  ;;  %v5660_v63 = vadd.f32 0.2548296, %v5644_v22  ;;  %v5617_v59 = vmul.f32 %v10497_v19, %v5601_v41  ;;  %v11320_v21 = vld [vmem:[#allocation51_spill] sm:$0xff]  ;;  %v5452_v53 = vsel %vm5436_vm11, 1.0, %v11321_v13  ;;  %v6160_v54 = vld [vmem:[#allocation14 + $0x48] sm:$0xff]  ;;  %v10603_v55 = vld [vmem:[#allocation2 + $0xa8] sm:$0xff] }
 0xfe4   : > { %v5600_v49 = vadd.f32 1.4214138, %v5584_v27  ;;  %v5586_v23 = vmul.f32 %v10492_v10, %v5570_v33  ;;  %6240 = vmatprep.subr.mxu1 %v6170_v31  ;;  %v5630_v61 = vadd.f32 -0.28449672, %v5614_v40  ;;  %v5619_v52 = vmul.f32 %v10506_v7, %v5603_v28  ;;  %6326 = vmatpush1.msra.mxu0 %v10575_v2  ;;  %v6159_v27 = vld [vmem:[#allocation14 + $0x40] sm:$0xff]  ;;  %v10608_v33 = vld [vmem:[#allocation2 + $0xa0] sm:$0xff] }
 0xfe5   : > { %6241 = vmatpush1.msra.mxu1 %v6169_v58  ;;  %v5676_v43 = vmul.f32 %v10438_v26, %v5660_v63  ;;  %v5633_v8 = vadd.f32 -0.28449672, %v5617_v59  ;;  %6327 = vmatprep.subr.mxu0 %v10580_v0  ;;  %v5404_v14 = vmul.f32 0.5, %v11320_v21  ;;  %v5454_v45 = vsel %vm5438_vm12, 1.0, %v11321_v13  ;;  %v11323_v58 = vld [vmem:[#allocation33_spill] sm:$0xff]  ;;  %v7598_v63 = vpop.eup %7597 }
 0xfe6   : > { %v5616_v46 = vmul.f32 %v10482_v42, %v5600_v49  ;;  %v5602_v15 = vadd.f32 1.4214138, %v5586_v23  ;;  %6242 = vmatprep.subr.mxu1 %v6168_v50  ;;  %v5646_v4 = vmul.f32 %v10457_v16, %v5630_v61  ;;  %v5635_v35 = vadd.f32 -0.28449672, %v5619_v52  ;;  %6328 = vmatpush1.msra.mxu0 %v10586_v29  ;;  %v10617_v50 = vld [vmem:[#allocation2 + $0x98] sm:$0xff]  ;;  %v10622_v61 = vld [vmem:[#allocation2 + $0x90] sm:$0xff] }
 0xfe7   : > { %6243 = vmatpush1.msra.mxu1 %v6167_v5  ;;  %v5756_v26 = vmul.f32 %v10449_v24, %v5676_v43  ;;  %v5649_v38 = vmul.f32 %v10497_v19, %v5633_v8  ;;  %6329 = vmatprep.subr.mxu0 %v10591_v3  ;;  %v6157_v5 = vld [vmem:[#allocation14 + $0x30] sm:$0xff]  ;;  %v11325_v52 = vld [vmem:[#allocation53_spill] sm:$0xff]  ;;  %v6156_v8 = vld [vmem:[#allocation14 + $0x28] sm:$0xff] }
 0xfe8   : > { %v5632_v51 = vadd.f32 -0.28449672, %v5616_v46  ;;  %v5618_v36 = vmul.f32 %v10492_v10, %v5602_v15  ;;  %6244 = vmatprep.subr.mxu1 %v6166_v20  ;;  %v5662_v47 = vadd.f32 0.2548296, %v5646_v4  ;;  %v5651_v57 = vmul.f32 %v10506_v7, %v5635_v35  ;;  %6330 = vmatpush1.msra.mxu0 %v10595_v30  ;;  %v10627_v46 = vld [vmem:[#allocation2 + $0x88] sm:$0xff] }
 0xfe9   : > { %6245 = vmatpush1.msra.mxu1 %v6165_v25  ;;  %v5772_v24 = vsub.f32 1.0, %v5756_v26  ;;  %v5665_v18 = vadd.f32 0.2548296, %v5649_v38  ;;  %6331 = vmatprep.subr.mxu0 %v10603_v55  ;;  %vm5443_vm15 = vcmp.ge.f32.partialorder %v11325_v52, 0.0  ;;  %v11326_v25 = vld [vmem:[#allocation43_spill] sm:$0xff] }
 0xfea   : > { %v5648_v37 = vmul.f32 %v10482_v42, %v5632_v51  ;;  %v5634_v1 = vadd.f32 -0.28449672, %v5618_v36  ;;  %6246 = vmatprep.subr.mxu1 %v6164_v48  ;;  %v5678_v34 = vmul.f32 %v10457_v16, %v5662_v47  ;;  %v5667_v60 = vadd.f32 0.2548296, %v5651_v57  ;;  %6332 = vmatpush1.msra.mxu0 %v10608_v33  ;;  %v11322_v16 = vld [vmem:[#allocation31_spill] sm:$0xff]  ;;  %v6155_v48 = vld [vmem:[#allocation14 + $0x20] sm:$0xff] }
 0xfeb   : > { %6247 = vmatpush1.msra.mxu1 %v6163_v9  ;;  %v5788_v56 = vmul.f32 %v5772_v24, %v5452_v53  ;;  %v5681_v31 = vmul.f32 %v10497_v19, %v5665_v18  ;;  %vm5441_vm13 = vcmp.ge.f32.partialorder %v11322_v16, 0.0  ;;  %v6158_v19 = vld [vmem:[#allocation14 + $0x38] sm:$0xff]  ;;  %6333 = vmatprep.subr.mxu0 %v10617_v50  ;;  %v10632_v26 = vld [vmem:[#allocation2 + $0x80] sm:$0xff]  ;;  %v10639_v57 = vld [vmem:[#allocation2 + $0x78] sm:$0xff] }
 0xfec   : > { %v5664_v22 = vadd.f32 0.2548296, %v5648_v37  ;;  %v5650_v41 = vmul.f32 %v10492_v10, %v5634_v1  ;;  %6248 = vmatprep.subr.mxu1 %v6162_v17  ;;  %v5758_v40 = vmul.f32 %v11323_v58, %v5678_v34  ;;  %v5683_v28 = vmul.f32 %v10506_v7, %v5667_v60  ;;  %6334 = vmatpush1.msra.mxu0 %v10622_v61  ;;  %v11324_v7 = vld [vmem:[#allocation41_spill] sm:$0xff]  ;;  %v11327_v38 = vld [vmem:[#allocation35_spill] sm:$0xff]  ;;  %v6154_v47 = vld [vmem:[#allocation14 + $0x18] sm:$0xff] }
 0xfed   : > { %6249 = vmatpush1.msra.mxu1 %v6161_v62  ;;  %v5804_v59 = vadd.f32 1.0, %v5788_v56  ;;  %v5761_v49 = vmul.f32 %v10502_v44, %v5681_v31  ;;  %vm5440_vm14 = vcmp.ge.f32.partialorder %v11324_v7, 0.0  ;;  %6335 = vmatprep.subr.mxu0 %v10627_v46  ;;  %v7600_v44 = vpop.eup %7599  ;;  %vm5442_vm0 = vcmp.ge.f32.partialorder %v11327_v38, 0.0  ;;  %v6153_v37 = vld [vmem:[#allocation14 + $0x10] sm:$0xff]  ;;  %v11328_v1 = vld [vmem:[#allocation49_spill] sm:$0xff]  ;;  %v6152_v34 = vld [vmem:[#allocation14 + $0x8] sm:$0xff] }
 0xfee   : > { %v5680_v23 = vmul.f32 %v10482_v42, %v5664_v22  ;;  %v5666_v32 = vadd.f32 0.2548296, %v5650_v41  ;;  %6250 = vmatprep.subr.mxu1 %v6160_v54  ;;  %v5774_v20 = vsub.f32 1.0, %v5758_v40  ;;  %v5763_v43 = vmul.f32 %v7598_v63, %v5683_v28  ;;  %6336 = vmatpush1.msra.mxu0 %v10632_v26  ;;  %v10649_v60 = vld [vmem:[#allocation2 + $0x70] sm:$0xff]  ;;  %v11329_v54 = vld [vmem:[#allocation38_spill] sm:$0xff]  ;;  %v6214_v63 = vld [vmem:[#allocation14 + $0x1f8] sm:$0xff] }
 0xfef   : > { %6251 = vmatpush1.msra.mxu1 %v6159_v27  ;;  %v5820_v42 = vmul.f32 %v5804_v59, %v5404_v14  ;;  %v5777_v15 = vsub.f32 1.0, %v5761_v49  ;;  %v5457_v51 = vsel %vm5441_vm13, 1.0, %v11321_v13  ;;  %6337 = vmatprep.subr.mxu0 %v10639_v57  ;;  %v5406_v62 = vmul.f32 0.5, %v11328_v1  ;;  %v6151_v27 = vld [vmem:[#allocation14] sm:$0xff]  ;;  %v10660_v59 = vld [vmem:[#allocation2 + $0x60] sm:$0xff]  ;;  %v11331_v49 = vld [vmem:[#allocation32_spill] sm:$0xff] }
 0xff0   : > { %v5760_v4 = vmul.f32 %v11326_v25, %v5680_v23  ;;  %v5682_v35 = vmul.f32 %v10492_v10, %v5666_v32  ;;  %6252 = vmatprep.subr.mxu1 %v6158_v19  ;;  %v5790_v36 = vmul.f32 %v5774_v20, %v5454_v45  ;;  %v5779_v9 = vsub.f32 1.0, %v5763_v43  ;;  %6338 = vmatpush1.msra.mxu0 %v10649_v60  ;;  %v10653_v45 = vld [vmem:[#allocation2 + $0x68] sm:$0xff]  ;;  %v11330_v58 = vld [vmem:[#allocation37_spill] sm:$0xff]  ;;  %v6213_v52 = vld [vmem:[#allocation14 + $0x1f0] sm:$0xff] }
 0xff1   : > { %6253 = vmatpush1.msra.mxu1 %v6157_v5  ;;  %v5459_v10 = vsel %vm5443_vm15, 1.0, %v11321_v13  ;;  %v5793_v17 = vmul.f32 %v5777_v15, %v5457_v51  ;;  %v5456_v21 = vsel %vm5440_vm14, 1.0, %v11321_v13  ;;  %v5409_v56 = vmul.f32 0.5, %v11329_v54  ;;  %6339 = vmatprep.subr.mxu0 %v10653_v45  ;;  %v10664_v20 = vld [vmem:[#allocation2 + $0x58] sm:$0xff]  ;;  %v6211_v25 = vld [vmem:[#allocation14 + $0x1e0] sm:$0xff] }
 0xff2   : > { %6042 = vmatmul.mubr.f32.gmra.mxu1 %v5820_v42  ;;  %v5776_v24 = vsub.f32 1.0, %v5760_v4  ;;  %v5762_v18 = vmul.f32 %v7600_v44, %v5682_v35  ;;  %6254 = vmatprep.subr.mxu1 %v6156_v8  ;;  %v5806_v14 = vadd.f32 1.0, %v5790_v36  ;;  %v5795_v53 = vmul.f32 %v5779_v9, %v5459_v10  ;;  %v6212_v43 = vld [vmem:[#allocation14 + $0x1e8] sm:$0xff]  ;;  %v11332_v8 = vld [vmem:[#allocation39_spill] sm:$0xff]  ;;  %v6210_v4 = vld [vmem:[#allocation14 + $0x1d8] sm:$0xff] }
 0xff3   : > { %6255 = vmatpush1.msra.mxu1 %v6155_v48  ;;  %v5809_v31 = vadd.f32 1.0, %v5793_v17  ;;  %v5458_v16 = vsel %vm5442_vm0, 1.0, %v11321_v13  ;;  %v5411_v40 = vmul.f32 0.5, %v11330_v58  ;;  %6340 = vmatpush1.msra.mxu0 %v10660_v59  ;;  %v5408_v23 = vmul.f32 0.5, %v11331_v49  ;;  %v6209_v48 = vld [vmem:[#allocation14 + $0x1d0] sm:$0xff]  ;;  %v6208_v38 = vld [vmem:[#allocation14 + $0x1c8] sm:$0xff] }
 0xff4   : > { %v5792_v22 = vmul.f32 %v5776_v24, %v5456_v21  ;;  %v5778_v41 = vsub.f32 1.0, %v5762_v18  ;;  %6256 = vmatprep.subr.mxu1 %v6154_v47  ;;  %v5822_v28 = vmul.f32 %v5806_v14, %v5406_v62  ;;  %v5811_v19 = vadd.f32 1.0, %v5795_v53  ;;  %6341 = vmatprep.subr.mxu0 %v10664_v20  ;;  %v10668_v51 = vld [vmem:[#allocation2 + $0x50] sm:$0xff]  ;;  %v6206_v9 = vld [vmem:[#allocation14 + $0x1b8] sm:$0xff]  ;;  %v6205_v10 = vld [vmem:[#allocation14 + $0x1b0] sm:$0xff] }
 0xff5   : > { %6257 = vmatpush1.msra.mxu1 %v6153_v37  ;;  %v5825_v32 = vmul.f32 %v5809_v31, %v5409_v56  ;;  %v5410_v44 = vmul.f32 0.5, %v11332_v8  ;;  %6342 = vmatpush1.msra.mxu0 %v10668_v51  ;;  %v6207_v36 = vld [vmem:[#allocation14 + $0x1c0] sm:$0xff]  ;;  %v10671_v47 = vld [vmem:[#allocation2 + $0x48] sm:$0xff]  ;;  %v10674_v17 = vld [vmem:[#allocation2 + $0x40] sm:$0xff] }
 0xff6   : > { %v5808_v5 = vadd.f32 1.0, %v5792_v22  ;;  %v5794_v7 = vmul.f32 %v5778_v41, %v5458_v16  ;;  %6258 = vmatprep.subr.mxu1 %v6152_v34  ;;  %6131 = vmatmul.mubr.f32.gmra.mxu0 %v5822_v28  ;;  %v5827_v13 = vmul.f32 %v5811_v19, %v5411_v40  ;;  %v6204_v24 = vld [vmem:[#allocation14 + $0x1a8] sm:$0xff]  ;;  %v6203_v37 = vld [vmem:[#allocation14 + $0x1a0] sm:$0xff]  ;;  %v6202_v62 = vld [vmem:[#allocation14 + $0x198] sm:$0xff] }
 0xff7   : > { %6259 = vmatpush1.msra.mxu1 %v6151_v27  ;;  %6047 = vmatprep.mubr.f32.mxu1 %v5825_v32  ;;  %v10677_v18 = vld [vmem:[#allocation2 + $0x38] sm:$0xff]  ;;  %v10680_v1 = vld [vmem:[#allocation2 + $0x30] sm:$0xff]  ;;  %v10683_v21 = vld [vmem:[#allocation2 + $0x28] sm:$0xff] }
 0xff8   : > { %v5824_v42 = vmul.f32 %v5808_v5, %v5408_v23  ;;  %v5810_v15 = vadd.f32 1.0, %v5794_v7  ;;  %6260 = vmatprep.subr.mxu1 %v6214_v63  ;;  %6136 = vmatprep.mubr.f32.mxu0 %v5827_v13  ;;  %v6201_v14 = vld [vmem:[#allocation14 + $0x190] sm:$0xff]  ;;  %v6200_v34 = vld [vmem:[#allocation14 + $0x188] sm:$0xff]  ;;  %v6199_v56 = vld [vmem:[#allocation14 + $0x180] sm:$0xff] }
 0xff9   : > { %6261 = vmatpush2.msra.mxu1 %v6213_v52  ;;  %6343 = vmatprep.subr.mxu0 %v10671_v47  ;;  %v10686_v53 = vld [vmem:[#allocation2 + $0x20] sm:$0xff]  ;;  %v10689_v54 = vld [vmem:[#allocation2 + $0x18] sm:$0xff]  ;;  %v10692_v31 = vld [vmem:[#allocation2 + $0x10] sm:$0xff] }
 0xffa   : > { %6048 = vmatmul.mubr.f32.gmra.mxu1 %v5824_v42  ;;  %v5826_v35 = vmul.f32 %v5810_v15, %v5410_v44  ;;  %6262 = vmatprep.subr.mxu1 %v6212_v43  ;;  %v6198_v22 = vld [vmem:[#allocation14 + $0x178] sm:$0xff]  ;;  %v6197_v27 = vld [vmem:[#allocation14 + $0x170] sm:$0xff]  ;;  %v6196_v58 = vld [vmem:[#allocation14 + $0x168] sm:$0xff] }
 0xffb   : > { %6263 = vmatpush2.msra.mxu1 %v6211_v25  ;;  %6344 = vmatpush1.msra.mxu0 %v10674_v17  ;;  %v10695_v41 = vld [vmem:[#allocation2 + $0x8] sm:$0xff]  ;;  %v10698_v16 = vld [vmem:[#allocation2] sm:$0xff]  ;;  %v10701_v40 = vld [vmem:[#allocation2 + $0x1f8] sm:$0xff] }
 0xffc   : > { %6137 = vmatmul.mubr.f32.gmra.mxu0 %v5826_v35  ;;  %6264 = vmatprep.subr.mxu1 %v6210_v4  ;;  %v6195_v28 = vld [vmem:[#allocation14 + $0x160] sm:$0xff]  ;;  %v6194_v63 = vld [vmem:[#allocation14 + $0x158] sm:$0xff]  ;;  %v6193_v23 = vld [vmem:[#allocation14 + $0x150] sm:$0xff] }
 0xffd   : > { %6265 = vmatpush2.msra.mxu1 %v6209_v48  ;;  %6345 = vmatprep.subr.mxu0 %v10677_v18  ;;  %v10704_v19 = vld [vmem:[#allocation2 + $0x1f0] sm:$0xff]  ;;  %v10707_v49 = vld [vmem:[#allocation2 + $0x1e8] sm:$0xff]  ;;  %v10710_v32 = vld [vmem:[#allocation2 + $0x1e0] sm:$0xff] }
 0xffe   : > { %6266 = vmatprep.subr.mxu1 %v6208_v38  ;;  %6346 = vmatpush1.msra.mxu0 %v10680_v1  ;;  %v10713_v5 = vld [vmem:[#allocation2 + $0x1d8] sm:$0xff]  ;;  %v10716_v7 = vld [vmem:[#allocation2 + $0x1d0] sm:$0xff]  ;;  %v10719_v52 = vld [vmem:[#allocation2 + $0x1c8] sm:$0xff] }
 0xfff   : > { %6267 = vmatpush2.msra.mxu1 %v6207_v36  ;;  %6347 = vmatprep.subr.mxu0 %v10683_v21  ;;  %v10722_v13 = vld [vmem:[#allocation2 + $0x1c0] sm:$0xff]  ;;  %v10725_v43 = vld [vmem:[#allocation2 + $0x1b8] sm:$0xff]  ;;  %v10728_v8 = vld [vmem:[#allocation2 + $0x1b0] sm:$0xff] }
0x1000   : > { %6268 = vmatprep.subr.mxu1 %v6206_v9  ;;  %6348 = vmatpush1.msra.mxu0 %v10686_v53  ;;  %11333 = vst [vmem:[#allocation34_spill] sm:$0xff] %v10728_v8  ;;  %v10731_v44 = vld [vmem:[#allocation2 + $0x1a8] sm:$0xff]  ;;  %v10734_v42 = vld [vmem:[#allocation2 + $0x1a0] sm:$0xff]  ;;  %v10737_v15 = vld [vmem:[#allocation2 + $0x198] sm:$0xff] }
0x1001   : > { %6269 = vmatpush2.msra.mxu1 %v6205_v10  ;;  %6349 = vmatprep.subr.mxu0 %v10689_v54  ;;  %11334 = vst [vmem:[#allocation40_spill] sm:$0xff] %v10731_v44  ;;  %11335 = vst [vmem:[#allocation47_spill] sm:$0xff] %v10734_v42  ;;  %v10740_v25 = vld [vmem:[#allocation2 + $0x190] sm:$0xff]  ;;  %v10743_v4 = vld [vmem:[#allocation2 + $0x188] sm:$0xff] }
0x1002   : > { %6270 = vmatprep.subr.mxu1 %v6204_v24  ;;  %6350 = vmatpush1.msra.mxu0 %v10692_v31  ;;  %11336 = vst [vmem:[#allocation51_spill] sm:$0xff] %v10737_v15  ;;  %11337 = vst [vmem:[#allocation31_spill] sm:$0xff] %v10740_v25  ;;  %v10746_v35 = vld [vmem:[#allocation2 + $0x180] sm:$0xff]  ;;  %v10749_v48 = vld [vmem:[#allocation2 + $0x178] sm:$0xff] }
0x1003   : > { %6271 = vmatpush2.msra.mxu1 %v6203_v37  ;;  %6351 = vmatprep.subr.mxu0 %v10695_v41  ;;  %11338 = vst [vmem:[#allocation33_spill] sm:$0xff] %v10743_v4  ;;  %11339 = vst [vmem:[#allocation41_spill] sm:$0xff] %v10746_v35  ;;  %v10752_v38 = vld [vmem:[#allocation2 + $0x170] sm:$0xff]  ;;  %v10755_v36 = vld [vmem:[#allocation2 + $0x168] sm:$0xff] }
0x1004   : > { %6272 = vmatprep.subr.mxu1 %v6202_v62  ;;  %6352 = vmatpush1.msra.mxu0 %v10698_v16  ;;  %11340 = vst [vmem:[#allocation53_spill] sm:$0xff] %v10749_v48  ;;  %11341 = vst [vmem:[#allocation43_spill] sm:$0xff] %v10752_v38  ;;  %v10758_v9 = vld [vmem:[#allocation2 + $0x160] sm:$0xff]  ;;  %v10761_v10 = vld [vmem:[#allocation2 + $0x158] sm:$0xff] }
0x1005   : > { %6273 = vmatpush2.msra.mxu1 %v6201_v14  ;;  %6353 = vmatprep.subr.mxu0 %v10701_v40  ;;  %11342 = vst [vmem:[#allocation35_spill] sm:$0xff] %v10755_v36  ;;  %11343 = vst [vmem:[#allocation49_spill] sm:$0xff] %v10758_v9  ;;  %v10764_v24 = vld [vmem:[#allocation2 + $0x150] sm:$0xff]  ;;  %v10767_v37 = vld [vmem:[#allocation2 + $0x148] sm:$0xff] }
0x1006   : > { %6274 = vmatprep.subr.mxu1 %v6200_v34  ;;  %6354 = vmatpush2.msra.mxu0 %v10704_v19  ;;  %11344 = vst [vmem:[#allocation38_spill] sm:$0xff] %v10761_v10  ;;  %11345 = vst [vmem:[#allocation37_spill] sm:$0xff] %v10764_v24  ;;  %v10770_v62 = vld [vmem:[#allocation2 + $0x140] sm:$0xff]  ;;  %v6192_v14 = vld [vmem:[#allocation14 + $0x148] sm:$0xff] }
0x1007   : > { %6275 = vmatpush2.msra.mxu1 %v6199_v56  ;;  %6355 = vmatprep.subr.mxu0 %v10707_v49  ;;  %11346 = vst [vmem:[#allocation32_spill] sm:$0xff] %v10767_v37  ;;  %11347 = vst [vmem:[#allocation39_spill] sm:$0xff] %v10770_v62  ;;  %v6191_v34 = vld [vmem:[#allocation14 + $0x140] sm:$0xff]  ;;  %v10773_v56 = vld [vmem:[#allocation2 + $0x138] sm:$0xff] }
0x1008   : > { %6276 = vmatprep.subr.mxu1 %v6198_v22  ;;  %6356 = vmatpush2.msra.mxu0 %v10710_v32  ;;  %11348 = vst [vmem:[#allocation54_spill] sm:$0xff] %v10773_v56  ;;  %v10776_v22 = vld [vmem:[#allocation2 + $0x130] sm:$0xff] }
0x1009   : > { %6277 = vmatpush2.msra.mxu1 %v6197_v27  ;;  %6357 = vmatprep.subr.mxu0 %v10713_v5  ;;  %11349 = vst [vmem:[#allocation55_spill] sm:$0xff] %v10776_v22  ;;  %v6190_v27 = vld [vmem:[#allocation14 + $0x138] sm:$0xff] }
0x100a   : > { %6278 = vmatprep.subr.mxu1 %v6196_v58  ;;  %6358 = vmatpush2.msra.mxu0 %v10716_v7  ;;  %v6189_v58 = vld [vmem:[#allocation14 + $0x130] sm:$0xff] }
0x100b   : > { %6279 = vmatpush2.msra.mxu1 %v6195_v28  ;;  %6359 = vmatprep.subr.mxu0 %v10719_v52  ;;  %v10779_v28 = vld [vmem:[#allocation2 + $0x128] sm:$0xff] }
0x100c   : > { %6280 = vmatprep.subr.mxu1 %v6194_v63  ;;  %6360 = vmatpush2.msra.mxu0 %v10722_v13  ;;  %11350 = vst [vmem:[#allocation56_spill] sm:$0xff] %v10779_v28  ;;  %v10782_v63 = vld [vmem:[#allocation2 + $0x120] sm:$0xff] }
0x100d   : > { %6281 = vmatpush2.msra.mxu1 %v6193_v23  ;;  %6361 = vmatprep.subr.mxu0 %v10725_v43  ;;  %11351 = vst [vmem:[#allocation57_spill] sm:$0xff] %v10782_v63  ;;  %v6188_v23 = vld [vmem:[#allocation14 + $0x128] sm:$0xff] }
0x100e   : > { %6362 = vmatpush2.msra.mxu0 %v10728_v8  ;;  %6282 = vmatprep.subr.mxu1 %v6192_v14  ;;  %v10785_v14 = vld [vmem:[#allocation2 + $0x118] sm:$0xff] }
0x100f   : > { %6363 = vmatprep.subr.mxu0 %v10731_v44  ;;  %6283 = vmatpush2.msra.mxu1 %v6191_v34  ;;  %11352 = vst [vmem:[#allocation58_spill] sm:$0xff] %v10785_v14  ;;  %v10788_v34 = vld [vmem:[#allocation2 + $0x110] sm:$0xff] }
0x1010   : > { %6364 = vmatpush2.msra.mxu0 %v10734_v42  ;;  %6284 = vmatprep.subr.mxu1 %v6190_v27  ;;  %11353 = vst [vmem:[#allocation59_spill] sm:$0xff] %v10788_v34  ;;  %v10791_v27 = vld [vmem:[#allocation2 + $0x108] sm:$0xff] }
0x1011   : > { %6365 = vmatprep.subr.mxu0 %v10737_v15  ;;  %6285 = vmatpush2.msra.mxu1 %v6189_v58  ;;  %11354 = vst [vmem:[#allocation60_spill] sm:$0xff] %v10791_v27  ;;  %v10794_v58 = vld [vmem:[#allocation2 + $0x100] sm:$0xff] }
0x1012   : > { %6366 = vmatpush2.msra.mxu0 %v10740_v25  ;;  %6286 = vmatprep.subr.mxu1 %v6188_v23  ;;  %11355 = vst [vmem:[#allocation61_spill] sm:$0xff] %v10794_v58  ;;  %v7895_v23 = vld [vmem:[#allocation2 + $0xf8] sm:$0xff]  ;;  %v11358_v25 = vld [vmem:[#allocation44_spill] sm:$0xff] }
0x1013   : > { %6367 = vmatprep.subr.mxu0 %v10743_v4 }
0x1014   : > { %6368 = vmatpush2.msra.mxu0 %v10746_v35  ;;  %v11357_v35 = vld [vmem:[#allocation36_spill] sm:$0xff] }
0x1015   : > { %6369 = vmatprep.subr.mxu0 %v10749_v48 }
0x1016   : > { %6370 = vmatpush2.msra.mxu0 %v10752_v38 }
0x1017   : > { %6371 = vmatprep.subr.mxu0 %v10755_v36 }
0x1018   : > { %6372 = vmatpush2.msra.mxu0 %v10758_v9 }
0x1019   : > { %6373 = vmatprep.subr.mxu0 %v10761_v10 }
0x101a   : > { %6374 = vmatpush2.msra.mxu0 %v10764_v24 }
0x101b   : > { %6375 = vmatprep.subr.mxu0 %v10767_v37 }
0x101c   : > { %6376 = vmatpush2.msra.mxu0 %v10770_v62 }
0x101d   : > { %6377 = vmatprep.subr.mxu0 %v10773_v56  ;;  %v6187_v56 = vld [vmem:[#allocation14 + $0x120] sm:$0xff] }
0x101e   : > { %6378 = vmatpush2.msra.mxu0 %v10776_v22  ;;  %6287 = vmatpush2.msra.mxu1 %v6187_v56  ;;  %v6186_v22 = vld [vmem:[#allocation14 + $0x118] sm:$0xff]  ;;  %v7896_v56 = vld [vmem:[%s10980_s9 + $0x10] sm:$0xff] }
0x101f   : > { %6379 = vmatprep.subr.mxu0 %v10779_v28  ;;  %v6185_v28 = vld [vmem:[#allocation14 + $0x110] sm:$0xff]  ;;  %6288 = vmatprep.subr.mxu1 %v6186_v22  ;;  %v7897_v22 = vld [vmem:[%s10980_s9 + $0x18] sm:$0xff] }
0x1020   : > { %6380 = vmatpush2.msra.mxu0 %v10782_v63  ;;  %6289 = vmatpush2.msra.mxu1 %v6185_v28  ;;  %v6184_v63 = vld [vmem:[#allocation14 + $0x108] sm:$0xff] }
0x1021   : > { %6381 = vmatprep.subr.mxu0 %v10785_v14  ;;  %v6183_v14 = vld [vmem:[#allocation14 + $0x100] sm:$0xff]  ;;  %6290 = vmatprep.subr.mxu1 %v6184_v63 }
0x1022   : > { %6382 = vmatpush2.msra.mxu0 %v10788_v34  ;;  %6291 = vmatpush2.msra.mxu1 %v6183_v14  ;;  %v11356_v34 = vld [vmem:[#allocation48_spill] sm:$0xff] }
0x1023   : > { %6383 = vmatprep.subr.mxu0 %v10791_v27  ;;  %6426 = vmatprep.subr.mxu1 %v7895_v23  ;;  %v5960_v62 = vrot.slane %v7896_v56, %v11356_v34 }
0x1024   : > { %6384 = vmatpush2.msra.mxu0 %v10794_v58  ;;  %v5964_v58 = vrot.slane %v7897_v22, %v11356_v34 }
0x1096   : > { %v6031_v37 = vpop.f32.mrf.mxu1 }
0x1097   : > { %v6032_v27 = vadd.f32 %v6031_v37, %v5960_v62  ;;  %v11359_v37 = vld [vmem:[#allocation50_spill] sm:$0xff] }
0x1098   : > { %v6033_v28 = vpop.f32.mrf.mxu1 }
0x1099   : > { %v6034_v24 = vadd.f32 %v6033_v28, %v5964_v58 }
0x109b   : > { %v6120_v63 = vpop.f32.mrf.mxu0 }
0x109c   : > { %v6121_v14 = vadd.f32 %v6120_v63, %v6032_v27  ;;  %v11360_v27 = vld [vmem:[#allocation28_spill] sm:$0xff] }
0x109d   : > { %v6122_v10 = vpop.f32.mrf.mxu0 }
0x109e   : > { %v6037_v23 = vpop.f32.mrf.mxu1  ;;  %v6123_v9 = vadd.f32 %v6122_v10, %v6034_v24  ;;  %v6143_v15 = vadd.f32 %v6121_v14, %v11358_v25  ;;  %v11385_v25 = vld [vmem:[#allocation59_spill] sm:$0xff] }
0x109f   : > { %v6038_v36 = vadd.f32 %v6037_v23, %v5960_v62 }
0x10a0   : > { %v6126_v38 = vpop.f32.mrf.mxu0  ;;  %v6039_v48 = vpop.f32.mrf.mxu1  ;;  %v6144_v56 = vadd.f32 %v6123_v9, %v11357_v35  ;;  %v11387_v35 = vld [vmem:[#allocation61_spill] sm:$0xff] }
0x10a1   : > { %v6040_v4 = vadd.f32 %v6039_v48, %v5964_v58  ;;  %v6127_v42 = vadd.f32 %v6126_v38, %v6038_v36  ;;  %v6216_v48 = vld [vmem:[#allocation14 + $0x200] ss:$8 sm:$0x3] }
0x10a2   : > { %v6128_v44 = vpop.f32.mrf.mxu0  ;;  %6292 = vmatprep.mubr.f32.mxu1 %v6144_v56  ;;  %v11388_v38 = vld [vmem:[#allocation30_spill] sm:$0xff]  ;;  %v11389_v9 = vld [vmem:[#allocation29_spill] sm:$0xff] }
0x10a3   : > { %v6129_v8 = vadd.f32 %v6128_v44, %v6040_v4  ;;  %6293 = vmatmul.mubr.f32.vlgmr.msra.gmra.mxu1 %v6143_v15  ;;  %v6145_v22 = vadd.f32 %v6127_v42, %v11360_v27  ;;  %v11382_v44 = vld [vmem:[#allocation56_spill] sm:$0xff]  ;;  %v11383_v42 = vld [vmem:[#allocation57_spill] sm:$0xff]  ;;  %v11384_v15 = vld [vmem:[#allocation58_spill] sm:$0xff]  ;;  %v6225_v36 = vrot.slane %v6216_v48, %v11388_v38  ;;  %v6221_v10 = vrot.slane %v6216_v48, %v11389_v9 }
0x10a4   : > { %6427 = vmatpush1.msra.mxu1 %v10549_v12  ;;  %v11386_v4 = vld [vmem:[#allocation60_spill] sm:$0xff]  ;;  %v6575_v48 = vld [vmem:[#allocation16 + $0x30] sm:$0xff] }
0x10a5   : > { %v6146_v34 = vadd.f32 %v6129_v8, %v11359_v37  ;;  %6428 = vmatprep.subr.mxu1 %v10559_v39  ;;  %v11381_v8 = vld [vmem:[#allocation55_spill] sm:$0xff] }
0x10a6   : > { %6429 = vmatpush1.msra.mxu1 %v10566_v6 }
0x10a7   : > { %6298 = vmatprep.mubr.f32.mxu1 %v6146_v34  ;;  %6430 = vmatprep.subr.mxu1 %v10570_v11 }
0x10a8   : > { %6299 = vmatmul.mubr.f32.gmra.mxu1 %v6145_v22 }
0x10a9   : > { %6431 = vmatpush1.msra.mxu1 %v10575_v2 }
0x10aa   : > { %6432 = vmatprep.subr.mxu1 %v10580_v0 }
0x10ab   : > { %6433 = vmatpush1.msra.mxu1 %v10586_v29 }
0x10ac   : > { %6434 = vmatprep.subr.mxu1 %v10591_v3 }
0x10ad   : > { %6435 = vmatpush1.msra.mxu1 %v10595_v30 }
0x10ae   : > { %6436 = vmatprep.subr.mxu1 %v10603_v55 }
0x10af   : > { %6437 = vmatpush1.msra.mxu1 %v10608_v33  ;;  %v11361_v33 = vld [vmem:[#allocation52_spill] sm:$0xff] }
0x10b0   : > { %6438 = vmatprep.subr.mxu1 %v10617_v50 }
0x10b1   : > { %6439 = vmatpush1.msra.mxu1 %v10622_v61 }
0x10b2   : > { %v6043_v12 = vpop.f32.mrf.mxu1  ;;  %6440 = vmatprep.subr.mxu1 %v10627_v46 }
0x10b3   : > { %6441 = vmatpush1.msra.mxu1 %v10632_v26  ;;  %v6044_v6 = vadd.f32 %v6043_v12, %v5960_v62  ;;  %v11362_v26 = vld [vmem:[#allocation46_spill] sm:$0xff] }
0x10b4   : > { %v6045_v39 = vpop.f32.mrf.mxu1  ;;  %6442 = vmatprep.subr.mxu1 %v10639_v57 }
0x10b5   : > { %6443 = vmatpush1.msra.mxu1 %v10649_v60  ;;  %v6046_v11 = vadd.f32 %v6045_v39, %v5964_v58 }
0x10b6   : > { %6444 = vmatprep.subr.mxu1 %v10653_v45  ;;  %v6132_v2 = vpop.f32.mrf.mxu0 }
0x10b7   : > { %6445 = vmatpush1.msra.mxu1 %v10660_v59  ;;  %v6133_v0 = vadd.f32 %v6132_v2, %v6044_v6  ;;  %v6600_v2 = vld [vmem:[#allocation16 + $0xf8] sm:$0xff] }
0x10b8   : > { %6446 = vmatprep.subr.mxu1 %v10664_v20  ;;  %v6134_v29 = vpop.f32.mrf.mxu0  ;;  %7029 = vmatprep.subr.mxu0 %v6600_v2 }
0x10b9   : > { %6447 = vmatpush1.msra.mxu1 %v10668_v51  ;;  %v6135_v3 = vadd.f32 %v6134_v29, %v6046_v11  ;;  %v6147_v57 = vadd.f32 %v6133_v0, %v11362_v26  ;;  %v11363_v51 = vld [vmem:[#allocation42_spill] sm:$0xff]  ;;  %v6599_v29 = vld [vmem:[#allocation16 + $0xf0] sm:$0xff] }
0x10ba   : > { %v6049_v30 = vpop.f32.mrf.mxu1  ;;  %6448 = vmatprep.subr.mxu1 %v10671_v47  ;;  %v6584_v0 = vld [vmem:[#allocation16 + $0x78] sm:$0xff] }
0x10bb   : > { %v6050_v55 = vadd.f32 %v6049_v30, %v5960_v62  ;;  %6449 = vmatpush1.msra.mxu1 %v10674_v17  ;;  %v6148_v50 = vadd.f32 %v6135_v3, %v11361_v33  ;;  %v11364_v17 = vld [vmem:[#allocation45_spill] sm:$0xff]  ;;  %v6598_v30 = vld [vmem:[#allocation16 + $0xe8] sm:$0xff] }
0x10bc   : > { %v6138_v61 = vpop.f32.mrf.mxu0  ;;  %v6051_v46 = vpop.f32.mrf.mxu1  ;;  %6450 = vmatprep.subr.mxu1 %v10677_v18  ;;  %v6583_v3 = vld [vmem:[#allocation16 + $0x70] sm:$0xff] }
0x10bd   : > { %v6052_v60 = vadd.f32 %v6051_v46, %v5964_v58  ;;  %6451 = vmatpush1.msra.mxu1 %v10680_v1  ;;  %v6139_v45 = vadd.f32 %v6138_v61, %v6050_v55  ;;  %6304 = vmatprep.mubr.f32.mxu1 %v6148_v50  ;;  %v11365_v1 = vld [vmem:[#allocation34_spill] sm:$0xff]  ;;  %v6582_v55 = vld [vmem:[#allocation16 + $0x68] sm:$0xff] }
0x10be   : > { %v6140_v59 = vpop.f32.mrf.mxu0  ;;  %6452 = vmatprep.subr.mxu1 %v10683_v21  ;;  %6305 = vmatmul.mubr.f32.gmra.mxu1 %v6147_v57  ;;  %v11366_v21 = vld [vmem:[#allocation40_spill] sm:$0xff] }
0x10bf   : > { %v6141_v20 = vadd.f32 %v6140_v59, %v6052_v60  ;;  %6453 = vmatpush1.msra.mxu1 %v10686_v53  ;;  %v6149_v18 = vadd.f32 %v6139_v45, %v11364_v17  ;;  %v11367_v53 = vld [vmem:[#allocation47_spill] sm:$0xff] }
0x10c0   : > { %6454 = vmatprep.subr.mxu1 %v10689_v54  ;;  %v11368_v54 = vld [vmem:[#allocation51_spill] sm:$0xff] }
0x10c1   : > { %v6150_v47 = vadd.f32 %v6141_v20, %v11363_v51  ;;  %6455 = vmatpush1.msra.mxu1 %v10692_v31  ;;  %v11369_v31 = vld [vmem:[#allocation31_spill] sm:$0xff] }
0x10c2   : > { %6456 = vmatprep.subr.mxu1 %v10695_v41  ;;  %v11370_v41 = vld [vmem:[#allocation33_spill] sm:$0xff] }
0x10c3   : > { %6310 = vmatprep.mubr.f32.mxu1 %v6150_v47  ;;  %6457 = vmatpush1.msra.mxu1 %v10698_v16  ;;  %v11371_v16 = vld [vmem:[#allocation41_spill] sm:$0xff] }
0x10c4   : > { %6311 = vmatmul.mubr.f32.gmra.mxu1 %v6149_v18  ;;  %6458 = vmatprep.subr.mxu1 %v10701_v40  ;;  %v11372_v40 = vld [vmem:[#allocation53_spill] sm:$0xff] }
0x10c5   : > { %6459 = vmatpush2.msra.mxu1 %v10704_v19  ;;  %v11373_v19 = vld [vmem:[#allocation43_spill] sm:$0xff] }
0x10c6   : > { %6460 = vmatprep.subr.mxu1 %v10707_v49  ;;  %v11374_v49 = vld [vmem:[#allocation35_spill] sm:$0xff] }
0x10c7   : > { %6461 = vmatpush2.msra.mxu1 %v10710_v32  ;;  %v11375_v32 = vld [vmem:[#allocation49_spill] sm:$0xff] }
0x10c8   : > { %6462 = vmatprep.subr.mxu1 %v10713_v5  ;;  %v11376_v5 = vld [vmem:[#allocation38_spill] sm:$0xff] }
0x10c9   : > { %6463 = vmatpush2.msra.mxu1 %v10716_v7  ;;  %v11377_v7 = vld [vmem:[#allocation37_spill] sm:$0xff] }
0x10ca   : > { %6464 = vmatprep.subr.mxu1 %v10719_v52  ;;  %v11378_v52 = vld [vmem:[#allocation32_spill] sm:$0xff] }
0x10cb   : > { %6465 = vmatpush2.msra.mxu1 %v10722_v13  ;;  %v11379_v13 = vld [vmem:[#allocation39_spill] sm:$0xff] }
0x10cc   : > { %6466 = vmatprep.subr.mxu1 %v10725_v43  ;;  %v11380_v43 = vld [vmem:[#allocation54_spill] sm:$0xff] }
0x10cd   : > { %6467 = vmatpush2.msra.mxu1 %v11365_v1 }
0x10ce   : > { %6468 = vmatprep.subr.mxu1 %v11366_v21 }
0x10cf   : > { %6469 = vmatpush2.msra.mxu1 %v11367_v53 }
0x10d0   : > { %6470 = vmatprep.subr.mxu1 %v11368_v54 }
0x10d1   : > { %6471 = vmatpush2.msra.mxu1 %v11369_v31 }
0x10d2   : > { %6472 = vmatprep.subr.mxu1 %v11370_v41 }
0x10d3   : > { %6473 = vmatpush2.msra.mxu1 %v11371_v16 }
0x10d4   : > { %6474 = vmatprep.subr.mxu1 %v11372_v40 }
0x10d5   : > { %6475 = vmatpush2.msra.mxu1 %v11373_v19 }
0x10d6   : > { %6476 = vmatprep.subr.mxu1 %v11374_v49 }
0x10d7   : > { %6477 = vmatpush2.msra.mxu1 %v11375_v32  ;;  %v6597_v32 = vld [vmem:[#allocation16 + $0xe0] sm:$0xff] }
0x10d8   : > { %6478 = vmatprep.subr.mxu1 %v11376_v5  ;;  %v6581_v5 = vld [vmem:[#allocation16 + $0x60] sm:$0xff] }
0x10d9   : > { %6479 = vmatpush2.msra.mxu1 %v11377_v7  ;;  %v6596_v7 = vld [vmem:[#allocation16 + $0xd8] sm:$0xff] }
0x10da   : > { %6480 = vmatprep.subr.mxu1 %v11378_v52  ;;  %v6580_v52 = vld [vmem:[#allocation16 + $0x58] sm:$0xff] }
0x10db   : > { %6481 = vmatpush2.msra.mxu1 %v11379_v13  ;;  %v6595_v13 = vld [vmem:[#allocation16 + $0xd0] sm:$0xff] }
0x10dc   : > { %6482 = vmatprep.subr.mxu1 %v11380_v43  ;;  %v6579_v43 = vld [vmem:[#allocation16 + $0x50] sm:$0xff] }
0x10dd   : > { %6483 = vmatpush2.msra.mxu1 %v11381_v8  ;;  %v6594_v8 = vld [vmem:[#allocation16 + $0xc8] sm:$0xff] }
0x10de   : > { %6484 = vmatprep.subr.mxu1 %v11382_v44  ;;  %v6578_v44 = vld [vmem:[#allocation16 + $0x48] sm:$0xff] }
0x10df   : > { %6485 = vmatpush2.msra.mxu1 %v11383_v42  ;;  %v6593_v42 = vld [vmem:[#allocation16 + $0xc0] sm:$0xff] }
0x10e0   : > { %6486 = vmatprep.subr.mxu1 %v11384_v15  ;;  %v6577_v15 = vld [vmem:[#allocation16 + $0x40] sm:$0xff] }
0x10e1   : > { %6487 = vmatpush2.msra.mxu1 %v11385_v25  ;;  %v6592_v25 = vld [vmem:[#allocation16 + $0xb8] sm:$0xff] }
0x10e2   : > { %6488 = vmatprep.subr.mxu1 %v11386_v4  ;;  %v6576_v4 = vld [vmem:[#allocation16 + $0x38] sm:$0xff] }
0x10e3   : > { %6489 = vmatpush2.msra.mxu1 %v11387_v35  ;;  %v6591_v35 = vld [vmem:[#allocation16 + $0xb0] sm:$0xff] }
0x1163   : > { %v6294_v24 = vpop.f32.mrf.mxu1 }
0x1164   : > { %v6295_v28 = vadd.f32 %v6294_v24, %v6221_v10  ;;  %v6589_v24 = vld [vmem:[#allocation16 + $0xa0] sm:$0xff] }
0x1165   : > { %v6296_v62 = vpop.f32.mrf.mxu1 }
0x1166   : > { %v6297_v58 = vadd.f32 %v6296_v62, %v6225_v36  ;;  %v6573_v62 = vld [vmem:[#allocation16 + $0x20] sm:$0xff] }
0x1168   : > { %v6300_v63 = vpop.f32.mrf.mxu1  ;;  %6385 = vmatprep.mubr.f32.mxu0 %v6297_v58 }
0x1169   : > { %6386 = vmatmul.mubr.f32.vlgmr.msra.gmra.mxu0 %v6295_v28  ;;  %v6301_v56 = vadd.f32 %v6300_v63, %v6221_v10  ;;  %v6587_v63 = vld [vmem:[#allocation16 + $0x90] sm:$0xff] }
0x116a   : > { %v6302_v14 = vpop.f32.mrf.mxu1  ;;  %7030 = vmatpush3.msra.mxu0 %v6584_v0 }
0x116b   : > { %v6303_v23 = vadd.f32 %v6302_v14, %v6225_v36  ;;  %7031 = vmatprep.subr.mxu0 %v6599_v29  ;;  %v6571_v14 = vld [vmem:[#allocation16 + $0x10] sm:$0xff] }
0x116c   : > { %7032 = vmatpush3.msra.mxu0 %v6583_v3  ;;  %v6318_v29 = vld [vmem:[#allocation14 + $0x201] ss:$8 sm:$0x3] }
0x116d   : > { %6391 = vmatprep.mubr.f32.mxu0 %v6303_v23  ;;  %7033 = vmatprep.subr.mxu0 %v6598_v30  ;;  %v6535_v30 = vrot.slane %v6318_v29, %v11389_v9 }
0x116e   : > { %6392 = vmatmul.mubr.f32.gmra.mxu0 %v6301_v56 }
0x116f   : > { %7034 = vmatpush3.msra.mxu0 %v6582_v55 }
0x1170   : > { %7035 = vmatprep.subr.mxu0 %v6597_v32 }
0x1171   : > { %7036 = vmatpush3.msra.mxu0 %v6581_v5 }
0x1172   : > { %7037 = vmatprep.subr.mxu0 %v6596_v7 }
0x1173   : > { %7038 = vmatpush3.msra.mxu0 %v6580_v52 }
0x1174   : > { %7039 = vmatprep.subr.mxu0 %v6595_v13 }
0x1175   : > { %7040 = vmatpush3.msra.mxu0 %v6579_v43 }
0x1176   : > { %7041 = vmatprep.subr.mxu0 %v6594_v8 }
0x1177   : > { %7042 = vmatpush3.msra.mxu0 %v6578_v44 }
0x1178   : > { %7043 = vmatprep.subr.mxu0 %v6593_v42 }
0x1179   : > { %7044 = vmatpush3.msra.mxu0 %v6577_v15 }
0x117a   : > { %7045 = vmatprep.subr.mxu0 %v6592_v25 }
0x117b   : > { %7046 = vmatpush3.msra.mxu0 %v6576_v4 }
0x117c   : > { %7047 = vmatprep.subr.mxu0 %v6591_v35 }
0x117d   : > { %7048 = vmatpush3.msra.mxu0 %v6575_v48 }
0x117e   : > { %v6306_v37 = vpop.f32.mrf.mxu1 }
0x117f   : > { %v6307_v22 = vadd.f32 %v6306_v37, %v6221_v10  ;;  %v6585_v37 = vld [vmem:[#allocation16 + $0x80] sm:$0xff] }
0x1180   : > { %v6308_v34 = vpop.f32.mrf.mxu1 }
0x1181   : > { %v6309_v27 = vadd.f32 %v6308_v34, %v6225_v36  ;;  %v6569_v34 = vld [vmem:[#allocation16] sm:$0xff] }
0x1183   : > { %6397 = vmatprep.mubr.f32.mxu0 %v6309_v27 }
0x1184   : > { %v6312_v12 = vpop.f32.mrf.mxu1  ;;  %6398 = vmatmul.mubr.f32.gmra.mxu0 %v6307_v22 }
0x1185   : > { %v6313_v11 = vadd.f32 %v6312_v12, %v6221_v10  ;;  %v6574_v10 = vld [vmem:[#allocation16 + $0x28] sm:$0xff] }
0x1186   : > { %v6314_v39 = vpop.f32.mrf.mxu1 }
0x1187   : > { %v6315_v6 = vadd.f32 %v6314_v39, %v6225_v36  ;;  %v6590_v36 = vld [vmem:[#allocation16 + $0xa8] sm:$0xff] }
0x1188   : > { %7049 = vmatprep.subr.mxu0 %v6590_v36 }
0x1189   : > { %6403 = vmatprep.mubr.f32.mxu0 %v6315_v6  ;;  %7050 = vmatpush3.msra.mxu0 %v6574_v10 }
0x118a   : > { %6404 = vmatmul.mubr.f32.gmra.mxu0 %v6313_v11  ;;  %7051 = vmatprep.subr.mxu0 %v6589_v24 }
0x118b   : > { %7052 = vmatpush3.msra.mxu0 %v6573_v62 }
0x1229   : > { %v6387_v33 = vpop.f32.mrf.mxu0 }
0x122a   : > { %v10878_v50 = vsub.f32 %v6295_v28, %v6387_v33  ;;  %v6572_v28 = vld [vmem:[#allocation16 + $0x18] sm:$0xff] }
0x122b   : > { %v6389_v61 = vpop.f32.mrf.mxu0  ;;  %v6320_v33 = vld [vmem:[#allocation14 + $0x202] ss:$8 sm:$0x3] }
0x122c   : > { %v10880_v46 = vsub.f32 %v6297_v58, %v6389_v61  ;;  %v6418_v60 = vmul.f32 %v10878_v50, %v10878_v50  ;;  %v6588_v58 = vld [vmem:[#allocation16 + $0x98] sm:$0xff]  ;;  %v6539_v61 = vrot.slane %v6318_v29, %v11388_v38 }
0x122d   : > { %7053 = vmatprep.subr.mxu0 %v6588_v58 }
0x122e   : > { %v6393_v26 = vpop.f32.mrf.mxu0  ;;  %v6419_v57 = vmul.f32 %v10880_v46, %v10880_v46  ;;  %7054 = vmatpush3.msra.mxu0 %v6572_v28 }
0x122f   : > { %v10886_v45 = vsub.f32 %v6301_v56, %v6393_v26  ;;  %7055 = vmatprep.subr.mxu0 %v6587_v63  ;;  %v6570_v56 = vld [vmem:[#allocation16 + $0x8] sm:$0xff]  ;;  %v6724_v63 = vld [vmem:[#allocation16 + $0x170] sm:$0xff] }
0x1230   : > { %v6395_v59 = vpop.f32.mrf.mxu0  ;;  %6490 = vmatprep.mubr.f32.mxu1 %v6419_v57  ;;  %7056 = vmatpush3.msra.mxu0 %v6571_v14  ;;  %v6722_v14 = vld [vmem:[#allocation16 + $0x160] sm:$0xff] }
0x1231   : > { %v10888_v20 = vsub.f32 %v6303_v23, %v6395_v59  ;;  %6491 = vmatmul.mubr.f32.vlgmr.msra.gmra.mxu1 %v6418_v60  ;;  %v6420_v47 = vmul.f32 %v10886_v45, %v10886_v45  ;;  %v6586_v23 = vld [vmem:[#allocation16 + $0x88] sm:$0xff]  ;;  %v6558_v60 = vrot.slane %v6320_v33, %v11388_v38 }
0x1232   : > { %7057 = vmatprep.subr.mxu0 %v6586_v23 }
0x1233   : > { %v6421_v51 = vmul.f32 %v10888_v20, %v10888_v20  ;;  %7058 = vmatpush3.msra.mxu0 %v6570_v56  ;;  %v7022_v56 = vld [vmem:[#allocation16 + $0x100] ss:$0 sm:$0xff] }
0x1234   : > { %7059 = vmatprep.subr.mxu0 %v6585_v37 }
0x1235   : > { %6496 = vmatprep.mubr.f32.mxu1 %v6421_v51  ;;  %7060 = vmatpush3.msra.mxu0 %v6569_v34  ;;  %v6554_v51 = vrot.slane %v6320_v33, %v11389_v9 }
0x1236   : > { %6497 = vmatmul.mubr.f32.gmra.mxu1 %v6420_v47 }
0x1244   : > { %v6399_v17 = vpop.f32.mrf.mxu0 }
0x1245   : > { %v10894_v18 = vsub.f32 %v6307_v22, %v6399_v17 }
0x1246   : > { %v6401_v1 = vpop.f32.mrf.mxu0 }
0x1247   : > { %v10896_v21 = vsub.f32 %v6309_v27, %v6401_v1  ;;  %v6422_v31 = vmul.f32 %v10894_v18, %v10894_v18 }
0x1249   : > { %v6423_v53 = vmul.f32 %v10896_v21, %v10896_v21 }
0x124a   : > { %v6405_v54 = vpop.f32.mrf.mxu0 }
0x124b   : > { %v10902_v41 = vsub.f32 %v6313_v11, %v6405_v54  ;;  %6502 = vmatprep.mubr.f32.mxu1 %v6423_v53 }
0x124c   : > { %v6407_v16 = vpop.f32.mrf.mxu0  ;;  %6503 = vmatmul.mubr.f32.gmra.mxu1 %v6422_v31 }
0x124d   : > { %v10904_v40 = vsub.f32 %v6315_v6, %v6407_v16  ;;  %v6424_v49 = vmul.f32 %v10902_v41, %v10902_v41 }
0x124f   : > { %v6425_v19 = vmul.f32 %v10904_v40, %v10904_v40 }
0x1251   : > { %6508 = vmatprep.mubr.f32.mxu1 %v6425_v19 }
0x1252   : > { %6509 = vmatmul.mubr.f32.gmra.mxu1 %v6424_v49 }
0x12f1   : > { %v6492_v27 = vpop.f32.mrf.mxu1 }
0x12f2   : > { %v6493_v22 = vadd.f32 1e-05, %v6492_v27 }
0x12f3   : > { %v6494_v12 = vpop.f32.mrf.mxu1 }
0x12f4   : > { %7601 = vrsqrt.f32 %v6493_v22  ;;  %v6495_v39 = vadd.f32 1e-05, %v6494_v12 }
0x12f6   : > { %v6498_v6 = vpop.f32.mrf.mxu1  ;;  %7603 = vrsqrt.f32 %v6495_v39 }
0x12f7   : > { %v6499_v11 = vadd.f32 1e-05, %v6498_v6  ;;  %v6721_v6 = vld [vmem:[#allocation16 + $0x158] sm:$0xff] }
0x12f8   : > { %v6500_v2 = vpop.f32.mrf.mxu1 }
0x12f9   : > { %7605 = vrsqrt.f32 %v6499_v11  ;;  %v6501_v0 = vadd.f32 1e-05, %v6500_v2  ;;  %v6720_v11 = vld [vmem:[#allocation16 + $0x150] sm:$0xff]  ;;  %v6719_v2 = vld [vmem:[#allocation16 + $0x148] sm:$0xff] }
0x12fb   : > { %7607 = vrsqrt.f32 %v6501_v0  ;;  %v6718_v0 = vld [vmem:[#allocation16 + $0x140] sm:$0xff] }
0x1301   : > { %v7602_v3 = vpop.eup %7601 }
0x1302   : > { %v6523_v55 = vmul.f32 %v7602_v3, %v10878_v50 }
0x1303   : > { %v7604_v26 = vpop.eup %7603 }
0x1304   : > { %v6524_v57 = vmul.f32 %v7604_v26, %v10880_v46  ;;  %v6542_v47 = vmul.f32 %v6535_v30, %v6523_v55 }
0x1306   : > { %v7606_v59 = vpop.eup %7605  ;;  %v6543_v17 = vmul.f32 %v6539_v61, %v6524_v57  ;;  %v6561_v50 = vadd.f32 %v6554_v51, %v6542_v47  ;;  %v6714_v47 = vld [vmem:[#allocation16 + $0x120] sm:$0xff] }
0x1307   : > { %v6525_v1 = vmul.f32 %v7606_v59, %v10886_v45  ;;  %v6716_v59 = vld [vmem:[#allocation16 + $0x130] sm:$0xff] }
0x1308   : > { %v7608_v53 = vpop.eup %7607  ;;  %v6562_v54 = vadd.f32 %v6558_v60, %v6543_v17  ;;  %v6713_v17 = vld [vmem:[#allocation16 + $0x118] sm:$0xff] }
0x1309   : > { %v6526_v31 = vmul.f32 %v7608_v53, %v10888_v20  ;;  %v6544_v16 = vmul.f32 %v6535_v30, %v6525_v1  ;;  %v6712_v1 = vld [vmem:[#allocation16 + $0x110] sm:$0xff]  ;;  %v6711_v53 = vld [vmem:[#allocation16 + $0x108] sm:$0xff] }
0x130a   : > { %6670 = vmatprep.mubr.f32.mxu0 %v6562_v54 }
0x130b   : > { %v6545_v19 = vmul.f32 %v6539_v61, %v6526_v31  ;;  %6671 = vmatmul.mubr.f32.vlgmr.msra.gmra.mxu0 %v6561_v50  ;;  %v6563_v38 = vadd.f32 %v6554_v51, %v6544_v16 }
0x130c   : > { %v6504_v49 = vpop.f32.mrf.mxu1 }
0x130d   : > { %v6564_v46 = vadd.f32 %v6558_v60, %v6545_v19  ;;  %v6505_v32 = vadd.f32 1e-05, %v6504_v49 }
0x130e   : > { %v6506_v5 = vpop.f32.mrf.mxu1 }
0x130f   : > { %6675 = vmatprep.mubr.f32.mxu0 %v6564_v46  ;;  %7609 = vrsqrt.f32 %v6505_v32  ;;  %v6507_v9 = vadd.f32 1e-05, %v6506_v5 }
0x1310   : > { %6676 = vmatmul.mubr.f32.gmra.mxu0 %v6563_v38 }
0x1311   : > { %7611 = vrsqrt.f32 %v6507_v9 }
0x1312   : > { %v6510_v45 = vpop.f32.mrf.mxu1 }
0x1313   : > { %v6511_v7 = vadd.f32 1e-05, %v6510_v45 }
0x1314   : > { %v6512_v52 = vpop.f32.mrf.mxu1 }
0x1315   : > { %7613 = vrsqrt.f32 %v6511_v7  ;;  %v6513_v20 = vadd.f32 1e-05, %v6512_v52 }
0x1317   : > { %7615 = vrsqrt.f32 %v6513_v20 }
0x131c   : > { %v7610_v13 = vpop.eup %7609 }
0x131d   : > { %v6527_v43 = vmul.f32 %v7610_v13, %v10894_v18  ;;  %v6726_v18 = vld [vmem:[#allocation16 + $0x180] sm:$0xff] }
0x131e   : > { %v7612_v8 = vpop.eup %7611  ;;  %7093 = vmatprep.subr.mxu0 %v6726_v18 }
0x131f   : > { %v6528_v44 = vmul.f32 %v7612_v8, %v10896_v21  ;;  %v6546_v42 = vmul.f32 %v6535_v30, %v6527_v43  ;;  %v6725_v21 = vld [vmem:[#allocation16 + $0x178] sm:$0xff]  ;;  %7094 = vmatpush3.msra.mxu0 %v6726_v18 }
0x1320   : > { %7095 = vmatprep.subr.mxu0 %v6725_v21 }
0x1321   : > { %v6547_v25 = vmul.f32 %v6539_v61, %v6528_v44  ;;  %v6565_v36 = vadd.f32 %v6554_v51, %v6546_v42  ;;  %7096 = vmatpush3.msra.mxu0 %v6725_v21 }
0x1322   : > { %v7614_v15 = vpop.eup %7613  ;;  %7097 = vmatprep.subr.mxu0 %v6724_v63 }
0x1323   : > { %v6529_v4 = vmul.f32 %v7614_v15, %v10902_v41  ;;  %v6566_v48 = vadd.f32 %v6558_v60, %v6547_v25  ;;  %v6723_v41 = vld [vmem:[#allocation16 + $0x168] sm:$0xff]  ;;  %7098 = vmatpush3.msra.mxu0 %v6724_v63 }
0x1324   : > { %v7616_v35 = vpop.eup %7615  ;;  %7099 = vmatprep.subr.mxu0 %v6723_v41 }
0x1325   : > { %v6530_v10 = vmul.f32 %v7616_v35, %v10904_v40  ;;  %6680 = vmatprep.mubr.f32.mxu0 %v6566_v48  ;;  %v6548_v24 = vmul.f32 %v6535_v30, %v6529_v4  ;;  %7100 = vmatpush3.msra.mxu0 %v6723_v41 }
0x1326   : > { %6681 = vmatmul.mubr.f32.gmra.mxu0 %v6565_v36  ;;  %7101 = vmatprep.subr.mxu0 %v6722_v14 }
0x1327   : > { %v6549_v62 = vmul.f32 %v6539_v61, %v6530_v10  ;;  %v6567_v28 = vadd.f32 %v6554_v51, %v6548_v24  ;;  %7102 = vmatpush3.msra.mxu0 %v6722_v14  ;;  %v6715_v51 = vld [vmem:[#allocation16 + $0x128] sm:$0xff] }
0x1328   : > { %7103 = vmatprep.subr.mxu0 %v6721_v6 }
0x1329   : > { %v6568_v58 = vadd.f32 %v6558_v60, %v6549_v62  ;;  %7104 = vmatpush3.msra.mxu0 %v6721_v6  ;;  %v6717_v60 = vld [vmem:[#allocation16 + $0x138] sm:$0xff] }
0x132a   : > { %7105 = vmatprep.subr.mxu0 %v6720_v11 }
0x132b   : > { %6685 = vmatprep.mubr.f32.mxu0 %v6568_v58  ;;  %7106 = vmatpush3.msra.mxu0 %v6720_v11 }
0x132c   : > { %6686 = vmatmul.mubr.f32.gmra.mxu0 %v6567_v28  ;;  %7107 = vmatprep.subr.mxu0 %v6719_v2 }
0x132d   : > { %7108 = vmatpush3.msra.mxu0 %v6719_v2 }
0x132e   : > { %7109 = vmatprep.subr.mxu0 %v6718_v0 }
0x132f   : > { %7110 = vmatpush3.msra.mxu0 %v6718_v0 }
0x1330   : > { %7111 = vmatprep.subr.mxu0 %v6717_v60 }
0x1331   : > { %7112 = vmatpush3.msra.mxu0 %v6717_v60 }
0x1332   : > { %7113 = vmatprep.subr.mxu0 %v6716_v59 }
0x1333   : > { %7114 = vmatpush3.msra.mxu0 %v6716_v59 }
0x1334   : > { %7115 = vmatprep.subr.mxu0 %v6715_v51 }
0x1335   : > { %7116 = vmatpush3.msra.mxu0 %v6715_v51 }
0x1336   : > { %7117 = vmatprep.subr.mxu0 %v6714_v47 }
0x1337   : > { %7118 = vmatpush3.msra.mxu0 %v6714_v47 }
0x1338   : > { %7119 = vmatprep.subr.mxu0 %v6713_v17 }
0x1339   : > { %7120 = vmatpush3.msra.mxu0 %v6713_v17 }
0x133a   : > { %7121 = vmatprep.subr.mxu0 %v6712_v1 }
0x133b   : > { %7122 = vmatpush3.msra.mxu0 %v6712_v1 }
0x133c   : > { %7123 = vmatprep.subr.mxu0 %v6711_v53 }
0x133d   : > { %7124 = vmatpush3.msra.mxu0 %v6711_v53 }
0x13cb   : > { %v7061_v40 = vpop.f32.mrf.mxu0 }
0x13cd   : > { %v7062_v23 = vpop.f32.mrf.mxu0 }
0x13ce   : > { %v7063_v37 = vadd.f32 %v7062_v23, %v7061_v40 }
0x13d0   : > { %v7064_v34 = vpop.f32.mrf.mxu0  ;;  %v6673_v27 = vadd.f32 %v7063_v37, %v7022_v56 }
0x13d2   : > { %v7065_v22 = vpop.f32.mrf.mxu0  ;;  %6691 = vmax.xlane.f32.xlu0 %v6673_v27 }
0x13d3   : > { %v7066_v12 = vadd.f32 %v7065_v22, %v7064_v34 }
0x13d5   : > { %v6678_v39 = vadd.f32 %v7066_v12, %v7022_v56 }
0x13d7   : > { %6693 = vmax.xlane.f32.xlu1 %v6678_v39 }
0x13e6   : > { %v7067_v29 = vpop.f32.mrf.mxu0 }
0x13e8   : > { %v7068_v3 = vpop.f32.mrf.mxu0 }
0x13e9   : > { %v7069_v30 = vadd.f32 %v7068_v3, %v7067_v29 }
0x13eb   : > { %v6683_v33 = vadd.f32 %v7069_v30, %v7022_v56 }
0x13ec   : > { %v7070_v55 = vpop.f32.mrf.mxu0 }
0x13ed   : > { %6695 = vmax.xlane.f32.xlu0 %v6683_v33 }
0x13ee   : > { %v7071_v61 = vpop.f32.mrf.mxu0 }
0x13ef   : > { %v7072_v26 = vadd.f32 %v7071_v61, %v7070_v55 }
0x13f1   : > { %v6688_v57 = vadd.f32 %v7072_v26, %v7022_v56 }
0x13f3   : > { %6697 = vmax.xlane.f32.xlu1 %v6688_v57 }
0x145b   : > { %v6692_v54 = vpop.xlane.xlu0 %6691 }
0x145c   : > { %v6699_v31 = vsub.f32 %v6673_v27, %v6692_v54 }
0x145e   : > { %v6703_v50 = vmul.f32 1.442695, %v6699_v31 }
0x1460   : > { %v6694_v16 = vpop.xlane.xlu1 %6693  ;;  %7617 = vpow2.f32 %v6703_v50 }
0x1461   : > { %v6700_v19 = vsub.f32 %v6678_v39, %v6694_v16 }
0x1463   : > { %v6705_v49 = vmul.f32 1.442695, %v6700_v19 }
0x1465   : > { %7619 = vpow2.f32 %v6705_v49 }
0x146d   : > { %v7618_v46 = vpop.eup %7617 }
0x146e   : > { %7125 = vmatprep.mubr.f32.mxu0 %v7618_v46 }
0x1472   : > { %v7620_v32 = vpop.eup %7619 }
0x1473   : > { %7126 = vmatmul.mubr.f32.vlgmr.msra.gmra.mxu0 %v7620_v32 }
0x1476   : > { %v6696_v38 = vpop.xlane.xlu0 %6695 }
0x1477   : > { %v6701_v5 = vsub.f32 %v6683_v33, %v6696_v38 }
0x1479   : > { %v6707_v9 = vmul.f32 1.442695, %v6701_v5 }
0x147b   : > { %7621 = vpow2.f32 %v6707_v9 }
0x147c   : > { %v6698_v45 = vpop.xlane.xlu1 %6697 }
0x147d   : > { %v6702_v7 = vsub.f32 %v6688_v57, %v6698_v45 }
0x147f   : > { %v6709_v52 = vmul.f32 1.442695, %v6702_v7 }
0x1481   : > { %7623 = vpow2.f32 %v6709_v52 }
0x1488   : > { %v7622_v20 = vpop.eup %7621 }
0x1489   : > { %7128 = vmatprep.mubr.f32.mxu0 %v7622_v20 }
0x148e   : > { %v7624_v13 = vpop.eup %7623 }
0x148f   : > { %7129 = vmatmul.mubr.f32.gmra.mxu0 %v7624_v13 }
0x1533   : > { %v7127_v43 = vpop.f32.mrf.mxu0 }
0x1534   : > { %7625 = vrcp.f32 %v7127_v43 }
0x1535   : > { %v6793_v8 = vpop.f32.mrf.mxu0 }
0x1536   : > { %7627 = vrcp.f32 %v6793_v8 }
0x1541   : > { %v7626_v44 = vpop.eup %7625 }
0x1542   : > { %v6815_v42 = vmul.f32 %v7626_v44, %v7620_v32 }
0x1543   : > { %v7628_v15 = vpop.eup %7627 }
0x1544   : > { %6821 = vst [vmem:[%s538_s29 + $0x8] sm:$0xff] %v6815_v42  ;;  %v6813_v25 = vmul.f32 %v7628_v15, %v7618_v46 }
0x1546   : > { %6820 = vst [vmem:[%s538_s29] sm:$0xff] %v6813_v25 }
0x154f   : > { %v7130_v4 = vpop.f32.mrf.mxu0 }
0x1550   : > { %7629 = vrcp.f32 %v7130_v4 }
0x1551   : > { %v6803_v35 = vpop.f32.mrf.mxu0 }
0x1552   : > { %7631 = vrcp.f32 %v6803_v35 }
0x155d   : > { %v7630_v48 = vpop.eup %7629 }
0x155e   : > { %v6819_v36 = vmul.f32 %v7630_v48, %v7624_v13 }
0x155f   : > { %v7632_v10 = vpop.eup %7631 }
0x1560   : > { %6823 = vst [vmem:[%s538_s29 + $0x18] sm:$0xff] %v6819_v36  ;;  %v6817_v24 = vmul.f32 %v7632_v10, %v7622_v20 }
0x1562   : > { %6822 = vst [vmem:[%s538_s29 + $0x10] sm:$0xff] %v6817_v24 }
0x1563   : > { %8145 = shalt.err (!%p8142_p2)
}
0x1564   : > { %s8146_s3 = scalar_lea.hbm %s10927_s26, 512  ;;  %s8150_s20 = scalar_lea.hbm %s10983_s12, 1024 }
0x1565   : > { %p8147_p12 = scmp.ne.s32.totalorder %s10927_s26, %s8146_s3  ;;  %p8151_p4 = scmp.lt.s32.totalorder %s10927_s26, %s10983_s12 }
0x1566   : > { %p8152_p7 = scmp.lt.s32.totalorder %s8150_s20, %s8146_s3 }
0x1567   : > { %p8148_p10 = pnand %p8147_p12, %p8339_p5 }
0x1568   : > { %p8153_p11 = por %p8152_p7, %p8151_p4 }
0x1569   : > { %p8149_p3 = pneg %p8148_p10 }
0x156b   : > { %p8154_p8 = pnand %p8153_p11, %p8149_p3 }
0x156d   : > { %8157 = shalt.err (!%p8154_p8)
}
0x156e   : > { %s8234_s15 = smov 128   ;;  %s8235_s18 = smov 8  }
0x156f   : > { %7167 = dma.vmem_to_hbm [thread:$0]  (%p8339_p5), %s10929_s19, 512, %s10927_s26, %s10931_s27, %s8234_s15, %s8234_s15, %s8235_s18  }
0x1570 PF: > { %s11390_s25 = sld [smem:[#allocation27_spill]]  ;;  %p7219_p6 = scmp.ge.s32.totalorder %s8212_s24, 2 }
0x1571   : > { %s6853_s28 = sand.u32 1, %s8200_s21  }
0x1572   : > { %s6854_s16 = scalar_lea.sflag [#allocation4], %s6853_s28 }
0x1576   : > { %p11391_p9 = scmp.ne.s32.totalorder %s11390_s25, 0 }
0x1578   : > { %p7198_p13 = pnand %p7219_p6, %p11391_p9 }
0x157a   : > { %p7199_p0 = pneg %p7198_p13 }
0x157c   : > { %8195 = dma.done.wait (%p7199_p0), %s6854_s16, 512  }
0x157d   : > { %8197 = vsyncadd (%p7199_p0), %s6854_s16, 4294966784  ;;  %s11392_s24 = sld [smem:[#allocation25_spill]]  ;;  %s11395_s21 = smov %s8204_s22 }
0x157e   : > { %s11393_s23 = sld [smem:[#allocation24_spill]] }
0x157f   : > { %s11394_s3 = sld [smem:[#allocation26_spill]] }
0x1583   : > { %p27_p1 = scmp.ge.s32.totalorder %s11392_s24, 4  }
0x1584   : > { %s11396_s22 = smov %s11393_s23 }
0x1585   : > { %s11397_s23 = smov %s11394_s3  ;;  %29 = sbr.rel (!%p27_p1) target bundleno = 10 (0xa), region = 153 }
0x158a   :  { %6859 = vsyncpa [#allocation3], 1 }
0x158b   :  { %6861 = vsyncpa [#allocation3 + $0x1], 1 }
0x158c   :  { %6862 = vsyncpa [#allocation6], 1 }
0x158d   :  { %6863 = vsyncpa [#allocation9], 1 }
0x158e   :  { %6864 = vsyncpa [#allocation12], 1 }
0x158f   :  { %6865 = vsyncpa [#allocation15], 1 }
0x1590   :  { %6866 = vsyncpa [#allocation4], 1 }
0x1591   :  { %6868 = vsyncpa [#allocation4 + $0x1], 1 }

</bundles_post_ra>
